<compile_context>
chip_gen: v5e
topology: v5e:2x2
jax: 0.10.0
libtpu: 0.0.40
codegen_flags: <defaults>
</compile_context>

<pallas_src>
import math
import functools

import jax
import jax.numpy as jnp
from jax.experimental import pallas as pl
from jax.experimental.pallas import tpu as pltpu


# ----------------------------- config ---------------------------------------
class Config:
    pass


# ----------------------------- in-kernel helpers -----------------------------
def _ln(x, g, b):
    mu = jnp.mean(x, axis=-1, keepdims=True)
    xc = x - mu
    var = jnp.mean(xc * xc, axis=-1, keepdims=True)
    return xc * jax.lax.rsqrt(var + 1e-5) * g + b


def _erf(x):
    # Abramowitz & Stegun 7.1.26 polynomial erf, |abs err| <= 1.5e-7.
    # Avoids relying on lax.erf lowering inside Mosaic while keeping exact
    # (torch-default) GELU semantics to f32 precision.
    p = 0.3275911
    a1, a2, a3, a4, a5 = (0.254829592, -0.284496736, 1.421413741,
                          -1.453152027, 1.061405429)
    ax = jnp.abs(x)
    t = 1.0 / (1.0 + p * ax)
    poly = ((((a5 * t + a4) * t + a3) * t + a2) * t + a1) * t
    y = 1.0 - poly * jnp.exp(-ax * ax)
    return jnp.where(x < 0.0, -y, y)


def _gelu(u):
    return 0.5 * u * (1.0 + _erf(u * (1.0 / math.sqrt(2.0))))


# ----------------------------- fused kernel ---------------------------------
def _fused_forward_kernel(
    x_ref, mb_ref,
    ln1g_ref, ln1b_ref, wqkv_ref, bqkv_ref, wproj_ref, bproj_ref,
    ln2g_ref, ln2b_ref, wfc1_ref, bfc1_ref, wfc2_ref, bfc2_ref,
    lnfg_ref, lnfb_ref, whead_ref, wheadl2_ref, bl2_ref,
    logits_ref, miec_ref, attn_ref,
    *, n_layer, n_head, head_dim, n_prompt,
):
    BB, T, C = x_ref.shape          # BB = 1 (batch grid) or B (collapsed grid)
    H, D = n_head, head_dim

    for b in range(BB):                        # static, tiny
        x = x_ref[b]                           # (T, C)
        for l in range(n_layer):               # static, tiny
            # ---- LN1 + single lane-packed QKV matmul (C -> 3C lanes) ----
            h = _ln(x, ln1g_ref[l], ln1b_ref[l])
            qkv = (jnp.dot(h, wqkv_ref[l], preferred_element_type=jnp.float32)
                   + bqkv_ref[l])                                    # (T, 3C)

            # Head split via static lane slices + leading-dim stack.
            qh = jnp.stack(
                [qkv[:, hh * D:(hh + 1) * D] for hh in range(H)], axis=0)
            kh = jnp.stack(
                [qkv[:, C + hh * D:C + (hh + 1) * D] for hh in range(H)], axis=0)
            vh = jnp.stack(
                [qkv[:, 2 * C + hh * D:2 * C + (hh + 1) * D] for hh in range(H)],
                axis=0)                                              # (H, T, D)

            # ---- batched-head attention (1/sqrt(D) folded into Wq/bq) ----
            s = jax.lax.dot_general(
                qh, kh, (((2,), (2,)), ((0,), (0,))),
                preferred_element_type=jnp.float32)                  # (H, T, T)
            s = s + mb_ref[l]                                        # additive mask bias
            s = s - jnp.max(s, axis=-1, keepdims=True)
            e = jnp.exp(s)
            p = e * pl.reciprocal(jnp.sum(e, axis=-1, keepdims=True), approx=True)
            attn_ref[b, l] = p                                       # attn_save (pre-dropout)

            y = jax.lax.dot_general(
                p, vh, (((2,), (1,)), ((0,), (0,))),
                preferred_element_type=jnp.float32)                  # (H, T, D)
            yc = jnp.concatenate([y[hh] for hh in range(H)], axis=1)  # (T, C)

            # ---- output projection: one (T,C)@(C,C) matmul + residual ----
            x = x + (jnp.dot(yc, wproj_ref[l], preferred_element_type=jnp.float32)
                     + bproj_ref[l])

            # ---- LN2 + MLP (exact GELU) + residual ----
            h2 = _ln(x, ln2g_ref[l], ln2b_ref[l])
            u = (jnp.dot(h2, wfc1_ref[l], preferred_element_type=jnp.float32)
                 + bfc1_ref[l])
            u = _gelu(u)
            x = x + (jnp.dot(u, wfc2_ref[l], preferred_element_type=jnp.float32)
                     + bfc2_ref[l])

        # ---- final LN + head (prompt rows) + folded head@linein2 (miec rows) --
        xf = _ln(x, lnfg_ref[...], lnfb_ref[...])
        logits_ref[b] = jnp.dot(xf[:n_prompt, :], whead_ref[...],
                                preferred_element_type=jnp.float32)
        miec_ref[b] = (jnp.dot(xf[n_prompt:, :], wheadl2_ref[...],
                               preferred_element_type=jnp.float32)
                       + bl2_ref[...])


def _prefer_batch_grid(batch):
    """grid=(B,) 'parallel' only pays off on multi-TensorCore chips (v7x)."""
    if batch < 2:
        return False
    try:
        kind = jax.devices()[0].device_kind.lower()
    except Exception:
        return False
    return "v7" in kind


def fused_forward(x, packed, n_head):
    """x: (B, T, C) f32 -> (logits[:, :n_prompt, :], miec, attn (B, L, H, T, T))."""
    B, T, C = x.shape
    L = packed["n_layer"]
    H = n_head
    D = C // H
    V = packed["w_head"].shape[1]
    n_prompt = packed["n_prompt"]
    rec_len = T - n_prompt

    if _prefer_batch_grid(B):
        grid, bb = (B,), 1                      # v7x: one batch element per TC
        bmap = lambda i: i
        semantics = ("parallel",)
    else:
        grid, bb = (1,), B                      # v5e/v6e: single grid step, B inside
        bmap = lambda i: 0
        semantics = ("arbitrary",)

    args = (
        x, packed["mask_bias"],
        packed["ln1_g"], packed["ln1_b"],
        packed["w_qkv"], packed["b_qkv"],
        packed["w_proj"], packed["b_proj"],
        packed["ln2_g"], packed["ln2_b"],
        packed["w_fc1"], packed["b_fc1"],
        packed["w_fc2"], packed["b_fc2"],
        packed["ln_f_g"], packed["ln_f_b"],
        packed["w_head"], packed["w_headl2"], packed["b_l2"],
    )

    def whole_spec(a):
        nd = a.ndim

        def imap(i):
            return (0,) * nd

        return pl.BlockSpec(a.shape, imap)

    in_specs = [pl.BlockSpec((bb, T, C), lambda i: (bmap(i), 0, 0))]
    in_specs += [whole_spec(a) for a in args[1:]]

    out_shape = (
        jax.ShapeDtypeStruct((B, n_prompt, V), jnp.float32),
        jax.ShapeDtypeStruct((B, rec_len, 4), jnp.float32),
        jax.ShapeDtypeStruct((B, L, H, T, T), jnp.float32),
    )
    out_specs = (
        pl.BlockSpec((bb, n_prompt, V), lambda i: (bmap(i), 0, 0)),
        pl.BlockSpec((bb, rec_len, 4), lambda i: (bmap(i), 0, 0)),
        pl.BlockSpec((bb, L, H, T, T), lambda i: (bmap(i), 0, 0, 0, 0)),
    )

    kernel = functools.partial(
        _fused_forward_kernel,
        n_layer=L, n_head=H, head_dim=D, n_prompt=n_prompt)

    return pl.pallas_call(
        kernel,
        out_shape=out_shape,
        grid=grid,
        in_specs=in_specs,
        out_specs=out_specs,
        compiler_params=pltpu.CompilerParams(dimension_semantics=semantics),
    )(*args)


# ----------------------------- masks & packing -------------------------------
def build_masks(block_size, num_miec):
    # Same statement order as the torch buffers.
    num = 1
    size = block_size + num_miec + num
    tri = jnp.tril(jnp.ones((size, size), jnp.float32))
    # Bid mask: receptor cols visible to all rows, then row 0 sees only col 0.
    bid = tri.at[:, block_size + num + 1:].set(1.0)
    bid = bid.at[0, 1:].set(0.0)
    # Causal mask: receptor block (rows/cols >= block_size+num+1) fully visible.
    cau = tri.at[block_size + num + 1:, block_size + num + 1:].set(1.0)
    return bid, cau


def pack_params(params, cfg):
    """One-time (outside the forward path) repack of params for the fused kernel."""
    C = cfg.n_embd
    H = cfg.n_head
    D = C // H
    scale = 1.0 / math.sqrt(D)
    rec_len = len(cfg.seqlist[0])
    n_prompt = cfg.block_size + 1                 # == 12 in the reference model
    T = cfg.block_size + cfg.num_miec + 1
    blocks = [params["bidblock"]] + list(params["blocks"])
    L = len(blocks)

    def stack(get):
        return jnp.stack([get(bp) for bp in blocks], axis=0)

    def qkv_w(bp):
        a = bp["attn"]
        # 1/sqrt(D) attention scale folded into the query weights.
        return jnp.concatenate(
            [a["query"]["w"] * scale, a["key"]["w"], a["value"]["w"]], axis=1)  # (C, 3C)

    def qkv_b(bp):
        a = bp["attn"]
        return jnp.concatenate(
            [a["query"]["b"] * scale, a["key"]["b"], a["value"]["b"]])[None, :]  # (1, 3C)

    bid_mask, cau_mask = build_masks(cfg.block_size, cfg.num_miec)
    bid_mask, cau_mask = bid_mask[:T, :T], cau_mask[:T, :T]
    masks = [bid_mask] + [cau_mask] * (L - 1)
    mask_bias = jnp.stack(
        [jnp.where(m == 0.0, -1e30, 0.0).astype(jnp.float32) for m in masks])  # (L,T,T)

    w_head = params["head"]["w"]                                        # (C, V), no bias
    return {
        "n_layer": L,
        "rec_len": rec_len,
        "n_prompt": n_prompt,
        "tok_emb": params["tok_emb"],
        "type_emb": params["type_emb"],
        "pos_emb": params["pos_emb"],
        "seqarr": jnp.asarray(cfg.seqlist, dtype=jnp.int32),
        "mask_bias": mask_bias,
        "ln1_g": stack(lambda bp: bp["ln1"]["g"][None, :]),             # (L, 1, C)
        "ln1_b": stack(lambda bp: bp["ln1"]["b"][None, :]),
        "w_qkv": stack(qkv_w),                                          # (L, C, 3C)
        "b_qkv": stack(qkv_b),                                          # (L, 1, 3C)
        "w_proj": stack(lambda bp: bp["attn"]["proj"]["w"]),            # (L, C, C)
        "b_proj": stack(lambda bp: bp["attn"]["proj"]["b"][None, :]),   # (L, 1, C)
        "ln2_g": stack(lambda bp: bp["ln2"]["g"][None, :]),
        "ln2_b": stack(lambda bp: bp["ln2"]["b"][None, :]),
        "w_fc1": stack(lambda bp: bp["mlp"]["fc1"]["w"]),               # (L, C, 4C)
        "b_fc1": stack(lambda bp: bp["mlp"]["fc1"]["b"][None, :]),      # (L, 1, 4C)
        "w_fc2": stack(lambda bp: bp["mlp"]["fc2"]["w"]),               # (L, 4C, C)
        "b_fc2": stack(lambda bp: bp["mlp"]["fc2"]["b"][None, :]),      # (L, 1, C)
        "ln_f_g": params["ln_f"]["g"][None, :],                         # (1, C)
        "ln_f_b": params["ln_f"]["b"][None, :],
        "w_head": w_head,                                               # (C, V)
        "w_headl2": w_head @ params["linein2"]["w"],                    # (C, 4) head∘linein2
        "b_l2": params["linein2"]["b"][None, :],                        # (1, 4)
    }


# ----------------------------- model glue -----------------------------------
def rlpmiec_forward(packed, cfg, idx, cluster=None):
    b, t = idx.shape
    rec_len = packed["rec_len"]
    if t < 11:
        idx = jnp.concatenate(
            [idx, jnp.zeros((b, 11 - t), dtype=idx.dtype)], axis=1)

    tok_emb = packed["tok_emb"]
    type_emb = packed["type_emb"]

    token_embeddings = tok_emb[idx]                                   # (b, 11, C)
    position_embeddings = packed["pos_emb"][:, : 12 + rec_len, :]     # (1, T, C)
    type_embeddings = type_emb[jnp.ones((b, 11), jnp.int32)]
    type_embeddings2 = type_emb[jnp.full((b, rec_len), 2, jnp.int32)]

    x = token_embeddings + type_embeddings
    con_typ = type_emb[jnp.zeros((b, 1), jnp.int32)]
    if cluster is None:
        cluster = jnp.full((b, 1), 23, dtype=idx.dtype)
    con_tok = tok_emb[cluster]
    con = con_typ + con_tok

    recpseq_ids = packed["seqarr"][cluster[:, 0] - 23]                # (b, rec_len)

    x = jnp.concatenate([x[:, :1, :], con, x[:, 1:, :]], axis=1)      # (b, 12, C)
    recpseq = tok_emb[recpseq_ids] + type_embeddings2                 # dropout = identity (eval)
    x = jnp.concatenate([x, recpseq], axis=1) + position_embeddings   # dropout = identity (eval)

    logits12, miec, attn = fused_forward(x, packed, cfg.n_head)

    seq = logits12[:, 1:12, :23]
    clu = logits12[:, :1, 23:]
    attn_maps = [attn[:, l] for l in range(packed["n_layer"])]

    # TODO(synk): training losses (cross-entropy / MSE vs targets) not computed — inference only.
    losses = (None, None, None, None)
    return (miec, seq, clu), losses, attn_maps


# ----------------------------- params ---------------------------------------
def init_params(key, cfg):
    C, V = cfg.n_embd, cfg.vocab_size
    kit = iter(jax.random.split(key, 256))

    def nrm(shape):
        return (0.02 * jax.random.normal(next(kit), shape)).astype(jnp.float32)

    def lin(in_f, out_f):
        return {"w": nrm((in_f, out_f)), "b": jnp.zeros((out_f,), jnp.float32)}

    def lnp():
        return {"g": jnp.ones((C,), jnp.float32), "b": jnp.zeros((C,), jnp.float32)}

    def block_params():
        return {
            "ln1": lnp(),
            "ln2": lnp(),
            "attn": {
                "key": lin(C, C),
                "query": lin(C, C),
                "value": lin(C, C),
                "proj": lin(C, C),
            },
            "mlp": {"fc1": lin(C, 4 * C), "fc2": lin(4 * C, C)},
        }

    return {
        "tok_emb": nrm((V, C)),
        "type_emb": nrm((3, C)),
        "pos_emb": jax.random.normal(next(kit), (1, 12 + 180, C)).astype(jnp.float32),
        "bidblock": block_params(),
        "blocks": [block_params() for _ in range(cfg.n_layer - 1)],
        "ln_f": lnp(),
        "head": {"w": nrm((C, V))},      # bias=False in torch
        "linein2": lin(V, 4),
    }


# ----------------------------- main ------------------------------------------
if __name__ == "__main__":
    cfg = Config()
    cfg.vocab_size = 26
    cfg.n_embd = 32
    cfg.n_head = 4
    cfg.n_layer = 2          # 1 BidBlock + 1 causal Block
    cfg.block_size = 11
    rec_len = 8
    cfg.num_miec = rec_len
    cfg.seqlist = [[(3 * i + 1) % 23 for i in range(rec_len)]]
    cfg.is_pretrain = True
    cfg.is_mc = False
    cfg.attn_pdrop = cfg.resid_pdrop = cfg.embd_pdrop = 0.1  # identity (eval mode)

    root = jax.random.PRNGKey(0)
    kp, ki = jax.random.split(root)
    params = init_params(kp, cfg)
    packed = pack_params(params, cfg)      # one-time weight repack (outside forward path)
    idx = jax.random.randint(ki, (2, 11), 0, 23, dtype=jnp.int32)

    fwd = jax.jit(lambda idx_: rlpmiec_forward(packed, cfg, idx_))
    (miec, seq, clu), losses, attn_maps = fwd(idx)
    jax.block_until_ready((miec, seq, clu, attn_maps))

    T = 12 + rec_len
    assert miec.shape == (2, rec_len, 4)
    assert seq.shape == (2, 11, 23)
    assert clu.shape == (2, 1, cfg.vocab_size - 23)
    assert attn_maps[0].shape == (2, cfg.n_head, T, T)
    assert len(attn_maps) == cfg.n_layer
    print("KERNEL_OK")
</pallas_src>

<mosaic_0001>
module attributes {stable_mosaic.version = 11 : i64} {
  func.func @_fused_forward_kernel(%arg0: i32, %arg1: memref<2x20x32xf32, #tpu.memory_space<vmem>>, %arg2: memref<2x20x20xf32, #tpu.memory_space<vmem>>, %arg3: memref<2x1x32xf32, #tpu.memory_space<vmem>>, %arg4: memref<2x1x32xf32, #tpu.memory_space<vmem>>, %arg5: memref<2x32x96xf32, #tpu.memory_space<vmem>>, %arg6: memref<2x1x96xf32, #tpu.memory_space<vmem>>, %arg7: memref<2x32x32xf32, #tpu.memory_space<vmem>>, %arg8: memref<2x1x32xf32, #tpu.memory_space<vmem>>, %arg9: memref<2x1x32xf32, #tpu.memory_space<vmem>>, %arg10: memref<2x1x32xf32, #tpu.memory_space<vmem>>, %arg11: memref<2x32x128xf32, #tpu.memory_space<vmem>>, %arg12: memref<2x1x128xf32, #tpu.memory_space<vmem>>, %arg13: memref<2x128x32xf32, #tpu.memory_space<vmem>>, %arg14: memref<2x1x32xf32, #tpu.memory_space<vmem>>, %arg15: memref<1x32xf32, #tpu.memory_space<vmem>>, %arg16: memref<1x32xf32, #tpu.memory_space<vmem>>, %arg17: memref<32x26xf32, #tpu.memory_space<vmem>>, %arg18: memref<32x4xf32, #tpu.memory_space<vmem>>, %arg19: memref<1x4xf32, #tpu.memory_space<vmem>>, %arg20: memref<2x12x26xf32, #tpu.memory_space<vmem>>, %arg21: memref<2x8x4xf32, #tpu.memory_space<vmem>>, %arg22: memref<2x2x4x20x20xf32, #tpu.memory_space<vmem>>) attributes {dimension_semantics = [#tpu.dimension_semantics<arbitrary>], iteration_bounds = array<i64: 1>, scalar_prefetch = 0 : i64, scratch_operands = 0 : i64, tpu.core_type = #tpu.core_type<tc>, window_params = [{pipeline_mode = #tpu.pipeline_mode<synchronous>, transform_indices = @transform_0, window_bounds = array<i64: 2, 20, 32>}, {pipeline_mode = #tpu.pipeline_mode<synchronous>, transform_indices = @transform_1, window_bounds = array<i64: 2, 20, 20>}, {pipeline_mode = #tpu.pipeline_mode<synchronous>, transform_indices = @transform_2, window_bounds = array<i64: 2, 1, 32>}, {pipeline_mode = #tpu.pipeline_mode<synchronous>, transform_indices = @transform_3, window_bounds = array<i64: 2, 1, 32>}, {pipeline_mode = #tpu.pipeline_mode<synchronous>, transform_indices = @transform_4, window_bounds = array<i64: 2, 32, 96>}, {pipeline_mode = #tpu.pipeline_mode<synchronous>, transform_indices = @transform_5, window_bounds = array<i64: 2, 1, 96>}, {pipeline_mode = #tpu.pipeline_mode<synchronous>, transform_indices = @transform_6, window_bounds = array<i64: 2, 32, 32>}, {pipeline_mode = #tpu.pipeline_mode<synchronous>, transform_indices = @transform_7, window_bounds = array<i64: 2, 1, 32>}, {pipeline_mode = #tpu.pipeline_mode<synchronous>, transform_indices = @transform_8, window_bounds = array<i64: 2, 1, 32>}, {pipeline_mode = #tpu.pipeline_mode<synchronous>, transform_indices = @transform_9, window_bounds = array<i64: 2, 1, 32>}, {pipeline_mode = #tpu.pipeline_mode<synchronous>, transform_indices = @transform_10, window_bounds = array<i64: 2, 32, 128>}, {pipeline_mode = #tpu.pipeline_mode<synchronous>, transform_indices = @transform_11, window_bounds = array<i64: 2, 1, 128>}, {pipeline_mode = #tpu.pipeline_mode<synchronous>, transform_indices = @transform_12, window_bounds = array<i64: 2, 128, 32>}, {pipeline_mode = #tpu.pipeline_mode<synchronous>, transform_indices = @transform_13, window_bounds = array<i64: 2, 1, 32>}, {pipeline_mode = #tpu.pipeline_mode<synchronous>, transform_indices = @transform_14, window_bounds = array<i64: 1, 32>}, {pipeline_mode = #tpu.pipeline_mode<synchronous>, transform_indices = @transform_15, window_bounds = array<i64: 1, 32>}, {pipeline_mode = #tpu.pipeline_mode<synchronous>, transform_indices = @transform_16, window_bounds = array<i64: 32, 26>}, {pipeline_mode = #tpu.pipeline_mode<synchronous>, transform_indices = @transform_17, window_bounds = array<i64: 32, 4>}, {pipeline_mode = #tpu.pipeline_mode<synchronous>, transform_indices = @transform_18, window_bounds = array<i64: 1, 4>}, {pipeline_mode = #tpu.pipeline_mode<synchronous>, transform_indices = @transform_19, window_bounds = array<i64: 2, 12, 26>}, {pipeline_mode = #tpu.pipeline_mode<synchronous>, transform_indices = @transform_20, window_bounds = array<i64: 2, 8, 4>}, {pipeline_mode = #tpu.pipeline_mode<synchronous>, transform_indices = @transform_21, window_bounds = array<i64: 2, 2, 4, 20, 20>}]} {
    %c0 = arith.constant 0 : index
    %c0_0 = arith.constant 0 : index
    %c0_1 = arith.constant 0 : index
    %0 = vector.load %arg1[%c0, %c0_0, %c0_1] : memref<2x20x32xf32, #tpu.memory_space<vmem>>, vector<1x20x32xf32>
    %1 = vector.shape_cast %0 : vector<1x20x32xf32> to vector<20x32xf32>
    %c0_2 = arith.constant 0 : index
    %c0_3 = arith.constant 0 : index
    %c0_4 = arith.constant 0 : index
    %2 = vector.load %arg3[%c0_2, %c0_3, %c0_4] : memref<2x1x32xf32, #tpu.memory_space<vmem>>, vector<1x1x32xf32>
    %3 = vector.shape_cast %2 : vector<1x1x32xf32> to vector<1x32xf32>
    %c0_5 = arith.constant 0 : index
    %c0_6 = arith.constant 0 : index
    %c0_7 = arith.constant 0 : index
    %4 = vector.load %arg4[%c0_5, %c0_6, %c0_7] : memref<2x1x32xf32, #tpu.memory_space<vmem>>, vector<1x1x32xf32>
    %5 = vector.shape_cast %4 : vector<1x1x32xf32> to vector<1x32xf32>
    %cst = arith.constant dense<0.000000e+00> : vector<20xf32>
    %6 = vector.multi_reduction <add>, %1, %cst [1] : vector<20x32xf32> to vector<20xf32>
    %7 = vector.shape_cast %6 : vector<20xf32> to vector<20x1xf32>
    %cst_8 = arith.constant 3.200000e+01 : f32
    %8 = vector.broadcast %cst_8 : f32 to vector<20x1xf32>
    %9 = arith.divf %7, %8 : vector<20x1xf32>
    %10 = vector.broadcast %9 : vector<20x1xf32> to vector<20x32xf32>
    %11 = arith.subf %1, %10 : vector<20x32xf32>
    %12 = arith.mulf %11, %11 : vector<20x32xf32>
    %cst_9 = arith.constant dense<0.000000e+00> : vector<20xf32>
    %13 = vector.multi_reduction <add>, %12, %cst_9 [1] : vector<20x32xf32> to vector<20xf32>
    %14 = vector.shape_cast %13 : vector<20xf32> to vector<20x1xf32>
    %cst_10 = arith.constant 3.200000e+01 : f32
    %15 = vector.broadcast %cst_10 : f32 to vector<20x1xf32>
    %16 = arith.divf %14, %15 : vector<20x1xf32>
    %cst_11 = arith.constant 9.99999974E-6 : f32
    %17 = vector.broadcast %cst_11 : f32 to vector<20x1xf32>
    %18 = arith.addf %16, %17 : vector<20x1xf32>
    %19 = math.rsqrt %18 : vector<20x1xf32>
    %20 = vector.broadcast %19 : vector<20x1xf32> to vector<20x32xf32>
    %21 = arith.mulf %11, %20 : vector<20x32xf32>
    %22 = vector.broadcast %3 : vector<1x32xf32> to vector<20x32xf32>
    %23 = arith.mulf %21, %22 : vector<20x32xf32>
    %24 = vector.broadcast %5 : vector<1x32xf32> to vector<20x32xf32>
    %25 = arith.addf %23, %24 : vector<20x32xf32>
    %c0_12 = arith.constant 0 : index
    %c0_13 = arith.constant 0 : index
    %c0_14 = arith.constant 0 : index
    %26 = vector.load %arg5[%c0_12, %c0_13, %c0_14] : memref<2x32x96xf32, #tpu.memory_space<vmem>>, vector<1x32x96xf32>
    %27 = vector.shape_cast %26 : vector<1x32x96xf32> to vector<32x96xf32>
    %cst_15 = arith.constant dense<0.000000e+00> : vector<20x96xf32>
    %28 = tpu.matmul %25, %27, %cst_15 {dimension_numbers = #tpu.dot_dimension_numbers<[1], [0], [0], [1], [0, 0, 1, 1], [], []>} : vector<20x32xf32>, vector<32x96xf32>, vector<20x96xf32> -> vector<20x96xf32>
    %c0_16 = arith.constant 0 : index
    %c0_17 = arith.constant 0 : index
    %c0_18 = arith.constant 0 : index
    %29 = vector.load %arg6[%c0_16, %c0_17, %c0_18] : memref<2x1x96xf32, #tpu.memory_space<vmem>>, vector<1x1x96xf32>
    %30 = vector.shape_cast %29 : vector<1x1x96xf32> to vector<1x96xf32>
    %31 = vector.broadcast %30 : vector<1x96xf32> to vector<20x96xf32>
    %32 = arith.addf %28, %31 : vector<20x96xf32>
    %33 = vector.extract_strided_slice %32 {offsets = [0, 0], sizes = [20, 8], strides = [1, 1]} : vector<20x96xf32> to vector<20x8xf32>
    %34 = vector.extract_strided_slice %32 {offsets = [0, 8], sizes = [20, 8], strides = [1, 1]} : vector<20x96xf32> to vector<20x8xf32>
    %35 = vector.extract_strided_slice %32 {offsets = [0, 16], sizes = [20, 8], strides = [1, 1]} : vector<20x96xf32> to vector<20x8xf32>
    %36 = vector.extract_strided_slice %32 {offsets = [0, 24], sizes = [20, 8], strides = [1, 1]} : vector<20x96xf32> to vector<20x8xf32>
    %37 = vector.shape_cast %33 : vector<20x8xf32> to vector<1x20x8xf32>
    %38 = vector.shape_cast %34 : vector<20x8xf32> to vector<1x20x8xf32>
    %39 = vector.shape_cast %35 : vector<20x8xf32> to vector<1x20x8xf32>
    %40 = vector.shape_cast %36 : vector<20x8xf32> to vector<1x20x8xf32>
    %41 = tpu.concatenate %37, %38, %39, %40 in 0 : vector<1x20x8xf32>, vector<1x20x8xf32>, vector<1x20x8xf32>, vector<1x20x8xf32> -> vector<4x20x8xf32>
    %42 = vector.extract_strided_slice %32 {offsets = [0, 32], sizes = [20, 8], strides = [1, 1]} : vector<20x96xf32> to vector<20x8xf32>
    %43 = vector.extract_strided_slice %32 {offsets = [0, 40], sizes = [20, 8], strides = [1, 1]} : vector<20x96xf32> to vector<20x8xf32>
    %44 = vector.extract_strided_slice %32 {offsets = [0, 48], sizes = [20, 8], strides = [1, 1]} : vector<20x96xf32> to vector<20x8xf32>
    %45 = vector.extract_strided_slice %32 {offsets = [0, 56], sizes = [20, 8], strides = [1, 1]} : vector<20x96xf32> to vector<20x8xf32>
    %46 = vector.shape_cast %42 : vector<20x8xf32> to vector<1x20x8xf32>
    %47 = vector.shape_cast %43 : vector<20x8xf32> to vector<1x20x8xf32>
    %48 = vector.shape_cast %44 : vector<20x8xf32> to vector<1x20x8xf32>
    %49 = vector.shape_cast %45 : vector<20x8xf32> to vector<1x20x8xf32>
    %50 = tpu.concatenate %46, %47, %48, %49 in 0 : vector<1x20x8xf32>, vector<1x20x8xf32>, vector<1x20x8xf32>, vector<1x20x8xf32> -> vector<4x20x8xf32>
    %51 = vector.extract_strided_slice %32 {offsets = [0, 64], sizes = [20, 8], strides = [1, 1]} : vector<20x96xf32> to vector<20x8xf32>
    %52 = vector.extract_strided_slice %32 {offsets = [0, 72], sizes = [20, 8], strides = [1, 1]} : vector<20x96xf32> to vector<20x8xf32>
    %53 = vector.extract_strided_slice %32 {offsets = [0, 80], sizes = [20, 8], strides = [1, 1]} : vector<20x96xf32> to vector<20x8xf32>
    %54 = vector.extract_strided_slice %32 {offsets = [0, 88], sizes = [20, 8], strides = [1, 1]} : vector<20x96xf32> to vector<20x8xf32>
    %55 = vector.shape_cast %51 : vector<20x8xf32> to vector<1x20x8xf32>
    %56 = vector.shape_cast %52 : vector<20x8xf32> to vector<1x20x8xf32>
    %57 = vector.shape_cast %53 : vector<20x8xf32> to vector<1x20x8xf32>
    %58 = vector.shape_cast %54 : vector<20x8xf32> to vector<1x20x8xf32>
    %59 = tpu.concatenate %55, %56, %57, %58 in 0 : vector<1x20x8xf32>, vector<1x20x8xf32>, vector<1x20x8xf32>, vector<1x20x8xf32> -> vector<4x20x8xf32>
    %cst_19 = arith.constant dense<0.000000e+00> : vector<4x20x20xf32>
    %60 = tpu.matmul %41, %50, %cst_19 {dimension_numbers = #tpu.dot_dimension_numbers<[2], [2], [1], [1], [0, 0, 0, 1, 1, 1], [0], [0]>} : vector<4x20x8xf32>, vector<4x20x8xf32>, vector<4x20x20xf32> -> vector<4x20x20xf32>
    %c0_20 = arith.constant 0 : index
    %c0_21 = arith.constant 0 : index
    %c0_22 = arith.constant 0 : index
    %61 = vector.load %arg2[%c0_20, %c0_21, %c0_22] : memref<2x20x20xf32, #tpu.memory_space<vmem>>, vector<1x20x20xf32>
    %62 = vector.shape_cast %61 : vector<1x20x20xf32> to vector<20x20xf32>
    %63 = vector.shape_cast %62 : vector<20x20xf32> to vector<1x20x20xf32>
    %64 = vector.broadcast %63 : vector<1x20x20xf32> to vector<4x20x20xf32>
    %65 = arith.addf %60, %64 : vector<4x20x20xf32>
    %cst_23 = arith.constant dense<0xFF800000> : vector<4x20xf32>
    %66 = vector.multi_reduction <maximumf>, %65, %cst_23 [2] : vector<4x20x20xf32> to vector<4x20xf32>
    %67 = vector.shape_cast %66 : vector<4x20xf32> to vector<4x20x1xf32>
    %68 = vector.broadcast %67 : vector<4x20x1xf32> to vector<4x20x20xf32>
    %69 = arith.subf %65, %68 : vector<4x20x20xf32>
    %70 = math.exp %69 : vector<4x20x20xf32>
    %cst_24 = arith.constant dense<0.000000e+00> : vector<4x20xf32>
    %71 = vector.multi_reduction <add>, %70, %cst_24 [2] : vector<4x20x20xf32> to vector<4x20xf32>
    %72 = vector.shape_cast %71 : vector<4x20xf32> to vector<4x20x1xf32>
    %73 = tpu.reciprocal %72 {approx = true} : vector<4x20x1xf32> -> vector<4x20x1xf32>
    %74 = vector.broadcast %73 : vector<4x20x1xf32> to vector<4x20x20xf32>
    %75 = arith.mulf %70, %74 : vector<4x20x20xf32>
    %c0_25 = arith.constant 0 : index
    %c0_26 = arith.constant 0 : index
    %c0_27 = arith.constant 0 : index
    %c0_28 = arith.constant 0 : index
    %c0_29 = arith.constant 0 : index
    %76 = vector.load %arg22[%c0_25, %c0_26, %c0_27, %c0_28, %c0_29] : memref<2x2x4x20x20xf32, #tpu.memory_space<vmem>>, vector<1x1x4x20x20xf32>
    %77 = vector.shape_cast %76 : vector<1x1x4x20x20xf32> to vector<4x20x20xf32>
    %78 = vector.shape_cast %75 : vector<4x20x20xf32> to vector<1x1x4x20x20xf32>
    tpu.vector_store %arg22[%c0_25, %c0_26, %c0_27, %c0_28, %c0_29], %78 {strides = array<i32>} : memref<2x2x4x20x20xf32, #tpu.memory_space<vmem>>, vector<1x1x4x20x20xf32>,
    %cst_30 = arith.constant dense<0.000000e+00> : vector<4x20x8xf32>
    %79 = tpu.matmul %75, %59, %cst_30 {dimension_numbers = #tpu.dot_dimension_numbers<[2], [1], [1], [2], [0, 0, 0, 1, 1, 2], [0], [0]>} : vector<4x20x20xf32>, vector<4x20x8xf32>, vector<4x20x8xf32> -> vector<4x20x8xf32>
    %80 = vector.extract_strided_slice %79 {offsets = [0, 0, 0], sizes = [1, 20, 8], strides = [1, 1, 1]} : vector<4x20x8xf32> to vector<1x20x8xf32>
    %81 = vector.shape_cast %80 : vector<1x20x8xf32> to vector<20x8xf32>
    %82 = vector.extract_strided_slice %79 {offsets = [1, 0, 0], sizes = [1, 20, 8], strides = [1, 1, 1]} : vector<4x20x8xf32> to vector<1x20x8xf32>
    %83 = vector.shape_cast %82 : vector<1x20x8xf32> to vector<20x8xf32>
    %84 = vector.extract_strided_slice %79 {offsets = [2, 0, 0], sizes = [1, 20, 8], strides = [1, 1, 1]} : vector<4x20x8xf32> to vector<1x20x8xf32>
    %85 = vector.shape_cast %84 : vector<1x20x8xf32> to vector<20x8xf32>
    %86 = vector.extract_strided_slice %79 {offsets = [3, 0, 0], sizes = [1, 20, 8], strides = [1, 1, 1]} : vector<4x20x8xf32> to vector<1x20x8xf32>
    %87 = vector.shape_cast %86 : vector<1x20x8xf32> to vector<20x8xf32>
    %88 = tpu.concatenate %81, %83, %85, %87 in 1 : vector<20x8xf32>, vector<20x8xf32>, vector<20x8xf32>, vector<20x8xf32> -> vector<20x32xf32>
    %c0_31 = arith.constant 0 : index
    %c0_32 = arith.constant 0 : index
    %c0_33 = arith.constant 0 : index
    %89 = vector.load %arg7[%c0_31, %c0_32, %c0_33] : memref<2x32x32xf32, #tpu.memory_space<vmem>>, vector<1x32x32xf32>
    %90 = vector.shape_cast %89 : vector<1x32x32xf32> to vector<32x32xf32>
    %cst_34 = arith.constant dense<0.000000e+00> : vector<20x32xf32>
    %91 = tpu.matmul %88, %90, %cst_34 {dimension_numbers = #tpu.dot_dimension_numbers<[1], [0], [0], [1], [0, 0, 1, 1], [], []>} : vector<20x32xf32>, vector<32x32xf32>, vector<20x32xf32> -> vector<20x32xf32>
    %c0_35 = arith.constant 0 : index
    %c0_36 = arith.constant 0 : index
    %c0_37 = arith.constant 0 : index
    %92 = vector.load %arg8[%c0_35, %c0_36, %c0_37] : memref<2x1x32xf32, #tpu.memory_space<vmem>>, vector<1x1x32xf32>
    %93 = vector.shape_cast %92 : vector<1x1x32xf32> to vector<1x32xf32>
    %94 = vector.broadcast %93 : vector<1x32xf32> to vector<20x32xf32>
    %95 = arith.addf %91, %94 : vector<20x32xf32>
    %96 = arith.addf %1, %95 : vector<20x32xf32>
    %c0_38 = arith.constant 0 : index
    %c0_39 = arith.constant 0 : index
    %c0_40 = arith.constant 0 : index
    %97 = vector.load %arg9[%c0_38, %c0_39, %c0_40] : memref<2x1x32xf32, #tpu.memory_space<vmem>>, vector<1x1x32xf32>
    %98 = vector.shape_cast %97 : vector<1x1x32xf32> to vector<1x32xf32>
    %c0_41 = arith.constant 0 : index
    %c0_42 = arith.constant 0 : index
    %c0_43 = arith.constant 0 : index
    %99 = vector.load %arg10[%c0_41, %c0_42, %c0_43] : memref<2x1x32xf32, #tpu.memory_space<vmem>>, vector<1x1x32xf32>
    %100 = vector.shape_cast %99 : vector<1x1x32xf32> to vector<1x32xf32>
    %cst_44 = arith.constant dense<0.000000e+00> : vector<20xf32>
    %101 = vector.multi_reduction <add>, %96, %cst_44 [1] : vector<20x32xf32> to vector<20xf32>
    %102 = vector.shape_cast %101 : vector<20xf32> to vector<20x1xf32>
    %cst_45 = arith.constant 3.200000e+01 : f32
    %103 = vector.broadcast %cst_45 : f32 to vector<20x1xf32>
    %104 = arith.divf %102, %103 : vector<20x1xf32>
    %105 = vector.broadcast %104 : vector<20x1xf32> to vector<20x32xf32>
    %106 = arith.subf %96, %105 : vector<20x32xf32>
    %107 = arith.mulf %106, %106 : vector<20x32xf32>
    %cst_46 = arith.constant dense<0.000000e+00> : vector<20xf32>
    %108 = vector.multi_reduction <add>, %107, %cst_46 [1] : vector<20x32xf32> to vector<20xf32>
    %109 = vector.shape_cast %108 : vector<20xf32> to vector<20x1xf32>
    %cst_47 = arith.constant 3.200000e+01 : f32
    %110 = vector.broadcast %cst_47 : f32 to vector<20x1xf32>
    %111 = arith.divf %109, %110 : vector<20x1xf32>
    %cst_48 = arith.constant 9.99999974E-6 : f32
    %112 = vector.broadcast %cst_48 : f32 to vector<20x1xf32>
    %113 = arith.addf %111, %112 : vector<20x1xf32>
    %114 = math.rsqrt %113 : vector<20x1xf32>
    %115 = vector.broadcast %114 : vector<20x1xf32> to vector<20x32xf32>
    %116 = arith.mulf %106, %115 : vector<20x32xf32>
    %117 = vector.broadcast %98 : vector<1x32xf32> to vector<20x32xf32>
    %118 = arith.mulf %116, %117 : vector<20x32xf32>
    %119 = vector.broadcast %100 : vector<1x32xf32> to vector<20x32xf32>
    %120 = arith.addf %118, %119 : vector<20x32xf32>
    %c0_49 = arith.constant 0 : index
    %c0_50 = arith.constant 0 : index
    %c0_51 = arith.constant 0 : index
    %121 = vector.load %arg11[%c0_49, %c0_50, %c0_51] : memref<2x32x128xf32, #tpu.memory_space<vmem>>, vector<1x32x128xf32>
    %122 = vector.shape_cast %121 : vector<1x32x128xf32> to vector<32x128xf32>
    %cst_52 = arith.constant dense<0.000000e+00> : vector<20x128xf32>
    %123 = tpu.matmul %120, %122, %cst_52 {dimension_numbers = #tpu.dot_dimension_numbers<[1], [0], [0], [1], [0, 0, 1, 1], [], []>} : vector<20x32xf32>, vector<32x128xf32>, vector<20x128xf32> -> vector<20x128xf32>
    %c0_53 = arith.constant 0 : index
    %c0_54 = arith.constant 0 : index
    %c0_55 = arith.constant 0 : index
    %124 = vector.load %arg12[%c0_53, %c0_54, %c0_55] : memref<2x1x128xf32, #tpu.memory_space<vmem>>, vector<1x1x128xf32>
    %125 = vector.shape_cast %124 : vector<1x1x128xf32> to vector<1x128xf32>
    %126 = vector.broadcast %125 : vector<1x128xf32> to vector<20x128xf32>
    %127 = arith.addf %123, %126 : vector<20x128xf32>
    %cst_56 = arith.constant 5.000000e-01 : f32
    %128 = vector.broadcast %cst_56 : f32 to vector<20x128xf32>
    %129 = arith.mulf %128, %127 : vector<20x128xf32>
    %cst_57 = arith.constant 0.707106769 : f32
    %130 = vector.broadcast %cst_57 : f32 to vector<20x128xf32>
    %131 = arith.mulf %127, %130 : vector<20x128xf32>
    %132 = math.absf %131 : vector<20x128xf32>
    %cst_58 = arith.constant 0.327591091 : f32
    %133 = vector.broadcast %cst_58 : f32 to vector<20x128xf32>
    %134 = arith.mulf %133, %132 : vector<20x128xf32>
    %cst_59 = arith.constant 1.000000e+00 : f32
    %135 = vector.broadcast %cst_59 : f32 to vector<20x128xf32>
    %136 = arith.addf %135, %134 : vector<20x128xf32>
    %cst_60 = arith.constant 1.000000e+00 : f32
    %137 = vector.broadcast %cst_60 : f32 to vector<20x128xf32>
    %138 = arith.divf %137, %136 : vector<20x128xf32>
    %cst_61 = arith.constant 1.06140542 : f32
    %139 = vector.broadcast %cst_61 : f32 to vector<20x128xf32>
    %140 = arith.mulf %139, %138 : vector<20x128xf32>
    %cst_62 = arith.constant -1.45315206 : f32
    %141 = vector.broadcast %cst_62 : f32 to vector<20x128xf32>
    %142 = arith.addf %140, %141 : vector<20x128xf32>
    %143 = arith.mulf %142, %138 : vector<20x128xf32>
    %cst_63 = arith.constant 1.42141378 : f32
    %144 = vector.broadcast %cst_63 : f32 to vector<20x128xf32>
    %145 = arith.addf %143, %144 : vector<20x128xf32>
    %146 = arith.mulf %145, %138 : vector<20x128xf32>
    %cst_64 = arith.constant -0.284496725 : f32
    %147 = vector.broadcast %cst_64 : f32 to vector<20x128xf32>
    %148 = arith.addf %146, %147 : vector<20x128xf32>
    %149 = arith.mulf %148, %138 : vector<20x128xf32>
    %cst_65 = arith.constant 0.254829586 : f32
    %150 = vector.broadcast %cst_65 : f32 to vector<20x128xf32>
    %151 = arith.addf %149, %150 : vector<20x128xf32>
    %152 = arith.mulf %151, %138 : vector<20x128xf32>
    %cst_66 = arith.constant 0.000000e+00 : f32
    %153 = vector.broadcast %cst_66 : f32 to vector<20x128xf32>
    %154 = arith.subf %153, %132 : vector<20x128xf32>
    %155 = arith.mulf %154, %132 : vector<20x128xf32>
    %156 = math.exp %155 : vector<20x128xf32>
    %157 = arith.mulf %152, %156 : vector<20x128xf32>
    %cst_67 = arith.constant 1.000000e+00 : f32
    %158 = vector.broadcast %cst_67 : f32 to vector<20x128xf32>
    %159 = arith.subf %158, %157 : vector<20x128xf32>
    %cst_68 = arith.constant 0.000000e+00 : f32
    %160 = vector.broadcast %cst_68 : f32 to vector<20x128xf32>
    %161 = arith.cmpf olt, %131, %160 : vector<20x128xf32>
    %cst_69 = arith.constant 0.000000e+00 : f32
    %162 = vector.broadcast %cst_69 : f32 to vector<20x128xf32>
    %163 = arith.subf %162, %159 : vector<20x128xf32>
    %164 = arith.select %161, %163, %159 : vector<20x128xi1>, vector<20x128xf32>
    %cst_70 = arith.constant 1.000000e+00 : f32
    %165 = vector.broadcast %cst_70 : f32 to vector<20x128xf32>
    %166 = arith.addf %165, %164 : vector<20x128xf32>
    %167 = arith.mulf %129, %166 : vector<20x128xf32>
    %c0_71 = arith.constant 0 : index
    %c0_72 = arith.constant 0 : index
    %c0_73 = arith.constant 0 : index
    %168 = vector.load %arg13[%c0_71, %c0_72, %c0_73] : memref<2x128x32xf32, #tpu.memory_space<vmem>>, vector<1x128x32xf32>
    %169 = vector.shape_cast %168 : vector<1x128x32xf32> to vector<128x32xf32>
    %cst_74 = arith.constant dense<0.000000e+00> : vector<20x32xf32>
    %170 = tpu.matmul %167, %169, %cst_74 {dimension_numbers = #tpu.dot_dimension_numbers<[1], [0], [0], [1], [0, 0, 1, 1], [], []>} : vector<20x128xf32>, vector<128x32xf32>, vector<20x32xf32> -> vector<20x32xf32>
    %c0_75 = arith.constant 0 : index
    %c0_76 = arith.constant 0 : index
    %c0_77 = arith.constant 0 : index
    %171 = vector.load %arg14[%c0_75, %c0_76, %c0_77] : memref<2x1x32xf32, #tpu.memory_space<vmem>>, vector<1x1x32xf32>
    %172 = vector.shape_cast %171 : vector<1x1x32xf32> to vector<1x32xf32>
    %173 = vector.broadcast %172 : vector<1x32xf32> to vector<20x32xf32>
    %174 = arith.addf %170, %173 : vector<20x32xf32>
    %175 = arith.addf %96, %174 : vector<20x32xf32>
    %c1 = arith.constant 1 : index
    %c0_78 = arith.constant 0 : index
    %c0_79 = arith.constant 0 : index
    %176 = vector.load %arg3[%c1, %c0_78, %c0_79] : memref<2x1x32xf32, #tpu.memory_space<vmem>>, vector<1x1x32xf32>
    %177 = vector.shape_cast %176 : vector<1x1x32xf32> to vector<1x32xf32>
    %c1_80 = arith.constant 1 : index
    %c0_81 = arith.constant 0 : index
    %c0_82 = arith.constant 0 : index
    %178 = vector.load %arg4[%c1_80, %c0_81, %c0_82] : memref<2x1x32xf32, #tpu.memory_space<vmem>>, vector<1x1x32xf32>
    %179 = vector.shape_cast %178 : vector<1x1x32xf32> to vector<1x32xf32>
    %cst_83 = arith.constant dense<0.000000e+00> : vector<20xf32>
    %180 = vector.multi_reduction <add>, %175, %cst_83 [1] : vector<20x32xf32> to vector<20xf32>
    %181 = vector.shape_cast %180 : vector<20xf32> to vector<20x1xf32>
    %cst_84 = arith.constant 3.200000e+01 : f32
    %182 = vector.broadcast %cst_84 : f32 to vector<20x1xf32>
    %183 = arith.divf %181, %182 : vector<20x1xf32>
    %184 = vector.broadcast %183 : vector<20x1xf32> to vector<20x32xf32>
    %185 = arith.subf %175, %184 : vector<20x32xf32>
    %186 = arith.mulf %185, %185 : vector<20x32xf32>
    %cst_85 = arith.constant dense<0.000000e+00> : vector<20xf32>
    %187 = vector.multi_reduction <add>, %186, %cst_85 [1] : vector<20x32xf32> to vector<20xf32>
    %188 = vector.shape_cast %187 : vector<20xf32> to vector<20x1xf32>
    %cst_86 = arith.constant 3.200000e+01 : f32
    %189 = vector.broadcast %cst_86 : f32 to vector<20x1xf32>
    %190 = arith.divf %188, %189 : vector<20x1xf32>
    %cst_87 = arith.constant 9.99999974E-6 : f32
    %191 = vector.broadcast %cst_87 : f32 to vector<20x1xf32>
    %192 = arith.addf %190, %191 : vector<20x1xf32>
    %193 = math.rsqrt %192 : vector<20x1xf32>
    %194 = vector.broadcast %193 : vector<20x1xf32> to vector<20x32xf32>
    %195 = arith.mulf %185, %194 : vector<20x32xf32>
    %196 = vector.broadcast %177 : vector<1x32xf32> to vector<20x32xf32>
    %197 = arith.mulf %195, %196 : vector<20x32xf32>
    %198 = vector.broadcast %179 : vector<1x32xf32> to vector<20x32xf32>
    %199 = arith.addf %197, %198 : vector<20x32xf32>
    %c1_88 = arith.constant 1 : index
    %c0_89 = arith.constant 0 : index
    %c0_90 = arith.constant 0 : index
    %200 = vector.load %arg5[%c1_88, %c0_89, %c0_90] : memref<2x32x96xf32, #tpu.memory_space<vmem>>, vector<1x32x96xf32>
    %201 = vector.shape_cast %200 : vector<1x32x96xf32> to vector<32x96xf32>
    %cst_91 = arith.constant dense<0.000000e+00> : vector<20x96xf32>
    %202 = tpu.matmul %199, %201, %cst_91 {dimension_numbers = #tpu.dot_dimension_numbers<[1], [0], [0], [1], [0, 0, 1, 1], [], []>} : vector<20x32xf32>, vector<32x96xf32>, vector<20x96xf32> -> vector<20x96xf32>
    %c1_92 = arith.constant 1 : index
    %c0_93 = arith.constant 0 : index
    %c0_94 = arith.constant 0 : index
    %203 = vector.load %arg6[%c1_92, %c0_93, %c0_94] : memref<2x1x96xf32, #tpu.memory_space<vmem>>, vector<1x1x96xf32>
    %204 = vector.shape_cast %203 : vector<1x1x96xf32> to vector<1x96xf32>
    %205 = vector.broadcast %204 : vector<1x96xf32> to vector<20x96xf32>
    %206 = arith.addf %202, %205 : vector<20x96xf32>
    %207 = vector.extract_strided_slice %206 {offsets = [0, 0], sizes = [20, 8], strides = [1, 1]} : vector<20x96xf32> to vector<20x8xf32>
    %208 = vector.extract_strided_slice %206 {offsets = [0, 8], sizes = [20, 8], strides = [1, 1]} : vector<20x96xf32> to vector<20x8xf32>
    %209 = vector.extract_strided_slice %206 {offsets = [0, 16], sizes = [20, 8], strides = [1, 1]} : vector<20x96xf32> to vector<20x8xf32>
    %210 = vector.extract_strided_slice %206 {offsets = [0, 24], sizes = [20, 8], strides = [1, 1]} : vector<20x96xf32> to vector<20x8xf32>
    %211 = vector.shape_cast %207 : vector<20x8xf32> to vector<1x20x8xf32>
    %212 = vector.shape_cast %208 : vector<20x8xf32> to vector<1x20x8xf32>
    %213 = vector.shape_cast %209 : vector<20x8xf32> to vector<1x20x8xf32>
    %214 = vector.shape_cast %210 : vector<20x8xf32> to vector<1x20x8xf32>
    %215 = tpu.concatenate %211, %212, %213, %214 in 0 : vector<1x20x8xf32>, vector<1x20x8xf32>, vector<1x20x8xf32>, vector<1x20x8xf32> -> vector<4x20x8xf32>
    %216 = vector.extract_strided_slice %206 {offsets = [0, 32], sizes = [20, 8], strides = [1, 1]} : vector<20x96xf32> to vector<20x8xf32>
    %217 = vector.extract_strided_slice %206 {offsets = [0, 40], sizes = [20, 8], strides = [1, 1]} : vector<20x96xf32> to vector<20x8xf32>
    %218 = vector.extract_strided_slice %206 {offsets = [0, 48], sizes = [20, 8], strides = [1, 1]} : vector<20x96xf32> to vector<20x8xf32>
    %219 = vector.extract_strided_slice %206 {offsets = [0, 56], sizes = [20, 8], strides = [1, 1]} : vector<20x96xf32> to vector<20x8xf32>
    %220 = vector.shape_cast %216 : vector<20x8xf32> to vector<1x20x8xf32>
    %221 = vector.shape_cast %217 : vector<20x8xf32> to vector<1x20x8xf32>
    %222 = vector.shape_cast %218 : vector<20x8xf32> to vector<1x20x8xf32>
    %223 = vector.shape_cast %219 : vector<20x8xf32> to vector<1x20x8xf32>
    %224 = tpu.concatenate %220, %221, %222, %223 in 0 : vector<1x20x8xf32>, vector<1x20x8xf32>, vector<1x20x8xf32>, vector<1x20x8xf32> -> vector<4x20x8xf32>
    %225 = vector.extract_strided_slice %206 {offsets = [0, 64], sizes = [20, 8], strides = [1, 1]} : vector<20x96xf32> to vector<20x8xf32>
    %226 = vector.extract_strided_slice %206 {offsets = [0, 72], sizes = [20, 8], strides = [1, 1]} : vector<20x96xf32> to vector<20x8xf32>
    %227 = vector.extract_strided_slice %206 {offsets = [0, 80], sizes = [20, 8], strides = [1, 1]} : vector<20x96xf32> to vector<20x8xf32>
    %228 = vector.extract_strided_slice %206 {offsets = [0, 88], sizes = [20, 8], strides = [1, 1]} : vector<20x96xf32> to vector<20x8xf32>
    %229 = vector.shape_cast %225 : vector<20x8xf32> to vector<1x20x8xf32>
    %230 = vector.shape_cast %226 : vector<20x8xf32> to vector<1x20x8xf32>
    %231 = vector.shape_cast %227 : vector<20x8xf32> to vector<1x20x8xf32>
    %232 = vector.shape_cast %228 : vector<20x8xf32> to vector<1x20x8xf32>
    %233 = tpu.concatenate %229, %230, %231, %232 in 0 : vector<1x20x8xf32>, vector<1x20x8xf32>, vector<1x20x8xf32>, vector<1x20x8xf32> -> vector<4x20x8xf32>
    %cst_95 = arith.constant dense<0.000000e+00> : vector<4x20x20xf32>
    %234 = tpu.matmul %215, %224, %cst_95 {dimension_numbers = #tpu.dot_dimension_numbers<[2], [2], [1], [1], [0, 0, 0, 1, 1, 1], [0], [0]>} : vector<4x20x8xf32>, vector<4x20x8xf32>, vector<4x20x20xf32> -> vector<4x20x20xf32>
    %c1_96 = arith.constant 1 : index
    %c0_97 = arith.constant 0 : index
    %c0_98 = arith.constant 0 : index
    %235 = vector.load %arg2[%c1_96, %c0_97, %c0_98] : memref<2x20x20xf32, #tpu.memory_space<vmem>>, vector<1x20x20xf32>
    %236 = vector.shape_cast %235 : vector<1x20x20xf32> to vector<20x20xf32>
    %237 = vector.shape_cast %236 : vector<20x20xf32> to vector<1x20x20xf32>
    %238 = vector.broadcast %237 : vector<1x20x20xf32> to vector<4x20x20xf32>
    %239 = arith.addf %234, %238 : vector<4x20x20xf32>
    %cst_99 = arith.constant dense<0xFF800000> : vector<4x20xf32>
    %240 = vector.multi_reduction <maximumf>, %239, %cst_99 [2] : vector<4x20x20xf32> to vector<4x20xf32>
    %241 = vector.shape_cast %240 : vector<4x20xf32> to vector<4x20x1xf32>
    %242 = vector.broadcast %241 : vector<4x20x1xf32> to vector<4x20x20xf32>
    %243 = arith.subf %239, %242 : vector<4x20x20xf32>
    %244 = math.exp %243 : vector<4x20x20xf32>
    %cst_100 = arith.constant dense<0.000000e+00> : vector<4x20xf32>
    %245 = vector.multi_reduction <add>, %244, %cst_100 [2] : vector<4x20x20xf32> to vector<4x20xf32>
    %246 = vector.shape_cast %245 : vector<4x20xf32> to vector<4x20x1xf32>
    %247 = tpu.reciprocal %246 {approx = true} : vector<4x20x1xf32> -> vector<4x20x1xf32>
    %248 = vector.broadcast %247 : vector<4x20x1xf32> to vector<4x20x20xf32>
    %249 = arith.mulf %244, %248 : vector<4x20x20xf32>
    %c0_101 = arith.constant 0 : index
    %c1_102 = arith.constant 1 : index
    %c0_103 = arith.constant 0 : index
    %c0_104 = arith.constant 0 : index
    %c0_105 = arith.constant 0 : index
    %250 = vector.load %arg22[%c0_101, %c1_102, %c0_103, %c0_104, %c0_105] : memref<2x2x4x20x20xf32, #tpu.memory_space<vmem>>, vector<1x1x4x20x20xf32>
    %251 = vector.shape_cast %250 : vector<1x1x4x20x20xf32> to vector<4x20x20xf32>
    %252 = vector.shape_cast %249 : vector<4x20x20xf32> to vector<1x1x4x20x20xf32>
    tpu.vector_store %arg22[%c0_101, %c1_102, %c0_103, %c0_104, %c0_105], %252 {strides = array<i32>} : memref<2x2x4x20x20xf32, #tpu.memory_space<vmem>>, vector<1x1x4x20x20xf32>,
    %cst_106 = arith.constant dense<0.000000e+00> : vector<4x20x8xf32>
    %253 = tpu.matmul %249, %233, %cst_106 {dimension_numbers = #tpu.dot_dimension_numbers<[2], [1], [1], [2], [0, 0, 0, 1, 1, 2], [0], [0]>} : vector<4x20x20xf32>, vector<4x20x8xf32>, vector<4x20x8xf32> -> vector<4x20x8xf32>
    %254 = vector.extract_strided_slice %253 {offsets = [0, 0, 0], sizes = [1, 20, 8], strides = [1, 1, 1]} : vector<4x20x8xf32> to vector<1x20x8xf32>
    %255 = vector.shape_cast %254 : vector<1x20x8xf32> to vector<20x8xf32>
    %256 = vector.extract_strided_slice %253 {offsets = [1, 0, 0], sizes = [1, 20, 8], strides = [1, 1, 1]} : vector<4x20x8xf32> to vector<1x20x8xf32>
    %257 = vector.shape_cast %256 : vector<1x20x8xf32> to vector<20x8xf32>
    %258 = vector.extract_strided_slice %253 {offsets = [2, 0, 0], sizes = [1, 20, 8], strides = [1, 1, 1]} : vector<4x20x8xf32> to vector<1x20x8xf32>
    %259 = vector.shape_cast %258 : vector<1x20x8xf32> to vector<20x8xf32>
    %260 = vector.extract_strided_slice %253 {offsets = [3, 0, 0], sizes = [1, 20, 8], strides = [1, 1, 1]} : vector<4x20x8xf32> to vector<1x20x8xf32>
    %261 = vector.shape_cast %260 : vector<1x20x8xf32> to vector<20x8xf32>
    %262 = tpu.concatenate %255, %257, %259, %261 in 1 : vector<20x8xf32>, vector<20x8xf32>, vector<20x8xf32>, vector<20x8xf32> -> vector<20x32xf32>
    %c1_107 = arith.constant 1 : index
    %c0_108 = arith.constant 0 : index
    %c0_109 = arith.constant 0 : index
    %263 = vector.load %arg7[%c1_107, %c0_108, %c0_109] : memref<2x32x32xf32, #tpu.memory_space<vmem>>, vector<1x32x32xf32>
    %264 = vector.shape_cast %263 : vector<1x32x32xf32> to vector<32x32xf32>
    %cst_110 = arith.constant dense<0.000000e+00> : vector<20x32xf32>
    %265 = tpu.matmul %262, %264, %cst_110 {dimension_numbers = #tpu.dot_dimension_numbers<[1], [0], [0], [1], [0, 0, 1, 1], [], []>} : vector<20x32xf32>, vector<32x32xf32>, vector<20x32xf32> -> vector<20x32xf32>
    %c1_111 = arith.constant 1 : index
    %c0_112 = arith.constant 0 : index
    %c0_113 = arith.constant 0 : index
    %266 = vector.load %arg8[%c1_111, %c0_112, %c0_113] : memref<2x1x32xf32, #tpu.memory_space<vmem>>, vector<1x1x32xf32>
    %267 = vector.shape_cast %266 : vector<1x1x32xf32> to vector<1x32xf32>
    %268 = vector.broadcast %267 : vector<1x32xf32> to vector<20x32xf32>
    %269 = arith.addf %265, %268 : vector<20x32xf32>
    %270 = arith.addf %175, %269 : vector<20x32xf32>
    %c1_114 = arith.constant 1 : index
    %c0_115 = arith.constant 0 : index
    %c0_116 = arith.constant 0 : index
    %271 = vector.load %arg9[%c1_114, %c0_115, %c0_116] : memref<2x1x32xf32, #tpu.memory_space<vmem>>, vector<1x1x32xf32>
    %272 = vector.shape_cast %271 : vector<1x1x32xf32> to vector<1x32xf32>
    %c1_117 = arith.constant 1 : index
    %c0_118 = arith.constant 0 : index
    %c0_119 = arith.constant 0 : index
    %273 = vector.load %arg10[%c1_117, %c0_118, %c0_119] : memref<2x1x32xf32, #tpu.memory_space<vmem>>, vector<1x1x32xf32>
    %274 = vector.shape_cast %273 : vector<1x1x32xf32> to vector<1x32xf32>
    %cst_120 = arith.constant dense<0.000000e+00> : vector<20xf32>
    %275 = vector.multi_reduction <add>, %270, %cst_120 [1] : vector<20x32xf32> to vector<20xf32>
    %276 = vector.shape_cast %275 : vector<20xf32> to vector<20x1xf32>
    %cst_121 = arith.constant 3.200000e+01 : f32
    %277 = vector.broadcast %cst_121 : f32 to vector<20x1xf32>
    %278 = arith.divf %276, %277 : vector<20x1xf32>
    %279 = vector.broadcast %278 : vector<20x1xf32> to vector<20x32xf32>
    %280 = arith.subf %270, %279 : vector<20x32xf32>
    %281 = arith.mulf %280, %280 : vector<20x32xf32>
    %cst_122 = arith.constant dense<0.000000e+00> : vector<20xf32>
    %282 = vector.multi_reduction <add>, %281, %cst_122 [1] : vector<20x32xf32> to vector<20xf32>
    %283 = vector.shape_cast %282 : vector<20xf32> to vector<20x1xf32>
    %cst_123 = arith.constant 3.200000e+01 : f32
    %284 = vector.broadcast %cst_123 : f32 to vector<20x1xf32>
    %285 = arith.divf %283, %284 : vector<20x1xf32>
    %cst_124 = arith.constant 9.99999974E-6 : f32
    %286 = vector.broadcast %cst_124 : f32 to vector<20x1xf32>
    %287 = arith.addf %285, %286 : vector<20x1xf32>
    %288 = math.rsqrt %287 : vector<20x1xf32>
    %289 = vector.broadcast %288 : vector<20x1xf32> to vector<20x32xf32>
    %290 = arith.mulf %280, %289 : vector<20x32xf32>
    %291 = vector.broadcast %272 : vector<1x32xf32> to vector<20x32xf32>
    %292 = arith.mulf %290, %291 : vector<20x32xf32>
    %293 = vector.broadcast %274 : vector<1x32xf32> to vector<20x32xf32>
    %294 = arith.addf %292, %293 : vector<20x32xf32>
    %c1_125 = arith.constant 1 : index
    %c0_126 = arith.constant 0 : index
    %c0_127 = arith.constant 0 : index
    %295 = vector.load %arg11[%c1_125, %c0_126, %c0_127] : memref<2x32x128xf32, #tpu.memory_space<vmem>>, vector<1x32x128xf32>
    %296 = vector.shape_cast %295 : vector<1x32x128xf32> to vector<32x128xf32>
    %cst_128 = arith.constant dense<0.000000e+00> : vector<20x128xf32>
    %297 = tpu.matmul %294, %296, %cst_128 {dimension_numbers = #tpu.dot_dimension_numbers<[1], [0], [0], [1], [0, 0, 1, 1], [], []>} : vector<20x32xf32>, vector<32x128xf32>, vector<20x128xf32> -> vector<20x128xf32>
    %c1_129 = arith.constant 1 : index
    %c0_130 = arith.constant 0 : index
    %c0_131 = arith.constant 0 : index
    %298 = vector.load %arg12[%c1_129, %c0_130, %c0_131] : memref<2x1x128xf32, #tpu.memory_space<vmem>>, vector<1x1x128xf32>
    %299 = vector.shape_cast %298 : vector<1x1x128xf32> to vector<1x128xf32>
    %300 = vector.broadcast %299 : vector<1x128xf32> to vector<20x128xf32>
    %301 = arith.addf %297, %300 : vector<20x128xf32>
    %cst_132 = arith.constant 5.000000e-01 : f32
    %302 = vector.broadcast %cst_132 : f32 to vector<20x128xf32>
    %303 = arith.mulf %302, %301 : vector<20x128xf32>
    %cst_133 = arith.constant 0.707106769 : f32
    %304 = vector.broadcast %cst_133 : f32 to vector<20x128xf32>
    %305 = arith.mulf %301, %304 : vector<20x128xf32>
    %306 = math.absf %305 : vector<20x128xf32>
    %cst_134 = arith.constant 0.327591091 : f32
    %307 = vector.broadcast %cst_134 : f32 to vector<20x128xf32>
    %308 = arith.mulf %307, %306 : vector<20x128xf32>
    %cst_135 = arith.constant 1.000000e+00 : f32
    %309 = vector.broadcast %cst_135 : f32 to vector<20x128xf32>
    %310 = arith.addf %309, %308 : vector<20x128xf32>
    %cst_136 = arith.constant 1.000000e+00 : f32
    %311 = vector.broadcast %cst_136 : f32 to vector<20x128xf32>
    %312 = arith.divf %311, %310 : vector<20x128xf32>
    %cst_137 = arith.constant 1.06140542 : f32
    %313 = vector.broadcast %cst_137 : f32 to vector<20x128xf32>
    %314 = arith.mulf %313, %312 : vector<20x128xf32>
    %cst_138 = arith.constant -1.45315206 : f32
    %315 = vector.broadcast %cst_138 : f32 to vector<20x128xf32>
    %316 = arith.addf %314, %315 : vector<20x128xf32>
    %317 = arith.mulf %316, %312 : vector<20x128xf32>
    %cst_139 = arith.constant 1.42141378 : f32
    %318 = vector.broadcast %cst_139 : f32 to vector<20x128xf32>
    %319 = arith.addf %317, %318 : vector<20x128xf32>
    %320 = arith.mulf %319, %312 : vector<20x128xf32>
    %cst_140 = arith.constant -0.284496725 : f32
    %321 = vector.broadcast %cst_140 : f32 to vector<20x128xf32>
    %322 = arith.addf %320, %321 : vector<20x128xf32>
    %323 = arith.mulf %322, %312 : vector<20x128xf32>
    %cst_141 = arith.constant 0.254829586 : f32
    %324 = vector.broadcast %cst_141 : f32 to vector<20x128xf32>
    %325 = arith.addf %323, %324 : vector<20x128xf32>
    %326 = arith.mulf %325, %312 : vector<20x128xf32>
    %cst_142 = arith.constant 0.000000e+00 : f32
    %327 = vector.broadcast %cst_142 : f32 to vector<20x128xf32>
    %328 = arith.subf %327, %306 : vector<20x128xf32>
    %329 = arith.mulf %328, %306 : vector<20x128xf32>
    %330 = math.exp %329 : vector<20x128xf32>
    %331 = arith.mulf %326, %330 : vector<20x128xf32>
    %cst_143 = arith.constant 1.000000e+00 : f32
    %332 = vector.broadcast %cst_143 : f32 to vector<20x128xf32>
    %333 = arith.subf %332, %331 : vector<20x128xf32>
    %cst_144 = arith.constant 0.000000e+00 : f32
    %334 = vector.broadcast %cst_144 : f32 to vector<20x128xf32>
    %335 = arith.cmpf olt, %305, %334 : vector<20x128xf32>
    %cst_145 = arith.constant 0.000000e+00 : f32
    %336 = vector.broadcast %cst_145 : f32 to vector<20x128xf32>
    %337 = arith.subf %336, %333 : vector<20x128xf32>
    %338 = arith.select %335, %337, %333 : vector<20x128xi1>, vector<20x128xf32>
    %cst_146 = arith.constant 1.000000e+00 : f32
    %339 = vector.broadcast %cst_146 : f32 to vector<20x128xf32>
    %340 = arith.addf %339, %338 : vector<20x128xf32>
    %341 = arith.mulf %303, %340 : vector<20x128xf32>
    %c1_147 = arith.constant 1 : index
    %c0_148 = arith.constant 0 : index
    %c0_149 = arith.constant 0 : index
    %342 = vector.load %arg13[%c1_147, %c0_148, %c0_149] : memref<2x128x32xf32, #tpu.memory_space<vmem>>, vector<1x128x32xf32>
    %343 = vector.shape_cast %342 : vector<1x128x32xf32> to vector<128x32xf32>
    %cst_150 = arith.constant dense<0.000000e+00> : vector<20x32xf32>
    %344 = tpu.matmul %341, %343, %cst_150 {dimension_numbers = #tpu.dot_dimension_numbers<[1], [0], [0], [1], [0, 0, 1, 1], [], []>} : vector<20x128xf32>, vector<128x32xf32>, vector<20x32xf32> -> vector<20x32xf32>
    %c1_151 = arith.constant 1 : index
    %c0_152 = arith.constant 0 : index
    %c0_153 = arith.constant 0 : index
    %345 = vector.load %arg14[%c1_151, %c0_152, %c0_153] : memref<2x1x32xf32, #tpu.memory_space<vmem>>, vector<1x1x32xf32>
    %346 = vector.shape_cast %345 : vector<1x1x32xf32> to vector<1x32xf32>
    %347 = vector.broadcast %346 : vector<1x32xf32> to vector<20x32xf32>
    %348 = arith.addf %344, %347 : vector<20x32xf32>
    %349 = arith.addf %270, %348 : vector<20x32xf32>
    %c0_154 = arith.constant 0 : index
    %c0_155 = arith.constant 0 : index
    %350 = vector.load %arg15[%c0_154, %c0_155] : memref<1x32xf32, #tpu.memory_space<vmem>>, vector<1x32xf32>
    %c0_156 = arith.constant 0 : index
    %c0_157 = arith.constant 0 : index
    %351 = vector.load %arg16[%c0_156, %c0_157] : memref<1x32xf32, #tpu.memory_space<vmem>>, vector<1x32xf32>
    %cst_158 = arith.constant dense<0.000000e+00> : vector<20xf32>
    %352 = vector.multi_reduction <add>, %349, %cst_158 [1] : vector<20x32xf32> to vector<20xf32>
    %353 = vector.shape_cast %352 : vector<20xf32> to vector<20x1xf32>
    %cst_159 = arith.constant 3.200000e+01 : f32
    %354 = vector.broadcast %cst_159 : f32 to vector<20x1xf32>
    %355 = arith.divf %353, %354 : vector<20x1xf32>
    %356 = vector.broadcast %355 : vector<20x1xf32> to vector<20x32xf32>
    %357 = arith.subf %349, %356 : vector<20x32xf32>
    %358 = arith.mulf %357, %357 : vector<20x32xf32>
    %cst_160 = arith.constant dense<0.000000e+00> : vector<20xf32>
    %359 = vector.multi_reduction <add>, %358, %cst_160 [1] : vector<20x32xf32> to vector<20xf32>
    %360 = vector.shape_cast %359 : vector<20xf32> to vector<20x1xf32>
    %cst_161 = arith.constant 3.200000e+01 : f32
    %361 = vector.broadcast %cst_161 : f32 to vector<20x1xf32>
    %362 = arith.divf %360, %361 : vector<20x1xf32>
    %cst_162 = arith.constant 9.99999974E-6 : f32
    %363 = vector.broadcast %cst_162 : f32 to vector<20x1xf32>
    %364 = arith.addf %362, %363 : vector<20x1xf32>
    %365 = math.rsqrt %364 : vector<20x1xf32>
    %366 = vector.broadcast %365 : vector<20x1xf32> to vector<20x32xf32>
    %367 = arith.mulf %357, %366 : vector<20x32xf32>
    %368 = vector.broadcast %350 : vector<1x32xf32> to vector<20x32xf32>
    %369 = arith.mulf %367, %368 : vector<20x32xf32>
    %370 = vector.broadcast %351 : vector<1x32xf32> to vector<20x32xf32>
    %371 = arith.addf %369, %370 : vector<20x32xf32>
    %372 = vector.extract_strided_slice %371 {offsets = [0, 0], sizes = [12, 32], strides = [1, 1]} : vector<20x32xf32> to vector<12x32xf32>
    %c0_163 = arith.constant 0 : index
    %c0_164 = arith.constant 0 : index
    %373 = vector.load %arg17[%c0_163, %c0_164] : memref<32x26xf32, #tpu.memory_space<vmem>>, vector<32x26xf32>
    %cst_165 = arith.constant dense<0.000000e+00> : vector<12x26xf32>
    %374 = tpu.matmul %372, %373, %cst_165 {dimension_numbers = #tpu.dot_dimension_numbers<[1], [0], [0], [1], [0, 0, 1, 1], [], []>} : vector<12x32xf32>, vector<32x26xf32>, vector<12x26xf32> -> vector<12x26xf32>
    %c0_166 = arith.constant 0 : index
    %c0_167 = arith.constant 0 : index
    %c0_168 = arith.constant 0 : index
    %375 = vector.load %arg20[%c0_166, %c0_167, %c0_168] : memref<2x12x26xf32, #tpu.memory_space<vmem>>, vector<1x12x26xf32>
    %376 = vector.shape_cast %375 : vector<1x12x26xf32> to vector<12x26xf32>
    %377 = vector.shape_cast %374 : vector<12x26xf32> to vector<1x12x26xf32>
    tpu.vector_store %arg20[%c0_166, %c0_167, %c0_168], %377 {strides = array<i32>} : memref<2x12x26xf32, #tpu.memory_space<vmem>>, vector<1x12x26xf32>,
    %378 = vector.extract_strided_slice %371 {offsets = [12, 0], sizes = [8, 32], strides = [1, 1]} : vector<20x32xf32> to vector<8x32xf32>
    %c0_169 = arith.constant 0 : index
    %c0_170 = arith.constant 0 : index
    %379 = vector.load %arg18[%c0_169, %c0_170] : memref<32x4xf32, #tpu.memory_space<vmem>>, vector<32x4xf32>
    %cst_171 = arith.constant dense<0.000000e+00> : vector<8x4xf32>
    %380 = tpu.matmul %378, %379, %cst_171 {dimension_numbers = #tpu.dot_dimension_numbers<[1], [0], [0], [1], [0, 0, 1, 1], [], []>} : vector<8x32xf32>, vector<32x4xf32>, vector<8x4xf32> -> vector<8x4xf32>
    %c0_172 = arith.constant 0 : index
    %c0_173 = arith.constant 0 : index
    %381 = vector.load %arg19[%c0_172, %c0_173] : memref<1x4xf32, #tpu.memory_space<vmem>>, vector<1x4xf32>
    %382 = vector.broadcast %381 : vector<1x4xf32> to vector<8x4xf32>
    %383 = arith.addf %380, %382 : vector<8x4xf32>
    %c0_174 = arith.constant 0 : index
    %c0_175 = arith.constant 0 : index
    %c0_176 = arith.constant 0 : index
    %384 = vector.load %arg21[%c0_174, %c0_175, %c0_176] : memref<2x8x4xf32, #tpu.memory_space<vmem>>, vector<1x8x4xf32>
    %385 = vector.shape_cast %384 : vector<1x8x4xf32> to vector<8x4xf32>
    %386 = vector.shape_cast %383 : vector<8x4xf32> to vector<1x8x4xf32>
    tpu.vector_store %arg21[%c0_174, %c0_175, %c0_176], %386 {strides = array<i32>} : memref<2x8x4xf32, #tpu.memory_space<vmem>>, vector<1x8x4xf32>,
    %c1_177 = arith.constant 1 : index
    %c0_178 = arith.constant 0 : index
    %c0_179 = arith.constant 0 : index
    %387 = vector.load %arg1[%c1_177, %c0_178, %c0_179] : memref<2x20x32xf32, #tpu.memory_space<vmem>>, vector<1x20x32xf32>
    %388 = vector.shape_cast %387 : vector<1x20x32xf32> to vector<20x32xf32>
    %c0_180 = arith.constant 0 : index
    %c0_181 = arith.constant 0 : index
    %c0_182 = arith.constant 0 : index
    %389 = vector.load %arg3[%c0_180, %c0_181, %c0_182] : memref<2x1x32xf32, #tpu.memory_space<vmem>>, vector<1x1x32xf32>
    %390 = vector.shape_cast %389 : vector<1x1x32xf32> to vector<1x32xf32>
    %c0_183 = arith.constant 0 : index
    %c0_184 = arith.constant 0 : index
    %c0_185 = arith.constant 0 : index
    %391 = vector.load %arg4[%c0_183, %c0_184, %c0_185] : memref<2x1x32xf32, #tpu.memory_space<vmem>>, vector<1x1x32xf32>
    %392 = vector.shape_cast %391 : vector<1x1x32xf32> to vector<1x32xf32>
    %cst_186 = arith.constant dense<0.000000e+00> : vector<20xf32>
    %393 = vector.multi_reduction <add>, %388, %cst_186 [1] : vector<20x32xf32> to vector<20xf32>
    %394 = vector.shape_cast %393 : vector<20xf32> to vector<20x1xf32>
    %cst_187 = arith.constant 3.200000e+01 : f32
    %395 = vector.broadcast %cst_187 : f32 to vector<20x1xf32>
    %396 = arith.divf %394, %395 : vector<20x1xf32>
    %397 = vector.broadcast %396 : vector<20x1xf32> to vector<20x32xf32>
    %398 = arith.subf %388, %397 : vector<20x32xf32>
    %399 = arith.mulf %398, %398 : vector<20x32xf32>
    %cst_188 = arith.constant dense<0.000000e+00> : vector<20xf32>
    %400 = vector.multi_reduction <add>, %399, %cst_188 [1] : vector<20x32xf32> to vector<20xf32>
    %401 = vector.shape_cast %400 : vector<20xf32> to vector<20x1xf32>
    %cst_189 = arith.constant 3.200000e+01 : f32
    %402 = vector.broadcast %cst_189 : f32 to vector<20x1xf32>
    %403 = arith.divf %401, %402 : vector<20x1xf32>
    %cst_190 = arith.constant 9.99999974E-6 : f32
    %404 = vector.broadcast %cst_190 : f32 to vector<20x1xf32>
    %405 = arith.addf %403, %404 : vector<20x1xf32>
    %406 = math.rsqrt %405 : vector<20x1xf32>
    %407 = vector.broadcast %406 : vector<20x1xf32> to vector<20x32xf32>
    %408 = arith.mulf %398, %407 : vector<20x32xf32>
    %409 = vector.broadcast %390 : vector<1x32xf32> to vector<20x32xf32>
    %410 = arith.mulf %408, %409 : vector<20x32xf32>
    %411 = vector.broadcast %392 : vector<1x32xf32> to vector<20x32xf32>
    %412 = arith.addf %410, %411 : vector<20x32xf32>
    %c0_191 = arith.constant 0 : index
    %c0_192 = arith.constant 0 : index
    %c0_193 = arith.constant 0 : index
    %413 = vector.load %arg5[%c0_191, %c0_192, %c0_193] : memref<2x32x96xf32, #tpu.memory_space<vmem>>, vector<1x32x96xf32>
    %414 = vector.shape_cast %413 : vector<1x32x96xf32> to vector<32x96xf32>
    %cst_194 = arith.constant dense<0.000000e+00> : vector<20x96xf32>
    %415 = tpu.matmul %412, %414, %cst_194 {dimension_numbers = #tpu.dot_dimension_numbers<[1], [0], [0], [1], [0, 0, 1, 1], [], []>} : vector<20x32xf32>, vector<32x96xf32>, vector<20x96xf32> -> vector<20x96xf32>
    %c0_195 = arith.constant 0 : index
    %c0_196 = arith.constant 0 : index
    %c0_197 = arith.constant 0 : index
    %416 = vector.load %arg6[%c0_195, %c0_196, %c0_197] : memref<2x1x96xf32, #tpu.memory_space<vmem>>, vector<1x1x96xf32>
    %417 = vector.shape_cast %416 : vector<1x1x96xf32> to vector<1x96xf32>
    %418 = vector.broadcast %417 : vector<1x96xf32> to vector<20x96xf32>
    %419 = arith.addf %415, %418 : vector<20x96xf32>
    %420 = vector.extract_strided_slice %419 {offsets = [0, 0], sizes = [20, 8], strides = [1, 1]} : vector<20x96xf32> to vector<20x8xf32>
    %421 = vector.extract_strided_slice %419 {offsets = [0, 8], sizes = [20, 8], strides = [1, 1]} : vector<20x96xf32> to vector<20x8xf32>
    %422 = vector.extract_strided_slice %419 {offsets = [0, 16], sizes = [20, 8], strides = [1, 1]} : vector<20x96xf32> to vector<20x8xf32>
    %423 = vector.extract_strided_slice %419 {offsets = [0, 24], sizes = [20, 8], strides = [1, 1]} : vector<20x96xf32> to vector<20x8xf32>
    %424 = vector.shape_cast %420 : vector<20x8xf32> to vector<1x20x8xf32>
    %425 = vector.shape_cast %421 : vector<20x8xf32> to vector<1x20x8xf32>
    %426 = vector.shape_cast %422 : vector<20x8xf32> to vector<1x20x8xf32>
    %427 = vector.shape_cast %423 : vector<20x8xf32> to vector<1x20x8xf32>
    %428 = tpu.concatenate %424, %425, %426, %427 in 0 : vector<1x20x8xf32>, vector<1x20x8xf32>, vector<1x20x8xf32>, vector<1x20x8xf32> -> vector<4x20x8xf32>
    %429 = vector.extract_strided_slice %419 {offsets = [0, 32], sizes = [20, 8], strides = [1, 1]} : vector<20x96xf32> to vector<20x8xf32>
    %430 = vector.extract_strided_slice %419 {offsets = [0, 40], sizes = [20, 8], strides = [1, 1]} : vector<20x96xf32> to vector<20x8xf32>
    %431 = vector.extract_strided_slice %419 {offsets = [0, 48], sizes = [20, 8], strides = [1, 1]} : vector<20x96xf32> to vector<20x8xf32>
    %432 = vector.extract_strided_slice %419 {offsets = [0, 56], sizes = [20, 8], strides = [1, 1]} : vector<20x96xf32> to vector<20x8xf32>
    %433 = vector.shape_cast %429 : vector<20x8xf32> to vector<1x20x8xf32>
    %434 = vector.shape_cast %430 : vector<20x8xf32> to vector<1x20x8xf32>
    %435 = vector.shape_cast %431 : vector<20x8xf32> to vector<1x20x8xf32>
    %436 = vector.shape_cast %432 : vector<20x8xf32> to vector<1x20x8xf32>
    %437 = tpu.concatenate %433, %434, %435, %436 in 0 : vector<1x20x8xf32>, vector<1x20x8xf32>, vector<1x20x8xf32>, vector<1x20x8xf32> -> vector<4x20x8xf32>
    %438 = vector.extract_strided_slice %419 {offsets = [0, 64], sizes = [20, 8], strides = [1, 1]} : vector<20x96xf32> to vector<20x8xf32>
    %439 = vector.extract_strided_slice %419 {offsets = [0, 72], sizes = [20, 8], strides = [1, 1]} : vector<20x96xf32> to vector<20x8xf32>
    %440 = vector.extract_strided_slice %419 {offsets = [0, 80], sizes = [20, 8], strides = [1, 1]} : vector<20x96xf32> to vector<20x8xf32>
    %441 = vector.extract_strided_slice %419 {offsets = [0, 88], sizes = [20, 8], strides = [1, 1]} : vector<20x96xf32> to vector<20x8xf32>
    %442 = vector.shape_cast %438 : vector<20x8xf32> to vector<1x20x8xf32>
    %443 = vector.shape_cast %439 : vector<20x8xf32> to vector<1x20x8xf32>
    %444 = vector.shape_cast %440 : vector<20x8xf32> to vector<1x20x8xf32>
    %445 = vector.shape_cast %441 : vector<20x8xf32> to vector<1x20x8xf32>
    %446 = tpu.concatenate %442, %443, %444, %445 in 0 : vector<1x20x8xf32>, vector<1x20x8xf32>, vector<1x20x8xf32>, vector<1x20x8xf32> -> vector<4x20x8xf32>
    %cst_198 = arith.constant dense<0.000000e+00> : vector<4x20x20xf32>
    %447 = tpu.matmul %428, %437, %cst_198 {dimension_numbers = #tpu.dot_dimension_numbers<[2], [2], [1], [1], [0, 0, 0, 1, 1, 1], [0], [0]>} : vector<4x20x8xf32>, vector<4x20x8xf32>, vector<4x20x20xf32> -> vector<4x20x20xf32>
    %c0_199 = arith.constant 0 : index
    %c0_200 = arith.constant 0 : index
    %c0_201 = arith.constant 0 : index
    %448 = vector.load %arg2[%c0_199, %c0_200, %c0_201] : memref<2x20x20xf32, #tpu.memory_space<vmem>>, vector<1x20x20xf32>
    %449 = vector.shape_cast %448 : vector<1x20x20xf32> to vector<20x20xf32>
    %450 = vector.shape_cast %449 : vector<20x20xf32> to vector<1x20x20xf32>
    %451 = vector.broadcast %450 : vector<1x20x20xf32> to vector<4x20x20xf32>
    %452 = arith.addf %447, %451 : vector<4x20x20xf32>
    %cst_202 = arith.constant dense<0xFF800000> : vector<4x20xf32>
    %453 = vector.multi_reduction <maximumf>, %452, %cst_202 [2] : vector<4x20x20xf32> to vector<4x20xf32>
    %454 = vector.shape_cast %453 : vector<4x20xf32> to vector<4x20x1xf32>
    %455 = vector.broadcast %454 : vector<4x20x1xf32> to vector<4x20x20xf32>
    %456 = arith.subf %452, %455 : vector<4x20x20xf32>
    %457 = math.exp %456 : vector<4x20x20xf32>
    %cst_203 = arith.constant dense<0.000000e+00> : vector<4x20xf32>
    %458 = vector.multi_reduction <add>, %457, %cst_203 [2] : vector<4x20x20xf32> to vector<4x20xf32>
    %459 = vector.shape_cast %458 : vector<4x20xf32> to vector<4x20x1xf32>
    %460 = tpu.reciprocal %459 {approx = true} : vector<4x20x1xf32> -> vector<4x20x1xf32>
    %461 = vector.broadcast %460 : vector<4x20x1xf32> to vector<4x20x20xf32>
    %462 = arith.mulf %457, %461 : vector<4x20x20xf32>
    %c1_204 = arith.constant 1 : index
    %c0_205 = arith.constant 0 : index
    %c0_206 = arith.constant 0 : index
    %c0_207 = arith.constant 0 : index
    %c0_208 = arith.constant 0 : index
    %463 = vector.load %arg22[%c1_204, %c0_205, %c0_206, %c0_207, %c0_208] : memref<2x2x4x20x20xf32, #tpu.memory_space<vmem>>, vector<1x1x4x20x20xf32>
    %464 = vector.shape_cast %463 : vector<1x1x4x20x20xf32> to vector<4x20x20xf32>
    %465 = vector.shape_cast %462 : vector<4x20x20xf32> to vector<1x1x4x20x20xf32>
    tpu.vector_store %arg22[%c1_204, %c0_205, %c0_206, %c0_207, %c0_208], %465 {strides = array<i32>} : memref<2x2x4x20x20xf32, #tpu.memory_space<vmem>>, vector<1x1x4x20x20xf32>,
    %cst_209 = arith.constant dense<0.000000e+00> : vector<4x20x8xf32>
    %466 = tpu.matmul %462, %446, %cst_209 {dimension_numbers = #tpu.dot_dimension_numbers<[2], [1], [1], [2], [0, 0, 0, 1, 1, 2], [0], [0]>} : vector<4x20x20xf32>, vector<4x20x8xf32>, vector<4x20x8xf32> -> vector<4x20x8xf32>
    %467 = vector.extract_strided_slice %466 {offsets = [0, 0, 0], sizes = [1, 20, 8], strides = [1, 1, 1]} : vector<4x20x8xf32> to vector<1x20x8xf32>
    %468 = vector.shape_cast %467 : vector<1x20x8xf32> to vector<20x8xf32>
    %469 = vector.extract_strided_slice %466 {offsets = [1, 0, 0], sizes = [1, 20, 8], strides = [1, 1, 1]} : vector<4x20x8xf32> to vector<1x20x8xf32>
    %470 = vector.shape_cast %469 : vector<1x20x8xf32> to vector<20x8xf32>
    %471 = vector.extract_strided_slice %466 {offsets = [2, 0, 0], sizes = [1, 20, 8], strides = [1, 1, 1]} : vector<4x20x8xf32> to vector<1x20x8xf32>
    %472 = vector.shape_cast %471 : vector<1x20x8xf32> to vector<20x8xf32>
    %473 = vector.extract_strided_slice %466 {offsets = [3, 0, 0], sizes = [1, 20, 8], strides = [1, 1, 1]} : vector<4x20x8xf32> to vector<1x20x8xf32>
    %474 = vector.shape_cast %473 : vector<1x20x8xf32> to vector<20x8xf32>
    %475 = tpu.concatenate %468, %470, %472, %474 in 1 : vector<20x8xf32>, vector<20x8xf32>, vector<20x8xf32>, vector<20x8xf32> -> vector<20x32xf32>
    %c0_210 = arith.constant 0 : index
    %c0_211 = arith.constant 0 : index
    %c0_212 = arith.constant 0 : index
    %476 = vector.load %arg7[%c0_210, %c0_211, %c0_212] : memref<2x32x32xf32, #tpu.memory_space<vmem>>, vector<1x32x32xf32>
    %477 = vector.shape_cast %476 : vector<1x32x32xf32> to vector<32x32xf32>
    %cst_213 = arith.constant dense<0.000000e+00> : vector<20x32xf32>
    %478 = tpu.matmul %475, %477, %cst_213 {dimension_numbers = #tpu.dot_dimension_numbers<[1], [0], [0], [1], [0, 0, 1, 1], [], []>} : vector<20x32xf32>, vector<32x32xf32>, vector<20x32xf32> -> vector<20x32xf32>
    %c0_214 = arith.constant 0 : index
    %c0_215 = arith.constant 0 : index
    %c0_216 = arith.constant 0 : index
    %479 = vector.load %arg8[%c0_214, %c0_215, %c0_216] : memref<2x1x32xf32, #tpu.memory_space<vmem>>, vector<1x1x32xf32>
    %480 = vector.shape_cast %479 : vector<1x1x32xf32> to vector<1x32xf32>
    %481 = vector.broadcast %480 : vector<1x32xf32> to vector<20x32xf32>
    %482 = arith.addf %478, %481 : vector<20x32xf32>
    %483 = arith.addf %388, %482 : vector<20x32xf32>
    %c0_217 = arith.constant 0 : index
    %c0_218 = arith.constant 0 : index
    %c0_219 = arith.constant 0 : index
    %484 = vector.load %arg9[%c0_217, %c0_218, %c0_219] : memref<2x1x32xf32, #tpu.memory_space<vmem>>, vector<1x1x32xf32>
    %485 = vector.shape_cast %484 : vector<1x1x32xf32> to vector<1x32xf32>
    %c0_220 = arith.constant 0 : index
    %c0_221 = arith.constant 0 : index
    %c0_222 = arith.constant 0 : index
    %486 = vector.load %arg10[%c0_220, %c0_221, %c0_222] : memref<2x1x32xf32, #tpu.memory_space<vmem>>, vector<1x1x32xf32>
    %487 = vector.shape_cast %486 : vector<1x1x32xf32> to vector<1x32xf32>
    %cst_223 = arith.constant dense<0.000000e+00> : vector<20xf32>
    %488 = vector.multi_reduction <add>, %483, %cst_223 [1] : vector<20x32xf32> to vector<20xf32>
    %489 = vector.shape_cast %488 : vector<20xf32> to vector<20x1xf32>
    %cst_224 = arith.constant 3.200000e+01 : f32
    %490 = vector.broadcast %cst_224 : f32 to vector<20x1xf32>
    %491 = arith.divf %489, %490 : vector<20x1xf32>
    %492 = vector.broadcast %491 : vector<20x1xf32> to vector<20x32xf32>
    %493 = arith.subf %483, %492 : vector<20x32xf32>
    %494 = arith.mulf %493, %493 : vector<20x32xf32>
    %cst_225 = arith.constant dense<0.000000e+00> : vector<20xf32>
    %495 = vector.multi_reduction <add>, %494, %cst_225 [1] : vector<20x32xf32> to vector<20xf32>
    %496 = vector.shape_cast %495 : vector<20xf32> to vector<20x1xf32>
    %cst_226 = arith.constant 3.200000e+01 : f32
    %497 = vector.broadcast %cst_226 : f32 to vector<20x1xf32>
    %498 = arith.divf %496, %497 : vector<20x1xf32>
    %cst_227 = arith.constant 9.99999974E-6 : f32
    %499 = vector.broadcast %cst_227 : f32 to vector<20x1xf32>
    %500 = arith.addf %498, %499 : vector<20x1xf32>
    %501 = math.rsqrt %500 : vector<20x1xf32>
    %502 = vector.broadcast %501 : vector<20x1xf32> to vector<20x32xf32>
    %503 = arith.mulf %493, %502 : vector<20x32xf32>
    %504 = vector.broadcast %485 : vector<1x32xf32> to vector<20x32xf32>
    %505 = arith.mulf %503, %504 : vector<20x32xf32>
    %506 = vector.broadcast %487 : vector<1x32xf32> to vector<20x32xf32>
    %507 = arith.addf %505, %506 : vector<20x32xf32>
    %c0_228 = arith.constant 0 : index
    %c0_229 = arith.constant 0 : index
    %c0_230 = arith.constant 0 : index
    %508 = vector.load %arg11[%c0_228, %c0_229, %c0_230] : memref<2x32x128xf32, #tpu.memory_space<vmem>>, vector<1x32x128xf32>
    %509 = vector.shape_cast %508 : vector<1x32x128xf32> to vector<32x128xf32>
    %cst_231 = arith.constant dense<0.000000e+00> : vector<20x128xf32>
    %510 = tpu.matmul %507, %509, %cst_231 {dimension_numbers = #tpu.dot_dimension_numbers<[1], [0], [0], [1], [0, 0, 1, 1], [], []>} : vector<20x32xf32>, vector<32x128xf32>, vector<20x128xf32> -> vector<20x128xf32>
    %c0_232 = arith.constant 0 : index
    %c0_233 = arith.constant 0 : index
    %c0_234 = arith.constant 0 : index
    %511 = vector.load %arg12[%c0_232, %c0_233, %c0_234] : memref<2x1x128xf32, #tpu.memory_space<vmem>>, vector<1x1x128xf32>
    %512 = vector.shape_cast %511 : vector<1x1x128xf32> to vector<1x128xf32>
    %513 = vector.broadcast %512 : vector<1x128xf32> to vector<20x128xf32>
    %514 = arith.addf %510, %513 : vector<20x128xf32>
    %cst_235 = arith.constant 5.000000e-01 : f32
    %515 = vector.broadcast %cst_235 : f32 to vector<20x128xf32>
    %516 = arith.mulf %515, %514 : vector<20x128xf32>
    %cst_236 = arith.constant 0.707106769 : f32
    %517 = vector.broadcast %cst_236 : f32 to vector<20x128xf32>
    %518 = arith.mulf %514, %517 : vector<20x128xf32>
    %519 = math.absf %518 : vector<20x128xf32>
    %cst_237 = arith.constant 0.327591091 : f32
    %520 = vector.broadcast %cst_237 : f32 to vector<20x128xf32>
    %521 = arith.mulf %520, %519 : vector<20x128xf32>
    %cst_238 = arith.constant 1.000000e+00 : f32
    %522 = vector.broadcast %cst_238 : f32 to vector<20x128xf32>
    %523 = arith.addf %522, %521 : vector<20x128xf32>
    %cst_239 = arith.constant 1.000000e+00 : f32
    %524 = vector.broadcast %cst_239 : f32 to vector<20x128xf32>
    %525 = arith.divf %524, %523 : vector<20x128xf32>
    %cst_240 = arith.constant 1.06140542 : f32
    %526 = vector.broadcast %cst_240 : f32 to vector<20x128xf32>
    %527 = arith.mulf %526, %525 : vector<20x128xf32>
    %cst_241 = arith.constant -1.45315206 : f32
    %528 = vector.broadcast %cst_241 : f32 to vector<20x128xf32>
    %529 = arith.addf %527, %528 : vector<20x128xf32>
    %530 = arith.mulf %529, %525 : vector<20x128xf32>
    %cst_242 = arith.constant 1.42141378 : f32
    %531 = vector.broadcast %cst_242 : f32 to vector<20x128xf32>
    %532 = arith.addf %530, %531 : vector<20x128xf32>
    %533 = arith.mulf %532, %525 : vector<20x128xf32>
    %cst_243 = arith.constant -0.284496725 : f32
    %534 = vector.broadcast %cst_243 : f32 to vector<20x128xf32>
    %535 = arith.addf %533, %534 : vector<20x128xf32>
    %536 = arith.mulf %535, %525 : vector<20x128xf32>
    %cst_244 = arith.constant 0.254829586 : f32
    %537 = vector.broadcast %cst_244 : f32 to vector<20x128xf32>
    %538 = arith.addf %536, %537 : vector<20x128xf32>
    %539 = arith.mulf %538, %525 : vector<20x128xf32>
    %cst_245 = arith.constant 0.000000e+00 : f32
    %540 = vector.broadcast %cst_245 : f32 to vector<20x128xf32>
    %541 = arith.subf %540, %519 : vector<20x128xf32>
    %542 = arith.mulf %541, %519 : vector<20x128xf32>
    %543 = math.exp %542 : vector<20x128xf32>
    %544 = arith.mulf %539, %543 : vector<20x128xf32>
    %cst_246 = arith.constant 1.000000e+00 : f32
    %545 = vector.broadcast %cst_246 : f32 to vector<20x128xf32>
    %546 = arith.subf %545, %544 : vector<20x128xf32>
    %cst_247 = arith.constant 0.000000e+00 : f32
    %547 = vector.broadcast %cst_247 : f32 to vector<20x128xf32>
    %548 = arith.cmpf olt, %518, %547 : vector<20x128xf32>
    %cst_248 = arith.constant 0.000000e+00 : f32
    %549 = vector.broadcast %cst_248 : f32 to vector<20x128xf32>
    %550 = arith.subf %549, %546 : vector<20x128xf32>
    %551 = arith.select %548, %550, %546 : vector<20x128xi1>, vector<20x128xf32>
    %cst_249 = arith.constant 1.000000e+00 : f32
    %552 = vector.broadcast %cst_249 : f32 to vector<20x128xf32>
    %553 = arith.addf %552, %551 : vector<20x128xf32>
    %554 = arith.mulf %516, %553 : vector<20x128xf32>
    %c0_250 = arith.constant 0 : index
    %c0_251 = arith.constant 0 : index
    %c0_252 = arith.constant 0 : index
    %555 = vector.load %arg13[%c0_250, %c0_251, %c0_252] : memref<2x128x32xf32, #tpu.memory_space<vmem>>, vector<1x128x32xf32>
    %556 = vector.shape_cast %555 : vector<1x128x32xf32> to vector<128x32xf32>
    %cst_253 = arith.constant dense<0.000000e+00> : vector<20x32xf32>
    %557 = tpu.matmul %554, %556, %cst_253 {dimension_numbers = #tpu.dot_dimension_numbers<[1], [0], [0], [1], [0, 0, 1, 1], [], []>} : vector<20x128xf32>, vector<128x32xf32>, vector<20x32xf32> -> vector<20x32xf32>
    %c0_254 = arith.constant 0 : index
    %c0_255 = arith.constant 0 : index
    %c0_256 = arith.constant 0 : index
    %558 = vector.load %arg14[%c0_254, %c0_255, %c0_256] : memref<2x1x32xf32, #tpu.memory_space<vmem>>, vector<1x1x32xf32>
    %559 = vector.shape_cast %558 : vector<1x1x32xf32> to vector<1x32xf32>
    %560 = vector.broadcast %559 : vector<1x32xf32> to vector<20x32xf32>
    %561 = arith.addf %557, %560 : vector<20x32xf32>
    %562 = arith.addf %483, %561 : vector<20x32xf32>
    %c1_257 = arith.constant 1 : index
    %c0_258 = arith.constant 0 : index
    %c0_259 = arith.constant 0 : index
    %563 = vector.load %arg3[%c1_257, %c0_258, %c0_259] : memref<2x1x32xf32, #tpu.memory_space<vmem>>, vector<1x1x32xf32>
    %564 = vector.shape_cast %563 : vector<1x1x32xf32> to vector<1x32xf32>
    %c1_260 = arith.constant 1 : index
    %c0_261 = arith.constant 0 : index
    %c0_262 = arith.constant 0 : index
    %565 = vector.load %arg4[%c1_260, %c0_261, %c0_262] : memref<2x1x32xf32, #tpu.memory_space<vmem>>, vector<1x1x32xf32>
    %566 = vector.shape_cast %565 : vector<1x1x32xf32> to vector<1x32xf32>
    %cst_263 = arith.constant dense<0.000000e+00> : vector<20xf32>
    %567 = vector.multi_reduction <add>, %562, %cst_263 [1] : vector<20x32xf32> to vector<20xf32>
    %568 = vector.shape_cast %567 : vector<20xf32> to vector<20x1xf32>
    %cst_264 = arith.constant 3.200000e+01 : f32
    %569 = vector.broadcast %cst_264 : f32 to vector<20x1xf32>
    %570 = arith.divf %568, %569 : vector<20x1xf32>
    %571 = vector.broadcast %570 : vector<20x1xf32> to vector<20x32xf32>
    %572 = arith.subf %562, %571 : vector<20x32xf32>
    %573 = arith.mulf %572, %572 : vector<20x32xf32>
    %cst_265 = arith.constant dense<0.000000e+00> : vector<20xf32>
    %574 = vector.multi_reduction <add>, %573, %cst_265 [1] : vector<20x32xf32> to vector<20xf32>
    %575 = vector.shape_cast %574 : vector<20xf32> to vector<20x1xf32>
    %cst_266 = arith.constant 3.200000e+01 : f32
    %576 = vector.broadcast %cst_266 : f32 to vector<20x1xf32>
    %577 = arith.divf %575, %576 : vector<20x1xf32>
    %cst_267 = arith.constant 9.99999974E-6 : f32
    %578 = vector.broadcast %cst_267 : f32 to vector<20x1xf32>
    %579 = arith.addf %577, %578 : vector<20x1xf32>
    %580 = math.rsqrt %579 : vector<20x1xf32>
    %581 = vector.broadcast %580 : vector<20x1xf32> to vector<20x32xf32>
    %582 = arith.mulf %572, %581 : vector<20x32xf32>
    %583 = vector.broadcast %564 : vector<1x32xf32> to vector<20x32xf32>
    %584 = arith.mulf %582, %583 : vector<20x32xf32>
    %585 = vector.broadcast %566 : vector<1x32xf32> to vector<20x32xf32>
    %586 = arith.addf %584, %585 : vector<20x32xf32>
    %c1_268 = arith.constant 1 : index
    %c0_269 = arith.constant 0 : index
    %c0_270 = arith.constant 0 : index
    %587 = vector.load %arg5[%c1_268, %c0_269, %c0_270] : memref<2x32x96xf32, #tpu.memory_space<vmem>>, vector<1x32x96xf32>
    %588 = vector.shape_cast %587 : vector<1x32x96xf32> to vector<32x96xf32>
    %cst_271 = arith.constant dense<0.000000e+00> : vector<20x96xf32>
    %589 = tpu.matmul %586, %588, %cst_271 {dimension_numbers = #tpu.dot_dimension_numbers<[1], [0], [0], [1], [0, 0, 1, 1], [], []>} : vector<20x32xf32>, vector<32x96xf32>, vector<20x96xf32> -> vector<20x96xf32>
    %c1_272 = arith.constant 1 : index
    %c0_273 = arith.constant 0 : index
    %c0_274 = arith.constant 0 : index
    %590 = vector.load %arg6[%c1_272, %c0_273, %c0_274] : memref<2x1x96xf32, #tpu.memory_space<vmem>>, vector<1x1x96xf32>
    %591 = vector.shape_cast %590 : vector<1x1x96xf32> to vector<1x96xf32>
    %592 = vector.broadcast %591 : vector<1x96xf32> to vector<20x96xf32>
    %593 = arith.addf %589, %592 : vector<20x96xf32>
    %594 = vector.extract_strided_slice %593 {offsets = [0, 0], sizes = [20, 8], strides = [1, 1]} : vector<20x96xf32> to vector<20x8xf32>
    %595 = vector.extract_strided_slice %593 {offsets = [0, 8], sizes = [20, 8], strides = [1, 1]} : vector<20x96xf32> to vector<20x8xf32>
    %596 = vector.extract_strided_slice %593 {offsets = [0, 16], sizes = [20, 8], strides = [1, 1]} : vector<20x96xf32> to vector<20x8xf32>
    %597 = vector.extract_strided_slice %593 {offsets = [0, 24], sizes = [20, 8], strides = [1, 1]} : vector<20x96xf32> to vector<20x8xf32>
    %598 = vector.shape_cast %594 : vector<20x8xf32> to vector<1x20x8xf32>
    %599 = vector.shape_cast %595 : vector<20x8xf32> to vector<1x20x8xf32>
    %600 = vector.shape_cast %596 : vector<20x8xf32> to vector<1x20x8xf32>
    %601 = vector.shape_cast %597 : vector<20x8xf32> to vector<1x20x8xf32>
    %602 = tpu.concatenate %598, %599, %600, %601 in 0 : vector<1x20x8xf32>, vector<1x20x8xf32>, vector<1x20x8xf32>, vector<1x20x8xf32> -> vector<4x20x8xf32>
    %603 = vector.extract_strided_slice %593 {offsets = [0, 32], sizes = [20, 8], strides = [1, 1]} : vector<20x96xf32> to vector<20x8xf32>
    %604 = vector.extract_strided_slice %593 {offsets = [0, 40], sizes = [20, 8], strides = [1, 1]} : vector<20x96xf32> to vector<20x8xf32>
    %605 = vector.extract_strided_slice %593 {offsets = [0, 48], sizes = [20, 8], strides = [1, 1]} : vector<20x96xf32> to vector<20x8xf32>
    %606 = vector.extract_strided_slice %593 {offsets = [0, 56], sizes = [20, 8], strides = [1, 1]} : vector<20x96xf32> to vector<20x8xf32>
    %607 = vector.shape_cast %603 : vector<20x8xf32> to vector<1x20x8xf32>
    %608 = vector.shape_cast %604 : vector<20x8xf32> to vector<1x20x8xf32>
    %609 = vector.shape_cast %605 : vector<20x8xf32> to vector<1x20x8xf32>
    %610 = vector.shape_cast %606 : vector<20x8xf32> to vector<1x20x8xf32>
    %611 = tpu.concatenate %607, %608, %609, %610 in 0 : vector<1x20x8xf32>, vector<1x20x8xf32>, vector<1x20x8xf32>, vector<1x20x8xf32> -> vector<4x20x8xf32>
    %612 = vector.extract_strided_slice %593 {offsets = [0, 64], sizes = [20, 8], strides = [1, 1]} : vector<20x96xf32> to vector<20x8xf32>
    %613 = vector.extract_strided_slice %593 {offsets = [0, 72], sizes = [20, 8], strides = [1, 1]} : vector<20x96xf32> to vector<20x8xf32>
    %614 = vector.extract_strided_slice %593 {offsets = [0, 80], sizes = [20, 8], strides = [1, 1]} : vector<20x96xf32> to vector<20x8xf32>
    %615 = vector.extract_strided_slice %593 {offsets = [0, 88], sizes = [20, 8], strides = [1, 1]} : vector<20x96xf32> to vector<20x8xf32>
    %616 = vector.shape_cast %612 : vector<20x8xf32> to vector<1x20x8xf32>
    %617 = vector.shape_cast %613 : vector<20x8xf32> to vector<1x20x8xf32>
    %618 = vector.shape_cast %614 : vector<20x8xf32> to vector<1x20x8xf32>
    %619 = vector.shape_cast %615 : vector<20x8xf32> to vector<1x20x8xf32>
    %620 = tpu.concatenate %616, %617, %618, %619 in 0 : vector<1x20x8xf32>, vector<1x20x8xf32>, vector<1x20x8xf32>, vector<1x20x8xf32> -> vector<4x20x8xf32>
    %cst_275 = arith.constant dense<0.000000e+00> : vector<4x20x20xf32>
    %621 = tpu.matmul %602, %611, %cst_275 {dimension_numbers = #tpu.dot_dimension_numbers<[2], [2], [1], [1], [0, 0, 0, 1, 1, 1], [0], [0]>} : vector<4x20x8xf32>, vector<4x20x8xf32>, vector<4x20x20xf32> -> vector<4x20x20xf32>
    %c1_276 = arith.constant 1 : index
    %c0_277 = arith.constant 0 : index
    %c0_278 = arith.constant 0 : index
    %622 = vector.load %arg2[%c1_276, %c0_277, %c0_278] : memref<2x20x20xf32, #tpu.memory_space<vmem>>, vector<1x20x20xf32>
    %623 = vector.shape_cast %622 : vector<1x20x20xf32> to vector<20x20xf32>
    %624 = vector.shape_cast %623 : vector<20x20xf32> to vector<1x20x20xf32>
    %625 = vector.broadcast %624 : vector<1x20x20xf32> to vector<4x20x20xf32>
    %626 = arith.addf %621, %625 : vector<4x20x20xf32>
    %cst_279 = arith.constant dense<0xFF800000> : vector<4x20xf32>
    %627 = vector.multi_reduction <maximumf>, %626, %cst_279 [2] : vector<4x20x20xf32> to vector<4x20xf32>
    %628 = vector.shape_cast %627 : vector<4x20xf32> to vector<4x20x1xf32>
    %629 = vector.broadcast %628 : vector<4x20x1xf32> to vector<4x20x20xf32>
    %630 = arith.subf %626, %629 : vector<4x20x20xf32>
    %631 = math.exp %630 : vector<4x20x20xf32>
    %cst_280 = arith.constant dense<0.000000e+00> : vector<4x20xf32>
    %632 = vector.multi_reduction <add>, %631, %cst_280 [2] : vector<4x20x20xf32> to vector<4x20xf32>
    %633 = vector.shape_cast %632 : vector<4x20xf32> to vector<4x20x1xf32>
    %634 = tpu.reciprocal %633 {approx = true} : vector<4x20x1xf32> -> vector<4x20x1xf32>
    %635 = vector.broadcast %634 : vector<4x20x1xf32> to vector<4x20x20xf32>
    %636 = arith.mulf %631, %635 : vector<4x20x20xf32>
    %c1_281 = arith.constant 1 : index
    %c1_282 = arith.constant 1 : index
    %c0_283 = arith.constant 0 : index
    %c0_284 = arith.constant 0 : index
    %c0_285 = arith.constant 0 : index
    %637 = vector.load %arg22[%c1_281, %c1_282, %c0_283, %c0_284, %c0_285] : memref<2x2x4x20x20xf32, #tpu.memory_space<vmem>>, vector<1x1x4x20x20xf32>
    %638 = vector.shape_cast %637 : vector<1x1x4x20x20xf32> to vector<4x20x20xf32>
    %639 = vector.shape_cast %636 : vector<4x20x20xf32> to vector<1x1x4x20x20xf32>
    tpu.vector_store %arg22[%c1_281, %c1_282, %c0_283, %c0_284, %c0_285], %639 {strides = array<i32>} : memref<2x2x4x20x20xf32, #tpu.memory_space<vmem>>, vector<1x1x4x20x20xf32>,
    %cst_286 = arith.constant dense<0.000000e+00> : vector<4x20x8xf32>
    %640 = tpu.matmul %636, %620, %cst_286 {dimension_numbers = #tpu.dot_dimension_numbers<[2], [1], [1], [2], [0, 0, 0, 1, 1, 2], [0], [0]>} : vector<4x20x20xf32>, vector<4x20x8xf32>, vector<4x20x8xf32> -> vector<4x20x8xf32>
    %641 = vector.extract_strided_slice %640 {offsets = [0, 0, 0], sizes = [1, 20, 8], strides = [1, 1, 1]} : vector<4x20x8xf32> to vector<1x20x8xf32>
    %642 = vector.shape_cast %641 : vector<1x20x8xf32> to vector<20x8xf32>
    %643 = vector.extract_strided_slice %640 {offsets = [1, 0, 0], sizes = [1, 20, 8], strides = [1, 1, 1]} : vector<4x20x8xf32> to vector<1x20x8xf32>
    %644 = vector.shape_cast %643 : vector<1x20x8xf32> to vector<20x8xf32>
    %645 = vector.extract_strided_slice %640 {offsets = [2, 0, 0], sizes = [1, 20, 8], strides = [1, 1, 1]} : vector<4x20x8xf32> to vector<1x20x8xf32>
    %646 = vector.shape_cast %645 : vector<1x20x8xf32> to vector<20x8xf32>
    %647 = vector.extract_strided_slice %640 {offsets = [3, 0, 0], sizes = [1, 20, 8], strides = [1, 1, 1]} : vector<4x20x8xf32> to vector<1x20x8xf32>
    %648 = vector.shape_cast %647 : vector<1x20x8xf32> to vector<20x8xf32>
    %649 = tpu.concatenate %642, %644, %646, %648 in 1 : vector<20x8xf32>, vector<20x8xf32>, vector<20x8xf32>, vector<20x8xf32> -> vector<20x32xf32>
    %c1_287 = arith.constant 1 : index
    %c0_288 = arith.constant 0 : index
    %c0_289 = arith.constant 0 : index
    %650 = vector.load %arg7[%c1_287, %c0_288, %c0_289] : memref<2x32x32xf32, #tpu.memory_space<vmem>>, vector<1x32x32xf32>
    %651 = vector.shape_cast %650 : vector<1x32x32xf32> to vector<32x32xf32>
    %cst_290 = arith.constant dense<0.000000e+00> : vector<20x32xf32>
    %652 = tpu.matmul %649, %651, %cst_290 {dimension_numbers = #tpu.dot_dimension_numbers<[1], [0], [0], [1], [0, 0, 1, 1], [], []>} : vector<20x32xf32>, vector<32x32xf32>, vector<20x32xf32> -> vector<20x32xf32>
    %c1_291 = arith.constant 1 : index
    %c0_292 = arith.constant 0 : index
    %c0_293 = arith.constant 0 : index
    %653 = vector.load %arg8[%c1_291, %c0_292, %c0_293] : memref<2x1x32xf32, #tpu.memory_space<vmem>>, vector<1x1x32xf32>
    %654 = vector.shape_cast %653 : vector<1x1x32xf32> to vector<1x32xf32>
    %655 = vector.broadcast %654 : vector<1x32xf32> to vector<20x32xf32>
    %656 = arith.addf %652, %655 : vector<20x32xf32>
    %657 = arith.addf %562, %656 : vector<20x32xf32>
    %c1_294 = arith.constant 1 : index
    %c0_295 = arith.constant 0 : index
    %c0_296 = arith.constant 0 : index
    %658 = vector.load %arg9[%c1_294, %c0_295, %c0_296] : memref<2x1x32xf32, #tpu.memory_space<vmem>>, vector<1x1x32xf32>
    %659 = vector.shape_cast %658 : vector<1x1x32xf32> to vector<1x32xf32>
    %c1_297 = arith.constant 1 : index
    %c0_298 = arith.constant 0 : index
    %c0_299 = arith.constant 0 : index
    %660 = vector.load %arg10[%c1_297, %c0_298, %c0_299] : memref<2x1x32xf32, #tpu.memory_space<vmem>>, vector<1x1x32xf32>
    %661 = vector.shape_cast %660 : vector<1x1x32xf32> to vector<1x32xf32>
    %cst_300 = arith.constant dense<0.000000e+00> : vector<20xf32>
    %662 = vector.multi_reduction <add>, %657, %cst_300 [1] : vector<20x32xf32> to vector<20xf32>
    %663 = vector.shape_cast %662 : vector<20xf32> to vector<20x1xf32>
    %cst_301 = arith.constant 3.200000e+01 : f32
    %664 = vector.broadcast %cst_301 : f32 to vector<20x1xf32>
    %665 = arith.divf %663, %664 : vector<20x1xf32>
    %666 = vector.broadcast %665 : vector<20x1xf32> to vector<20x32xf32>
    %667 = arith.subf %657, %666 : vector<20x32xf32>
    %668 = arith.mulf %667, %667 : vector<20x32xf32>
    %cst_302 = arith.constant dense<0.000000e+00> : vector<20xf32>
    %669 = vector.multi_reduction <add>, %668, %cst_302 [1] : vector<20x32xf32> to vector<20xf32>
    %670 = vector.shape_cast %669 : vector<20xf32> to vector<20x1xf32>
    %cst_303 = arith.constant 3.200000e+01 : f32
    %671 = vector.broadcast %cst_303 : f32 to vector<20x1xf32>
    %672 = arith.divf %670, %671 : vector<20x1xf32>
    %cst_304 = arith.constant 9.99999974E-6 : f32
    %673 = vector.broadcast %cst_304 : f32 to vector<20x1xf32>
    %674 = arith.addf %672, %673 : vector<20x1xf32>
    %675 = math.rsqrt %674 : vector<20x1xf32>
    %676 = vector.broadcast %675 : vector<20x1xf32> to vector<20x32xf32>
    %677 = arith.mulf %667, %676 : vector<20x32xf32>
    %678 = vector.broadcast %659 : vector<1x32xf32> to vector<20x32xf32>
    %679 = arith.mulf %677, %678 : vector<20x32xf32>
    %680 = vector.broadcast %661 : vector<1x32xf32> to vector<20x32xf32>
    %681 = arith.addf %679, %680 : vector<20x32xf32>
    %c1_305 = arith.constant 1 : index
    %c0_306 = arith.constant 0 : index
    %c0_307 = arith.constant 0 : index
    %682 = vector.load %arg11[%c1_305, %c0_306, %c0_307] : memref<2x32x128xf32, #tpu.memory_space<vmem>>, vector<1x32x128xf32>
    %683 = vector.shape_cast %682 : vector<1x32x128xf32> to vector<32x128xf32>
    %cst_308 = arith.constant dense<0.000000e+00> : vector<20x128xf32>
    %684 = tpu.matmul %681, %683, %cst_308 {dimension_numbers = #tpu.dot_dimension_numbers<[1], [0], [0], [1], [0, 0, 1, 1], [], []>} : vector<20x32xf32>, vector<32x128xf32>, vector<20x128xf32> -> vector<20x128xf32>
    %c1_309 = arith.constant 1 : index
    %c0_310 = arith.constant 0 : index
    %c0_311 = arith.constant 0 : index
    %685 = vector.load %arg12[%c1_309, %c0_310, %c0_311] : memref<2x1x128xf32, #tpu.memory_space<vmem>>, vector<1x1x128xf32>
    %686 = vector.shape_cast %685 : vector<1x1x128xf32> to vector<1x128xf32>
    %687 = vector.broadcast %686 : vector<1x128xf32> to vector<20x128xf32>
    %688 = arith.addf %684, %687 : vector<20x128xf32>
    %cst_312 = arith.constant 5.000000e-01 : f32
    %689 = vector.broadcast %cst_312 : f32 to vector<20x128xf32>
    %690 = arith.mulf %689, %688 : vector<20x128xf32>
    %cst_313 = arith.constant 0.707106769 : f32
    %691 = vector.broadcast %cst_313 : f32 to vector<20x128xf32>
    %692 = arith.mulf %688, %691 : vector<20x128xf32>
    %693 = math.absf %692 : vector<20x128xf32>
    %cst_314 = arith.constant 0.327591091 : f32
    %694 = vector.broadcast %cst_314 : f32 to vector<20x128xf32>
    %695 = arith.mulf %694, %693 : vector<20x128xf32>
    %cst_315 = arith.constant 1.000000e+00 : f32
    %696 = vector.broadcast %cst_315 : f32 to vector<20x128xf32>
    %697 = arith.addf %696, %695 : vector<20x128xf32>
    %cst_316 = arith.constant 1.000000e+00 : f32
    %698 = vector.broadcast %cst_316 : f32 to vector<20x128xf32>
    %699 = arith.divf %698, %697 : vector<20x128xf32>
    %cst_317 = arith.constant 1.06140542 : f32
    %700 = vector.broadcast %cst_317 : f32 to vector<20x128xf32>
    %701 = arith.mulf %700, %699 : vector<20x128xf32>
    %cst_318 = arith.constant -1.45315206 : f32
    %702 = vector.broadcast %cst_318 : f32 to vector<20x128xf32>
    %703 = arith.addf %701, %702 : vector<20x128xf32>
    %704 = arith.mulf %703, %699 : vector<20x128xf32>
    %cst_319 = arith.constant 1.42141378 : f32
    %705 = vector.broadcast %cst_319 : f32 to vector<20x128xf32>
    %706 = arith.addf %704, %705 : vector<20x128xf32>
    %707 = arith.mulf %706, %699 : vector<20x128xf32>
    %cst_320 = arith.constant -0.284496725 : f32
    %708 = vector.broadcast %cst_320 : f32 to vector<20x128xf32>
    %709 = arith.addf %707, %708 : vector<20x128xf32>
    %710 = arith.mulf %709, %699 : vector<20x128xf32>
    %cst_321 = arith.constant 0.254829586 : f32
    %711 = vector.broadcast %cst_321 : f32 to vector<20x128xf32>
    %712 = arith.addf %710, %711 : vector<20x128xf32>
    %713 = arith.mulf %712, %699 : vector<20x128xf32>
    %cst_322 = arith.constant 0.000000e+00 : f32
    %714 = vector.broadcast %cst_322 : f32 to vector<20x128xf32>
    %715 = arith.subf %714, %693 : vector<20x128xf32>
    %716 = arith.mulf %715, %693 : vector<20x128xf32>
    %717 = math.exp %716 : vector<20x128xf32>
    %718 = arith.mulf %713, %717 : vector<20x128xf32>
    %cst_323 = arith.constant 1.000000e+00 : f32
    %719 = vector.broadcast %cst_323 : f32 to vector<20x128xf32>
    %720 = arith.subf %719, %718 : vector<20x128xf32>
    %cst_324 = arith.constant 0.000000e+00 : f32
    %721 = vector.broadcast %cst_324 : f32 to vector<20x128xf32>
    %722 = arith.cmpf olt, %692, %721 : vector<20x128xf32>
    %cst_325 = arith.constant 0.000000e+00 : f32
    %723 = vector.broadcast %cst_325 : f32 to vector<20x128xf32>
    %724 = arith.subf %723, %720 : vector<20x128xf32>
    %725 = arith.select %722, %724, %720 : vector<20x128xi1>, vector<20x128xf32>
    %cst_326 = arith.constant 1.000000e+00 : f32
    %726 = vector.broadcast %cst_326 : f32 to vector<20x128xf32>
    %727 = arith.addf %726, %725 : vector<20x128xf32>
    %728 = arith.mulf %690, %727 : vector<20x128xf32>
    %c1_327 = arith.constant 1 : index
    %c0_328 = arith.constant 0 : index
    %c0_329 = arith.constant 0 : index
    %729 = vector.load %arg13[%c1_327, %c0_328, %c0_329] : memref<2x128x32xf32, #tpu.memory_space<vmem>>, vector<1x128x32xf32>
    %730 = vector.shape_cast %729 : vector<1x128x32xf32> to vector<128x32xf32>
    %cst_330 = arith.constant dense<0.000000e+00> : vector<20x32xf32>
    %731 = tpu.matmul %728, %730, %cst_330 {dimension_numbers = #tpu.dot_dimension_numbers<[1], [0], [0], [1], [0, 0, 1, 1], [], []>} : vector<20x128xf32>, vector<128x32xf32>, vector<20x32xf32> -> vector<20x32xf32>
    %c1_331 = arith.constant 1 : index
    %c0_332 = arith.constant 0 : index
    %c0_333 = arith.constant 0 : index
    %732 = vector.load %arg14[%c1_331, %c0_332, %c0_333] : memref<2x1x32xf32, #tpu.memory_space<vmem>>, vector<1x1x32xf32>
    %733 = vector.shape_cast %732 : vector<1x1x32xf32> to vector<1x32xf32>
    %734 = vector.broadcast %733 : vector<1x32xf32> to vector<20x32xf32>
    %735 = arith.addf %731, %734 : vector<20x32xf32>
    %736 = arith.addf %657, %735 : vector<20x32xf32>
    %c0_334 = arith.constant 0 : index
    %c0_335 = arith.constant 0 : index
    %737 = vector.load %arg15[%c0_334, %c0_335] : memref<1x32xf32, #tpu.memory_space<vmem>>, vector<1x32xf32>
    %c0_336 = arith.constant 0 : index
    %c0_337 = arith.constant 0 : index
    %738 = vector.load %arg16[%c0_336, %c0_337] : memref<1x32xf32, #tpu.memory_space<vmem>>, vector<1x32xf32>
    %cst_338 = arith.constant dense<0.000000e+00> : vector<20xf32>
    %739 = vector.multi_reduction <add>, %736, %cst_338 [1] : vector<20x32xf32> to vector<20xf32>
    %740 = vector.shape_cast %739 : vector<20xf32> to vector<20x1xf32>
    %cst_339 = arith.constant 3.200000e+01 : f32
    %741 = vector.broadcast %cst_339 : f32 to vector<20x1xf32>
    %742 = arith.divf %740, %741 : vector<20x1xf32>
    %743 = vector.broadcast %742 : vector<20x1xf32> to vector<20x32xf32>
    %744 = arith.subf %736, %743 : vector<20x32xf32>
    %745 = arith.mulf %744, %744 : vector<20x32xf32>
    %cst_340 = arith.constant dense<0.000000e+00> : vector<20xf32>
    %746 = vector.multi_reduction <add>, %745, %cst_340 [1] : vector<20x32xf32> to vector<20xf32>
    %747 = vector.shape_cast %746 : vector<20xf32> to vector<20x1xf32>
    %cst_341 = arith.constant 3.200000e+01 : f32
    %748 = vector.broadcast %cst_341 : f32 to vector<20x1xf32>
    %749 = arith.divf %747, %748 : vector<20x1xf32>
    %cst_342 = arith.constant 9.99999974E-6 : f32
    %750 = vector.broadcast %cst_342 : f32 to vector<20x1xf32>
    %751 = arith.addf %749, %750 : vector<20x1xf32>
    %752 = math.rsqrt %751 : vector<20x1xf32>
    %753 = vector.broadcast %752 : vector<20x1xf32> to vector<20x32xf32>
    %754 = arith.mulf %744, %753 : vector<20x32xf32>
    %755 = vector.broadcast %737 : vector<1x32xf32> to vector<20x32xf32>
    %756 = arith.mulf %754, %755 : vector<20x32xf32>
    %757 = vector.broadcast %738 : vector<1x32xf32> to vector<20x32xf32>
    %758 = arith.addf %756, %757 : vector<20x32xf32>
    %759 = vector.extract_strided_slice %758 {offsets = [0, 0], sizes = [12, 32], strides = [1, 1]} : vector<20x32xf32> to vector<12x32xf32>
    %c0_343 = arith.constant 0 : index
    %c0_344 = arith.constant 0 : index
    %760 = vector.load %arg17[%c0_343, %c0_344] : memref<32x26xf32, #tpu.memory_space<vmem>>, vector<32x26xf32>
    %cst_345 = arith.constant dense<0.000000e+00> : vector<12x26xf32>
    %761 = tpu.matmul %759, %760, %cst_345 {dimension_numbers = #tpu.dot_dimension_numbers<[1], [0], [0], [1], [0, 0, 1, 1], [], []>} : vector<12x32xf32>, vector<32x26xf32>, vector<12x26xf32> -> vector<12x26xf32>
    %c1_346 = arith.constant 1 : index
    %c0_347 = arith.constant 0 : index
    %c0_348 = arith.constant 0 : index
    %762 = vector.load %arg20[%c1_346, %c0_347, %c0_348] : memref<2x12x26xf32, #tpu.memory_space<vmem>>, vector<1x12x26xf32>
    %763 = vector.shape_cast %762 : vector<1x12x26xf32> to vector<12x26xf32>
    %764 = vector.shape_cast %761 : vector<12x26xf32> to vector<1x12x26xf32>
    tpu.vector_store %arg20[%c1_346, %c0_347, %c0_348], %764 {strides = array<i32>} : memref<2x12x26xf32, #tpu.memory_space<vmem>>, vector<1x12x26xf32>,
    %765 = vector.extract_strided_slice %758 {offsets = [12, 0], sizes = [8, 32], strides = [1, 1]} : vector<20x32xf32> to vector<8x32xf32>
    %c0_349 = arith.constant 0 : index
    %c0_350 = arith.constant 0 : index
    %766 = vector.load %arg18[%c0_349, %c0_350] : memref<32x4xf32, #tpu.memory_space<vmem>>, vector<32x4xf32>
    %cst_351 = arith.constant dense<0.000000e+00> : vector<8x4xf32>
    %767 = tpu.matmul %765, %766, %cst_351 {dimension_numbers = #tpu.dot_dimension_numbers<[1], [0], [0], [1], [0, 0, 1, 1], [], []>} : vector<8x32xf32>, vector<32x4xf32>, vector<8x4xf32> -> vector<8x4xf32>
    %c0_352 = arith.constant 0 : index
    %c0_353 = arith.constant 0 : index
    %768 = vector.load %arg19[%c0_352, %c0_353] : memref<1x4xf32, #tpu.memory_space<vmem>>, vector<1x4xf32>
    %769 = vector.broadcast %768 : vector<1x4xf32> to vector<8x4xf32>
    %770 = arith.addf %767, %769 : vector<8x4xf32>
    %c1_354 = arith.constant 1 : index
    %c0_355 = arith.constant 0 : index
    %c0_356 = arith.constant 0 : index
    %771 = vector.load %arg21[%c1_354, %c0_355, %c0_356] : memref<2x8x4xf32, #tpu.memory_space<vmem>>, vector<1x8x4xf32>
    %772 = vector.shape_cast %771 : vector<1x8x4xf32> to vector<8x4xf32>
    %773 = vector.shape_cast %770 : vector<8x4xf32> to vector<1x8x4xf32>
    tpu.vector_store %arg21[%c1_354, %c0_355, %c0_356], %773 {strides = array<i32>} : memref<2x8x4xf32, #tpu.memory_space<vmem>>, vector<1x8x4xf32>,
    return
  }
  func.func @transform_0(%arg0: i32) -> (i32, i32, i32) {
    %c0_i32 = arith.constant 0 : i32
    %c0_i32_0 = arith.constant 0 : i32
    %c0_i32_1 = arith.constant 0 : i32
    %c0_i32_2 = arith.constant 0 : i32
    return %c0_i32, %c0_i32_0, %c0_i32_1 : i32, i32, i32
  }
  func.func @transform_1(%arg0: i32) -> (i32, i32, i32) {
    %c0_i32 = arith.constant 0 : i32
    %c0_i32_0 = arith.constant 0 : i32
    %c0_i32_1 = arith.constant 0 : i32
    %c0_i32_2 = arith.constant 0 : i32
    return %c0_i32, %c0_i32_0, %c0_i32_1 : i32, i32, i32
  }
  func.func @transform_2(%arg0: i32) -> (i32, i32, i32) {
    %c0_i32 = arith.constant 0 : i32
    %c0_i32_0 = arith.constant 0 : i32
    %c0_i32_1 = arith.constant 0 : i32
    %c0_i32_2 = arith.constant 0 : i32
    return %c0_i32, %c0_i32_0, %c0_i32_1 : i32, i32, i32
  }
  func.func @transform_3(%arg0: i32) -> (i32, i32, i32) {
    %c0_i32 = arith.constant 0 : i32
    %c0_i32_0 = arith.constant 0 : i32
    %c0_i32_1 = arith.constant 0 : i32
    %c0_i32_2 = arith.constant 0 : i32
    return %c0_i32, %c0_i32_0, %c0_i32_1 : i32, i32, i32
  }
  func.func @transform_4(%arg0: i32) -> (i32, i32, i32) {
    %c0_i32 = arith.constant 0 : i32
    %c0_i32_0 = arith.constant 0 : i32
    %c0_i32_1 = arith.constant 0 : i32
    %c0_i32_2 = arith.constant 0 : i32
    return %c0_i32, %c0_i32_0, %c0_i32_1 : i32, i32, i32
  }
  func.func @transform_5(%arg0: i32) -> (i32, i32, i32) {
    %c0_i32 = arith.constant 0 : i32
    %c0_i32_0 = arith.constant 0 : i32
    %c0_i32_1 = arith.constant 0 : i32
    %c0_i32_2 = arith.constant 0 : i32
    return %c0_i32, %c0_i32_0, %c0_i32_1 : i32, i32, i32
  }
  func.func @transform_6(%arg0: i32) -> (i32, i32, i32) {
    %c0_i32 = arith.constant 0 : i32
    %c0_i32_0 = arith.constant 0 : i32
    %c0_i32_1 = arith.constant 0 : i32
    %c0_i32_2 = arith.constant 0 : i32
    return %c0_i32, %c0_i32_0, %c0_i32_1 : i32, i32, i32
  }
  func.func @transform_7(%arg0: i32) -> (i32, i32, i32) {
    %c0_i32 = arith.constant 0 : i32
    %c0_i32_0 = arith.constant 0 : i32
    %c0_i32_1 = arith.constant 0 : i32
    %c0_i32_2 = arith.constant 0 : i32
    return %c0_i32, %c0_i32_0, %c0_i32_1 : i32, i32, i32
  }
  func.func @transform_8(%arg0: i32) -> (i32, i32, i32) {
    %c0_i32 = arith.constant 0 : i32
    %c0_i32_0 = arith.constant 0 : i32
    %c0_i32_1 = arith.constant 0 : i32
    %c0_i32_2 = arith.constant 0 : i32
    return %c0_i32, %c0_i32_0, %c0_i32_1 : i32, i32, i32
  }
  func.func @transform_9(%arg0: i32) -> (i32, i32, i32) {
    %c0_i32 = arith.constant 0 : i32
    %c0_i32_0 = arith.constant 0 : i32
    %c0_i32_1 = arith.constant 0 : i32
    %c0_i32_2 = arith.constant 0 : i32
    return %c0_i32, %c0_i32_0, %c0_i32_1 : i32, i32, i32
  }
  func.func @transform_10(%arg0: i32) -> (i32, i32, i32) {
    %c0_i32 = arith.constant 0 : i32
    %c0_i32_0 = arith.constant 0 : i32
    %c0_i32_1 = arith.constant 0 : i32
    %c0_i32_2 = arith.constant 0 : i32
    return %c0_i32, %c0_i32_0, %c0_i32_1 : i32, i32, i32
  }
  func.func @transform_11(%arg0: i32) -> (i32, i32, i32) {
    %c0_i32 = arith.constant 0 : i32
    %c0_i32_0 = arith.constant 0 : i32
    %c0_i32_1 = arith.constant 0 : i32
    %c0_i32_2 = arith.constant 0 : i32
    return %c0_i32, %c0_i32_0, %c0_i32_1 : i32, i32, i32
  }
  func.func @transform_12(%arg0: i32) -> (i32, i32, i32) {
    %c0_i32 = arith.constant 0 : i32
    %c0_i32_0 = arith.constant 0 : i32
    %c0_i32_1 = arith.constant 0 : i32
    %c0_i32_2 = arith.constant 0 : i32
    return %c0_i32, %c0_i32_0, %c0_i32_1 : i32, i32, i32
  }
  func.func @transform_13(%arg0: i32) -> (i32, i32, i32) {
    %c0_i32 = arith.constant 0 : i32
    %c0_i32_0 = arith.constant 0 : i32
    %c0_i32_1 = arith.constant 0 : i32
    %c0_i32_2 = arith.constant 0 : i32
    return %c0_i32, %c0_i32_0, %c0_i32_1 : i32, i32, i32
  }
  func.func @transform_14(%arg0: i32) -> (i32, i32) {
    %c0_i32 = arith.constant 0 : i32
    %c0_i32_0 = arith.constant 0 : i32
    %c0_i32_1 = arith.constant 0 : i32
    return %c0_i32, %c0_i32_0 : i32, i32
  }
  func.func @transform_15(%arg0: i32) -> (i32, i32) {
    %c0_i32 = arith.constant 0 : i32
    %c0_i32_0 = arith.constant 0 : i32
    %c0_i32_1 = arith.constant 0 : i32
    return %c0_i32, %c0_i32_0 : i32, i32
  }
  func.func @transform_16(%arg0: i32) -> (i32, i32) {
    %c0_i32 = arith.constant 0 : i32
    %c0_i32_0 = arith.constant 0 : i32
    %c0_i32_1 = arith.constant 0 : i32
    return %c0_i32, %c0_i32_0 : i32, i32
  }
  func.func @transform_17(%arg0: i32) -> (i32, i32) {
    %c0_i32 = arith.constant 0 : i32
    %c0_i32_0 = arith.constant 0 : i32
    %c0_i32_1 = arith.constant 0 : i32
    return %c0_i32, %c0_i32_0 : i32, i32
  }
  func.func @transform_18(%arg0: i32) -> (i32, i32) {
    %c0_i32 = arith.constant 0 : i32
    %c0_i32_0 = arith.constant 0 : i32
    %c0_i32_1 = arith.constant 0 : i32
    return %c0_i32, %c0_i32_0 : i32, i32
  }
  func.func @transform_19(%arg0: i32) -> (i32, i32, i32) {
    %c0_i32 = arith.constant 0 : i32
    %c0_i32_0 = arith.constant 0 : i32
    %c0_i32_1 = arith.constant 0 : i32
    %c0_i32_2 = arith.constant 0 : i32
    return %c0_i32, %c0_i32_0, %c0_i32_1 : i32, i32, i32
  }
  func.func @transform_20(%arg0: i32) -> (i32, i32, i32) {
    %c0_i32 = arith.constant 0 : i32
    %c0_i32_0 = arith.constant 0 : i32
    %c0_i32_1 = arith.constant 0 : i32
    %c0_i32_2 = arith.constant 0 : i32
    return %c0_i32, %c0_i32_0, %c0_i32_1 : i32, i32, i32
  }
  func.func @transform_21(%arg0: i32) -> (i32, i32, i32, i32, i32) {
    %c0_i32 = arith.constant 0 : i32
    %c0_i32_0 = arith.constant 0 : i32
    %c0_i32_1 = arith.constant 0 : i32
    %c0_i32_2 = arith.constant 0 : i32
    %c0_i32_3 = arith.constant 0 : i32
    %c0_i32_4 = arith.constant 0 : i32
    return %c0_i32, %c0_i32_0, %c0_i32_1, %c0_i32_2, %c0_i32_3 : i32, i32, i32, i32, i32
  }
}

</mosaic_0001>

<bundles_post_ra>
// kernel: _lambda_.1
= control target key start
LH: loop header
LB: loop body
LE: loop exit
PB: predicated region body
PF: predicated region fallthrough
CT: control target
= control target key end

     0   :  { %vm70_vm0 = vcmask 261120   ;;  %vm77_vm1 = vcmask 257024   ;;  %v5300_v6 = vmov 32.0   ;;  %s7688_s23 = smov 112   ;;  %s7682_s24 = smov 96   ;;  %vm230_vm12 = vcmask 64512   ;;  %s7652_s0 = inlined_call_operand.vmem [shape: f32[2,20,32], index: 0, kind: input, shape index: {}]   ;;  %s7653_s2 = inlined_call_operand.vmem [shape: f32[2,1,32], index: 2, kind: input, shape index: {}, may-alias: {2,8}]   ;;  %s7654_s3 = inlined_call_operand.vmem [shape: f32[2,1,32], index: 3, kind: input, shape index: {}, may-alias: {3,7,9,13}]   ;;  %s7655_s5 = inlined_call_operand.vmem [shape: f32[2,1,96], index: 5, kind: input, shape index: {}]   ;;  %s7656_s4 = inlined_call_operand.vmem [shape: f32[2,32,96], index: 4, kind: input, shape index: {}]   ;;  %s7657_s1 = inlined_call_operand.vmem [shape: f32[2,20,20], index: 1, kind: input, shape index: {}]   ;;  %s7658_s21 = inlined_call_operand.vmem [shape: f32[2,2,4,20,20], index: 21, kind: output, shape index: {2}]   ;;  %s7659_s7 = inlined_call_operand.vmem [shape: f32[2,1,32], index: 7, kind: input, shape index: {}, may-alias: {3,7,9,13}]   ;;  %s7660_s6 = inlined_call_operand.vmem [shape: f32[2,32,32], index: 6, kind: input, shape index: {}]   ;;  %s7661_s8 = inlined_call_operand.vmem [shape: f32[2,1,32], index: 8, kind: input, shape index: {}, may-alias: {2,8}]   ;;  %s7662_s9 = inlined_call_operand.vmem [shape: f32[2,1,32], index: 9, kind: input, shape index: {}, may-alias: {3,7,9,13}]   ;;  %s7663_s11 = inlined_call_operand.vmem [shape: f32[2,1,128], index: 11, kind: input, shape index: {}]   ;;  %s7664_s10 = inlined_call_operand.vmem [shape: f32[2,32,128], index: 10, kind: input, shape index: {}]   ;;  %s7665_s13 = inlined_call_operand.vmem [shape: f32[2,1,32], index: 13, kind: input, shape index: {}, may-alias: {3,7,9,13}]   ;;  %s7666_s12 = inlined_call_operand.vmem [shape: f32[2,128,32], index: 12, kind: input, shape index: {}]   ;;  %s7667_s14 = inlined_call_operand.vmem [shape: f32[1,32], index: 14, kind: input, shape index: {}]   ;;  %s7668_s15 = inlined_call_operand.vmem [shape: f32[1,32], index: 15, kind: input, shape index: {}]   ;;  %s7669_s17 = inlined_call_operand.vmem [shape: f32[32,4], index: 17, kind: input, shape index: {}]   ;;  %s7670_s16 = inlined_call_operand.vmem [shape: f32[32,26], index: 16, kind: input, shape index: {}]   ;;  %s7671_s18 = inlined_call_operand.vmem [shape: f32[1,4], index: 18, kind: input, shape index: {}]   ;;  %s7672_s20 = inlined_call_operand.vmem [shape: f32[2,8,4], index: 20, kind: output, shape index: {1}]   ;;  %s7673_s19 = inlined_call_operand.vmem [shape: f32[2,12,26], index: 19, kind: output, shape index: {0}]  }
   0x1   :  { %7711 = sst [smem:[#allocation2_spill]] %s7652_s0  ;;  %4992 = vrcp.f32 %v5300_v6  ;;  %s7680_s25 = smov 64   ;;  %vm564_vm13 = vcmask 1043456   ;;  %vm401_vm14 = vcmask 162816   ;;  %vm408_vm15 = vcmask 158720  }
   0x2   :  { %7712 = sst [smem:[#allocation3_spill]] %s7653_s2  ;;  %s7686_s2 = smov 120  }
   0x3   :  { %7713 = sst [smem:[#allocation4_spill]] %s7654_s3  ;;  %s7684_s3 = smov 104  }
   0x4   :  { %7714 = sst [smem:[#allocation5_spill]] %s7655_s5  ;;  %s7693_s27 = smov 8  }
   0x5   :  { %7715 = sst [smem:[#allocation6_spill]] %s7656_s4  ;;  %s7690_s28 = smov 24  }
   0x6   :  { %7716 = sst [smem:[#allocation7_spill]] %s7657_s1  ;;  %s7695_s4 = smov 16  }
   0x7   :  { %7717 = sst [smem:[#allocation8_spill]] %s7658_s21  ;;  %v4993_v7 = vpop.eup %4992  ;;  %s7732_s1 = smov 120  }
   0x8   :  { %7718 = sst [smem:[#allocation9_spill]] %s7667_s14  ;;  %v82_v8 = vmul.f32 32.0, %v4993_v7  ;;  %vm86_vm2 = vweird.f32 %v4993_v7 }
   0x9   :  { %7719 = sst [smem:[#allocation10_spill]] %s7668_s15 }
   0xa   :  { %7720 = sst [smem:[#allocation11_spill]] %s7669_s17  ;;  %v83_v9 = vsub.f32 1.0, %v82_v8 }
   0xb   :  { %7721 = sst [smem:[#allocation12_spill]] %s7670_s16 }
   0xc   :  { %7722 = sst [smem:[#allocation13_spill]] %s7671_s18  ;;  %v84_v10 = vmul.f32 %v4993_v7, %v83_v9 }
   0xd   :  { %7723 = sst [smem:[#allocation14_spill]] %s7672_s20 }
   0xe   :  { %7724 = sst [smem:[#allocation15_spill]] %s7673_s19  ;;  %v85_v11 = vadd.f32 %v4993_v7, %v84_v10 }
   0xf   :  { %s7725_s26 = sld [smem:[#allocation2_spill]] }
  0x10   :  { %v5431_v12 = vsel %vm86_vm2, %v4993_v7, %v85_v11  ;;  %s7726_s30 = sld [smem:[#allocation6_spill]]  ;;  %vm767_vm2 = vcmask 130048  }
  0x11   :  { %s7727_s5 = sld [smem:[#allocation3_spill]] }
  0x12   :  { %s7728_s0 = sld [smem:[#allocation4_spill]] }
  0x13   :  { %s7729_s22 = sld [smem:[#allocation5_spill]] }
  0x14   :  { %s7730_s29 = sld [smem:[#allocation7_spill]] }
  0x15   :  { %v65_v0 = vld [vmem:[%s7725_s26] sm:$0xff]  ;;  %v67_v1 = vld [vmem:[%s7725_s26 + $0x10] sm:$0xf]  ;;  %v66_v4 = vld [vmem:[%s7725_s26 + $0x8] sm:$0xff]  ;;  %s7741_s20 = sld [smem:[#allocation13_spill]] }
  0x16   :  { %v71_v2 = vsel %vm70_vm0, %v65_v0, 0.0  ;;  %v78_v3 = vsel %vm77_vm1, %v67_v1, 0.0  ;;  %v74_v5 = vsel %vm70_vm0, %v66_v4, 0.0  ;;  %v160_v28 = vld [vmem:[%s7726_s30 + $0x18] sm:$0xff]  ;;  %v159_v29 = vld [vmem:[%s7726_s30 + $0x10] sm:$0xff]  ;;  %v158_v30 = vld [vmem:[%s7726_s30 + $0x8] sm:$0xff] }
  0x17   :  { %72 = vadd.xlane.f32.xlu0 %v71_v2  ;;  %79 = vadd.xlane.f32.xlu1 %v78_v3  ;;  %v157_v31 = vld [vmem:[%s7726_s30] sm:$0xff]  ;;  %s7742_s18 = sld [smem:[#allocation14_spill]] }
  0x18   :  { %186 = vmatpush.msra.mxu0 %v160_v28  ;;  %v4954_v49 = vld [vmem:[%s7727_s5] ss:$0 sm:$0xff]  ;;  %s7743_s19 = sld [smem:[#allocation15_spill]] }
  0x19   :  { %v4955_v53 = vld [vmem:[%s7728_s0] ss:$0 sm:$0xff] }
  0x1a   :  { %187 = vmatpush.msra.mxu0 %v159_v29  ;;  %v4957_v10 = vld [vmem:[%s7729_s22] ss:$0 sm:$0xff] }
  0x1c   :  { %188 = vmatpush.msra.mxu0 %v158_v30 }
  0x1e   :  { %189 = vmatpush.msra.mxu0 %v157_v31 }
  0x1f   :  { %75 = vadd.xlane.f32.xlu0 %v74_v5 }
  0x8a   :  { %v73_v13 = vpop.xlane.xlu0 %72  ;;  %v80_v17 = vpop.xlane.xlu1 %79 }
  0x8b   :  { %v88_v14 = vmul.f32 %v5431_v12, %v73_v13  ;;  %v90_v21 = vmul.f32 %v5431_v12, %v80_v17 }
  0x8d   :  { %v91_v15 = vsub.f32 %v65_v0, %v88_v14  ;;  %v5437_v23 = vsub.f32 %v67_v1, %v90_v21 }
  0x8f   :  { %v94_v16 = vmul.f32 %v91_v15, %v91_v15  ;;  %v96_v26 = vmul.f32 %v5437_v23, %v5437_v23 }
  0x91   :  { %v97_v18 = vsel %vm70_vm0, %v94_v16, 0.0  ;;  %v103_v27 = vsel %vm77_vm1, %v96_v26, 0.0 }
  0x92   :  { %98 = vadd.xlane.f32.xlu1 %v97_v18  ;;  %v76_v19 = vpop.xlane.xlu0 %75 }
  0x93   :  { %v89_v20 = vmul.f32 %v5431_v12, %v76_v19 }
  0x95   :  { %v92_v22 = vsub.f32 %v66_v4, %v89_v20 }
  0x97   :  { %v95_v24 = vmul.f32 %v92_v22, %v92_v22 }
  0x99   :  { %v100_v25 = vsel %vm70_vm0, %v95_v24, 0.0 }
  0x9a   :  { %101 = vadd.xlane.f32.xlu2 %v100_v25 }
  0xa2   :  { %104 = vadd.xlane.f32.xlu2 %v103_v27 }
 0x105   :  { %v99_v32 = vpop.xlane.xlu1 %98 }
 0x106   :  { %v106_v33 = vmul.f32 %v99_v32, %v5431_v12 }
 0x108   :  { %v109_v34 = vadd.f32 1e-05, %v106_v33 }
 0x10a   :  { %4994 = vrsqrt.f32 %v109_v34  ;;  %vm118_vm4 = vweird.f32 %v109_v34 }
 0x10d   :  { %v102_v35 = vpop.xlane.xlu2 %101 }
 0x10e   :  { %v107_v36 = vmul.f32 %v102_v35, %v5431_v12 }
 0x110   :  { %v4995_v37 = vpop.eup %4994  ;;  %v110_v38 = vadd.f32 1e-05, %v107_v36 }
 0x111   :  { %v113_v39 = vmul.f32 %v4995_v37, %v109_v34  ;;  %vm119_vm3 = vweird.f32 %v4995_v37 }
 0x112   :  { %4996 = vrsqrt.f32 %v110_v38  ;;  %vm120_vm5 = vmor %vm118_vm4, %vm119_vm3  ;;  %vm128_vm7 = vweird.f32 %v110_v38  ;;  %vm771_vm3 = vcmask 195584  }
 0x113   :  { %v114_v40 = vmul.f32 %v4995_v37, %v113_v39 }
 0x115   :  { %v115_v41 = vmul.f32 0.5, %v114_v40  ;;  %v105_v42 = vpop.xlane.xlu2 %104 }
 0x116   :  { %v108_v43 = vmul.f32 %v105_v42, %v5431_v12  ;;  %v221_v42 = vld [vmem:[%s7730_s29] sm:$0xff] }
 0x117   :  { %v116_v44 = vsub.f32 1.5, %v115_v41 }
 0x118   :  { %v4997_v45 = vpop.eup %4996  ;;  %v111_v46 = vadd.f32 1e-05, %v108_v43 }
 0x119   :  { %v117_v47 = vmul.f32 %v4995_v37, %v116_v44  ;;  %v123_v48 = vmul.f32 %v4997_v45, %v110_v38  ;;  %vm129_vm6 = vweird.f32 %v4997_v45 }
 0x11a   :  { %4998 = vrsqrt.f32 %v111_v46  ;;  %vm130_vm8 = vmor %vm128_vm7, %vm129_vm6  ;;  %vm138_vm10 = vweird.f32 %v111_v46 }
 0x11b   :  { %v124_v50 = vmul.f32 %v4997_v45, %v123_v48  ;;  %v121_v51 = vsel %vm120_vm5, %v4995_v37, %v117_v47  ;;  %v222_v48 = vld [vmem:[%s7730_s29 + $0x8] sm:$0xff] }
 0x11c   :  { %v142_v52 = vmul.f32 %v121_v51, %v91_v15 }
 0x11d   :  { %v125_v54 = vmul.f32 0.5, %v124_v50 }
 0x11e   :  { %v148_v55 = vmul.f32 %v4954_v49, %v142_v52  ;;  %v223_v52 = vld [vmem:[%s7730_s29 + $0x10] sm:$0xf] }
 0x11f   :  { %v126_v56 = vsub.f32 1.5, %v125_v54 }
 0x120   :  { %v4999_v57 = vpop.eup %4998  ;;  %v154_v58 = vadd.f32 %v4955_v53, %v148_v55 }
 0x121   :  { %v127_v59 = vmul.f32 %v4997_v45, %v126_v56  ;;  %v133_v60 = vmul.f32 %v4999_v57, %v111_v46  ;;  %vm139_vm9 = vweird.f32 %v4999_v57 }
 0x122   :  { %4540 = vmatmul.msk.f32.vlgmr.msra.gmra.mxu0 %vm70_vm0, %v154_v58  ;;  %vm140_vm11 = vmor %vm138_vm10, %vm139_vm9 }
 0x123   :  { %v134_v61 = vmul.f32 %v4999_v57, %v133_v60  ;;  %v131_v62 = vsel %vm130_vm8, %v4997_v45, %v127_v59 }
 0x124   :  { %v143_v63 = vmul.f32 %v131_v62, %v92_v22 }
 0x125   :  { %v135_v0 = vmul.f32 0.5, %v134_v61 }
 0x126   :  { %v149_v1 = vmul.f32 %v4954_v49, %v143_v63 }
 0x127   :  { %v136_v2 = vsub.f32 1.5, %v135_v0 }
 0x128   :  { %v155_v3 = vadd.f32 %v4955_v53, %v149_v1 }
 0x129   :  { %v137_v4 = vmul.f32 %v4999_v57, %v136_v2 }
 0x12a   :  { %4541 = vmatmul.msk.f32.gmra.mxu0 %vm70_vm0, %v155_v3 }
 0x12b   :  { %v141_v5 = vsel %vm140_vm11, %v4999_v57, %v137_v4 }
 0x12c   :  { %v144_v6 = vmul.f32 %v141_v5, %v5437_v23 }
 0x12e   :  { %v150_v7 = vmul.f32 %v4954_v49, %v144_v6 }
 0x130   :  { %v156_v8 = vadd.f32 %v4955_v53, %v150_v7 }
 0x132   :  { %4542 = vmatmul.msk.f32.gmra.mxu0 %vm70_vm0, %v156_v8 }
 0x19f   :  { %v191_v9 = vpop.f32.mrf.mxu0 }
 0x1a0   :  { %v5475_v15 = vadd.f32 %v4957_v10, %v191_v9 }
 0x1a7   :  { %v194_v11 = vpop.f32.mrf.mxu0 }
 0x1a8   :  { %v5471_v13 = vadd.f32 %v4957_v10, %v194_v11 }
 0x1aa   :  { %211 = vrot.lane.b32.xlu1 %v5471_v13, %s7688_s23 }
 0x1af   :  { %v197_v14 = vpop.f32.mrf.mxu0 }
 0x1b0   :  { %v5477_v16 = vadd.f32 %v4957_v10, %v197_v14 }
 0x1b2   :  { %203 = vrot.lane.b32.xlu1 %v5475_v15, %s7686_s2  ;;  %207 = vrot.lane.b32.xlu2 %v5477_v16, %s7686_s2 }
 0x1b3   :  { %213 = vrot.lane.b32.xlu0 %v5477_v16, %s7688_s23 }
 0x1ba   :  { %228 = vrot.lane.b32.xlu1 %v5477_v16, %s7682_s24  ;;  %205 = vrot.lane.b32.xlu2 %v5471_v13, %s7686_s2  ;;  %s7737_s2 = smov 8  }
 0x1bb   :  { %209 = vrot.lane.b32.xlu0 %v5475_v15, %s7688_s23  ;;  %s7736_s23 = smov 16  }
 0x1c2   :  { %224 = vrot.lane.b32.xlu1 %v5475_v15, %s7682_s24  ;;  %217 = vrot.lane.b32.xlu2 %v5471_v13, %s7684_s3 }
 0x1c3   :  { %219 = vrot.lane.b32.xlu0 %v5477_v16, %s7684_s3 }
 0x1ca   :  { %226 = vrot.lane.b32.xlu2 %v5471_v13, %s7682_s24 }
 0x1cb   :  { %215 = vrot.lane.b32.xlu0 %v5475_v15, %s7684_s3  ;;  %s7738_s3 = smov 24  }
 0x20c   :  { %v208_v17 = vpop.permute.xlu2 %207 }
 0x20d   :  { %273 = vrot.lane.b32.xlu1 %v208_v17, %s7682_s24 }
 0x214   :  { %v206_v18 = vpop.permute.xlu2 %205 }
 0x21c   :  { %v212_v19 = vpop.permute.xlu1 %211  ;;  %v5508_v22 = vpop.permute.xlu2 %217 }
 0x21d   :  { %315 = vrot.lane.b32.xlu2 %v212_v19, %s7682_s24  ;;  %v4874_v28 = vpack.i.bf16 %v212_v19, %v206_v18 }
 0x224   :  { %v5503_v20 = vpop.permute.xlu1 %203  ;;  %v227_v25 = vpop.permute.xlu2 %226 }
 0x225   :  { %v214_v21 = vpop.permute.xlu0 %213  ;;  %269 = vrot.lane.b32.xlu1 %v5503_v20, %s7682_s24  ;;  %271 = vrot.lane.b32.xlu2 %v206_v18, %s7682_s24 }
 0x226   :  { %317 = vrot.lane.b32.xlu0 %v214_v21, %s7682_s24 }
 0x22c   :  { %v229_v23 = vpop.permute.xlu1 %228 }
 0x22d   :  { %v5511_v24 = vpop.permute.xlu0 %209  ;;  %4543 = vmatpush.xpose.msk.msra.mxu1 %vm230_vm12, %v229_v23  ;;  %359 = vrot.lane.b32.xlu2 %v5508_v22, %s7682_s24 }
 0x22e   :  { %313 = vrot.lane.b32.xlu0 %v5511_v24, %s7682_s24 }
 0x231   :  { %4544 = vmatpush.xpose.msk.msra.mxu1 %vm230_vm12, %v227_v25 }
 0x234   :  { %v225_v26 = vpop.permute.xlu1 %224 }
 0x235   :  { %v5519_v27 = vpop.permute.xlu0 %219  ;;  %597 = vrot.lane.b32.xlu2 %v208_v17, %s7680_s25  ;;  %4545 = vmatpush.xpose.msk.msra.mxu1 %vm230_vm12, %v225_v26  ;;  %v4879_v26 = vpack.i.bf16 %v5511_v24, %v5503_v20 }
 0x236   :  { %361 = vrot.lane.b32.xlu0 %v5519_v27, %s7682_s24 }
 0x238   :  { %4546 = vmatmul.msk.f32.vlgmr.msra.gmra.mxu1 %vm230_vm12, %v5475_v15 }
 0x23d   :  { %v5527_v29 = vpop.permute.xlu0 %215 }
 0x23e   :  { %4875 = vrot.lane.b32.xlu0 %v4874_v28, %s7680_s25  ;;  %357 = vrot.lane.b32.xlu1 %v5527_v29, %s7682_s24  ;;  %v4884_v28 = vpack.i.bf16 %v5527_v29, %v5508_v22  ;;  %s7733_s24 = smov 104  }
 0x240   :  { %4547 = vmatmul.msk.f32.gmra.mxu1 %vm230_vm12, %v5471_v13 }
 0x246   :  { %642 = vrot.lane.b32.xlu1 %v214_v21, %s7680_s25 }
 0x248   :  { %4548 = vmatmul.msk.f32.gmra.mxu1 %vm230_vm12, %v5477_v16 }
 0x277   :  { %v316_v30 = vpop.permute.xlu2 %315 }
 0x27f   :  { %v274_v31 = vpop.permute.xlu1 %273  ;;  %v272_v32 = vpop.permute.xlu2 %271 }
 0x280   :  { %4549 = vmatpush.xpose.msk.msrb.mxu1 %vm230_vm12, %v274_v31  ;;  %4862 = vmatpush.xpose.msk.msra.mxu2 %vm230_vm12, %v274_v31 }
 0x284   :  { %4550 = vmatpush.xpose.msk.msrb.mxu1 %vm230_vm12, %v272_v32  ;;  %4863 = vmatpush.xpose.msk.msra.mxu2 %vm230_vm12, %v272_v32 }
 0x287   :  { %v360_v33 = vpop.permute.xlu2 %359 }
 0x28f   :  { %v598_v35 = vpop.permute.xlu2 %597 }
 0x297   :  { %v270_v34 = vpop.permute.xlu1 %269 }
 0x298   :  { %v318_v36 = vpop.permute.xlu0 %317  ;;  %4551 = vmatpush.xpose.msk.msrb.mxu1 %vm230_vm12, %v270_v34  ;;  %4864 = vmatpush.xpose.msk.msra.mxu2 %vm230_vm12, %v270_v34 }
 0x299   :  { %4555 = vmatpush.xpose.msk.msra.mxu3 %vm230_vm12, %v318_v36 }
 0x29b   :  { %4552 = vmatmul.msk.f32.vlgmr.msrb.gmra.mxu1 %vm230_vm12, %v5503_v20  ;;  %4553 = vmatmul.msk.f32.vlgmr.msra.gmra.mxu2 %vm230_vm12, %v206_v18 }
 0x29c   :  { %4571 = vmatpush.msk.msrb.mxu2 %vm564_vm13, %v598_v35 }
 0x29d   :  { %4556 = vmatpush.xpose.msk.msra.mxu3 %vm230_vm12, %v316_v30 }
 0x2a0   :  { %v314_v37 = vpop.permute.xlu0 %313 }
 0x2a1   :  { %4557 = vmatpush.xpose.msk.msra.mxu3 %vm230_vm12, %v314_v37 }
 0x2a3   :  { %4554 = vmatmul.msk.f32.gmra.mxu2 %vm230_vm12, %v208_v17 }
 0x2a4   :  { %4558 = vmatmul.msk.f32.vlgmr.msra.gmra.mxu3 %vm230_vm12, %v5511_v24 }
 0x2a8   :  { %v362_v38 = vpop.permute.xlu0 %361 }
 0x2a9   :  { %4561 = vmatpush.xpose.msk.msrb.mxu0 %vm230_vm12, %v362_v38 }
 0x2ac   :  { %4559 = vmatmul.msk.f32.gmra.mxu3 %vm230_vm12, %v212_v19 }
 0x2ad   :  { %4562 = vmatpush.xpose.msk.msrb.mxu0 %vm230_vm12, %v360_v33 }
 0x2b0   :  { %v358_v39 = vpop.permute.xlu1 %357  ;;  %v4876_v40 = vpop.permute.xlu0 %4875 }
 0x2b1   :  { %4563 = vmatpush.xpose.msk.msrb.mxu0 %vm230_vm12, %v358_v39  ;;  %v4877_v41 = vunpack.i.l.bf16 %v4876_v40  ;;  %v4878_v47 = vunpack.i.h.bf16 %v4876_v40 }
 0x2b3   :  { %626 = vmatpush.msrb.mxu2 %v4877_v41 }
 0x2b4   :  { %4560 = vmatmul.msk.f32.gmra.mxu3 %vm230_vm12, %v214_v21  ;;  %4564 = vmatmul.msk.f32.vlgmr.msrb.gmra.mxu0 %vm230_vm12, %v5527_v29 }
 0x2b5   :  { %v260_v43 = vpop.f32.mrf.mxu1 }
 0x2b6   :  { %v5563_v44 = vadd.f32 %v260_v43, %v221_v42 }
 0x2b8   :  { %v643_v45 = vpop.permute.xlu1 %642  ;;  %v402_v46 = vsel %vm401_vm14, %v5563_v44, -inf }
 0x2b9   :  { %4575 = vmatpush.msk.msrb.mxu3 %vm564_vm13, %v643_v45  ;;  %403 = vmax.xlane.f32.xlu0 %v402_v46 }
 0x2bb   :  { %671 = vmatpush.msrb.mxu3 %v4878_v47 }
 0x2bc   :  { %4565 = vmatmul.msk.f32.gmra.mxu0 %vm230_vm12, %v5508_v22 }
 0x2bd   :  { %v263_v49 = vpop.f32.mrf.mxu1 }
 0x2be   :  { %v5573_v50 = vadd.f32 %v263_v49, %v222_v48 }
 0x2c0   :  { %v405_v51 = vsel %vm401_vm14, %v5573_v50, -inf }
 0x2c1   :  { %406 = vmax.xlane.f32.xlu1 %v405_v51 }
 0x2c4   :  { %4566 = vmatmul.msk.f32.gmra.mxu0 %vm230_vm12, %v5519_v27 }
 0x2c5   :  { %v266_v53 = vpop.f32.mrf.mxu1 }
 0x2c6   :  { %v5582_v54 = vadd.f32 %v266_v53, %v223_v52 }
 0x2c8   :  { %v409_v55 = vsel %vm408_vm15, %v5582_v54, -inf }
 0x2c9   :  { %410 = vmax.xlane.f32.xlu1 %v409_v55 }
 0x318   :  { %v304_v56 = vpop.f32.mrf.mxu1 }
 0x319   :  { %v305_v57 = vadd.f32 %v304_v56, %v221_v42 }
 0x31b   :  { %v412_v58 = vsel %vm401_vm14, %v305_v57, -inf }
 0x31c   :  { %413 = vmax.xlane.f32.xlu0 %v412_v58 }
 0x31e   :  { %v307_v59 = vpop.f32.mrf.mxu2 }
 0x31f   :  { %v308_v60 = vadd.f32 %v307_v59, %v222_v48 }
 0x321   :  { %v415_v61 = vsel %vm401_vm14, %v308_v60, -inf }
 0x322   :  { %416 = vmax.xlane.f32.xlu1 %v415_v61 }
 0x326   :  { %v310_v62 = vpop.f32.mrf.mxu2 }
 0x327   :  { %v5588_v63 = vadd.f32 %v310_v62, %v223_v52  ;;  %v348_v0 = vpop.f32.mrf.mxu3 }
 0x328   :  { %v349_v1 = vadd.f32 %v348_v0, %v221_v42 }
 0x329   :  { %v418_v2 = vsel %vm408_vm15, %v5588_v63, -inf }
 0x32a   :  { %419 = vmax.xlane.f32.xlu1 %v418_v2  ;;  %v421_v3 = vsel %vm401_vm14, %v349_v1, -inf }
 0x32b   :  { %422 = vmax.xlane.f32.xlu2 %v421_v3 }
 0x32c   :  { %v404_v31 = vpop.xlane.xlu0 %403 }
 0x32f   :  { %v351_v4 = vpop.f32.mrf.mxu3 }
 0x330   :  { %v352_v5 = vadd.f32 %v351_v4, %v222_v48 }
 0x331   :  { %v392_v6 = vpop.f32.mrf.mxu0 }
 0x332   :  { %v393_v7 = vadd.f32 %v392_v6, %v221_v42  ;;  %v424_v8 = vsel %vm401_vm14, %v352_v5, -inf }
 0x333   :  { %425 = vmax.xlane.f32.xlu2 %v424_v8 }
 0x334   :  { %v430_v9 = vsel %vm401_vm14, %v393_v7, -inf  ;;  %v407_v30 = vpop.xlane.xlu1 %406 }
 0x335   :  { %431 = vmax.xlane.f32.xlu0 %v430_v9  ;;  %v440_v4 = vsub.f32 %v5573_v50, %v407_v30 }
 0x337   :  { %v354_v10 = vpop.f32.mrf.mxu3  ;;  %v453_v9 = vmul.f32 1.442695, %v440_v4 }
 0x338   :  { %v355_v11 = vadd.f32 %v354_v10, %v223_v52 }
 0x339   :  { %v395_v14 = vpop.f32.mrf.mxu0 }
 0x33a   :  { %v396_v17 = vadd.f32 %v395_v14, %v222_v48  ;;  %v427_v18 = vsel %vm408_vm15, %v355_v11, -inf }
 0x33b   :  { %428 = vmax.xlane.f32.xlu2 %v427_v18 }
 0x33c   :  { %v433_v19 = vsel %vm401_vm14, %v396_v17, -inf  ;;  %v5609_v32 = vpop.xlane.xlu1 %410 }
 0x33d   :  { %434 = vmax.xlane.f32.xlu0 %v433_v19  ;;  %v441_v14 = vsub.f32 %v5582_v54, %v5609_v32 }
 0x341   :  { %v398_v21 = vpop.f32.mrf.mxu0 }
 0x342   :  { %v5597_v23 = vadd.f32 %v398_v21, %v223_v52 }
 0x344   :  { %v436_v25 = vsel %vm408_vm15, %v5597_v23, -inf }
 0x345   :  { %437 = vmax.xlane.f32.xlu1 %v436_v25  ;;  %v455_v25 = vmul.f32 1.442695, %v441_v14 }
 0x351   :  { %4880 = vrot.lane.b32.xlu0 %v4879_v26, %s7680_s25 }
 0x353   :  { %4885 = vrot.lane.b32.xlu2 %v4884_v28, %s7680_s25 }
 0x35e   :  { %687 = vrot.lane.b32.xlu1 %v5519_v27, %s7680_s25 }
 0x38f   :  { %v414_v33 = vpop.xlane.xlu0 %413 }
 0x390   :  { %v442_v34 = vsub.f32 %v305_v57, %v414_v33  ;;  %v439_v57 = vsub.f32 %v5563_v44, %v404_v31 }
 0x392   :  { %v457_v35 = vmul.f32 1.442695, %v442_v34  ;;  %v451_v0 = vmul.f32 1.442695, %v439_v57 }
 0x394   :  { %5000 = vpow2.f32 %v457_v35  ;;  %v4889_v35 = vpack.i.bf16 %v5475_v15, %v5471_v13 }
 0x395   :  { %v417_v36 = vpop.xlane.xlu1 %416 }
 0x396   :  { %v443_v20 = vsub.f32 %v308_v60, %v417_v36 }
 0x398   :  { %v459_v24 = vmul.f32 1.442695, %v443_v20 }
 0x39a   :  { %v5611_v37 = vpop.eup %5000  ;;  %5002 = vpow2.f32 %v459_v24 }
 0x39b   :  { %v484_v22 = vsel %vm401_vm14, %v5611_v37, 0.0 }
 0x39c   :  { %485 = vadd.xlane.f32.xlu2 %v484_v22 }
 0x39d   :  { %v420_v51 = vpop.xlane.xlu1 %419 }
 0x39e   :  { %v423_v29 = vpop.xlane.xlu2 %422  ;;  %v444_v60 = vsub.f32 %v5588_v63, %v420_v51 }
 0x39f   :  { %v445_v45 = vsub.f32 %v349_v1, %v423_v29 }
 0x3a0   :  { %v5615_v27 = vpop.eup %5002  ;;  %v461_v1 = vmul.f32 1.442695, %v444_v60 }
 0x3a1   :  { %v487_v38 = vsel %vm401_vm14, %v5615_v27, 0.0  ;;  %v463_v47 = vmul.f32 1.442695, %v445_v45 }
 0x3a4   :  { %488 = vadd.xlane.f32.xlu2 %v487_v38 }
 0x3a6   :  { %v426_v39 = vpop.xlane.xlu2 %425 }
 0x3a7   :  { %v446_v40 = vsub.f32 %v352_v5, %v426_v39 }
 0x3a8   :  { %v432_v41 = vpop.xlane.xlu0 %431 }
 0x3a9   :  { %v465_v42 = vmul.f32 1.442695, %v446_v40  ;;  %v448_v43 = vsub.f32 %v393_v7, %v432_v41 }
 0x3ab   :  { %5004 = vpow2.f32 %v465_v42  ;;  %v469_v46 = vmul.f32 1.442695, %v448_v43 }
 0x3ad   :  { %5006 = vpow2.f32 %v469_v46 }
 0x3ae   :  { %v429_v48 = vpop.xlane.xlu2 %428  ;;  %5008 = vpow2.f32 %v463_v47 }
 0x3af   :  { %v447_v49 = vsub.f32 %v355_v11, %v429_v48 }
 0x3b0   :  { %v435_v52 = vpop.xlane.xlu0 %434 }
 0x3b1   :  { %v5619_v53 = vpop.eup %5004  ;;  %v467_v55 = vmul.f32 1.442695, %v447_v49  ;;  %v449_v56 = vsub.f32 %v396_v17, %v435_v52 }
 0x3b2   :  { %v496_v58 = vsel %vm401_vm14, %v5619_v53, 0.0 }
 0x3b3   :  { %v5624_v59 = vpop.eup %5006  ;;  %5010 = vpow2.f32 %v467_v55  ;;  %v471_v61 = vmul.f32 1.442695, %v449_v56  ;;  %497 = vadd.xlane.f32.xlu2 %v496_v58 }
 0x3b4   :  { %v502_v62 = vsel %vm401_vm14, %v5624_v59, 0.0  ;;  %v5629_v2 = vpop.eup %5008 }
 0x3b5   :  { %5012 = vpow2.f32 %v471_v61  ;;  %503 = vadd.xlane.f32.xlu0 %v502_v62  ;;  %v493_v7 = vsel %vm401_vm14, %v5629_v2, 0.0 }
 0x3b6   :  { %5014 = vpow2.f32 %v451_v0  ;;  %v4886_v31 = vpop.permute.xlu2 %4885 }
 0x3b7   :  { %5016 = vpow2.f32 %v461_v1  ;;  %v4887_v34 = vunpack.i.l.bf16 %v4886_v31  ;;  %v4888_v36 = vunpack.i.h.bf16 %v4886_v31 }
 0x3b8   :  { %v438_v44 = vpop.xlane.xlu1 %437  ;;  %5018 = vpow2.f32 %v453_v9 }
 0x3b9   :  { %v5631_v3 = vpop.eup %5010  ;;  %v450_v6 = vsub.f32 %v5597_v23, %v438_v44 }
 0x3ba   :  { %v499_v63 = vsel %vm408_vm15, %v5631_v3, 0.0 }
 0x3bb   :  { %v5636_v5 = vpop.eup %5012  ;;  %500 = vadd.xlane.f32.xlu2 %v499_v63  ;;  %v473_v10 = vmul.f32 1.442695, %v450_v6 }
 0x3bc   :  { %v505_v8 = vsel %vm401_vm14, %v5636_v5, 0.0  ;;  %v5643_v50 = vpop.eup %5014 }
 0x3bd   :  { %494 = vadd.xlane.f32.xlu0 %v493_v7  ;;  %506 = vadd.xlane.f32.xlu1 %v505_v8  ;;  %v5645_v11 = vpop.eup %5016  ;;  %5020 = vpow2.f32 %v473_v10  ;;  %v475_v19 = vsel %vm401_vm14, %v5643_v50, 0.0 }
 0x3be   :  { %v490_v18 = vsel %vm408_vm15, %v5645_v11, 0.0  ;;  %v5653_v26 = vpop.eup %5018  ;;  %5022 = vpow2.f32 %v455_v25  ;;  %v776_v25 = vld [vmem:[%s7660_s6 + $0x8] sm:$0xff] }
 0x3bf   :  { %v478_v30 = vsel %vm401_vm14, %v5653_v26, 0.0 }
 0x3c3   :  { %v4881_v17 = vpop.permute.xlu0 %4880  ;;  %v5655_v28 = vpop.eup %5020 }
 0x3c4   :  { %v4882_v21 = vunpack.i.l.bf16 %v4881_v17  ;;  %v4883_v23 = vunpack.i.h.bf16 %v4881_v17  ;;  %v508_v54 = vsel %vm408_vm15, %v5655_v28, 0.0  ;;  %v5661_v33 = vpop.eup %5022 }
 0x3c5   :  { %491 = vadd.xlane.f32.xlu0 %v490_v18  ;;  %476 = vadd.xlane.f32.xlu1 %v475_v19  ;;  %v481_v20 = vsel %vm408_vm15, %v5661_v33, 0.0 }
 0x3c6   :  { %627 = vmatpush.msrb.mxu2 %v4882_v21  ;;  %672 = vmatpush.msrb.mxu3 %v4883_v23  ;;  %v778_v21 = vld [vmem:[%s7660_s6 + $0x18] sm:$0xff]  ;;  %v777_v23 = vld [vmem:[%s7660_s6 + $0x10] sm:$0xff] }
 0x3cd   :  { %509 = vadd.xlane.f32.xlu0 %v508_v54  ;;  %479 = vadd.xlane.f32.xlu1 %v478_v30 }
 0x3d0   :  { %v688_v32 = vpop.permute.xlu1 %687 }
 0x3d1   :  { %4579 = vmatpush.msk.msra.mxu0 %vm564_vm13, %v688_v32 }
 0x3d3   :  { %716 = vmatpush.msra.mxu0 %v4887_v34  ;;  %4890 = vrot.lane.b32.xlu2 %v4889_v35, %s7680_s25 }
 0x3d5   :  { %717 = vmatpush.msra.mxu0 %v4888_v36  ;;  %482 = vadd.xlane.f32.xlu1 %v481_v20 }
 0x3e1   :  { %551 = vrot.lane.b32.xlu0 %v5477_v16, %s7680_s25  ;;  %s7734_s25 = smov 96  }
 0x40f   :  { %v486_v24 = vpop.xlane.xlu2 %485 }
 0x410   :  { %5024 = vrcp.f32 %v486_v24 }
 0x416   :  { %v5025_v22 = vpop.eup %5024 }
 0x417   :  { %v489_v29 = vpop.xlane.xlu2 %488  ;;  %v526_v38 = vmul.f32 %v5025_v22, %v5611_v37 }
 0x418   :  { %5026 = vrcp.f32 %v489_v29 }
 0x419   :  { %538 = vst.msk [vmem:[%s7658_s21 + $0x18] sm:$0xff] %vm401_vm14, %v526_v38  ;;  %4572 = vmatmul.msk.f32.vlgmr.msrb.gmra.mxu2 %vm401_vm14, %v526_v38 }
 0x41e   :  { %v5027_v13 = vpop.eup %5026 }
 0x41f   :  { %v527_v15 = vmul.f32 %v5027_v13, %v5615_v27 }
 0x421   :  { %539 = vst.msk [vmem:[%s7658_s21 + $0x20] sm:$0xff] %vm401_vm14, %v527_v15  ;;  %4573 = vmatmul.msk.f32.gmra.mxu2 %vm401_vm14, %v527_v15 }
 0x426   :  { %v498_v16 = vpop.xlane.xlu2 %497 }
 0x427   :  { %5028 = vrcp.f32 %v498_v16 }
 0x428   :  { %v504_v37 = vpop.xlane.xlu0 %503 }
 0x429   :  { %5030 = vrcp.f32 %v504_v37 }
 0x42d   :  { %v5029_v39 = vpop.eup %5028 }
 0x42e   :  { %v501_v40 = vpop.xlane.xlu2 %500  ;;  %v530_v41 = vmul.f32 %v5029_v39, %v5619_v53 }
 0x42f   :  { %v5031_v42 = vpop.eup %5030  ;;  %5032 = vrcp.f32 %v501_v40 }
 0x430   :  { %v532_v43 = vmul.f32 %v5031_v42, %v5624_v59  ;;  %v507_v27 = vpop.xlane.xlu1 %506  ;;  %v495_v45 = vpop.xlane.xlu0 %494  ;;  %542 = vst.msk [vmem:[%s7658_s21 + $0x38] sm:$0xff] %vm401_vm14, %v530_v41  ;;  %v4958_v42 = vld [vmem:[%s7659_s7] ss:$0 sm:$0xff] }
 0x431   :  { %5034 = vrcp.f32 %v507_v27 }
 0x432   :  { %544 = vst.msk [vmem:[%s7658_s21 + $0x48] sm:$0xff] %vm401_vm14, %v532_v43  ;;  %5036 = vrcp.f32 %v495_v45  ;;  %4580 = vmatmul.msk.f32.vlgmr.msra.gmra.mxu0 %vm401_vm14, %v532_v43  ;;  %v5294_v45 = vld [vmem:[%s7725_s26] sm:$0xff] }
 0x435   :  { %v5033_v46 = vpop.eup %5032 }
 0x436   :  { %v531_v47 = vmul.f32 %v5033_v46, %v5631_v3  ;;  %v4891_v63 = vpop.permute.xlu2 %4890 }
 0x437   :  { %v5035_v48 = vpop.eup %5034  ;;  %v4892_v6 = vunpack.i.l.bf16 %v4891_v63  ;;  %v4893_v7 = vunpack.i.h.bf16 %v4891_v63 }
 0x438   :  { %v5037_v49 = vpop.eup %5036  ;;  %v477_v51 = vpop.xlane.xlu1 %476  ;;  %v533_v53 = vmul.f32 %v5035_v48, %v5636_v5  ;;  %543 = vst.msk [vmem:[%s7658_s21 + $0x40] sm:$0xf] %vm408_vm15, %v531_v47 }
 0x439   :  { %v492_v52 = vpop.xlane.xlu0 %491  ;;  %5038 = vrcp.f32 %v477_v51  ;;  %v529_v55 = vmul.f32 %v5037_v49, %v5629_v2  ;;  %v5295_v51 = vld [vmem:[%s7725_s26 + $0x8] sm:$0xff] }
 0x43a   :  { %5040 = vrcp.f32 %v492_v52  ;;  %545 = vst.msk [vmem:[%s7658_s21 + $0x50] sm:$0xff] %vm401_vm14, %v533_v53  ;;  %4581 = vmatmul.msk.f32.gmra.mxu0 %vm401_vm14, %v533_v53 }
 0x43b   :  { %541 = vst.msk [vmem:[%s7658_s21 + $0x30] sm:$0xff] %vm401_vm14, %v529_v55  ;;  %4576 = vmatmul.msk.f32.vlgmr.msrb.gmra.mxu3 %vm401_vm14, %v529_v55 }
 0x43f   :  { %v5039_v56 = vpop.eup %5038 }
 0x440   :  { %v5041_v57 = vpop.eup %5040  ;;  %v523_v58 = vmul.f32 %v5039_v56, %v5643_v50  ;;  %v480_v59 = vpop.xlane.xlu1 %479 }
 0x441   :  { %v510_v60 = vpop.xlane.xlu0 %509  ;;  %5042 = vrcp.f32 %v480_v59  ;;  %v528_v61 = vmul.f32 %v5041_v57, %v5645_v11  ;;  %v5296_v57 = vld [vmem:[%s7725_s26 + $0x10] sm:$0xf] }
 0x442   :  { %535 = vst.msk [vmem:[%s7658_s21] sm:$0xff] %vm401_vm14, %v523_v58  ;;  %5044 = vrcp.f32 %v510_v60 }
 0x443   :  { %540 = vst.msk [vmem:[%s7658_s21 + $0x28] sm:$0xf] %vm408_vm15, %v528_v61  ;;  %4574 = vmatmul.msk.f32.gmra.mxu2 %vm401_vm14, %v528_v61  ;;  %4577 = vmatmul.msk.f32.gmra.mxu3 %vm401_vm14, %v530_v41 }
 0x447   :  { %v5043_v62 = vpop.eup %5042 }
 0x448   :  { %v5045_v0 = vpop.eup %5044  ;;  %v483_v1 = vpop.xlane.xlu1 %482  ;;  %v524_v2 = vmul.f32 %v5043_v62, %v5653_v26  ;;  %v775_v26 = vld [vmem:[%s7660_s6] sm:$0xff] }
 0x449   :  { %5046 = vrcp.f32 %v483_v1  ;;  %v534_v44 = vmul.f32 %v5045_v0, %v5655_v28 }
 0x44a   :  { %536 = vst.msk [vmem:[%s7658_s21 + $0x8] sm:$0xff] %vm401_vm14, %v524_v2 }
 0x44b   :  { %4578 = vmatmul.msk.f32.gmra.mxu3 %vm401_vm14, %v531_v47  ;;  %546 = vst.msk [vmem:[%s7658_s21 + $0x58] sm:$0xf] %vm408_vm15, %v534_v44  ;;  %4582 = vmatmul.msk.f32.gmra.mxu0 %vm401_vm14, %v534_v44 }
 0x44f   :  { %v5047_v3 = vpop.eup %5046 }
 0x450   :  { %v525_v4 = vmul.f32 %v5047_v3, %v5661_v33 }
 0x452   :  { %537 = vst.msk [vmem:[%s7658_s21 + $0x10] sm:$0xf] %vm408_vm15, %v525_v4 }
 0x453   :  { %v552_v5 = vpop.permute.xlu0 %551 }
 0x454   :  { %4567 = vmatpush.msk.msra.mxu1 %vm564_vm13, %v552_v5 }
 0x456   :  { %581 = vmatpush.msra.mxu1 %v4892_v6 }
 0x458   :  { %582 = vmatpush.msra.mxu1 %v4893_v7 }
 0x459   :  { %4568 = vmatmul.msk.f32.vlgmr.msra.gmra.mxu1 %vm401_vm14, %v523_v58 }
 0x45a   :  { %804 = vmatpush.msrb.mxu1 %v778_v21 }
 0x45c   :  { %805 = vmatpush.msrb.mxu1 %v777_v23 }
 0x45e   :  { %806 = vmatpush.msrb.mxu1 %v776_v25 }
 0x460   :  { %807 = vmatpush.msrb.mxu1 %v775_v26 }
 0x461   :  { %4569 = vmatmul.msk.f32.gmra.mxu1 %vm401_vm14, %v524_v2 }
 0x469   :  { %4570 = vmatmul.msk.f32.gmra.mxu1 %vm401_vm14, %v525_v4 }
 0x49c   :  { %v629_v8 = vpop.f32.mrf.mxu2 }
 0x49d   :  { %731 = vrot.lane.b32.xlu0 %v629_v8, %s7693_s27 }
 0x4a4   :  { %v632_v9 = vpop.f32.mrf.mxu2 }
 0x4a5   :  { %733 = vrot.lane.b32.xlu0 %v632_v9, %s7693_s27 }
 0x4af   :  { %v719_v10 = vpop.f32.mrf.mxu0 }
 0x4b0   :  { %755 = vrot.lane.b32.xlu2 %v719_v10, %s7690_s28  ;;  %v904_v10 = vld [vmem:[%s7664_s10 + $0x18] sm:$0xff] }
 0x4b1   :  { %930 = vmatpush.msra.mxu2 %v904_v10 }
 0x4b7   :  { %v722_v50 = vpop.f32.mrf.mxu0 }
 0x4b8   :  { %757 = vrot.lane.b32.xlu0 %v722_v50, %s7690_s28  ;;  %v903_v50 = vld [vmem:[%s7664_s10 + $0x10] sm:$0xff] }
 0x4b9   :  { %931 = vmatpush.msra.mxu2 %v903_v50 }
 0x4be   :  { %v674_v11 = vpop.f32.mrf.mxu3 }
 0x4bf   :  { %743 = vrot.lane.b32.xlu1 %v674_v11, %s7695_s4  ;;  %v902_v11 = vld [vmem:[%s7664_s10 + $0x8] sm:$0xff] }
 0x4c0   :  { %932 = vmatpush.msra.mxu2 %v902_v11  ;;  %v1071_v11 = vld [vmem:[%s7666_s12 + $0x38] sm:$0xff] }
 0x4c6   :  { %v677_v14 = vpop.f32.mrf.mxu3  ;;  %v635_v18 = vpop.f32.mrf.mxu2 }
 0x4c7   :  { %745 = vrot.lane.b32.xlu2 %v677_v14, %s7695_s4  ;;  %v901_v14 = vld [vmem:[%s7664_s10] sm:$0xff] }
 0x4c8   :  { %v725_v17 = vpop.f32.mrf.mxu0  ;;  %933 = vmatpush.msra.mxu2 %v901_v14 }
 0x4c9   :  { %759 = vrot.lane.b32.xlu1 %v725_v17, %s7690_s28  ;;  %s7731_s28 = smov 112  }
 0x4ce   :  { %v680_v19 = vpop.f32.mrf.mxu3 }
 0x4cf   :  { %747 = vrot.lane.b32.xlu0 %v680_v19, %s7695_s4  ;;  %735 = vrot.lane.b32.xlu2 %v635_v18, %s7693_s27  ;;  %s7735_s27 = smov 64   ;;  %s7740_s4 = sld [smem:[#allocation7_spill]] }
 0x4d6   :  { %v584_v54 = vpop.f32.mrf.mxu1 }
 0x4de   :  { %v587_v20 = vpop.f32.mrf.mxu1 }
 0x4e6   :  { %v590_v15 = vpop.f32.mrf.mxu1 }
 0x50a   :  { %v756_v30 = vpop.permute.xlu2 %755 }
 0x50f   :  { %v732_v28 = vpop.permute.xlu0 %731 }
 0x510   :  { %v764_v32 = vsel %vm230_vm12, %v584_v54, %v732_v28 }
 0x517   :  { %v734_v31 = vpop.permute.xlu0 %733 }
 0x518   :  { %v765_v22 = vsel %vm230_vm12, %v587_v20, %v734_v31 }
 0x521   :  { %v746_v36 = vpop.permute.xlu2 %745 }
 0x522   :  { %v769_v29 = vsel %vm767_vm2, %v765_v22, %v746_v36 }
 0x529   :  { %v736_v13 = vpop.permute.xlu2 %735 }
 0x52a   :  { %v758_v24 = vpop.permute.xlu0 %757  ;;  %v766_v16 = vsel %vm230_vm12, %v590_v15, %v736_v13  ;;  %v4960_v13 = vld [vmem:[%s7662_s9] ss:$0 sm:$0xff] }
 0x52b   :  { %v773_v38 = vsel %vm771_vm3, %v769_v29, %v758_v24  ;;  %v4959_v24 = vld [vmem:[%s7661_s8] ss:$0 sm:$0xff] }
 0x531   :  { %v744_v33 = vpop.permute.xlu1 %743 }
 0x532   :  { %v768_v34 = vsel %vm767_vm2, %v764_v32, %v744_v33 }
 0x533   :  { %v772_v35 = vsel %vm771_vm3, %v768_v34, %v756_v30 }
 0x534   :  { %4583 = vmatmul.msk.f32.vlgmr.msrb.gmra.mxu1 %vm70_vm0, %v772_v35 }
 0x53b   :  { %v760_v39 = vpop.permute.xlu1 %759 }
 0x53c   :  { %4584 = vmatmul.msk.f32.gmra.mxu1 %vm70_vm0, %v773_v38 }
 0x541   :  { %v748_v37 = vpop.permute.xlu0 %747 }
 0x542   :  { %v770_v40 = vsel %vm767_vm2, %v766_v16, %v748_v37 }
 0x543   :  { %v774_v41 = vsel %vm771_vm3, %v770_v40, %v760_v39 }
 0x544   :  { %4585 = vmatmul.msk.f32.gmra.mxu1 %vm70_vm0, %v774_v41 }
 0x5b1   :  { %v809_v43 = vpop.f32.mrf.mxu1 }
 0x5b2   :  { %v810_v27 = vadd.f32 %v4958_v42, %v809_v43 }
 0x5b4   :  { %v5783_v46 = vadd.f32 %v5294_v45, %v810_v27 }
 0x5b6   :  { %v823_v47 = vsel %vm70_vm0, %v5783_v46, 0.0 }
 0x5b7   :  { %824 = vadd.xlane.f32.xlu2 %v823_v47 }
 0x5b9   :  { %v812_v48 = vpop.f32.mrf.mxu1 }
 0x5ba   :  { %v813_v49 = vadd.f32 %v4958_v42, %v812_v48 }
 0x5bc   :  { %v5790_v52 = vadd.f32 %v5295_v51, %v813_v49 }
 0x5be   :  { %v826_v53 = vsel %vm70_vm0, %v5790_v52, 0.0 }
 0x5bf   :  { %827 = vadd.xlane.f32.xlu0 %v826_v53 }
 0x5c1   :  { %v815_v55 = vpop.f32.mrf.mxu1 }
 0x5c2   :  { %v816_v56 = vadd.f32 %v4958_v42, %v815_v55 }
 0x5c4   :  { %v5797_v58 = vadd.f32 %v5296_v57, %v816_v56 }
 0x5c6   :  { %v829_v59 = vsel %vm77_vm1, %v5797_v58, 0.0 }
 0x5c7   :  { %830 = vadd.xlane.f32.xlu1 %v829_v59 }
 0x62a   :  { %v825_v60 = vpop.xlane.xlu2 %824 }
 0x62b   :  { %v832_v61 = vmul.f32 %v825_v60, %v5431_v12  ;;  %v1079_v60 = vld [vmem:[%s7666_s12 + $0x78] sm:$0xff] }
 0x62c   :  { %1084 = vmatpush.msra.mxu3 %v1079_v60 }
 0x62d   :  { %v835_v62 = vsub.f32 %v5783_v46, %v832_v61  ;;  %v1078_v61 = vld [vmem:[%s7666_s12 + $0x70] sm:$0xff] }
 0x62e   :  { %1085 = vmatpush.msra.mxu3 %v1078_v61 }
 0x62f   :  { %v838_v0 = vmul.f32 %v835_v62, %v835_v62 }
 0x631   :  { %v841_v1 = vsel %vm70_vm0, %v838_v0, 0.0  ;;  %v1077_v0 = vld [vmem:[%s7666_s12 + $0x68] sm:$0xff] }
 0x632   :  { %v828_v2 = vpop.xlane.xlu0 %827  ;;  %842 = vadd.xlane.f32.xlu2 %v841_v1  ;;  %1086 = vmatpush.msra.mxu3 %v1077_v0 }
 0x633   :  { %v833_v44 = vmul.f32 %v828_v2, %v5431_v12  ;;  %v1076_v2 = vld [vmem:[%s7666_s12 + $0x60] sm:$0xff] }
 0x634   :  { %1087 = vmatpush.msra.mxu3 %v1076_v2 }
 0x635   :  { %v5806_v3 = vsub.f32 %v5790_v52, %v833_v44 }
 0x637   :  { %v839_v4 = vmul.f32 %v5806_v3, %v5806_v3 }
 0x639   :  { %v844_v63 = vsel %vm70_vm0, %v839_v4, 0.0 }
 0x63a   :  { %845 = vadd.xlane.f32.xlu0 %v844_v63  ;;  %v831_v5 = vpop.xlane.xlu1 %830  ;;  %v1074_v63 = vld [vmem:[%s7666_s12 + $0x50] sm:$0xff] }
 0x63b   :  { %v834_v6 = vmul.f32 %v831_v5, %v5431_v12 }
 0x63d   :  { %v5813_v7 = vsub.f32 %v5797_v58, %v834_v6  ;;  %v1073_v6 = vld [vmem:[%s7666_s12 + $0x48] sm:$0xff] }
 0x63f   :  { %v840_v8 = vmul.f32 %v5813_v7, %v5813_v7 }
 0x641   :  { %v847_v9 = vsel %vm77_vm1, %v840_v8, 0.0 }
 0x642   :  { %848 = vadd.xlane.f32.xlu1 %v847_v9  ;;  %v1072_v9 = vld [vmem:[%s7666_s12 + $0x40] sm:$0xff] }
 0x6a5   :  { %v843_v17 = vpop.xlane.xlu2 %842 }
 0x6a6   :  { %v850_v18 = vmul.f32 %v843_v17, %v5431_v12  ;;  %v1070_v17 = vld [vmem:[%s7666_s12 + $0x30] sm:$0xff] }
 0x6a8   :  { %v853_v19 = vadd.f32 1e-05, %v850_v18 }
 0x6aa   :  { %5048 = vrsqrt.f32 %v853_v19  ;;  %vm862_vm5 = vweird.f32 %v853_v19 }
 0x6ad   :  { %v846_v21 = vpop.xlane.xlu0 %845 }
 0x6ae   :  { %v851_v23 = vmul.f32 %v846_v21, %v5431_v12 }
 0x6b0   :  { %v5049_v25 = vpop.eup %5048  ;;  %v854_v26 = vadd.f32 1e-05, %v851_v23 }
 0x6b1   :  { %v857_v28 = vmul.f32 %v5049_v25, %v853_v19  ;;  %vm863_vm4 = vweird.f32 %v5049_v25  ;;  %v1069_v19 = vld [vmem:[%s7666_s12 + $0x28] sm:$0xff] }
 0x6b2   :  { %5050 = vrsqrt.f32 %v854_v26  ;;  %vm864_vm6 = vmor %vm862_vm5, %vm863_vm4  ;;  %vm872_vm8 = vweird.f32 %v854_v26 }
 0x6b3   :  { %v858_v54 = vmul.f32 %v5049_v25, %v857_v28 }
 0x6b5   :  { %v859_v30 = vmul.f32 0.5, %v858_v54  ;;  %v849_v31 = vpop.xlane.xlu1 %848 }
 0x6b6   :  { %v852_v32 = vmul.f32 %v849_v31, %v5431_v12  ;;  %v1067_v31 = vld [vmem:[%s7666_s12 + $0x18] sm:$0xff] }
 0x6b7   :  { %v860_v33 = vsub.f32 1.5, %v859_v30 }
 0x6b8   :  { %v5051_v34 = vpop.eup %5050  ;;  %v855_v35 = vadd.f32 1e-05, %v852_v32 }
 0x6b9   :  { %v861_v36 = vmul.f32 %v5049_v25, %v860_v33  ;;  %v867_v20 = vmul.f32 %v5051_v34, %v854_v26  ;;  %vm873_vm7 = vweird.f32 %v5051_v34 }
 0x6ba   :  { %5052 = vrsqrt.f32 %v855_v35  ;;  %vm874_vm9 = vmor %vm872_vm8, %vm873_vm7  ;;  %vm882_vm11 = vweird.f32 %v855_v35 }
 0x6bb   :  { %v865_v22 = vsel %vm864_vm6, %v5049_v25, %v861_v36  ;;  %v868_v29 = vmul.f32 %v5051_v34, %v867_v20  ;;  %v1068_v25 = vld [vmem:[%s7666_s12 + $0x20] sm:$0xff] }
 0x6bc   :  { %v886_v38 = vmul.f32 %v865_v22, %v835_v62  ;;  %v4961_v62 = vld [vmem:[%s7663_s11] ss:$0 sm:$0xff]  ;;  %v1065_v22 = vld [vmem:[%s7666_s12 + $0x8] sm:$0xff] }
 0x6bd   :  { %v869_v15 = vmul.f32 0.5, %v868_v29 }
 0x6be   :  { %v892_v16 = vmul.f32 %v4959_v24, %v886_v38  ;;  %v1064_v38 = vld [vmem:[%s7666_s12] sm:$0xff] }
 0x6bf   :  { %v870_v37 = vsub.f32 1.5, %v869_v15 }
 0x6c0   :  { %v5053_v39 = vpop.eup %5052  ;;  %v898_v40 = vadd.f32 %v4960_v13, %v892_v16 }
 0x6c1   :  { %v871_v41 = vmul.f32 %v5051_v34, %v870_v37  ;;  %v877_v42 = vmul.f32 %v5053_v39, %v855_v35  ;;  %vm883_vm10 = vweird.f32 %v5053_v39 }
 0x6c2   :  { %4586 = vmatmul.msk.f32.vlgmr.msra.gmra.mxu2 %vm70_vm0, %v898_v40  ;;  %vm884_vm4 = vmor %vm882_vm11, %vm883_vm10 }
 0x6c3   :  { %v878_v43 = vmul.f32 %v5053_v39, %v877_v42  ;;  %v875_v27 = vsel %vm874_vm9, %v5051_v34, %v871_v41  ;;  %v1066_v34 = vld [vmem:[%s7666_s12 + $0x10] sm:$0xff] }
 0x6c4   :  { %v887_v45 = vmul.f32 %v875_v27, %v5806_v3  ;;  %v1075_v3 = vld [vmem:[%s7666_s12 + $0x58] sm:$0xff] }
 0x6c5   :  { %v879_v47 = vmul.f32 0.5, %v878_v43  ;;  %1088 = vmatpush.msra.mxu3 %v1075_v3 }
 0x6c6   :  { %v893_v48 = vmul.f32 %v4959_v24, %v887_v45 }
 0x6c7   :  { %v880_v49 = vsub.f32 1.5, %v879_v47  ;;  %1089 = vmatpush.msra.mxu3 %v1074_v63 }
 0x6c8   :  { %v899_v51 = vadd.f32 %v4960_v13, %v893_v48 }
 0x6c9   :  { %v881_v53 = vmul.f32 %v5053_v39, %v880_v49  ;;  %1090 = vmatpush.msra.mxu3 %v1073_v6 }
 0x6ca   :  { %4587 = vmatmul.msk.f32.gmra.mxu2 %vm70_vm0, %v899_v51 }
 0x6cb   :  { %v885_v55 = vsel %vm884_vm4, %v5053_v39, %v881_v53  ;;  %1091 = vmatpush.msra.mxu3 %v1072_v9 }
 0x6cc   :  { %v888_v56 = vmul.f32 %v885_v55, %v5813_v7 }
 0x6cd   :  { %1092 = vmatpush.msra.mxu3 %v1071_v11 }
 0x6ce   :  { %v894_v57 = vmul.f32 %v4959_v24, %v888_v56 }
 0x6cf   :  { %1093 = vmatpush.msra.mxu3 %v1070_v17 }
 0x6d0   :  { %v900_v59 = vadd.f32 %v4960_v13, %v894_v57 }
 0x6d1   :  { %1094 = vmatpush.msra.mxu3 %v1069_v19 }
 0x6d2   :  { %4588 = vmatmul.msk.f32.gmra.mxu2 %vm70_vm0, %v900_v59 }
 0x6d3   :  { %1095 = vmatpush.msra.mxu3 %v1068_v25 }
 0x6d5   :  { %1096 = vmatpush.msra.mxu3 %v1067_v31 }
 0x6d7   :  { %1097 = vmatpush.msra.mxu3 %v1066_v34 }
 0x6d9   :  { %1098 = vmatpush.msra.mxu3 %v1065_v22 }
 0x6db   :  { %1099 = vmatpush.msra.mxu3 %v1064_v38 }
 0x745   :  { %v935_v1 = vpop.f32.mrf.mxu2 }
 0x746   :  { %v5859_v44 = vadd.f32 %v4961_v62, %v935_v1 }
 0x748   :  { %v5865_v4 = vmul.f32 0.70710677, %v5859_v44 }
 0x74a   :  { %v950_v5 = vand.u32 2147483647, %v5865_v4 }
 0x74c   :  { %v953_v7 = vmul.f32 0.3275911, %v950_v5  ;;  %v1031_v41 = vsub.f32 0.0, %v950_v5 }
 0x74d   :  { %v938_v8 = vpop.f32.mrf.mxu2 }
 0x74e   :  { %v956_v10 = vadd.f32 1.0, %v953_v7  ;;  %v5877_v50 = vadd.f32 %v4961_v62, %v938_v8  ;;  %v1034_v48 = vmul.f32 %v1031_v41, %v950_v5 }
 0x750   :  { %5054 = vrcp.f32 %v956_v10  ;;  %v5883_v14 = vmul.f32 0.70710677, %v5877_v50  ;;  %v970_v35 = vand.u32 2147483648, %v956_v10  ;;  %v968_v24 = vand.u32 2147483647, %v956_v10 }
 0x751   :  { %vm964_vm6 = vweird.f32 %v956_v10  ;;  %v1037_v61 = vmul.f32 1.442695, %v1034_v48 }
 0x752   :  { %v5889_v18 = vand.u32 2147483647, %v5883_v14  ;;  %v971_v15 = vor.u32 1.1754944e-38, %v970_v35  ;;  %vm969_vm8 = vcmp.eq.f32.partialorder %v968_v24, 8.507059e+37 }
 0x754   :  { %v954_v21 = vmul.f32 0.3275911, %v5889_v18  ;;  %v1032_v1 = vsub.f32 0.0, %v5889_v18 }
 0x755   :  { %v941_v23 = vpop.f32.mrf.mxu2 }
 0x756   :  { %v5055_v26 = vpop.eup %5054  ;;  %v5898_v28 = vadd.f32 %v4961_v62, %v941_v23  ;;  %v957_v30 = vadd.f32 1.0, %v954_v21  ;;  %v1035_v11 = vmul.f32 %v1032_v1, %v5889_v18 }
 0x757   :  { %v960_v54 = vmul.f32 %v5055_v26, %v956_v10  ;;  %vm965_vm5 = vweird.f32 %v5055_v26 }
 0x758   :  { %v5904_v32 = vmul.f32 0.70710677, %v5898_v28  ;;  %5056 = vrcp.f32 %v957_v30  ;;  %vm966_vm7 = vmor %vm964_vm6, %vm965_vm5  ;;  %v985_v47 = vand.u32 2147483648, %v957_v30  ;;  %v983_v51 = vand.u32 2147483647, %v957_v30 }
 0x759   :  { %v961_v33 = vsub.f32 1.0, %v960_v54  ;;  %vm979_vm10 = vweird.f32 %v957_v30 }
 0x75a   :  { %v5910_v36 = vand.u32 2147483647, %v5904_v32  ;;  %v986_v60 = vor.u32 1.1754944e-38, %v985_v47  ;;  %vm984_vm4 = vcmp.eq.f32.partialorder %v983_v51, 8.507059e+37 }
 0x75b   :  { %v962_v20 = vmul.f32 %v5055_v26, %v961_v33  ;;  %v1039_v33 = vmul.f32 1.442695, %v1035_v11 }
 0x75c   :  { %v955_v29 = vmul.f32 0.3275911, %v5910_v36 }
 0x75d   :  { %v963_v13 = vadd.f32 %v5055_v26, %v962_v20 }
 0x75e   :  { %v958_v16 = vadd.f32 1.0, %v955_v29  ;;  %v5057_v37 = vpop.eup %5056 }
 0x75f   :  { %v967_v39 = vsel %vm966_vm7, %v5055_v26, %v963_v13  ;;  %v975_v42 = vmul.f32 %v5057_v37, %v957_v30  ;;  %vm980_vm9 = vweird.f32 %v5057_v37  ;;  %v1033_v26 = vsub.f32 0.0, %v5910_v36 }
 0x760   :  { %v972_v40 = vsel %vm969_vm8, %v971_v15, %v967_v39  ;;  %5058 = vrcp.f32 %v958_v16  ;;  %vm981_vm11 = vmor %vm979_vm10, %vm980_vm9  ;;  %v1000_v5 = vand.u32 2147483648, %v958_v16  ;;  %v998_v8 = vand.u32 2147483647, %v958_v16 }
 0x761   :  { %v1004_v43 = vmul.f32 1.0614054, %v972_v40  ;;  %v976_v27 = vsub.f32 1.0, %v975_v42  ;;  %5060 = vpow2.f32 %v1037_v61  ;;  %vm994_vm6 = vweird.f32 %v958_v16 }
 0x762   :  { %v1001_v21 = vor.u32 1.1754944e-38, %v1000_v5  ;;  %vm999_vm8 = vcmp.eq.f32.partialorder %v998_v8, 8.507059e+37  ;;  %v1036_v18 = vmul.f32 %v1033_v26, %v5910_v36  ;;  %5062 = vpow2.f32 %v1039_v33 }
 0x763   :  { %v1007_v45 = vadd.f32 -1.4531521, %v1004_v43  ;;  %v977_v49 = vmul.f32 %v5057_v37, %v976_v27  ;;  %vm1049_vm9 = vcmp.lt.f32.partialorder %v5865_v4, 0.0  ;;  %v944_v43 = vmul.f32 0.5, %v5859_v44 }
 0x764   :  { %v1041_v39 = vmul.f32 1.442695, %v1036_v18  ;;  %vm1050_vm10 = vcmp.lt.f32.partialorder %v5883_v14, 0.0  ;;  %v4962_v14 = vld [vmem:[%s7665_s13] ss:$0 sm:$0xff]  ;;  %v4594_v18 = vld [vmem:[%s7726_s30 + $0x38] sm:$0xff] }
 0x765   :  { %v1010_v53 = vmul.f32 %v1007_v45, %v972_v40  ;;  %v978_v56 = vadd.f32 %v5057_v37, %v977_v49  ;;  %1226 = vmatpush.msrb.mxu0 %v4594_v18 }
 0x766   :  { %v5059_v55 = vpop.eup %5058  ;;  %5064 = vpow2.f32 %v1041_v39 }
 0x767   :  { %v1013_v57 = vadd.f32 1.4214138, %v1010_v53  ;;  %v990_v59 = vmul.f32 %v5059_v55, %v958_v16  ;;  %v982_v62 = vsel %vm981_vm11, %v5057_v37, %v978_v56  ;;  %vm995_vm5 = vweird.f32 %v5059_v55  ;;  %v5061_v35 = vpop.eup %5060 }
 0x768   :  { %v987_v3 = vsel %vm984_vm4, %v986_v60, %v982_v62  ;;  %vm996_vm7 = vmor %vm994_vm6, %vm995_vm5  ;;  %v5063_v47 = vpop.eup %5062  ;;  %v945_v60 = vmul.f32 0.5, %v5877_v50  ;;  %vm1051_vm11 = vcmp.lt.f32.partialorder %v5904_v32, 0.0 }
 0x769   :  { %v1016_v0 = vmul.f32 %v1013_v57, %v972_v40  ;;  %v991_v2 = vsub.f32 1.0, %v990_v59  ;;  %v1005_v63 = vmul.f32 1.0614054, %v987_v3 }
 0x76b   :  { %v1019_v6 = vadd.f32 -0.28449672, %v1016_v0  ;;  %v992_v7 = vmul.f32 %v5059_v55, %v991_v2  ;;  %v1008_v9 = vadd.f32 -1.4531521, %v1005_v63 }
 0x76c   :  { %v5065_v57 = vpop.eup %5064 }
 0x76d   :  { %v1022_v10 = vmul.f32 %v1019_v6, %v972_v40  ;;  %v993_v17 = vadd.f32 %v5059_v55, %v992_v7  ;;  %v1011_v19 = vmul.f32 %v1008_v9, %v987_v3 }
 0x76f   :  { %v1025_v23 = vadd.f32 0.2548296, %v1022_v10  ;;  %v997_v25 = vsel %vm996_vm7, %v5059_v55, %v993_v17  ;;  %v1014_v54 = vadd.f32 1.4214138, %v1011_v19 }
 0x770   :  { %v1002_v30 = vsel %vm999_vm8, %v1001_v21, %v997_v25 }
 0x771   :  { %v1028_v31 = vmul.f32 %v1025_v23, %v972_v40  ;;  %v1006_v34 = vmul.f32 1.0614054, %v1002_v30  ;;  %v1017_v20 = vmul.f32 %v1014_v54, %v987_v3 }
 0x773   :  { %v1043_v24 = vmul.f32 %v5061_v35, %v1028_v31  ;;  %v1009_v22 = vadd.f32 -1.4531521, %v1006_v34  ;;  %v1020_v29 = vadd.f32 -0.28449672, %v1017_v20 }
 0x775   :  { %v1046_v38 = vsub.f32 1.0, %v1043_v24  ;;  %v1012_v13 = vmul.f32 %v1009_v22, %v1002_v30  ;;  %v1023_v15 = vmul.f32 %v1020_v29, %v987_v3  ;;  %v4593_v29 = vld [vmem:[%s7726_s30 + $0x30] sm:$0xff] }
 0x776   :  { %1227 = vmatpush.msrb.mxu0 %v4593_v29 }
 0x777   :  { %v1052_v16 = vsub.f32 0.0, %v1046_v38  ;;  %v1015_v37 = vadd.f32 1.4214138, %v1012_v13  ;;  %v1026_v41 = vadd.f32 0.2548296, %v1023_v15  ;;  %v4591_v13 = vld [vmem:[%s7726_s30 + $0x20] sm:$0xff] }
 0x779   :  { %v1055_v40 = vsel %vm1049_vm9, %v1052_v16, %v1046_v38  ;;  %v1018_v42 = vmul.f32 %v1015_v37, %v1002_v30  ;;  %v1029_v45 = vmul.f32 %v1026_v41, %v987_v3  ;;  %v946_v3 = vmul.f32 0.5, %v5898_v28  ;;  %v4592_v38 = vld [vmem:[%s7726_s30 + $0x28] sm:$0xff] }
 0x77a   :  { %v1058_v27 = vadd.f32 1.0, %v1055_v40  ;;  %1228 = vmatpush.msrb.mxu0 %v4592_v38 }
 0x77b   :  { %v1021_v48 = vadd.f32 -0.28449672, %v1018_v42  ;;  %v1044_v49 = vmul.f32 %v5063_v47, %v1029_v45 }
 0x77c   :  { %v1061_v36 = vmul.f32 %v1058_v27, %v944_v43  ;;  %1229 = vmatpush.msrb.mxu0 %v4591_v13 }
 0x77d   :  { %v1024_v51 = vmul.f32 %v1021_v48, %v1002_v30  ;;  %v1047_v53 = vsub.f32 1.0, %v1044_v49 }
 0x77e   :  { %1100 = vmatmul.f32.vlgmr.msra.gmra.mxu3 %v1061_v36 }
 0x77f   :  { %v1027_v55 = vadd.f32 0.2548296, %v1024_v51  ;;  %v1053_v56 = vsub.f32 0.0, %v1047_v53 }
 0x781   :  { %v1030_v4 = vmul.f32 %v1027_v55, %v1002_v30  ;;  %v1056_v59 = vsel %vm1050_vm10, %v1053_v56, %v1047_v53  ;;  %v4963_v55 = vld [vmem:[%s7727_s5 + $0x1] ss:$0 sm:$0xff] }
 0x782   :  { %v1059_v44 = vadd.f32 1.0, %v1056_v59 }
 0x783   :  { %v1045_v61 = vmul.f32 %v5065_v57, %v1030_v4 }
 0x784   :  { %v1062_v62 = vmul.f32 %v1059_v44, %v945_v60  ;;  %v4964_v60 = vld [vmem:[%s7728_s0 + $0x1] ss:$0 sm:$0xff] }
 0x785   :  { %v1048_v0 = vsub.f32 1.0, %v1045_v61 }
 0x786   :  { %1103 = vmatmul.f32.gmra.mxu3 %v1062_v62 }
 0x787   :  { %v1054_v1 = vsub.f32 0.0, %v1048_v0 }
 0x789   :  { %v1057_v2 = vsel %vm1051_vm11, %v1054_v1, %v1048_v0 }
 0x78a   :  { %v1060_v63 = vadd.f32 1.0, %v1057_v2 }
 0x78c   :  { %v1063_v5 = vmul.f32 %v1060_v63, %v946_v3 }
 0x78e   :  { %1106 = vmatmul.f32.gmra.mxu3 %v1063_v5 }
 0x801   :  { %v1101_v6 = vpop.f32.mrf.mxu3 }
 0x802   :  { %v1102_v50 = vadd.f32 %v4962_v14, %v1101_v6 }
 0x804   :  { %v5933_v7 = vadd.f32 %v1102_v50, %v5783_v46 }
 0x806   :  { %v1117_v8 = vsel %vm70_vm0, %v5933_v7, 0.0 }
 0x807   :  { %1118 = vadd.xlane.f32.xlu2 %v1117_v8 }
 0x809   :  { %v1104_v32 = vpop.f32.mrf.mxu3 }
 0x80a   :  { %v1105_v9 = vadd.f32 %v4962_v14, %v1104_v32 }
 0x80c   :  { %v5938_v28 = vadd.f32 %v1105_v9, %v5790_v52 }
 0x80e   :  { %v1120_v10 = vsel %vm70_vm0, %v5938_v28, 0.0 }
 0x80f   :  { %1121 = vadd.xlane.f32.xlu0 %v1120_v10 }
 0x811   :  { %v1107_v11 = vpop.f32.mrf.mxu3 }
 0x812   :  { %v1108_v17 = vadd.f32 %v4962_v14, %v1107_v11 }
 0x814   :  { %v5943_v19 = vadd.f32 %v1108_v17, %v5797_v58 }
 0x816   :  { %v1123_v46 = vsel %vm77_vm1, %v5943_v19, 0.0 }
 0x817   :  { %1124 = vadd.xlane.f32.xlu1 %v1123_v46 }
 0x87a   :  { %v1119_v21 = vpop.xlane.xlu2 %1118 }
 0x87b   :  { %v1126_v23 = vmul.f32 %v1119_v21, %v5431_v12 }
 0x87d   :  { %v1129_v25 = vsub.f32 %v5933_v7, %v1126_v23  ;;  %v4965_v23 = vld [vmem:[%s7729_s22 + $0x1] ss:$0 sm:$0xff] }
 0x87f   :  { %v1132_v52 = vmul.f32 %v1129_v25, %v1129_v25 }
 0x881   :  { %v1135_v26 = vsel %vm70_vm0, %v1132_v52, 0.0 }
 0x882   :  { %1136 = vadd.xlane.f32.xlu2 %v1135_v26  ;;  %v1122_v54 = vpop.xlane.xlu0 %1121 }
 0x883   :  { %v1127_v30 = vmul.f32 %v1122_v54, %v5431_v12 }
 0x885   :  { %v1130_v31 = vsub.f32 %v5938_v28, %v1127_v30 }
 0x887   :  { %v1133_v58 = vmul.f32 %v1130_v31, %v1130_v31 }
 0x889   :  { %v1138_v33 = vsel %vm70_vm0, %v1133_v58, 0.0 }
 0x88a   :  { %v1125_v34 = vpop.xlane.xlu1 %1124  ;;  %1139 = vadd.xlane.f32.xlu0 %v1138_v33 }
 0x88b   :  { %v1128_v35 = vmul.f32 %v1125_v34, %v5431_v12 }
 0x88d   :  { %v5955_v20 = vsub.f32 %v5943_v19, %v1128_v35 }
 0x88f   :  { %v1134_v24 = vmul.f32 %v5955_v20, %v5955_v20 }
 0x891   :  { %v1141_v22 = vsel %vm77_vm1, %v1134_v24, 0.0 }
 0x892   :  { %1142 = vadd.xlane.f32.xlu1 %v1141_v22 }
 0x8f5   :  { %v1137_v15 = vpop.xlane.xlu2 %1136 }
 0x8f6   :  { %v1144_v16 = vmul.f32 %v1137_v15, %v5431_v12 }
 0x8f8   :  { %v1147_v37 = vadd.f32 1e-05, %v1144_v16 }
 0x8fa   :  { %5066 = vrsqrt.f32 %v1147_v37  ;;  %vm1156_vm5 = vweird.f32 %v1147_v37 }
 0x8fd   :  { %v1140_v39 = vpop.xlane.xlu0 %1139 }
 0x8fe   :  { %v1145_v41 = vmul.f32 %v1140_v39, %v5431_v12 }
 0x900   :  { %v5067_v40 = vpop.eup %5066  ;;  %v1148_v43 = vadd.f32 1e-05, %v1145_v41 }
 0x901   :  { %v1151_v42 = vmul.f32 %v5067_v40, %v1147_v37  ;;  %vm1157_vm4 = vweird.f32 %v5067_v40 }
 0x902   :  { %5068 = vrsqrt.f32 %v1148_v43  ;;  %vm1158_vm6 = vmor %vm1156_vm5, %vm1157_vm4  ;;  %vm1166_vm8 = vweird.f32 %v1148_v43 }
 0x903   :  { %v1152_v27 = vmul.f32 %v5067_v40, %v1151_v42 }
 0x905   :  { %v1153_v45 = vmul.f32 0.5, %v1152_v27  ;;  %v1143_v47 = vpop.xlane.xlu1 %1142 }
 0x906   :  { %v1146_v36 = vmul.f32 %v1143_v47, %v5431_v12 }
 0x907   :  { %v1154_v48 = vsub.f32 1.5, %v1153_v45 }
 0x908   :  { %v5069_v49 = vpop.eup %5068  ;;  %v1149_v53 = vadd.f32 1e-05, %v1146_v36 }
 0x909   :  { %v1155_v51 = vmul.f32 %v5067_v40, %v1154_v48  ;;  %v1161_v56 = vmul.f32 %v5069_v49, %v1148_v43  ;;  %vm1167_vm7 = vweird.f32 %v5069_v49 }
 0x90a   :  { %5070 = vrsqrt.f32 %v1149_v53  ;;  %vm1168_vm9 = vmor %vm1166_vm8, %vm1167_vm7  ;;  %vm1176_vm11 = vweird.f32 %v1149_v53 }
 0x90b   :  { %v1159_v4 = vsel %vm1158_vm6, %v5067_v40, %v1155_v51  ;;  %v1162_v59 = vmul.f32 %v5069_v49, %v1161_v56 }
 0x90c   :  { %v1180_v57 = vmul.f32 %v1159_v4, %v1129_v25 }
 0x90d   :  { %v1163_v61 = vmul.f32 0.5, %v1162_v59 }
 0x90e   :  { %v1186_v44 = vmul.f32 %v4963_v55, %v1180_v57  ;;  %v4600_v57 = vld [vmem:[%s7730_s29 + $0x20] sm:$0xff] }
 0x90f   :  { %v1164_v62 = vsub.f32 1.5, %v1163_v61 }
 0x910   :  { %v1192_v0 = vadd.f32 %v4964_v60, %v1186_v44  ;;  %v5071_v1 = vpop.eup %5070 }
 0x911   :  { %v1165_v2 = vmul.f32 %v5069_v49, %v1164_v62  ;;  %v1171_v3 = vmul.f32 %v5071_v1, %v1149_v53  ;;  %vm1177_vm10 = vweird.f32 %v5071_v1  ;;  %v4599_v53 = vld [vmem:[%s7730_s29 + $0x18] sm:$0xff] }
 0x912   :  { %4596 = vmatmul.msk.f32.vlgmr.msrb.gmra.mxu0 %vm70_vm0, %v1192_v0  ;;  %vm1178_vm4 = vmor %vm1176_vm11, %vm1177_vm10  ;;  %v4601_v0 = vld [vmem:[%s7730_s29 + $0x28] sm:$0xf] }
 0x913   :  { %v1172_v63 = vmul.f32 %v5071_v1, %v1171_v3  ;;  %v1169_v5 = vsel %vm1168_vm9, %v5069_v49, %v1165_v2 }
 0x914   :  { %v1181_v14 = vmul.f32 %v1169_v5, %v1130_v31 }
 0x915   :  { %v1173_v6 = vmul.f32 0.5, %v1172_v63 }
 0x916   :  { %v1187_v50 = vmul.f32 %v4963_v55, %v1181_v14 }
 0x917   :  { %v1174_v8 = vsub.f32 1.5, %v1173_v6 }
 0x918   :  { %v1193_v32 = vadd.f32 %v4964_v60, %v1187_v50 }
 0x919   :  { %v1175_v9 = vmul.f32 %v5071_v1, %v1174_v8 }
 0x91a   :  { %4597 = vmatmul.msk.f32.gmra.mxu0 %vm70_vm0, %v1193_v32 }
 0x91b   :  { %v1179_v10 = vsel %vm1178_vm4, %v5071_v1, %v1175_v9 }
 0x91c   :  { %v1182_v11 = vmul.f32 %v1179_v10, %v5955_v20 }
 0x91e   :  { %v1188_v17 = vmul.f32 %v4963_v55, %v1182_v11 }
 0x920   :  { %v1194_v46 = vadd.f32 %v4964_v60, %v1188_v17 }
 0x922   :  { %4598 = vmatmul.msk.f32.gmra.mxu0 %vm70_vm0, %v1194_v46 }
 0x98f   :  { %v1231_v21 = vpop.f32.mrf.mxu0 }
 0x990   :  { %v6002_v30 = vadd.f32 %v4965_v23, %v1231_v21 }
 0x997   :  { %v1234_v25 = vpop.f32.mrf.mxu0 }
 0x998   :  { %v5988_v52 = vadd.f32 %v4965_v23, %v1234_v25 }
 0x99a   :  { %1251 = vrot.lane.b32.xlu0 %v5988_v52, %s7731_s28  ;;  %1245 = vrot.lane.b32.xlu1 %v5988_v52, %s7732_s1 }
 0x99f   :  { %v1237_v26 = vpop.f32.mrf.mxu0 }
 0x9a0   :  { %v5994_v54 = vadd.f32 %v4965_v23, %v1237_v26 }
 0x9a2   :  { %1247 = vrot.lane.b32.xlu2 %v5994_v54, %s7732_s1  ;;  %1253 = vrot.lane.b32.xlu0 %v5994_v54, %s7731_s28 }
 0x9a3   :  { %1257 = vrot.lane.b32.xlu1 %v5988_v52, %s7733_s24 }
 0x9aa   :  { %1249 = vrot.lane.b32.xlu0 %v6002_v30, %s7731_s28  ;;  %1243 = vrot.lane.b32.xlu2 %v6002_v30, %s7732_s1 }
 0x9b2   :  { %1255 = vrot.lane.b32.xlu0 %v6002_v30, %s7733_s24  ;;  %1259 = vrot.lane.b32.xlu2 %v5994_v54, %s7733_s24 }
 0x9fc   :  { %v1248_v31 = vpop.permute.xlu2 %1247 }
 0x9fd   :  { %1313 = vrot.lane.b32.xlu2 %v1248_v31, %s7734_s25 }
 0xa04   :  { %v6013_v58 = vpop.permute.xlu2 %1243 }
 0xa0c   :  { %v1252_v33 = vpop.permute.xlu0 %1251  ;;  %v1246_v34 = vpop.permute.xlu1 %1245 }
 0xa0d   :  { %1311 = vrot.lane.b32.xlu0 %v1246_v34, %s7734_s25  ;;  %1355 = vrot.lane.b32.xlu2 %v1252_v33, %s7734_s25  ;;  %v6017_v35 = vpop.permute.xlu2 %1259  ;;  %v4894_v29 = vpack.i.bf16 %v1252_v33, %v1246_v34 }
 0xa14   :  { %v1254_v20 = vpop.permute.xlu0 %1253 }
 0xa15   :  { %1357 = vrot.lane.b32.xlu1 %v1254_v20, %s7734_s25  ;;  %1401 = vrot.lane.b32.xlu2 %v6017_v35, %s7734_s25  ;;  %v6030_v22 = vpop.permute.xlu1 %1257 }
 0xa1c   :  { %v6022_v24 = vpop.permute.xlu0 %1249 }
 0xa1d   :  { %1353 = vrot.lane.b32.xlu0 %v6022_v24, %s7734_s25  ;;  %1309 = vrot.lane.b32.xlu1 %v6013_v58, %s7734_s25 }
 0xa1e   :  { %1269 = vrot.lane.b32.xlu2 %v5994_v54, %s7734_s25 }
 0xa24   :  { %v6032_v18 = vpop.permute.xlu0 %1255 }
 0xa25   :  { %1397 = vrot.lane.b32.xlu0 %v6032_v18, %s7734_s25  ;;  %1399 = vrot.lane.b32.xlu1 %v6030_v22, %s7734_s25 }
 0xa26   :  { %1680 = vrot.lane.b32.xlu2 %v1254_v20, %s7735_s27 }
 0xa2d   :  { %1265 = vrot.lane.b32.xlu0 %v6002_v30, %s7734_s25  ;;  %1267 = vrot.lane.b32.xlu1 %v5988_v52, %s7734_s25 }
 0xa35   :  { %4895 = vrot.lane.b32.xlu0 %v4894_v29, %s7735_s27  ;;  %1635 = vrot.lane.b32.xlu1 %v1248_v31, %s7735_s27 }
 0xa57   :  { %v1314_v38 = vpop.permute.xlu2 %1313 }
 0xa58   :  { %4608 = vmatpush.xpose.msk.msrb.mxu2 %vm230_vm12, %v1314_v38  ;;  %v4899_v38 = vpack.i.bf16 %v6022_v24, %v6013_v58 }
 0xa67   :  { %v1356_v13 = vpop.permute.xlu2 %1355 }
 0xa6f   :  { %v1402_v15 = vpop.permute.xlu2 %1401 }
 0xa70   :  { %4620 = vmatpush.xpose.msk.msra.mxu0 %vm230_vm12, %v1402_v15 }
 0xa78   :  { %v1270_v16 = vpop.permute.xlu2 %1269 }
 0xa79   :  { %4602 = vmatpush.xpose.msk.msra.mxu1 %vm230_vm12, %v1270_v16 }
 0xa7f   :  { %v1312_v37 = vpop.permute.xlu0 %1311 }
 0xa80   :  { %4609 = vmatpush.xpose.msk.msrb.mxu2 %vm230_vm12, %v1312_v37  ;;  %v1681_v42 = vpop.permute.xlu2 %1680 }
 0xa87   :  { %v1358_v39 = vpop.permute.xlu1 %1357 }
 0xa88   :  { %4614 = vmatpush.xpose.msk.msrb.mxu3 %vm230_vm12, %v1358_v39 }
 0xa8c   :  { %4615 = vmatpush.xpose.msk.msrb.mxu3 %vm230_vm12, %v1356_v13 }
 0xa8f   :  { %v1354_v41 = vpop.permute.xlu0 %1353  ;;  %v1310_v40 = vpop.permute.xlu1 %1309 }
 0xa90   :  { %4610 = vmatpush.xpose.msk.msrb.mxu2 %vm230_vm12, %v1310_v40  ;;  %4616 = vmatpush.xpose.msk.msrb.mxu3 %vm230_vm12, %v1354_v41 }
 0xa93   :  { %4611 = vmatmul.msk.f32.vlgmr.msrb.gmra.mxu2 %vm230_vm12, %v6013_v58  ;;  %4617 = vmatmul.msk.f32.vlgmr.msrb.gmra.mxu3 %vm230_vm12, %v6022_v24 }
 0xa94   :  { %4646 = vmatpush.msk.msra.mxu3 %vm564_vm13, %v1681_v42 }
 0xa97   :  { %v1398_v43 = vpop.permute.xlu0 %1397  ;;  %v1400_v27 = vpop.permute.xlu1 %1399 }
 0xa98   :  { %4621 = vmatpush.xpose.msk.msra.mxu0 %vm230_vm12, %v1400_v27 }
 0xa9b   :  { %4612 = vmatmul.msk.f32.gmra.mxu2 %vm230_vm12, %v1246_v34  ;;  %4618 = vmatmul.msk.f32.gmra.mxu3 %vm230_vm12, %v1252_v33  ;;  %v4904_v33 = vpack.i.bf16 %v6032_v18, %v6030_v22 }
 0xa9c   :  { %4622 = vmatpush.xpose.msk.msra.mxu0 %vm230_vm12, %v1398_v43 }
 0xa9f   :  { %v1266_v45 = vpop.permute.xlu0 %1265  ;;  %v1268_v47 = vpop.permute.xlu1 %1267  ;;  %4623 = vmatmul.msk.f32.vlgmr.msra.gmra.mxu0 %vm230_vm12, %v6032_v18 }
 0xaa0   :  { %4603 = vmatpush.xpose.msk.msra.mxu1 %vm230_vm12, %v1268_v47 }
 0xaa3   :  { %4613 = vmatmul.msk.f32.gmra.mxu2 %vm230_vm12, %v1248_v31  ;;  %4619 = vmatmul.msk.f32.gmra.mxu3 %vm230_vm12, %v1254_v20 }
 0xaa4   :  { %4604 = vmatpush.xpose.msk.msra.mxu1 %vm230_vm12, %v1266_v45 }
 0xaa7   :  { %v4896_v48 = vpop.permute.xlu0 %4895  ;;  %v1636_v36 = vpop.permute.xlu1 %1635  ;;  %4605 = vmatmul.msk.f32.vlgmr.msra.gmra.mxu1 %vm230_vm12, %v6002_v30  ;;  %4624 = vmatmul.msk.f32.gmra.mxu0 %vm230_vm12, %v6030_v22 }
 0xaa8   :  { %v4898_v49 = vunpack.i.h.bf16 %v4896_v48  ;;  %v4897_v51 = vunpack.i.l.bf16 %v4896_v48  ;;  %4642 = vmatpush.msk.msra.mxu2 %vm564_vm13, %v1636_v36 }
 0xaaa   :  { %1664 = vmatpush.msra.mxu2 %v4897_v51  ;;  %1709 = vmatpush.msra.mxu3 %v4898_v49 }
 0xaaf   :  { %4606 = vmatmul.msk.f32.gmra.mxu1 %vm230_vm12, %v5988_v52  ;;  %4625 = vmatmul.msk.f32.gmra.mxu0 %vm230_vm12, %v6017_v35 }
 0xab7   :  { %4607 = vmatmul.msk.f32.gmra.mxu1 %vm230_vm12, %v5994_v54 }
 0xb16   :  { %v1388_v55 = vpop.f32.mrf.mxu3  ;;  %v1344_v2 = vpop.f32.mrf.mxu2 }
 0xb17   :  { %v6082_v56 = vadd.f32 %v4599_v53, %v1388_v55  ;;  %v1345_v34 = vadd.f32 %v4599_v53, %v1344_v2 }
 0xb19   :  { %v1459_v4 = vsel %vm401_vm14, %v6082_v56, -inf  ;;  %v1450_v20 = vsel %vm401_vm14, %v1345_v34, -inf }
 0xb1a   :  { %1460 = vmax.xlane.f32.xlu1 %v1459_v4 }
 0xb1c   :  { %v1432_v59 = vpop.f32.mrf.mxu0 }
 0xb1d   :  { %v1433_v26 = vadd.f32 %v4599_v53, %v1432_v59 }
 0xb1e   :  { %v1391_v60 = vpop.f32.mrf.mxu3  ;;  %v1347_v11 = vpop.f32.mrf.mxu2 }
 0xb1f   :  { %v6089_v44 = vadd.f32 %v4600_v57, %v1391_v60  ;;  %v6103_v17 = vadd.f32 %v4600_v57, %v1347_v11  ;;  %v1468_v31 = vsel %vm401_vm14, %v1433_v26, -inf }
 0xb21   :  { %v1462_v61 = vsel %vm401_vm14, %v6089_v44, -inf  ;;  %v1453_v25 = vsel %vm401_vm14, %v6103_v17, -inf }
 0xb22   :  { %1463 = vmax.xlane.f32.xlu1 %v1462_v61 }
 0xb24   :  { %v1300_v62 = vpop.f32.mrf.mxu1  ;;  %v1435_v14 = vpop.f32.mrf.mxu0 }
 0xb25   :  { %v1301_v1 = vadd.f32 %v4599_v53, %v1300_v62  ;;  %v1436_v50 = vadd.f32 %v4600_v57, %v1435_v14 }
 0xb26   :  { %v1394_v3 = vpop.f32.mrf.mxu3  ;;  %v1350_v16 = vpop.f32.mrf.mxu2 }
 0xb27   :  { %v6096_v63 = vadd.f32 %v4601_v0, %v1394_v3  ;;  %v1441_v5 = vsel %vm401_vm14, %v1301_v1, -inf  ;;  %v1471_v10 = vsel %vm401_vm14, %v1436_v50, -inf  ;;  %v6120_v22 = vadd.f32 %v4601_v0, %v1350_v16 }
 0xb28   :  { %1442 = vmax.xlane.f32.xlu0 %v1441_v5 }
 0xb29   :  { %v1465_v6 = vsel %vm408_vm15, %v6096_v63, -inf  ;;  %v1456_v18 = vsel %vm408_vm15, %v6120_v22, -inf }
 0xb2a   :  { %1466 = vmax.xlane.f32.xlu1 %v1465_v6 }
 0xb2c   :  { %v1303_v8 = vpop.f32.mrf.mxu1  ;;  %v1438_v29 = vpop.f32.mrf.mxu0 }
 0xb2d   :  { %v1304_v32 = vadd.f32 %v4600_v57, %v1303_v8  ;;  %v6115_v13 = vadd.f32 %v4601_v0, %v1438_v29 }
 0xb2f   :  { %v1444_v9 = vsel %vm401_vm14, %v1304_v32, -inf  ;;  %v1474_v15 = vsel %vm408_vm15, %v6115_v13, -inf }
 0xb30   :  { %1445 = vmax.xlane.f32.xlu2 %v1444_v9  ;;  %1472 = vmax.xlane.f32.xlu0 %v1471_v10 }
 0xb34   :  { %v1306_v46 = vpop.f32.mrf.mxu1 }
 0xb35   :  { %v1307_v21 = vadd.f32 %v4601_v0, %v1306_v46 }
 0xb37   :  { %v1447_v23 = vsel %vm408_vm15, %v1307_v21, -inf }
 0xb38   :  { %1448 = vmax.xlane.f32.xlu2 %v1447_v23  ;;  %1454 = vmax.xlane.f32.xlu0 %v1453_v25 }
 0xb40   :  { %1469 = vmax.xlane.f32.xlu2 %v1468_v31 }
 0xb43   :  { %4905 = vrot.lane.b32.xlu1 %v4904_v33, %s7735_s27 }
 0xb48   :  { %1451 = vmax.xlane.f32.xlu2 %v1450_v20 }
 0xb4c   :  { %4900 = vrot.lane.b32.xlu0 %v4899_v38, %s7735_s27 }
 0xb50   :  { %1475 = vmax.xlane.f32.xlu2 %v1474_v15 }
 0xb58   :  { %1457 = vmax.xlane.f32.xlu2 %v1456_v18 }
 0xb70   :  { %1725 = vrot.lane.b32.xlu2 %v6017_v35, %s7735_s27 }
 0xb8d   :  { %v1461_v48 = vpop.xlane.xlu1 %1460 }
 0xb8e   :  { %v1483_v53 = vsub.f32 %v6082_v56, %v1461_v48  ;;  %v4909_v48 = vpack.i.bf16 %v6002_v30, %v5988_v52 }
 0xb90   :  { %v1501_v60 = vmul.f32 1.442695, %v1483_v53 }
 0xb95   :  { %v1464_v14 = vpop.xlane.xlu1 %1463 }
 0xb96   :  { %v1484_v23 = vsub.f32 %v6089_v44, %v1464_v14 }
 0xb98   :  { %v1503_v20 = vmul.f32 1.442695, %v1484_v23 }
 0xb9b   :  { %v1443_v37 = vpop.xlane.xlu0 %1442 }
 0xb9c   :  { %v1477_v41 = vsub.f32 %v1301_v1, %v1443_v37 }
 0xb9e   :  { %v1489_v42 = vmul.f32 1.442695, %v1477_v41 }
 0xba3   :  { %v1473_v58 = vpop.xlane.xlu0 %1472  ;;  %v1446_v24 = vpop.xlane.xlu2 %1445 }
 0xba4   :  { %v1487_v39 = vsub.f32 %v1436_v50, %v1473_v58  ;;  %v1478_v45 = vsub.f32 %v1304_v32, %v1446_v24 }
 0xba6   :  { %v1509_v40 = vmul.f32 1.442695, %v1487_v39  ;;  %v1491_v36 = vmul.f32 1.442695, %v1478_v45 }
 0xba8   :  { %5072 = vpow2.f32 %v1509_v40 }
 0xba9   :  { %5074 = vpow2.f32 %v1489_v42 }
 0xbaa   :  { %5076 = vpow2.f32 %v1491_v36 }
 0xbab   :  { %v1449_v43 = vpop.xlane.xlu2 %1448  ;;  %v1455_v55 = vpop.xlane.xlu0 %1454 }
 0xbac   :  { %v1479_v4 = vsub.f32 %v1307_v21, %v1449_v43  ;;  %v1481_v56 = vsub.f32 %v6103_v17, %v1455_v55 }
 0xbae   :  { %v6126_v27 = vpop.eup %5072  ;;  %v1493_v61 = vmul.f32 1.442695, %v1479_v4  ;;  %v1497_v10 = vmul.f32 1.442695, %v1481_v56 }
 0xbaf   :  { %v1543_v47 = vsel %vm401_vm14, %v6126_v27, 0.0  ;;  %v6130_v49 = vpop.eup %5074 }
 0xbb0   :  { %1544 = vadd.xlane.f32.xlu2 %v1543_v47  ;;  %v1513_v59 = vsel %vm401_vm14, %v6130_v49, 0.0  ;;  %v6135_v0 = vpop.eup %5076 }
 0xbb1   :  { %v1516_v8 = vsel %vm401_vm14, %v6135_v0, 0.0 }
 0xbb3   :  { %v1470_v35 = vpop.xlane.xlu2 %1469 }
 0xbb4   :  { %v1486_v51 = vsub.f32 %v1433_v26, %v1470_v35 }
 0xbb6   :  { %v1507_v57 = vmul.f32 1.442695, %v1486_v51 }
 0xbb8   :  { %5078 = vpow2.f32 %v1507_v57  ;;  %1514 = vadd.xlane.f32.xlu2 %v1513_v59 }
 0xbb9   :  { %5080 = vpow2.f32 %v1501_v60 }
 0xbba   :  { %5082 = vpow2.f32 %v1493_v61 }
 0xbbb   :  { %v1452_v62 = vpop.xlane.xlu2 %1451 }
 0xbbc   :  { %v1480_v1 = vsub.f32 %v1345_v34, %v1452_v62  ;;  %v1467_v34 = vpop.xlane.xlu1 %1466 }
 0xbbd   :  { %v1485_v16 = vsub.f32 %v6096_v63, %v1467_v34 }
 0xbbe   :  { %v6137_v2 = vpop.eup %5078  ;;  %v1495_v3 = vmul.f32 1.442695, %v1480_v1  ;;  %v4901_v5 = vpop.permute.xlu0 %4900 }
 0xbbf   :  { %v4903_v6 = vunpack.i.h.bf16 %v4901_v5  ;;  %v4902_v50 = vunpack.i.l.bf16 %v4901_v5  ;;  %v1540_v32 = vsel %vm401_vm14, %v6137_v2, 0.0  ;;  %v6144_v9 = vpop.eup %5080  ;;  %v1505_v24 = vmul.f32 1.442695, %v1485_v16 }
 0xbc0   :  { %5084 = vpow2.f32 %v1495_v3  ;;  %1517 = vadd.xlane.f32.xlu2 %v1516_v8  ;;  %1541 = vadd.xlane.f32.xlu0 %v1540_v32  ;;  %v6146_v17 = vpop.eup %5082  ;;  %v1531_v31 = vsel %vm401_vm14, %v6144_v9, 0.0 }
 0xbc1   :  { %1665 = vmatpush.msra.mxu2 %v4902_v50  ;;  %1710 = vmatpush.msra.mxu3 %v4903_v6  ;;  %5086 = vpow2.f32 %v1497_v10  ;;  %v1519_v26 = vsel %vm408_vm15, %v6146_v17, 0.0 }
 0xbc3   :  { %v1476_v11 = vpop.xlane.xlu2 %1475 }
 0xbc4   :  { %v1488_v46 = vsub.f32 %v6115_v13, %v1476_v11  ;;  %v4906_v58 = vpop.permute.xlu1 %4905 }
 0xbc5   :  { %v4907_v39 = vunpack.i.l.bf16 %v4906_v58  ;;  %v4908_v63 = vunpack.i.h.bf16 %v4906_v58 }
 0xbc6   :  { %v6149_v21 = vpop.eup %5084  ;;  %v1511_v25 = vmul.f32 1.442695, %v1488_v46 }
 0xbc7   :  { %v1522_v33 = vsel %vm401_vm14, %v6149_v21, 0.0  ;;  %v6159_v38 = vpop.eup %5086 }
 0xbc8   :  { %5088 = vpow2.f32 %v1511_v25  ;;  %1520 = vadd.xlane.f32.xlu2 %v1519_v26  ;;  %1532 = vadd.xlane.f32.xlu0 %v1531_v31  ;;  %v1525_v37 = vsel %vm401_vm14, %v6159_v38, 0.0 }
 0xbc9   :  { %1523 = vadd.xlane.f32.xlu1 %v1522_v33  ;;  %5090 = vpow2.f32 %v1503_v20 }
 0xbcb   :  { %v1458_v29 = vpop.xlane.xlu2 %1457 }
 0xbcc   :  { %v1482_v44 = vsub.f32 %v6120_v22, %v1458_v29 }
 0xbce   :  { %v6161_v13 = vpop.eup %5088  ;;  %v1499_v15 = vmul.f32 1.442695, %v1482_v44 }
 0xbcf   :  { %v1546_v18 = vsel %vm408_vm15, %v6161_v13, 0.0  ;;  %v6169_v41 = vpop.eup %5090 }
 0xbd0   :  { %5092 = vpow2.f32 %v1499_v15  ;;  %1547 = vadd.xlane.f32.xlu0 %v1546_v18  ;;  %v1534_v43 = vsel %vm401_vm14, %v6169_v41, 0.0 }
 0xbd1   :  { %1526 = vadd.xlane.f32.xlu1 %v1525_v37  ;;  %5094 = vpow2.f32 %v1505_v24  ;;  %v4657_v24 = vld [vmem:[%s7660_s6 + $0x38] sm:$0xff] }
 0xbd3   :  { %v1726_v22 = vpop.permute.xlu2 %1725 }
 0xbd4   :  { %4650 = vmatpush.msk.msrb.mxu0 %vm564_vm13, %v1726_v22  ;;  %v4656_v22 = vld [vmem:[%s7660_s6 + $0x30] sm:$0xff] }
 0xbd6   :  { %v6171_v40 = vpop.eup %5092  ;;  %1754 = vmatpush.msrb.mxu0 %v4907_v39  ;;  %v4655_v39 = vld [vmem:[%s7660_s6 + $0x28] sm:$0xff] }
 0xbd7   :  { %v1528_v42 = vsel %vm408_vm15, %v6171_v40, 0.0  ;;  %v6177_v45 = vpop.eup %5094 }
 0xbd8   :  { %1529 = vadd.xlane.f32.xlu0 %v1528_v42  ;;  %1755 = vmatpush.msrb.mxu0 %v4908_v63  ;;  %v1537_v47 = vsel %vm408_vm15, %v6177_v45, 0.0 }
 0xbd9   :  { %1535 = vadd.xlane.f32.xlu1 %v1534_v43 }
 0xbe1   :  { %1538 = vadd.xlane.f32.xlu1 %v1537_v47 }
 0xbec   :  { %1590 = vrot.lane.b32.xlu0 %v5994_v54, %s7735_s27 }
 0xbfa   :  { %4910 = vrot.lane.b32.xlu1 %v4909_v48, %s7735_s27 }
 0xc23   :  { %v1545_v36 = vpop.xlane.xlu2 %1544 }
 0xc24   :  { %5096 = vrcp.f32 %v1545_v36 }
 0xc2a   :  { %v5097_v35 = vpop.eup %5096 }
 0xc2b   :  { %v1515_v51 = vpop.xlane.xlu2 %1514  ;;  %v1571_v53 = vmul.f32 %v5097_v35, %v6126_v27 }
 0xc2c   :  { %5098 = vrcp.f32 %v1515_v51 }
 0xc2d   :  { %4636 = vst.msk [vmem:[%s7658_s21 + $0xb0] sm:$0xff] %vm401_vm14, %v1571_v53 }
 0xc32   :  { %v5099_v55 = vpop.eup %5098 }
 0xc33   :  { %v6192_v54 = vmul.f32 %v5099_v55, %v6130_v49  ;;  %v1542_v4 = vpop.xlane.xlu0 %1541  ;;  %v1518_v52 = vpop.xlane.xlu2 %1517 }
 0xc34   :  { %5100 = vrcp.f32 %v1542_v4 }
 0xc35   :  { %4626 = vst.msk [vmem:[%s7658_s21 + $0x60] sm:$0xff] %vm401_vm14, %v6192_v54  ;;  %5102 = vrcp.f32 %v1518_v52 }
 0xc3a   :  { %v5101_v30 = vpop.eup %5100 }
 0xc3b   :  { %v5103_v27 = vpop.eup %5102  ;;  %v1570_v57 = vmul.f32 %v5101_v30, %v6137_v2  ;;  %v1533_v59 = vpop.xlane.xlu0 %1532 }
 0xc3c   :  { %v1521_v60 = vpop.xlane.xlu2 %1520  ;;  %5104 = vrcp.f32 %v1533_v59  ;;  %v1524_v61 = vpop.xlane.xlu1 %1523  ;;  %v1562_v49 = vmul.f32 %v5103_v27, %v6135_v0 }
 0xc3d   :  { %4635 = vst.msk [vmem:[%s7658_s21 + $0xa8] sm:$0xff] %vm401_vm14, %v1570_v57  ;;  %5106 = vrcp.f32 %v1524_v61  ;;  %4651 = vmatmul.msk.f32.vlgmr.msrb.gmra.mxu0 %vm401_vm14, %v1570_v57 }
 0xc3e   :  { %5108 = vrcp.f32 %v1521_v60  ;;  %4627 = vst.msk [vmem:[%s7658_s21 + $0x68] sm:$0xff] %vm401_vm14, %v1562_v49 }
 0xc42   :  { %v5105_v62 = vpop.eup %5104 }
 0xc43   :  { %v5107_v1 = vpop.eup %5106  ;;  %v1567_v2 = vmul.f32 %v5105_v62, %v6144_v9  ;;  %v1548_v56 = vpop.xlane.xlu0 %1547 }
 0xc44   :  { %v5109_v0 = vpop.eup %5108  ;;  %v1564_v3 = vmul.f32 %v5107_v1, %v6149_v21  ;;  %v1527_v5 = vpop.xlane.xlu1 %1526  ;;  %5110 = vrcp.f32 %v1548_v56 }
 0xc45   :  { %4632 = vst.msk [vmem:[%s7658_s21 + $0x90] sm:$0xff] %vm401_vm14, %v1567_v2  ;;  %5112 = vrcp.f32 %v1527_v5  ;;  %4647 = vmatmul.msk.f32.vlgmr.msra.gmra.mxu3 %vm401_vm14, %v1567_v2  ;;  %4652 = vmatmul.msk.f32.gmra.mxu0 %vm401_vm14, %v1571_v53  ;;  %v1563_v14 = vmul.f32 %v5109_v0, %v6146_v17 }
 0xc46   :  { %4629 = vst.msk [vmem:[%s7658_s21 + $0x78] sm:$0xff] %vm401_vm14, %v1564_v3  ;;  %4643 = vmatmul.msk.f32.vlgmr.msra.gmra.mxu2 %vm401_vm14, %v1564_v3 }
 0xc47   :  { %4628 = vst.msk [vmem:[%s7658_s21 + $0x70] sm:$0xf] %vm408_vm15, %v1563_v14 }
 0xc4a   :  { %v5111_v6 = vpop.eup %5110 }
 0xc4b   :  { %v5113_v50 = vpop.eup %5112  ;;  %v1530_v8 = vpop.xlane.xlu0 %1529  ;;  %v1572_v32 = vmul.f32 %v5111_v6, %v6161_v13 }
 0xc4c   :  { %v1536_v9 = vpop.xlane.xlu1 %1535  ;;  %5114 = vrcp.f32 %v1530_v8  ;;  %v1565_v10 = vmul.f32 %v5113_v50, %v6159_v38 }
 0xc4d   :  { %5116 = vrcp.f32 %v1536_v9  ;;  %4637 = vst.msk [vmem:[%s7658_s21 + $0xb8] sm:$0xf] %vm408_vm15, %v1572_v32  ;;  %4653 = vmatmul.msk.f32.gmra.mxu0 %vm401_vm14, %v1572_v32 }
 0xc4e   :  { %4630 = vst.msk [vmem:[%s7658_s21 + $0x80] sm:$0xff] %vm401_vm14, %v1565_v10  ;;  %4644 = vmatmul.msk.f32.gmra.mxu2 %vm401_vm14, %v1565_v10 }
 0xc52   :  { %v5115_v11 = vpop.eup %5114 }
 0xc53   :  { %v5117_v17 = vpop.eup %5116  ;;  %v1566_v46 = vmul.f32 %v5115_v11, %v6171_v40 }
 0xc54   :  { %v1539_v21 = vpop.xlane.xlu1 %1538  ;;  %v1568_v23 = vmul.f32 %v5117_v17, %v6169_v41  ;;  %v4654_v41 = vld [vmem:[%s7660_s6 + $0x20] sm:$0xff] }
 0xc55   :  { %5118 = vrcp.f32 %v1539_v21  ;;  %4631 = vst.msk [vmem:[%s7658_s21 + $0x88] sm:$0xf] %vm408_vm15, %v1566_v46 }
 0xc56   :  { %4645 = vmatmul.msk.f32.gmra.mxu2 %vm401_vm14, %v1566_v46  ;;  %4633 = vst.msk [vmem:[%s7658_s21 + $0x98] sm:$0xff] %vm401_vm14, %v1568_v23  ;;  %4648 = vmatmul.msk.f32.gmra.mxu3 %vm401_vm14, %v1568_v23  ;;  %v4692_v46 = vld [vmem:[%s7725_s26 + $0x18] sm:$0xff] }
 0xc57   :  { %v2316_v23 = vsel %vm70_vm0, %v4692_v46, 0.0 }
 0xc5b   :  { %v5119_v25 = vpop.eup %5118 }
 0xc5c   :  { %v1569_v26 = vmul.f32 %v5119_v25, %v6177_v45 }
 0xc5e   :  { %4634 = vst.msk [vmem:[%s7658_s21 + $0xa0] sm:$0xf] %vm408_vm15, %v1569_v26  ;;  %4649 = vmatmul.msk.f32.gmra.mxu3 %vm401_vm14, %v1569_v26  ;;  %v1591_v31 = vpop.permute.xlu0 %1590  ;;  %s7739_s21 = sld [smem:[#allocation10_spill]] }
 0xc5f   :  { %4638 = vmatpush.msk.msrb.mxu1 %vm564_vm13, %v1591_v31 }
 0xc6c   :  { %v4911_v33 = vpop.permute.xlu1 %4910 }
 0xc6d   :  { %v4912_v34 = vunpack.i.l.bf16 %v4911_v33  ;;  %v4913_v20 = vunpack.i.h.bf16 %v4911_v33 }
 0xc6f   :  { %1619 = vmatpush.msrb.mxu1 %v4912_v34  ;;  %v4693_v34 = vld [vmem:[%s7725_s26 + $0x20] sm:$0xff] }
 0xc71   :  { %1620 = vmatpush.msrb.mxu1 %v4913_v20 }
 0xc72   :  { %4639 = vmatmul.msk.f32.vlgmr.msrb.gmra.mxu1 %vm401_vm14, %v6192_v54 }
 0xc73   :  { %1842 = vmatpush.msra.mxu1 %v4657_v24 }
 0xc75   :  { %1843 = vmatpush.msra.mxu1 %v4656_v22 }
 0xc77   :  { %1844 = vmatpush.msra.mxu1 %v4655_v39 }
 0xc79   :  { %1845 = vmatpush.msra.mxu1 %v4654_v41 }
 0xc7a   :  { %4640 = vmatmul.msk.f32.gmra.mxu1 %vm401_vm14, %v1562_v49  ;;  %v4966_v49 = vld [vmem:[%s7659_s7 + $0x1] ss:$0 sm:$0xff] }
 0xc82   :  { %4641 = vmatmul.msk.f32.gmra.mxu1 %vm401_vm14, %v1563_v14 }
 0xcba   :  { %v1757_v29 = vpop.f32.mrf.mxu0 }
 0xcc2   :  { %v1760_v44 = vpop.f32.mrf.mxu0 }
 0xcc8   :  { %v1712_v38 = vpop.f32.mrf.mxu3 }
 0xcc9   :  { %v1667_v13 = vpop.f32.mrf.mxu2  ;;  %1781 = vrot.lane.b32.xlu2 %v1712_v38, %s7736_s23 }
 0xcca   :  { %1769 = vrot.lane.b32.xlu0 %v1667_v13, %s7737_s2  ;;  %v1763_v15 = vpop.f32.mrf.mxu0  ;;  %v4694_v13 = vld [vmem:[%s7725_s26 + $0x28] sm:$0xf] }
 0xcd1   :  { %v1670_v16 = vpop.f32.mrf.mxu2  ;;  %1797 = vrot.lane.b32.xlu2 %v1763_v15, %s7738_s3  ;;  %v2322_v15 = vsel %vm77_vm1, %v4694_v13, 0.0 }
 0xcd2   :  { %1771 = vrot.lane.b32.xlu1 %v1670_v16, %s7737_s2  ;;  %1793 = vrot.lane.b32.xlu0 %v1757_v29, %s7738_s3  ;;  %v2319_v29 = vsel %vm70_vm0, %v4693_v34, 0.0  ;;  %v4667_v16 = vld [vmem:[%s7664_s10 + $0x38] sm:$0xff] }
 0xcd3   :  { %1972 = vmatpush.msrb.mxu2 %v4667_v16 }
 0xcd9   :  { %v1715_v18 = vpop.f32.mrf.mxu3  ;;  %v1673_v37 = vpop.f32.mrf.mxu2 }
 0xcda   :  { %1783 = vrot.lane.b32.xlu0 %v1715_v18, %s7736_s23  ;;  %1795 = vrot.lane.b32.xlu1 %v1760_v44, %s7738_s3  ;;  %v4666_v18 = vld [vmem:[%s7664_s10 + $0x30] sm:$0xff]  ;;  %s7744_s3 = sld [smem:[#allocation8_spill]] }
 0xcdb   :  { %1973 = vmatpush.msrb.mxu2 %v4666_v18 }
 0xce1   :  { %v1718_v58 = vpop.f32.mrf.mxu3 }
 0xce2   :  { %1773 = vrot.lane.b32.xlu0 %v1673_v37, %s7737_s2  ;;  %1785 = vrot.lane.b32.xlu1 %v1718_v58, %s7736_s23  ;;  %v4665_v37 = vld [vmem:[%s7664_s10 + $0x28] sm:$0xff]  ;;  %v4664_v58 = vld [vmem:[%s7664_s10 + $0x20] sm:$0xff] }
 0xce3   :  { %1974 = vmatpush.msrb.mxu2 %v4665_v37  ;;  %v2396_v37 = vld [vmem:[%s7726_s30 + $0x10] sm:$0xff] }
 0xce5   :  { %1975 = vmatpush.msrb.mxu2 %v4664_v58  ;;  %v2395_v58 = vld [vmem:[%s7726_s30 + $0x8] sm:$0xff] }
 0xcef   :  { %v1622_v63 = vpop.f32.mrf.mxu1 }
 0xcf7   :  { %v1625_v35 = vpop.f32.mrf.mxu1 }
 0xcff   :  { %v1628_v52 = vpop.f32.mrf.mxu1 }
 0xd23   :  { %v1782_v43 = vpop.permute.xlu2 %1781 }
 0xd2b   :  { %v1798_v59 = vpop.permute.xlu2 %1797 }
 0xd3c   :  { %v1770_v40 = vpop.permute.xlu0 %1769 }
 0xd3d   :  { %v1802_v42 = vsel %vm230_vm12, %v1622_v63, %v1770_v40 }
 0xd3e   :  { %v1805_v48 = vsel %vm767_vm2, %v1802_v42, %v1782_v43 }
 0xd44   :  { %v1772_v45 = vpop.permute.xlu1 %1771  ;;  %v1794_v47 = vpop.permute.xlu0 %1793 }
 0xd45   :  { %v1808_v36 = vsel %vm771_vm3, %v1805_v48, %v1794_v47  ;;  %v1803_v51 = vsel %vm230_vm12, %v1625_v35, %v1772_v45 }
 0xd46   :  { %4659 = vmatmul.msk.f32.vlgmr.msra.gmra.mxu1 %vm70_vm0, %v1808_v36 }
 0xd4c   :  { %v1784_v53 = vpop.permute.xlu0 %1783  ;;  %v1796_v55 = vpop.permute.xlu1 %1795 }
 0xd4d   :  { %v1806_v54 = vsel %vm767_vm2, %v1803_v51, %v1784_v53 }
 0xd4e   :  { %v1809_v4 = vsel %vm771_vm3, %v1806_v54, %v1796_v55 }
 0xd4f   :  { %4660 = vmatmul.msk.f32.gmra.mxu1 %vm70_vm0, %v1809_v4 }
 0xd54   :  { %v1774_v30 = vpop.permute.xlu0 %1773  ;;  %v1786_v27 = vpop.permute.xlu1 %1785 }
 0xd55   :  { %v1804_v57 = vsel %vm230_vm12, %v1628_v52, %v1774_v30 }
 0xd56   :  { %v1807_v60 = vsel %vm767_vm2, %v1804_v57, %v1786_v27 }
 0xd57   :  { %v1810_v61 = vsel %vm771_vm3, %v1807_v60, %v1798_v59  ;;  %v4967_v60 = vld [vmem:[%s7661_s8 + $0x1] ss:$0 sm:$0xff] }
 0xd58   :  { %4661 = vmatmul.msk.f32.gmra.mxu1 %vm70_vm0, %v1810_v61 }
 0xdc3   :  { %v1847_v62 = vpop.f32.mrf.mxu1 }
 0xdc4   :  { %v1848_v1 = vadd.f32 %v4966_v49, %v1847_v62 }
 0xdc6   :  { %v6300_v2 = vadd.f32 %v1848_v1, %v5933_v7 }
 0xdc8   :  { %v1863_v56 = vsel %vm70_vm0, %v6300_v2, 0.0 }
 0xdc9   :  { %1864 = vadd.xlane.f32.xlu0 %v1863_v56 }
 0xdcc   :  { %v1850_v0 = vpop.f32.mrf.mxu1 }
 0xdcd   :  { %v1851_v3 = vadd.f32 %v4966_v49, %v1850_v0 }
 0xdcf   :  { %v6305_v5 = vadd.f32 %v1851_v3, %v5938_v28  ;;  %v4968_v3 = vld [vmem:[%s7662_s9 + $0x1] ss:$0 sm:$0xff] }
 0xdd1   :  { %v1866_v14 = vsel %vm70_vm0, %v6305_v5, 0.0 }
 0xdd2   :  { %1867 = vadd.xlane.f32.xlu1 %v1866_v14 }
 0xdd5   :  { %v1853_v6 = vpop.f32.mrf.mxu1 }
 0xdd6   :  { %v1854_v50 = vadd.f32 %v4966_v49, %v1853_v6 }
 0xdd8   :  { %v6310_v8 = vadd.f32 %v1854_v50, %v5943_v19 }
 0xdda   :  { %v1869_v7 = vsel %vm77_vm1, %v6310_v8, 0.0 }
 0xddb   :  { %1870 = vadd.xlane.f32.xlu2 %v1869_v7 }
 0xe3c   :  { %v1865_v32 = vpop.xlane.xlu0 %1864 }
 0xe3d   :  { %v1872_v9 = vmul.f32 %v1865_v32, %v5431_v12 }
 0xe3f   :  { %v6316_v10 = vsub.f32 %v6300_v2, %v1872_v9 }
 0xe41   :  { %v1878_v28 = vmul.f32 %v6316_v10, %v6316_v10 }
 0xe43   :  { %v1881_v11 = vsel %vm70_vm0, %v1878_v28, 0.0 }
 0xe44   :  { %1882 = vadd.xlane.f32.xlu0 %v1881_v11 }
 0xe45   :  { %v1868_v17 = vpop.xlane.xlu1 %1867 }
 0xe46   :  { %v1873_v19 = vmul.f32 %v1868_v17, %v5431_v12 }
 0xe48   :  { %v6326_v21 = vsub.f32 %v6305_v5, %v1873_v19 }
 0xe4a   :  { %v1879_v25 = vmul.f32 %v6326_v21, %v6326_v21 }
 0xe4c   :  { %2317 = vadd.xlane.f32.xlu0 %v2316_v23  ;;  %v1884_v26 = vsel %vm70_vm0, %v1879_v25, 0.0 }
 0xe4d   :  { %1885 = vadd.xlane.f32.xlu1 %v1884_v26 }
 0xe4e   :  { %v1871_v31 = vpop.xlane.xlu2 %1870 }
 0xe4f   :  { %v1874_v33 = vmul.f32 %v1871_v31, %v5431_v12 }
 0xe51   :  { %v6337_v20 = vsub.f32 %v6310_v8, %v1874_v33 }
 0xe53   :  { %v1880_v44 = vmul.f32 %v6337_v20, %v6337_v20 }
 0xe55   :  { %2320 = vadd.xlane.f32.xlu1 %v2319_v29  ;;  %v1887_v38 = vsel %vm77_vm1, %v1880_v44, 0.0 }
 0xe56   :  { %1888 = vadd.xlane.f32.xlu2 %v1887_v38 }
 0xe5e   :  { %2323 = vadd.xlane.f32.xlu2 %v2322_v15 }
 0xeb7   :  { %v1883_v24 = vpop.xlane.xlu0 %1882 }
 0xeb8   :  { %v1890_v22 = vmul.f32 %v1883_v24, %v5431_v12 }
 0xeba   :  { %v1893_v39 = vadd.f32 1e-05, %v1890_v22 }
 0xebc   :  { %5120 = vrsqrt.f32 %v1893_v39  ;;  %vm1902_vm6 = vweird.f32 %v1893_v39 }
 0xebf   :  { %v2318_v41 = vpop.xlane.xlu0 %2317 }
 0xec0   :  { %v2325_v40 = vmul.f32 %v2318_v41, %v5431_v12  ;;  %v1886_v63 = vpop.xlane.xlu1 %1885 }
 0xec1   :  { %v1891_v42 = vmul.f32 %v1886_v63, %v5431_v12 }
 0xec2   :  { %v5121_v43 = vpop.eup %5120  ;;  %v6362_v45 = vsub.f32 %v4692_v46, %v2325_v40 }
 0xec3   :  { %v1897_v47 = vmul.f32 %v5121_v43, %v1893_v39  ;;  %v1894_v48 = vadd.f32 1e-05, %v1891_v42  ;;  %vm1903_vm5 = vweird.f32 %v5121_v43 }
 0xec4   :  { %v2331_v36 = vmul.f32 %v6362_v45, %v6362_v45  ;;  %vm1904_vm7 = vmor %vm1902_vm6, %vm1903_vm5 }
 0xec5   :  { %v1898_v35 = vmul.f32 %v5121_v43, %v1897_v47  ;;  %5122 = vrsqrt.f32 %v1894_v48  ;;  %vm1912_vm9 = vweird.f32 %v1894_v48 }
 0xec6   :  { %v2334_v51 = vsel %vm70_vm0, %v2331_v36, 0.0 }
 0xec7   :  { %v1899_v53 = vmul.f32 0.5, %v1898_v35  ;;  %2335 = vadd.xlane.f32.xlu0 %v2334_v51 }
 0xec8   :  { %v2321_v55 = vpop.xlane.xlu1 %2320 }
 0xec9   :  { %v1900_v54 = vsub.f32 1.5, %v1899_v53  ;;  %v2326_v4 = vmul.f32 %v2321_v55, %v5431_v12  ;;  %v1889_v52 = vpop.xlane.xlu2 %1888 }
 0xeca   :  { %v1892_v30 = vmul.f32 %v1889_v52, %v5431_v12 }
 0xecb   :  { %v5123_v27 = vpop.eup %5122  ;;  %v1901_v57 = vmul.f32 %v5121_v43, %v1900_v54  ;;  %v6369_v59 = vsub.f32 %v4693_v34, %v2326_v4  ;;  %v6410_v54 = vld [vmem:[%s7727_s5] ss:$0 sm:$0xff] }
 0xecc   :  { %v1907_v61 = vmul.f32 %v5123_v27, %v1894_v48  ;;  %v1895_v49 = vadd.f32 1e-05, %v1892_v30  ;;  %vm1913_vm8 = vweird.f32 %v5123_v27 }
 0xecd   :  { %v1905_v62 = vsel %vm1904_vm7, %v5121_v43, %v1901_v57  ;;  %v2332_v1 = vmul.f32 %v6369_v59, %v6369_v59  ;;  %vm1914_vm10 = vmor %vm1912_vm9, %vm1913_vm8 }
 0xece   :  { %v1926_v56 = vmul.f32 %v1905_v62, %v6316_v10  ;;  %v1908_v0 = vmul.f32 %v5123_v27, %v1907_v61  ;;  %5124 = vrsqrt.f32 %v1895_v49  ;;  %vm1922_vm4 = vweird.f32 %v1895_v49  ;;  %v4687_v61 = vld [vmem:[%s7666_s12 + $0xf8] sm:$0xff] }
 0xecf   :  { %v2337_v14 = vsel %vm70_vm0, %v2332_v1, 0.0  ;;  %2128 = vmatpush.msrb.mxu3 %v4687_v61  ;;  %v4686_v1 = vld [vmem:[%s7666_s12 + $0xf0] sm:$0xff] }
 0xed0   :  { %v1932_v6 = vmul.f32 %v4967_v60, %v1926_v56  ;;  %v1909_v50 = vmul.f32 0.5, %v1908_v0  ;;  %2338 = vadd.xlane.f32.xlu1 %v2337_v14 }
 0xed1   :  { %v2324_v7 = vpop.xlane.xlu2 %2323  ;;  %2129 = vmatpush.msrb.mxu3 %v4686_v1 }
 0xed2   :  { %v1910_v32 = vsub.f32 1.5, %v1909_v50  ;;  %v2327_v9 = vmul.f32 %v2324_v7, %v5431_v12  ;;  %v1938_v28 = vadd.f32 %v4968_v3, %v1932_v6  ;;  %v4684_v7 = vld [vmem:[%s7666_s12 + $0xe0] sm:$0xff] }
 0xed4   :  { %v5125_v11 = vpop.eup %5124  ;;  %v1911_v17 = vmul.f32 %v5123_v27, %v1910_v32  ;;  %v6382_v10 = vsub.f32 %v4694_v13, %v2327_v9  ;;  %4669 = vmatmul.msk.f32.vlgmr.msrb.gmra.mxu2 %vm70_vm0, %v1938_v28 }
 0xed5   :  { %v1917_v19 = vmul.f32 %v5125_v11, %v1895_v49  ;;  %vm1923_vm11 = vweird.f32 %v5125_v11 }
 0xed6   :  { %v2333_v46 = vmul.f32 %v6382_v10, %v6382_v10  ;;  %v1915_v23 = vsel %vm1914_vm10, %v5123_v27, %v1911_v17  ;;  %vm1924_vm5 = vmor %vm1922_vm4, %vm1923_vm11 }
 0xed7   :  { %v1918_v25 = vmul.f32 %v5125_v11, %v1917_v19  ;;  %v1927_v26 = vmul.f32 %v1915_v23, %v6326_v21  ;;  %v2397_v21 = vld [vmem:[%s7726_s30 + $0x18] sm:$0xff]  ;;  %v4682_v23 = vld [vmem:[%s7666_s12 + $0xd0] sm:$0xff] }
 0xed8   :  { %v2340_v31 = vsel %vm77_vm1, %v2333_v46, 0.0  ;;  %2423 = vmatpush.msra.mxu2 %v2397_v21 }
 0xed9   :  { %v1919_v33 = vmul.f32 0.5, %v1918_v25  ;;  %2341 = vadd.xlane.f32.xlu2 %v2340_v31  ;;  %v1933_v34 = vmul.f32 %v4967_v60, %v1927_v26 }
 0xeda   :  { %2424 = vmatpush.msra.mxu2 %v2396_v37 }
 0xedb   :  { %v1920_v29 = vsub.f32 1.5, %v1919_v33  ;;  %v1939_v44 = vadd.f32 %v4968_v3, %v1933_v34  ;;  %v4681_v33 = vld [vmem:[%s7666_s12 + $0xc8] sm:$0xff] }
 0xedc   :  { %2425 = vmatpush.msra.mxu2 %v2395_v58  ;;  %v4678_v58 = vld [vmem:[%s7666_s12 + $0xb0] sm:$0xff] }
 0xedd   :  { %v1921_v38 = vmul.f32 %v5125_v11, %v1920_v29  ;;  %4670 = vmatmul.msk.f32.gmra.mxu2 %vm70_vm0, %v1939_v44  ;;  %v4680_v44 = vld [vmem:[%s7666_s12 + $0xc0] sm:$0xff] }
 0xedf   :  { %v1925_v13 = vsel %vm1924_vm5, %v5125_v11, %v1921_v38  ;;  %v4683_v11 = vld [vmem:[%s7666_s12 + $0xd8] sm:$0xff] }
 0xee0   :  { %v1928_v15 = vmul.f32 %v1925_v13, %v6337_v20  ;;  %v2394_v20 = vld [vmem:[%s7726_s30] sm:$0xff] }
 0xee1   :  { %2426 = vmatpush.msra.mxu2 %v2394_v20 }
 0xee2   :  { %v1934_v16 = vmul.f32 %v4967_v60, %v1928_v15  ;;  %v6416_v60 = vld [vmem:[%s7728_s0] ss:$0 sm:$0xff] }
 0xee4   :  { %v1940_v18 = vadd.f32 %v4968_v3, %v1934_v16  ;;  %v4685_v3 = vld [vmem:[%s7666_s12 + $0xe8] sm:$0xff] }
 0xee5   :  { %2130 = vmatpush.msrb.mxu3 %v4685_v3 }
 0xee6   :  { %4671 = vmatmul.msk.f32.gmra.mxu2 %vm70_vm0, %v1940_v18  ;;  %v4679_v18 = vld [vmem:[%s7666_s12 + $0xb8] sm:$0xff] }
 0xee7   :  { %2131 = vmatpush.msrb.mxu3 %v4684_v7 }
 0xee9   :  { %2132 = vmatpush.msrb.mxu3 %v4683_v11 }
 0xeeb   :  { %2133 = vmatpush.msrb.mxu3 %v4682_v23 }
 0xeed   :  { %2134 = vmatpush.msrb.mxu3 %v4681_v33 }
 0xeef   :  { %2135 = vmatpush.msrb.mxu3 %v4680_v44 }
 0xef1   :  { %2136 = vmatpush.msrb.mxu3 %v4679_v18 }
 0xef3   :  { %2137 = vmatpush.msrb.mxu3 %v4678_v58 }
 0xf3a   :  { %v2336_v24 = vpop.xlane.xlu0 %2335 }
 0xf3b   :  { %v2343_v22 = vmul.f32 %v2336_v24, %v5431_v12 }
 0xf3d   :  { %v2346_v39 = vadd.f32 1e-05, %v2343_v22  ;;  %v4677_v22 = vld [vmem:[%s7666_s12 + $0xa8] sm:$0xff] }
 0xf3e   :  { %2138 = vmatpush.msrb.mxu3 %v4677_v22 }
 0xf3f   :  { %5126 = vrsqrt.f32 %v2346_v39  ;;  %vm2355_vm6 = vweird.f32 %v2346_v39 }
 0xf43   :  { %v2339_v41 = vpop.xlane.xlu1 %2338 }
 0xf44   :  { %v2344_v40 = vmul.f32 %v2339_v41, %v5431_v12 }
 0xf45   :  { %v5127_v63 = vpop.eup %5126 }
 0xf46   :  { %v2350_v42 = vmul.f32 %v5127_v63, %v2346_v39  ;;  %v2347_v43 = vadd.f32 1e-05, %v2344_v40  ;;  %vm2356_vm7 = vweird.f32 %v5127_v63  ;;  %v4676_v40 = vld [vmem:[%s7666_s12 + $0xa0] sm:$0xff] }
 0xf47   :  { %vm2357_vm8 = vmor %vm2355_vm6, %vm2356_vm7  ;;  %2139 = vmatpush.msrb.mxu3 %v4676_v40 }
 0xf48   :  { %v2351_v47 = vmul.f32 %v5127_v63, %v2350_v42  ;;  %5128 = vrsqrt.f32 %v2347_v43  ;;  %vm2365_vm9 = vweird.f32 %v2347_v43 }
 0xf4a   :  { %v2352_v48 = vmul.f32 0.5, %v2351_v47 }
 0xf4c   :  { %v2353_v36 = vsub.f32 1.5, %v2352_v48  ;;  %v2342_v35 = vpop.xlane.xlu2 %2341  ;;  %v4675_v48 = vld [vmem:[%s7666_s12 + $0x98] sm:$0xff] }
 0xf4d   :  { %v2345_v51 = vmul.f32 %v2342_v35, %v5431_v12  ;;  %2140 = vmatpush.msrb.mxu3 %v4675_v48 }
 0xf4e   :  { %v5129_v53 = vpop.eup %5128  ;;  %v2354_v55 = vmul.f32 %v5127_v63, %v2353_v36 }
 0xf4f   :  { %v2360_v4 = vmul.f32 %v5129_v53, %v2347_v43  ;;  %v2348_v52 = vadd.f32 1e-05, %v2345_v51  ;;  %vm2366_vm10 = vweird.f32 %v5129_v53  ;;  %v4674_v51 = vld [vmem:[%s7666_s12 + $0x90] sm:$0xff] }
 0xf50   :  { %v2358_v30 = vsel %vm2357_vm8, %v5127_v63, %v2354_v55  ;;  %vm2367_vm11 = vmor %vm2365_vm9, %vm2366_vm10  ;;  %2141 = vmatpush.msrb.mxu3 %v4674_v51 }
 0xf51   :  { %v2379_v27 = vmul.f32 %v2358_v30, %v6362_v45  ;;  %v2361_v57 = vmul.f32 %v5129_v53, %v2360_v4  ;;  %5130 = vrsqrt.f32 %v2348_v52  ;;  %v6428_v45 = vld [vmem:[%s7663_s11 + $0x1] ss:$0 sm:$0xff]  ;;  %vm2375_vm4 = vweird.f32 %v2348_v52 }
 0xf53   :  { %v2385_v49 = vmul.f32 %v6410_v54, %v2379_v27  ;;  %v2362_v62 = vmul.f32 0.5, %v2361_v57  ;;  %v4672_v27 = vld [vmem:[%s7666_s12 + $0x80] sm:$0xff] }
 0xf55   :  { %v2363_v56 = vsub.f32 1.5, %v2362_v62  ;;  %v2391_v0 = vadd.f32 %v6416_v60, %v2385_v49 }
 0xf57   :  { %v5131_v14 = vpop.eup %5130  ;;  %v2364_v6 = vmul.f32 %v5129_v53, %v2363_v56  ;;  %v1977_v50 = vpop.f32.mrf.mxu2  ;;  %4695 = vmatmul.msk.f32.vlgmr.msra.gmra.mxu2 %vm70_vm0, %v2391_v0 }
 0xf58   :  { %v2370_v32 = vmul.f32 %v5131_v14, %v2348_v52  ;;  %v6439_v9 = vadd.f32 %v6428_v45, %v1977_v50  ;;  %vm2376_vm5 = vweird.f32 %v5131_v14  ;;  %v4673_v52 = vld [vmem:[%s7666_s12 + $0x88] sm:$0xff] }
 0xf59   :  { %v2368_v28 = vsel %vm2367_vm11, %v5129_v53, %v2364_v6  ;;  %vm2377_vm6 = vmor %vm2375_vm4, %vm2376_vm5  ;;  %2142 = vmatpush.msrb.mxu3 %v4673_v52 }
 0xf5a   :  { %v2371_v17 = vmul.f32 %v5131_v14, %v2370_v32  ;;  %v6445_v19 = vmul.f32 0.70710677, %v6439_v9  ;;  %v2380_v46 = vmul.f32 %v2368_v28, %v6369_v59 }
 0xf5b   :  { %2143 = vmatpush.msrb.mxu3 %v4672_v27 }
 0xf5c   :  { %v2372_v25 = vmul.f32 0.5, %v2371_v17  ;;  %v6452_v26 = vand.u32 2147483647, %v6445_v19  ;;  %v2386_v31 = vmul.f32 %v6410_v54, %v2380_v46 }
 0xf5e   :  { %v2373_v34 = vsub.f32 1.5, %v2372_v25  ;;  %v1995_v59 = vmul.f32 0.3275911, %v6452_v26  ;;  %v2392_v29 = vadd.f32 %v6416_v60, %v2386_v31 }
 0xf60   :  { %v2374_v38 = vmul.f32 %v5131_v14, %v2373_v34  ;;  %v1998_v13 = vadd.f32 1.0, %v1995_v59  ;;  %v1980_v15 = vpop.f32.mrf.mxu2  ;;  %4696 = vmatmul.msk.f32.gmra.mxu2 %vm70_vm0, %v2392_v29 }
 0xf61   :  { %v6465_v16 = vadd.f32 %v6428_v45, %v1980_v15 }
 0xf62   :  { %5132 = vrcp.f32 %v1998_v13  ;;  %v2378_v37 = vsel %vm2377_vm6, %v5131_v14, %v2374_v38  ;;  %v2012_v53 = vand.u32 2147483648, %v1998_v13  ;;  %v2010_v4 = vand.u32 2147483647, %v1998_v13 }
 0xf63   :  { %v6471_v21 = vmul.f32 0.70710677, %v6465_v16  ;;  %v2381_v20 = vmul.f32 %v2378_v37, %v6382_v10  ;;  %vm2006_vm8 = vweird.f32 %v1998_v13 }
 0xf64   :  { %vm2011_vm10 = vcmp.eq.f32.partialorder %v2010_v4, 8.507059e+37 }
 0xf65   :  { %v6478_v24 = vand.u32 2147483647, %v6471_v21  ;;  %v2387_v39 = vmul.f32 %v6410_v54, %v2381_v20 }
 0xf67   :  { %v1996_v41 = vmul.f32 0.3275911, %v6478_v24  ;;  %v2393_v10 = vadd.f32 %v6416_v60, %v2387_v39  ;;  %v2013_v60 = vor.u32 1.1754944e-38, %v2012_v53  ;;  %v2074_v33 = vsub.f32 0.0, %v6478_v24 }
 0xf68   :  { %v5133_v63 = vpop.eup %5132 }
 0xf69   :  { %v2002_v42 = vmul.f32 %v5133_v63, %v1998_v13  ;;  %v1999_v43 = vadd.f32 1.0, %v1996_v41  ;;  %v1983_v47 = vpop.f32.mrf.mxu2  ;;  %4697 = vmatmul.msk.f32.gmra.mxu2 %vm70_vm0, %v2393_v10  ;;  %vm2007_vm7 = vweird.f32 %v5133_v63  ;;  %v2077_v15 = vmul.f32 %v2074_v33, %v6478_v24 }
 0xf6a   :  { %v6493_v36 = vadd.f32 %v6428_v45, %v1983_v47  ;;  %vm2008_vm9 = vmor %vm2006_vm8, %vm2007_vm7  ;;  %v2073_v45 = vsub.f32 0.0, %v6452_v26 }
 0xf6b   :  { %v2003_v35 = vsub.f32 1.0, %v2002_v42  ;;  %5134 = vrcp.f32 %v1999_v43  ;;  %v2027_v50 = vand.u32 2147483648, %v1999_v43  ;;  %v2025_v28 = vand.u32 2147483647, %v1999_v43 }
 0xf6c   :  { %v6500_v55 = vmul.f32 0.70710677, %v6493_v36  ;;  %v2076_v7 = vmul.f32 %v2073_v45, %v6452_v26  ;;  %vm2021_vm4 = vweird.f32 %v1999_v43 }
 0xf6d   :  { %v2004_v54 = vmul.f32 %v5133_v63, %v2003_v35  ;;  %v2028_v23 = vor.u32 1.1754944e-38, %v2027_v50  ;;  %vm2026_vm6 = vcmp.eq.f32.partialorder %v2025_v28, 8.507059e+37 }
 0xf6e   :  { %v6506_v30 = vand.u32 2147483647, %v6500_v55  ;;  %v2079_v31 = vmul.f32 1.442695, %v2076_v7 }
 0xf6f   :  { %v2005_v57 = vadd.f32 %v5133_v63, %v2004_v54 }
 0xf70   :  { %v1997_v61 = vmul.f32 0.3275911, %v6506_v30  ;;  %v2075_v24 = vsub.f32 0.0, %v6506_v30 }
 0xf71   :  { %v5135_v49 = vpop.eup %5134  ;;  %v2009_v62 = vsel %vm2008_vm9, %v5133_v63, %v2005_v57 }
 0xf72   :  { %v2014_v1 = vsel %vm2011_vm10, %v2013_v60, %v2009_v62  ;;  %v2017_v56 = vmul.f32 %v5135_v49, %v1999_v43  ;;  %v2000_v0 = vadd.f32 1.0, %v1997_v61  ;;  %vm2022_vm11 = vweird.f32 %v5135_v49 }
 0xf73   :  { %v2046_v3 = vmul.f32 1.0614054, %v2014_v1  ;;  %vm2023_vm5 = vmor %vm2021_vm4, %vm2022_vm11  ;;  %v2081_v43 = vmul.f32 1.442695, %v2077_v15  ;;  %v2078_v57 = vmul.f32 %v2075_v24, %v6506_v30  ;;  %vm2091_vm11 = vcmp.lt.f32.partialorder %v6445_v19, 0.0 }
 0xf74   :  { %v2018_v14 = vsub.f32 1.0, %v2017_v56  ;;  %5136 = vrcp.f32 %v2000_v0  ;;  %v2042_v37 = vand.u32 2147483648, %v2000_v0  ;;  %v2040_v22 = vand.u32 2147483647, %v2000_v0 }
 0xf75   :  { %v2049_v6 = vadd.f32 -1.4531521, %v2046_v3  ;;  %5138 = vpow2.f32 %v2079_v31  ;;  %vm2036_vm8 = vweird.f32 %v2000_v0  ;;  %v1986_v56 = vmul.f32 0.5, %v6439_v9 }
 0xf76   :  { %v2019_v32 = vmul.f32 %v5135_v49, %v2018_v14  ;;  %v2043_v10 = vor.u32 1.1754944e-38, %v2042_v37  ;;  %vm2041_vm10 = vcmp.eq.f32.partialorder %v2040_v22, 8.507059e+37  ;;  %5140 = vpow2.f32 %v2081_v43 }
 0xf77   :  { %v2052_v11 = vmul.f32 %v2049_v6, %v2014_v1  ;;  %v2083_v3 = vmul.f32 1.442695, %v2078_v57  ;;  %vm2092_vm4 = vcmp.lt.f32.partialorder %v6471_v21, 0.0 }
 0xf78   :  { %v2020_v17 = vadd.f32 %v5135_v49, %v2019_v32 }
 0xf79   :  { %v2055_v46 = vadd.f32 1.4214138, %v2052_v11  ;;  %5142 = vpow2.f32 %v2083_v3 }
 0xf7a   :  { %v5137_v25 = vpop.eup %5136  ;;  %v2024_v34 = vsel %vm2023_vm5, %v5135_v49, %v2020_v17  ;;  %vm2093_vm5 = vcmp.lt.f32.partialorder %v6500_v55, 0.0 }
 0xf7b   :  { %v2058_v59 = vmul.f32 %v2055_v46, %v2014_v1  ;;  %v2032_v29 = vmul.f32 %v5137_v25, %v2000_v0  ;;  %v2029_v44 = vsel %vm2026_vm6, %v2028_v23, %v2024_v34  ;;  %vm2037_vm7 = vweird.f32 %v5137_v25  ;;  %v5139_v48 = vpop.eup %5138 }
 0xf7c   :  { %v2047_v38 = vmul.f32 1.0614054, %v2029_v44  ;;  %vm2038_vm9 = vmor %vm2036_vm8, %vm2037_vm7  ;;  %v5141_v6 = vpop.eup %5140  ;;  %v1987_v23 = vmul.f32 0.5, %v6465_v16  ;;  %v4972_v16 = vld [vmem:[%s7729_s22] ss:$0 sm:$0xff] }
 0xf7d   :  { %v2061_v26 = vadd.f32 -0.28449672, %v2058_v59  ;;  %v2033_v13 = vsub.f32 1.0, %v2032_v29 }
 0xf7e   :  { %v2050_v18 = vadd.f32 -1.4531521, %v2047_v38  ;;  %v1988_v38 = vmul.f32 0.5, %v6493_v36 }
 0xf7f   :  { %v2064_v58 = vmul.f32 %v2061_v26, %v2014_v1  ;;  %v2034_v20 = vmul.f32 %v5137_v25, %v2033_v13  ;;  %v5143_v31 = vpop.eup %5142 }
 0xf80   :  { %v2053_v39 = vmul.f32 %v2050_v18, %v2029_v44 }
 0xf81   :  { %v2067_v41 = vadd.f32 0.2548296, %v2064_v58  ;;  %v2035_v40 = vadd.f32 %v5137_v25, %v2034_v20  ;;  %v4973_v20 = vld [vmem:[%s7665_s13 + $0x1] ss:$0 sm:$0xff] }
 0xf82   :  { %v2056_v63 = vadd.f32 1.4214138, %v2053_v39 }
 0xf83   :  { %v2070_v42 = vmul.f32 %v2067_v41, %v2014_v1  ;;  %v2039_v47 = vsel %vm2038_vm9, %v5137_v25, %v2035_v40 }
 0xf84   :  { %v2059_v35 = vmul.f32 %v2056_v63, %v2029_v44  ;;  %v2044_v51 = vsel %vm2041_vm10, %v2043_v10, %v2039_v47 }
 0xf85   :  { %v2085_v53 = vmul.f32 %v5139_v48, %v2070_v42  ;;  %v2048_v54 = vmul.f32 1.0614054, %v2044_v51 }
 0xf86   :  { %v2062_v4 = vadd.f32 -0.28449672, %v2059_v35 }
 0xf87   :  { %v2088_v52 = vsub.f32 1.0, %v2085_v53  ;;  %v2051_v27 = vadd.f32 -1.4531521, %v2048_v54 }
 0xf88   :  { %v2065_v60 = vmul.f32 %v2062_v4, %v2029_v44 }
 0xf89   :  { %v2094_v61 = vsub.f32 0.0, %v2088_v52  ;;  %v2054_v49 = vmul.f32 %v2051_v27, %v2044_v51 }
 0xf8a   :  { %v2068_v62 = vadd.f32 0.2548296, %v2065_v60 }
 0xf8b   :  { %v2097_v1 = vsel %vm2091_vm11, %v2094_v61, %v2088_v52  ;;  %v2057_v45 = vadd.f32 1.4214138, %v2054_v49 }
 0xf8c   :  { %v2100_v0 = vadd.f32 1.0, %v2097_v1  ;;  %v2071_v14 = vmul.f32 %v2068_v62, %v2029_v44 }
 0xf8d   :  { %v2060_v50 = vmul.f32 %v2057_v45, %v2044_v51 }
 0xf8e   :  { %v2103_v7 = vmul.f32 %v2100_v0, %v1986_v56  ;;  %v2086_v32 = vmul.f32 %v5141_v6, %v2071_v14  ;;  %v2277_v6 = vld [vmem:[%s7669_s17 + $0x18] sm:$0xff] }
 0xf8f   :  { %v2063_v28 = vadd.f32 -0.28449672, %v2060_v50  ;;  %2300 = vmatpush.msrb.mxu1 %v2277_v6  ;;  %v2276_v50 = vld [vmem:[%s7669_s17 + $0x10] sm:$0xff] }
 0xf90   :  { %2144 = vmatmul.f32.vlgmr.msrb.gmra.mxu3 %v2103_v7  ;;  %v2089_v30 = vsub.f32 1.0, %v2086_v32  ;;  %v2275_v7 = vld [vmem:[%s7669_s17 + $0x8] sm:$0xff]  ;;  %v2274_v32 = vld [vmem:[%s7669_s17] sm:$0xff] }
 0xf91   :  { %v2066_v11 = vmul.f32 %v2063_v28, %v2044_v51  ;;  %2301 = vmatpush.msrb.mxu1 %v2276_v50 }
 0xf92   :  { %v2095_v17 = vsub.f32 0.0, %v2089_v30 }
 0xf93   :  { %v2069_v19 = vadd.f32 0.2548296, %v2066_v11  ;;  %2302 = vmatpush.msrb.mxu1 %v2275_v7 }
 0xf94   :  { %v2098_v46 = vsel %vm2092_vm4, %v2095_v17, %v2089_v30 }
 0xf95   :  { %v2101_v9 = vadd.f32 1.0, %v2098_v46  ;;  %v2072_v25 = vmul.f32 %v2069_v19, %v2044_v51  ;;  %2303 = vmatpush.msrb.mxu1 %v2274_v32 }
 0xf97   :  { %v2104_v33 = vmul.f32 %v2101_v9, %v1987_v23  ;;  %v2087_v34 = vmul.f32 %v5143_v31, %v2072_v25 }
 0xf99   :  { %2147 = vmatmul.f32.gmra.mxu3 %v2104_v33  ;;  %v2090_v59 = vsub.f32 1.0, %v2087_v34 }
 0xf9b   :  { %v2096_v29 = vsub.f32 0.0, %v2090_v59 }
 0xf9d   :  { %v2099_v44 = vsel %vm2093_vm5, %v2096_v29, %v2090_v59  ;;  %v2240_v29 = vld [vmem:[%s7670_s16 + $0x18] sm:$0xff] }
 0xf9e   :  { %v2102_v26 = vadd.f32 1.0, %v2099_v44  ;;  %2259 = vmatpush.msra.mxu0 %v2240_v29  ;;  %v2239_v44 = vld [vmem:[%s7670_s16 + $0x10] sm:$0xff] }
 0xfa0   :  { %v2105_v13 = vmul.f32 %v2102_v26, %v1988_v38  ;;  %2260 = vmatpush.msra.mxu0 %v2239_v44  ;;  %v2238_v38 = vld [vmem:[%s7670_s16 + $0x8] sm:$0xff] }
 0xfa2   :  { %2150 = vmatmul.f32.gmra.mxu3 %v2105_v13  ;;  %2261 = vmatpush.msra.mxu0 %v2238_v38  ;;  %v2237_v13 = vld [vmem:[%s7670_s16] sm:$0xff]  ;;  %s7753_s16 = sld [smem:[#allocation14_spill]] }
 0xfa4   :  { %2262 = vmatpush.msra.mxu0 %v2237_v13 }
 0xfda   :  { %v2428_v21 = vpop.f32.mrf.mxu2 }
 0xfdb   :  { %v6533_v55 = vadd.f32 %v4972_v16, %v2428_v21 }
 0xfe3   :  { %v2431_v15 = vpop.f32.mrf.mxu2 }
 0xfe4   :  { %v6527_v18 = vadd.f32 %v4972_v16, %v2431_v15 }
 0xfe6   :  { %2448 = vrot.lane.b32.xlu1 %v6527_v18, %s7731_s28  ;;  %2454 = vrot.lane.b32.xlu2 %v6527_v18, %s7733_s24 }
 0xfec   :  { %v2434_v36 = vpop.f32.mrf.mxu2 }
 0xfed   :  { %v6535_v37 = vadd.f32 %v4972_v16, %v2434_v36 }
 0xfee   :  { %2452 = vrot.lane.b32.xlu1 %v6533_v55, %s7733_s24 }
 0xfef   :  { %2456 = vrot.lane.b32.xlu0 %v6535_v37, %s7733_s24  ;;  %2450 = vrot.lane.b32.xlu2 %v6535_v37, %s7731_s28 }
 0xff6   :  { %2442 = vrot.lane.b32.xlu1 %v6527_v18, %s7732_s1 }
 0xff7   :  { %2446 = vrot.lane.b32.xlu2 %v6533_v55, %s7731_s28 }
 0xfff   :  { %2444 = vrot.lane.b32.xlu2 %v6535_v37, %s7732_s1 }
0x1007   :  { %2440 = vrot.lane.b32.xlu2 %v6533_v55, %s7732_s1 }
0x1013   :  { %v2145_v58 = vpop.f32.mrf.mxu3 }
0x1014   :  { %v2146_v40 = vadd.f32 %v4973_v20, %v2145_v58 }
0x1016   :  { %v6557_v10 = vadd.f32 %v2146_v40, %v6300_v2 }
0x1018   :  { %v2159_v48 = vsel %vm70_vm0, %v6557_v10, 0.0 }
0x101c   :  { %v2148_v22 = vpop.f32.mrf.mxu3 }
0x101d   :  { %v2149_v39 = vadd.f32 %v4973_v20, %v2148_v22 }
0x101f   :  { %v2155_v41 = vadd.f32 %v2149_v39, %v6305_v5 }
0x1021   :  { %v2162_v63 = vsel %vm70_vm0, %v2155_v41, 0.0 }
0x1022   :  { %2163 = vadd.xlane.f32.xlu0 %v2162_v63 }
0x1025   :  { %v2151_v42 = vpop.f32.mrf.mxu3 }
0x1026   :  { %v2152_v43 = vadd.f32 %v4973_v20, %v2151_v42 }
0x1028   :  { %v2156_v47 = vadd.f32 %v2152_v43, %v6310_v8 }
0x102a   :  { %2160 = vadd.xlane.f32.xlu0 %v2159_v48  ;;  %v2165_v24 = vsel %vm77_vm1, %v2156_v47, 0.0 }
0x102b   :  { %2166 = vadd.xlane.f32.xlu1 %v2165_v24 }
0x1040   :  { %v6563_v35 = vpop.permute.xlu2 %2454 }
0x1049   :  { %v6565_v5 = vpop.permute.xlu2 %2450 }
0x104a   :  { %2553 = vrot.lane.b32.xlu0 %v6565_v5, %s7734_s25 }
0x1051   :  { %v6577_v51 = vpop.permute.xlu2 %2446 }
0x1058   :  { %v6569_v2 = vpop.permute.xlu1 %2448 }
0x1059   :  { %2551 = vrot.lane.b32.xlu1 %v6569_v2, %s7734_s25  ;;  %v6585_v54 = vpop.permute.xlu2 %2444  ;;  %v4914_v34 = vpack.i.bf16 %v6563_v35, %v6569_v2 }
0x1060   :  { %v6581_v53 = vpop.permute.xlu1 %2452 }
0x1061   :  { %v6573_v8 = vpop.permute.xlu0 %2456  ;;  %v6589_v4 = vpop.permute.xlu2 %2440 }
0x1062   :  { %2597 = vrot.lane.b32.xlu0 %v6573_v8, %s7734_s25 }
0x1068   :  { %v6597_v27 = vpop.permute.xlu1 %2442 }
0x106a   :  { %2549 = vrot.lane.b32.xlu0 %v6577_v51, %s7734_s25 }
0x1072   :  { %2593 = vrot.lane.b32.xlu0 %v6581_v53, %s7734_s25 }
0x107a   :  { %2509 = vrot.lane.b32.xlu0 %v6585_v54, %s7734_s25 }
0x1082   :  { %2505 = vrot.lane.b32.xlu0 %v6589_v4, %s7734_s25 }
0x108a   :  { %2463 = vrot.lane.b32.xlu0 %v6527_v18, %s7734_s25 }
0x1092   :  { %2876 = vrot.lane.b32.xlu0 %v6565_v5, %s7735_s27 }
0x1095   :  { %v2164_v52 = vpop.xlane.xlu0 %2163 }
0x1096   :  { %v2169_v57 = vmul.f32 %v2164_v52, %v5431_v12 }
0x1098   :  { %v6600_v60 = vsub.f32 %v2155_v41, %v2169_v57 }
0x109a   :  { %v2175_v61 = vmul.f32 %v6600_v60, %v6600_v60 }
0x109c   :  { %v2180_v49 = vsel %vm70_vm0, %v2175_v61, 0.0 }
0x109d   :  { %2181 = vadd.xlane.f32.xlu1 %v2180_v49  ;;  %v2161_v3 = vpop.xlane.xlu0 %2160 }
0x109e   :  { %v2167_v62 = vpop.xlane.xlu1 %2166  ;;  %v2168_v11 = vmul.f32 %v2161_v3, %v5431_v12 }
0x109f   :  { %v2170_v1 = vmul.f32 %v2167_v62, %v5431_v12  ;;  %v4975_v62 = vld [vmem:[%s7739_s21] ss:$0 sm:$0xff] }
0x10a0   :  { %v6639_v19 = vsub.f32 %v6557_v10, %v2168_v11 }
0x10a1   :  { %v6606_v45 = vsub.f32 %v2156_v47, %v2170_v1 }
0x10a2   :  { %v2174_v46 = vmul.f32 %v6639_v19, %v6639_v19 }
0x10a3   :  { %v2176_v56 = vmul.f32 %v6606_v45, %v6606_v45 }
0x10a4   :  { %v2177_v9 = vsel %vm70_vm0, %v2174_v46, 0.0 }
0x10a5   :  { %v2183_v0 = vsel %vm77_vm1, %v2176_v56, 0.0 }
0x10a6   :  { %2184 = vadd.xlane.f32.xlu2 %v2183_v0 }
0x10b6   :  { %2507 = vrot.lane.b32.xlu1 %v6597_v27, %s7734_s25 }
0x10bc   :  { %v2554_v14 = vpop.permute.xlu0 %2553 }
0x10bd   :  { %4710 = vmatpush.xpose.msk.msra.mxu3 %vm230_vm12, %v2554_v14 }
0x10be   :  { %2465 = vrot.lane.b32.xlu1 %v6535_v37, %s7734_s25  ;;  %2595 = vrot.lane.b32.xlu2 %v6563_v35, %s7734_s25 }
0x10c6   :  { %2461 = vrot.lane.b32.xlu1 %v6533_v55, %s7734_s25 }
0x10cb   :  { %v2552_v28 = vpop.permute.xlu1 %2551 }
0x10cc   :  { %4711 = vmatpush.xpose.msk.msra.mxu3 %vm230_vm12, %v2552_v28 }
0x10ce   :  { %2921 = vrot.lane.b32.xlu1 %v6573_v8, %s7735_s27 }
0x10d4   :  { %v2598_v30 = vpop.permute.xlu0 %2597 }
0x10d5   :  { %4716 = vmatpush.xpose.msk.msrb.mxu2 %vm230_vm12, %v2598_v30 }
0x10dc   :  { %v2550_v17 = vpop.permute.xlu0 %2549 }
0x10dd   :  { %4712 = vmatpush.xpose.msk.msra.mxu3 %vm230_vm12, %v2550_v17 }
0x10e0   :  { %4713 = vmatmul.msk.f32.vlgmr.msra.gmra.mxu3 %vm230_vm12, %v6577_v51 }
0x10e4   :  { %v2594_v23 = vpop.permute.xlu0 %2593 }
0x10e7   :  { %2178 = vadd.xlane.f32.xlu2 %v2177_v9 }
0x10e8   :  { %4714 = vmatmul.msk.f32.gmra.mxu3 %vm230_vm12, %v6569_v2  ;;  %v4974_v2 = vld [vmem:[%s7667_s14] ss:$0 sm:$0xff] }
0x10ec   :  { %v2510_v25 = vpop.permute.xlu0 %2509 }
0x10ed   :  { %4704 = vmatpush.xpose.msk.msra.mxu1 %vm230_vm12, %v2510_v25 }
0x10f0   :  { %4715 = vmatmul.msk.f32.gmra.mxu3 %vm230_vm12, %v6565_v5 }
0x10f4   :  { %v2506_v31 = vpop.permute.xlu0 %2505 }
0x10fc   :  { %v2464_v33 = vpop.permute.xlu0 %2463 }
0x10ff   :  { %4915 = vrot.lane.b32.xlu2 %v4914_v34, %s7735_s27 }
0x1104   :  { %v2877_v59 = vpop.permute.xlu0 %2876 }
0x1105   :  { %4742 = vmatpush.msk.msrb.mxu3 %vm564_vm13, %v2877_v59  ;;  %v6710_v59 = vld [vmem:[%s7740_s4 + $0x8] sm:$0xff] }
0x1110   :  { %v2182_v26 = vpop.xlane.xlu1 %2181 }
0x1111   :  { %v2187_v21 = vmul.f32 %v2182_v26, %v5431_v12 }
0x1113   :  { %v2190_v16 = vadd.f32 1e-05, %v2187_v21 }
0x1115   :  { %5144 = vrsqrt.f32 %v2190_v16  ;;  %vm2208_vm7 = vweird.f32 %v2190_v16 }
0x1119   :  { %v2185_v15 = vpop.xlane.xlu2 %2184 }
0x111a   :  { %v2188_v36 = vmul.f32 %v2185_v15, %v5431_v12 }
0x111b   :  { %v5145_v58 = vpop.eup %5144 }
0x111c   :  { %v2203_v20 = vmul.f32 %v5145_v58, %v2190_v16  ;;  %v2191_v22 = vadd.f32 1e-05, %v2188_v36  ;;  %vm2209_vm6 = vweird.f32 %v5145_v58 }
0x111d   :  { %vm2210_vm8 = vmor %vm2208_vm7, %vm2209_vm6  ;;  %vm7710_vm7 = vcmask 31744  }
0x111e   :  { %v2204_v39 = vmul.f32 %v5145_v58, %v2203_v20  ;;  %5146 = vrsqrt.f32 %v2191_v22  ;;  %vm2218_vm10 = vweird.f32 %v2191_v22 }
0x1120   :  { %v2205_v41 = vmul.f32 0.5, %v2204_v39  ;;  %v2460_v39 = vld [vmem:[%s7740_s4 + $0x10] sm:$0xf] }
0x1121   :  { %v2596_v40 = vpop.permute.xlu2 %2595 }
0x1122   :  { %v2206_v63 = vsub.f32 1.5, %v2205_v41  ;;  %4717 = vmatpush.xpose.msk.msrb.mxu2 %vm230_vm12, %v2596_v40 }
0x1124   :  { %v5147_v10 = vpop.eup %5146  ;;  %v2207_v42 = vmul.f32 %v5145_v58, %v2206_v63  ;;  %v4977_v63 = vld [vmem:[%s7741_s20] ss:$0 sm:$0xff] }
0x1125   :  { %v2213_v43 = vmul.f32 %v5147_v10, %v2191_v22  ;;  %vm2219_vm9 = vweird.f32 %v5147_v10 }
0x1126   :  { %4718 = vmatpush.xpose.msk.msrb.mxu2 %vm230_vm12, %v2594_v23  ;;  %v2211_v47 = vsel %vm2210_vm8, %v5145_v58, %v2207_v42  ;;  %vm2220_vm11 = vmor %vm2218_vm10, %vm2219_vm9  ;;  %vm2270_vm8 = vcmask 211968   ;;  %vm2272_vm9 = vcmask 207872  }
0x1127   :  { %v2214_v48 = vmul.f32 %v5147_v10, %v2213_v43  ;;  %v2223_v52 = vmul.f32 %v2211_v47, %v6600_v60 }
0x1128   :  { %v2508_v24 = vpop.permute.xlu1 %2507 }
0x1129   :  { %v2215_v5 = vmul.f32 0.5, %v2214_v48  ;;  %4705 = vmatpush.xpose.msk.msra.mxu1 %vm230_vm12, %v2508_v24  ;;  %4719 = vmatmul.msk.f32.vlgmr.msrb.gmra.mxu2 %vm230_vm12, %v6581_v53  ;;  %v2229_v49 = vmul.f32 %v4974_v2, %v2223_v52 }
0x112b   :  { %v2216_v57 = vsub.f32 1.5, %v2215_v5  ;;  %v2235_v3 = vadd.f32 %v4975_v62, %v2229_v49 }
0x112d   :  { %v2217_v61 = vmul.f32 %v5147_v10, %v2216_v57  ;;  %4706 = vmatpush.xpose.msk.msra.mxu1 %vm230_vm12, %v2506_v31  ;;  %v2283_v6 = vrot.slane %v2235_v3, 4 }
0x112f   :  { %v2221_v1 = vsel %vm2220_vm11, %v5147_v10, %v2217_v61 }
0x1130   :  { %v2224_v56 = vmul.f32 %v2221_v1, %v6606_v45  ;;  %v2466_v0 = vpop.permute.xlu1 %2465 }
0x1131   :  { %4698 = vmatpush.xpose.msk.msrb.mxu0 %vm230_vm12, %v2466_v0  ;;  %4720 = vmatmul.msk.f32.gmra.mxu2 %vm230_vm12, %v6563_v35 }
0x1132   :  { %v2230_v60 = vmul.f32 %v4974_v2, %v2224_v56 }
0x1134   :  { %v2236_v14 = vadd.f32 %v4975_v62, %v2230_v60 }
0x1135   :  { %4699 = vmatpush.xpose.msk.msrb.mxu0 %vm230_vm12, %v2464_v33 }
0x1136   :  { %v2284_v50 = vrot.slane %v2236_v14, 4 }
0x1138   :  { %v2462_v7 = vpop.permute.xlu1 %2461  ;;  %v2285_v32 = vsel %vm564_vm13, %v2283_v6, %v2284_v50 }
0x1139   :  { %4691 = vmatmul.msk.f32.vlgmr.msrb.gmra.mxu1 %vm70_vm0, %v2285_v32  ;;  %4700 = vmatpush.xpose.msk.msrb.mxu0 %vm230_vm12, %v2462_v7 }
0x113a   :  { %4721 = vmatmul.msk.f32.gmra.mxu2 %vm230_vm12, %v6573_v8  ;;  %v6703_v8 = vld [vmem:[%s7740_s4] sm:$0xff] }
0x1140   :  { %v2922_v45 = vpop.permute.xlu1 %2921 }
0x1141   :  { %4707 = vmatmul.msk.f32.vlgmr.msra.gmra.mxu1 %vm230_vm12, %v6589_v4  ;;  %4746 = vmatpush.msk.msra.mxu2 %vm564_vm13, %v2922_v45 }
0x1149   :  { %4708 = vmatmul.msk.f32.gmra.mxu1 %vm230_vm12, %v6597_v27 }
0x1151   :  { %4709 = vmatmul.msk.f32.gmra.mxu1 %vm230_vm12, %v6585_v54 }
0x115a   :  { %v2179_v35 = vpop.xlane.xlu2 %2178 }
0x115b   :  { %v2186_v28 = vmul.f32 %v2179_v35, %v5431_v12 }
0x115d   :  { %v2189_v30 = vadd.f32 1e-05, %v2186_v28 }
0x115f   :  { %5148 = vrsqrt.f32 %v2189_v30  ;;  %vm2198_vm5 = vweird.f32 %v2189_v30 }
0x1162   :  { %v4916_v11 = vpop.permute.xlu2 %4915 }
0x1163   :  { %v4918_v17 = vunpack.i.h.bf16 %v4916_v11  ;;  %v4917_v46 = vunpack.i.l.bf16 %v4916_v11  ;;  %v2584_v23 = vpop.f32.mrf.mxu3 }
0x1164   :  { %v2585_v9 = vadd.f32 %v2584_v23, %v6703_v8 }
0x1165   :  { %v5149_v25 = vpop.eup %5148  ;;  %2905 = vmatpush.msrb.mxu3 %v4917_v46  ;;  %2950 = vmatpush.msra.mxu2 %v4918_v17 }
0x1166   :  { %v2193_v31 = vmul.f32 %v5149_v25, %v2189_v30  ;;  %v2655_v33 = vsel %vm401_vm14, %v2585_v9, -inf  ;;  %vm2199_vm4 = vweird.f32 %v5149_v25 }
0x1167   :  { %2656 = vmax.xlane.f32.xlu0 %v2655_v33  ;;  %vm2200_vm6 = vmor %vm2198_vm5, %vm2199_vm4 }
0x1168   :  { %v2194_v34 = vmul.f32 %v5149_v25, %v2193_v31 }
0x116a   :  { %v2195_v29 = vmul.f32 0.5, %v2194_v34 }
0x116b   :  { %v2587_v44 = vpop.f32.mrf.mxu3 }
0x116c   :  { %v2196_v38 = vsub.f32 1.5, %v2195_v29  ;;  %v6713_v26 = vadd.f32 %v2587_v44, %v6710_v59 }
0x116e   :  { %v2197_v13 = vmul.f32 %v5149_v25, %v2196_v38  ;;  %v2658_v21 = vsel %vm401_vm14, %v6713_v26, -inf }
0x116f   :  { %2659 = vmax.xlane.f32.xlu2 %v2658_v21 }
0x1170   :  { %v2201_v16 = vsel %vm2200_vm6, %v5149_v25, %v2197_v13 }
0x1171   :  { %v2222_v15 = vmul.f32 %v2201_v16, %v6639_v19 }
0x1173   :  { %v2228_v36 = vmul.f32 %v4974_v2, %v2222_v15  ;;  %v2590_v41 = vpop.f32.mrf.mxu3  ;;  %v4919_v15 = vpack.i.bf16 %v6581_v53, %v6577_v51 }
0x1174   :  { %v6731_v40 = vadd.f32 %v2590_v41, %v2460_v39 }
0x1175   :  { %v2234_v58 = vadd.f32 %v4975_v62, %v2228_v36 }
0x1176   :  { %v2661_v24 = vsel %vm408_vm15, %v6731_v40, -inf }
0x1177   :  { %4689 = vmatmul.msk.f32.vlgmr.msra.gmra.mxu0 %vm70_vm0, %v2234_v58 }
0x117f   :  { %4690 = vmatmul.msk.f32.gmra.mxu0 %vm70_vm0, %v2235_v3 }
0x1187   :  { %4701 = vmatmul.msk.f32.vlgmr.msrb.gmra.mxu0 %vm230_vm12, %v6533_v55 }
0x118f   :  { %4702 = vmatmul.msk.f32.gmra.mxu0 %vm230_vm12, %v6527_v18 }
0x1197   :  { %4703 = vmatmul.msk.f32.gmra.mxu0 %vm230_vm12, %v6535_v37 }
0x11ac   :  { %v2628_v20 = vpop.f32.mrf.mxu2 }
0x11ad   :  { %v2629_v22 = vadd.f32 %v2628_v20, %v6703_v8 }
0x11af   :  { %v2664_v19 = vsel %vm401_vm14, %v2629_v22, -inf }
0x11b0   :  { %2665 = vmax.xlane.f32.xlu1 %v2664_v19 }
0x11b4   :  { %v2631_v10 = vpop.f32.mrf.mxu2 }
0x11b5   :  { %v2632_v42 = vadd.f32 %v2631_v10, %v6710_v59 }
0x11b6   :  { %v2305_v43 = vpop.f32.mrf.mxu1 }
0x11b7   :  { %v2306_v47 = vadd.f32 %v4977_v63, %v2305_v43  ;;  %v2667_v48 = vsel %vm401_vm14, %v2632_v42, -inf }
0x11b8   :  { %2668 = vmax.xlane.f32.xlu2 %v2667_v48  ;;  %2662 = vmax.xlane.f32.xlu1 %v2661_v24 }
0x11b9   :  { %2309 = vst.msk [vmem:[%s7742_s18] sm:$0xff] %vm7710_vm7, %v2306_v47  ;;  %s7750_s18 = sld [smem:[#allocation15_spill]] }
0x11bd   :  { %v2634_v5 = vpop.f32.mrf.mxu2 }
0x11be   :  { %v6744_v2 = vadd.f32 %v2634_v5, %v2460_v39  ;;  %v2540_v3 = vpop.f32.mrf.mxu1 }
0x11bf   :  { %v6791_v19 = vadd.f32 %v2540_v3, %v6703_v8 }
0x11c0   :  { %v2670_v52 = vsel %vm408_vm15, %v6744_v2, -inf }
0x11c1   :  { %2671 = vmax.xlane.f32.xlu2 %v2670_v52  ;;  %v2646_v51 = vsel %vm401_vm14, %v6791_v19, -inf }
0x11c6   :  { %v2543_v7 = vpop.f32.mrf.mxu1 }
0x11c7   :  { %v2544_v45 = vadd.f32 %v2543_v7, %v6710_v59 }
0x11c9   :  { %v2649_v35 = vsel %vm401_vm14, %v2544_v45, -inf }
0x11ce   :  { %v2546_v28 = vpop.f32.mrf.mxu1 }
0x11cf   :  { %v2547_v17 = vadd.f32 %v2546_v28, %v2460_v39 }
0x11d1   :  { %v2652_v25 = vsel %vm408_vm15, %v2547_v17, -inf }
0x11da   :  { %v2657_v57 = vpop.xlane.xlu0 %2656 }
0x11db   :  { %v2679_v61 = vsub.f32 %v2585_v9, %v2657_v57 }
0x11dd   :  { %v2697_v49 = vmul.f32 1.442695, %v2679_v61 }
0x11df   :  { %5150 = vpow2.f32 %v2697_v49 }
0x11e2   :  { %v2660_v30 = vpop.xlane.xlu2 %2659 }
0x11e3   :  { %v2680_v23 = vsub.f32 %v6713_v26, %v2660_v30 }
0x11e5   :  { %v6748_v62 = vpop.eup %5150  ;;  %v2699_v31 = vmul.f32 1.442695, %v2680_v23 }
0x11e6   :  { %v2727_v1 = vsel %vm401_vm14, %v6748_v62, 0.0 }
0x11e7   :  { %2728 = vadd.xlane.f32.xlu0 %v2727_v1 }
0x11f4   :  { %v2264_v56 = vpop.f32.mrf.mxu0 }
0x11f5   :  { %2271 = vst.msk [vmem:[%s7743_s19] sm:$0xff] %vm2270_vm8, %v2264_v56 }
0x11fc   :  { %v2267_v0 = vpop.f32.mrf.mxu0 }
0x11fd   :  { %2273 = vst.msk [vmem:[%s7743_s19 + $0x8] sm:$0xf] %vm2272_vm9, %v2267_v0  ;;  %s7745_s19 = smov 24  }
0x1204   :  { %v2496_v60 = vpop.f32.mrf.mxu0 }
0x1205   :  { %v6780_v36 = vadd.f32 %v2496_v60, %v6703_v8 }
0x1207   :  { %v2637_v20 = vsel %vm401_vm14, %v6780_v36, -inf }
0x120c   :  { %v2499_v14 = vpop.f32.mrf.mxu0 }
0x120d   :  { %v6783_v58 = vadd.f32 %v2499_v14, %v6710_v59  ;;  %v4924_v59 = vpack.i.bf16 %v6589_v4, %v6597_v27 }
0x1214   :  { %v2502_v6 = vpop.f32.mrf.mxu0 }
0x1215   :  { %v6760_v50 = vadd.f32 %v2502_v6, %v2460_v39 }
0x1217   :  { %v2643_v32 = vsel %vm408_vm15, %v6760_v50, -inf }
0x1218   :  { %2644 = vmax.xlane.f32.xlu0 %v2643_v32 }
0x1220   :  { %2650 = vmax.xlane.f32.xlu0 %v2649_v35 }
0x1223   :  { %v2666_v11 = vpop.xlane.xlu1 %2665 }
0x1224   :  { %v2682_v46 = vsub.f32 %v2629_v22, %v2666_v11  ;;  %v2640_v22 = vsel %vm401_vm14, %v6783_v58, -inf }
0x1226   :  { %v2703_v9 = vmul.f32 1.442695, %v2682_v46 }
0x1228   :  { %5152 = vpow2.f32 %v2703_v9  ;;  %2653 = vmax.xlane.f32.xlu0 %v2652_v25 }
0x1229   :  { %5154 = vpow2.f32 %v2699_v31 }
0x122b   :  { %v2669_v33 = vpop.xlane.xlu2 %2668  ;;  %v2663_v8 = vpop.xlane.xlu1 %2662 }
0x122c   :  { %v2683_v34 = vsub.f32 %v2632_v42, %v2669_v33  ;;  %v2681_v63 = vsub.f32 %v6731_v40, %v2663_v8 }
0x122e   :  { %v5153_v29 = vpop.eup %5152  ;;  %v2705_v44 = vmul.f32 1.442695, %v2683_v34  ;;  %v2701_v10 = vmul.f32 1.442695, %v2681_v63 }
0x122f   :  { %v2736_v38 = vsel %vm401_vm14, %v5153_v29, 0.0  ;;  %v6769_v13 = vpop.eup %5154 }
0x1230   :  { %2737 = vadd.xlane.f32.xlu1 %v2736_v38  ;;  %5156 = vpow2.f32 %v2705_v44  ;;  %v2730_v26 = vsel %vm401_vm14, %v6769_v13, 0.0 }
0x1234   :  { %v2672_v61 = vpop.xlane.xlu2 %2671 }
0x1235   :  { %v2684_v33 = vsub.f32 %v6744_v2, %v2672_v61 }
0x1236   :  { %v6771_v21 = vpop.eup %5156 }
0x1237   :  { %v2739_v16 = vsel %vm401_vm14, %v6771_v21, 0.0  ;;  %v2707_v38 = vmul.f32 1.442695, %v2684_v33 }
0x1238   :  { %2731 = vadd.xlane.f32.xlu1 %v2730_v26  ;;  %2740 = vadd.xlane.f32.xlu2 %v2739_v16 }
0x123c   :  { %4920 = vrot.lane.b32.xlu0 %v4919_v15, %s7735_s27 }
0x1240   :  { %2638 = vmax.xlane.f32.xlu1 %v2637_v20  ;;  %2641 = vmax.xlane.f32.xlu2 %v2640_v22 }
0x1248   :  { %2647 = vmax.xlane.f32.xlu2 %v2646_v51  ;;  %v4929_v51 = vpack.i.bf16 %v6533_v55, %v6527_v18 }
0x1259   :  { %2831 = vrot.lane.b32.xlu1 %v6585_v54, %s7735_s27 }
0x125a   :  { %v2729_v53 = vpop.xlane.xlu0 %2728 }
0x125b   :  { %5158 = vrcp.f32 %v2729_v53 }
0x125c   :  { %5160 = vpow2.f32 %v2701_v10 }
0x1260   :  { %4925 = vrot.lane.b32.xlu2 %v4924_v59, %s7735_s27 }
0x1261   :  { %v5159_v39 = vpop.eup %5158 }
0x1262   :  { %v2763_v41 = vmul.f32 %v5159_v39, %v6748_v62  ;;  %v6806_v54 = vpop.eup %5160 }
0x1263   :  { %v2733_v4 = vsel %vm408_vm15, %v6806_v54, 0.0 }
0x1264   :  { %4728 = vst.msk [vmem:[%s7744_s3 + $0xf0] sm:$0xff] %vm401_vm14, %v2763_v41 }
0x1283   :  { %2734 = vadd.xlane.f32.xlu1 %v2733_v4 }
0x128b   :  { %v2645_v27 = vpop.xlane.xlu0 %2644 }
0x128c   :  { %v2675_v31 = vsub.f32 %v6760_v50, %v2645_v27 }
0x128e   :  { %v2689_v44 = vmul.f32 1.442695, %v2675_v31 }
0x1293   :  { %v2651_v42 = vpop.xlane.xlu0 %2650 }
0x1294   :  { %v2677_v43 = vsub.f32 %v2544_v45, %v2651_v42 }
0x1296   :  { %v2693_v47 = vmul.f32 1.442695, %v2677_v43 }
0x1298   :  { %5162 = vpow2.f32 %v2693_v47 }
0x129b   :  { %v2654_v48 = vpop.xlane.xlu0 %2653 }
0x129c   :  { %2786 = vrot.lane.b32.xlu1 %v6535_v37, %s7735_s27  ;;  %v2678_v24 = vsub.f32 %v2547_v17, %v2654_v48 }
0x129e   :  { %v6812_v5 = vpop.eup %5162  ;;  %v2695_v40 = vmul.f32 1.442695, %v2678_v24 }
0x129f   :  { %v2721_v52 = vsel %vm401_vm14, %v6812_v5, 0.0 }
0x12a0   :  { %5164 = vpow2.f32 %v2695_v40  ;;  %2722 = vadd.xlane.f32.xlu0 %v2721_v52 }
0x12a3   :  { %v2738_v57 = vpop.xlane.xlu1 %2737 }
0x12a4   :  { %5166 = vrcp.f32 %v2738_v57 }
0x12a6   :  { %v6816_v49 = vpop.eup %5164 }
0x12a7   :  { %v2724_v62 = vsel %vm408_vm15, %v6816_v49, 0.0 }
0x12a8   :  { %2725 = vadd.xlane.f32.xlu0 %v2724_v62 }
0x12aa   :  { %v5167_v1 = vpop.eup %5166 }
0x12ab   :  { %v2766_v37 = vmul.f32 %v5167_v1, %v5153_v29  ;;  %v2732_v56 = vpop.xlane.xlu1 %2731  ;;  %v2741_v0 = vpop.xlane.xlu2 %2740 }
0x12ac   :  { %5168 = vrcp.f32 %v2732_v56 }
0x12ad   :  { %4731 = vst.msk [vmem:[%s7744_s3 + $0x108] sm:$0xff] %vm401_vm14, %v2766_v37  ;;  %5170 = vrcp.f32 %v2741_v0 }
0x12ae   :  { %v4921_v60 = vpop.permute.xlu0 %4920 }
0x12af   :  { %v4923_v3 = vunpack.i.h.bf16 %v4921_v60  ;;  %v4922_v14 = vunpack.i.l.bf16 %v4921_v60 }
0x12b1   :  { %2906 = vmatpush.msrb.mxu3 %v4922_v14  ;;  %2951 = vmatpush.msra.mxu2 %v4923_v3 }
0x12b2   :  { %v5169_v6 = vpop.eup %5168  ;;  %4743 = vmatmul.msk.f32.vlgmr.msrb.gmra.mxu3 %vm401_vm14, %v2763_v41  ;;  %4747 = vmatmul.msk.f32.vlgmr.msra.gmra.mxu2 %vm401_vm14, %v2766_v37 }
0x12b3   :  { %v5171_v7 = vpop.eup %5170  ;;  %v2639_v32 = vpop.xlane.xlu1 %2638  ;;  %v2764_v45 = vmul.f32 %v5169_v6, %v6769_v13 }
0x12b4   :  { %v2673_v35 = vsub.f32 %v6780_v36, %v2639_v32  ;;  %v2642_v28 = vpop.xlane.xlu2 %2641  ;;  %v2767_v30 = vmul.f32 %v5171_v7, %v6771_v21 }
0x12b5   :  { %4729 = vst.msk [vmem:[%s7744_s3 + $0xf8] sm:$0xff] %vm401_vm14, %v2764_v45  ;;  %v2674_v17 = vsub.f32 %v6783_v58, %v2642_v28 }
0x12b6   :  { %v2685_v11 = vmul.f32 1.442695, %v2673_v35  ;;  %4732 = vst.msk [vmem:[%s7744_s3 + $0x110] sm:$0xff] %vm401_vm14, %v2767_v30 }
0x12b7   :  { %v2687_v46 = vmul.f32 1.442695, %v2674_v17  ;;  %v3008_v17 = vld [vmem:[%s7660_s6 + $0x8] sm:$0xff] }
0x12b8   :  { %5172 = vpow2.f32 %v2685_v11  ;;  %v3009_v11 = vld [vmem:[%s7660_s6 + $0x10] sm:$0xff] }
0x12b9   :  { %5174 = vpow2.f32 %v2687_v46  ;;  %v3007_v46 = vld [vmem:[%s7660_s6] sm:$0xff] }
0x12ba   :  { %4744 = vmatmul.msk.f32.gmra.mxu3 %vm401_vm14, %v2764_v45  ;;  %4748 = vmatmul.msk.f32.gmra.mxu2 %vm401_vm14, %v2767_v30  ;;  %v3010_v30 = vld [vmem:[%s7660_s6 + $0x18] sm:$0xff] }
0x12bc   :  { %v2648_v23 = vpop.xlane.xlu2 %2647 }
0x12bd   :  { %v2676_v9 = vsub.f32 %v6791_v19, %v2648_v23 }
0x12be   :  { %v5173_v25 = vpop.eup %5172 }
0x12bf   :  { %v2691_v34 = vmul.f32 1.442695, %v2676_v9  ;;  %v2709_v29 = vsel %vm401_vm14, %v5173_v25, 0.0  ;;  %v5175_v13 = vpop.eup %5174 }
0x12c0   :  { %2710 = vadd.xlane.f32.xlu0 %v2709_v29  ;;  %v2712_v26 = vsel %vm401_vm14, %v5175_v13, 0.0 }
0x12c1   :  { %5176 = vpow2.f32 %v2691_v34 }
0x12c2   :  { %5178 = vpow2.f32 %v2689_v44 }
0x12c3   :  { %5180 = vpow2.f32 %v2707_v38 }
0x12c4   :  { %v4926_v50 = vpop.permute.xlu2 %4925 }
0x12c5   :  { %v4927_v36 = vunpack.i.l.bf16 %v4926_v50  ;;  %v4928_v20 = vunpack.i.h.bf16 %v4926_v50 }
0x12c7   :  { %v5177_v21 = vpop.eup %5176 }
0x12c8   :  { %2713 = vadd.xlane.f32.xlu0 %v2712_v26  ;;  %v2718_v16 = vsel %vm401_vm14, %v5177_v21, 0.0  ;;  %v5179_v2 = vpop.eup %5178 }
0x12c9   :  { %2719 = vadd.xlane.f32.xlu2 %v2718_v16  ;;  %v5181_v58 = vpop.eup %5180  ;;  %v2715_v22 = vsel %vm408_vm15, %v5179_v2, 0.0 }
0x12ca   :  { %v2742_v19 = vsel %vm408_vm15, %v5181_v58, 0.0 }
0x12cb   :  { %v2832_v15 = vpop.permute.xlu1 %2831 }
0x12cc   :  { %4738 = vmatpush.msk.msrb.mxu1 %vm564_vm13, %v2832_v15 }
0x12ce   :  { %2860 = vmatpush.msrb.mxu1 %v4927_v36 }
0x12d0   :  { %2716 = vadd.xlane.f32.xlu0 %v2715_v22  ;;  %2861 = vmatpush.msrb.mxu1 %v4928_v20 }
0x12d1   :  { %2743 = vadd.xlane.f32.xlu2 %v2742_v19 }
0x12e9   :  { %4930 = vrot.lane.b32.xlu2 %v4929_v51, %s7735_s27  ;;  %v4978_v51 = vld [vmem:[%s7659_s7] ss:$0 sm:$0xff] }
0x12f6   :  { %v2735_v53 = vpop.xlane.xlu1 %2734 }
0x12f7   :  { %5182 = vrcp.f32 %v2735_v53 }
0x12fd   :  { %v5183_v59 = vpop.eup %5182 }
0x12fe   :  { %v2765_v39 = vmul.f32 %v5183_v59, %v6806_v54 }
0x1300   :  { %4730 = vst.msk [vmem:[%s7744_s3 + $0x100] sm:$0xf] %vm408_vm15, %v2765_v39  ;;  %4745 = vmatmul.msk.f32.gmra.mxu3 %vm401_vm14, %v2765_v39  ;;  %v5297_v39 = vld [vmem:[%s7725_s26 + $0x18] sm:$0xff] }
0x130e   :  { %v2787_v41 = vpop.permute.xlu1 %2786 }
0x130f   :  { %4734 = vmatpush.msk.msra.mxu0 %vm564_vm13, %v2787_v41 }
0x1313   :  { %v2723_v8 = vpop.xlane.xlu0 %2722 }
0x1314   :  { %5184 = vrcp.f32 %v2723_v8 }
0x131a   :  { %v5185_v18 = vpop.eup %5184 }
0x131b   :  { %v2726_v55 = vpop.xlane.xlu0 %2725  ;;  %v2761_v63 = vmul.f32 %v5185_v18, %v6812_v5 }
0x131c   :  { %5186 = vrcp.f32 %v2726_v55 }
0x131d   :  { %4726 = vst.msk [vmem:[%s7744_s3 + $0xe0] sm:$0xff] %vm401_vm14, %v2761_v63 }
0x1322   :  { %v5187_v10 = vpop.eup %5186 }
0x1323   :  { %v2762_v54 = vmul.f32 %v5187_v10, %v6816_v49 }
0x1325   :  { %4727 = vst.msk [vmem:[%s7744_s3 + $0xe8] sm:$0xf] %vm408_vm15, %v2762_v54 }
0x1333   :  { %v2711_v4 = vpop.xlane.xlu0 %2710 }
0x1334   :  { %5188 = vrcp.f32 %v2711_v4 }
0x1335   :  { %v2908_v27 = vpop.f32.mrf.mxu3  ;;  %v2953_v42 = vpop.f32.mrf.mxu2 }
0x1336   :  { %2989 = vrot.lane.b32.xlu1 %v2953_v42, %s7745_s19  ;;  %2977 = vrot.lane.b32.xlu2 %v2908_v27, %s7736_s23  ;;  %v5299_v42 = vld [vmem:[%s7725_s26 + $0x28] sm:$0xf] }
0x133a   :  { %v5189_v43 = vpop.eup %5188 }
0x133b   :  { %v2757_v47 = vmul.f32 %v5189_v43, %v5173_v25  ;;  %v2714_v48 = vpop.xlane.xlu0 %2713 }
0x133c   :  { %5190 = vrcp.f32 %v2714_v48  ;;  %v2720_v24 = vpop.xlane.xlu2 %2719 }
0x133d   :  { %4722 = vst.msk [vmem:[%s7744_s3 + $0xc0] sm:$0xff] %vm401_vm14, %v2757_v47  ;;  %5192 = vrcp.f32 %v2720_v24  ;;  %v2911_v5 = vpop.f32.mrf.mxu3  ;;  %v2956_v32 = vpop.f32.mrf.mxu2 }
0x133e   :  { %2979 = vrot.lane.b32.xlu1 %v2911_v5, %s7736_s23 }
0x1342   :  { %v5191_v40 = vpop.eup %5190 }
0x1343   :  { %v5193_v52 = vpop.eup %5192  ;;  %v2717_v57 = vpop.xlane.xlu0 %2716  ;;  %v2758_v61 = vmul.f32 %v5191_v40, %v5175_v13 }
0x1344   :  { %v2760_v49 = vmul.f32 %v5193_v52, %v5177_v21  ;;  %5194 = vrcp.f32 %v2717_v57  ;;  %v2744_v62 = vpop.xlane.xlu2 %2743 }
0x1345   :  { %5196 = vrcp.f32 %v2744_v62  ;;  %4723 = vst.msk [vmem:[%s7744_s3 + $0xc8] sm:$0xff] %vm401_vm14, %v2758_v61 }
0x1346   :  { %4725 = vst.msk [vmem:[%s7744_s3 + $0xd8] sm:$0xff] %vm401_vm14, %v2760_v49  ;;  %4739 = vmatmul.msk.f32.vlgmr.msrb.gmra.mxu1 %vm401_vm14, %v2760_v49 }
0x134a   :  { %v5195_v1 = vpop.eup %5194 }
0x134b   :  { %v5197_v37 = vpop.eup %5196  ;;  %v2759_v56 = vmul.f32 %v5195_v1, %v5179_v2 }
0x134c   :  { %v4931_v0 = vpop.permute.xlu2 %4930  ;;  %v2768_v60 = vmul.f32 %v5197_v37, %v5181_v58 }
0x134d   :  { %v4932_v3 = vunpack.i.l.bf16 %v4931_v0  ;;  %4724 = vst.msk [vmem:[%s7744_s3 + $0xd0] sm:$0xf] %vm408_vm15, %v2759_v56  ;;  %v4933_v14 = vunpack.i.h.bf16 %v4931_v0 }
0x134e   :  { %4740 = vmatmul.msk.f32.gmra.mxu1 %vm401_vm14, %v2761_v63  ;;  %4733 = vst.msk [vmem:[%s7744_s3 + $0x118] sm:$0xf] %vm408_vm15, %v2768_v60  ;;  %4749 = vmatmul.msk.f32.gmra.mxu2 %vm401_vm14, %v2768_v60  ;;  %v5298_v63 = vld [vmem:[%s7725_s26 + $0x20] sm:$0xff]  ;;  %s7746_s26 = sld [smem:[#allocation12_spill]] }
0x134f   :  { %2815 = vmatpush.msra.mxu0 %v4932_v3 }
0x1351   :  { %2816 = vmatpush.msra.mxu0 %v4933_v14  ;;  %v3136_v14 = vld [vmem:[%s7664_s10 + $0x18] sm:$0xff] }
0x1352   :  { %4735 = vmatmul.msk.f32.vlgmr.msra.gmra.mxu0 %vm401_vm14, %v2757_v47  ;;  %3162 = vmatpush.msra.mxu1 %v3136_v14 }
0x1353   :  { %3036 = vmatpush.msrb.mxu0 %v3010_v30 }
0x1355   :  { %3037 = vmatpush.msrb.mxu0 %v3009_v11 }
0x1356   :  { %4741 = vmatmul.msk.f32.gmra.mxu1 %vm401_vm14, %v2762_v54 }
0x1357   :  { %3038 = vmatpush.msrb.mxu0 %v3008_v17 }
0x1359   :  { %3039 = vmatpush.msrb.mxu0 %v3007_v46 }
0x135a   :  { %4736 = vmatmul.msk.f32.gmra.mxu0 %vm401_vm14, %v2758_v61 }
0x1362   :  { %4737 = vmatmul.msk.f32.gmra.mxu0 %vm401_vm14, %v2759_v56 }
0x1383   :  { %v2914_v6 = vpop.f32.mrf.mxu3 }
0x1384   :  { %2981 = vrot.lane.b32.xlu1 %v2914_v6, %s7736_s23  ;;  %v3135_v6 = vld [vmem:[%s7664_s10 + $0x10] sm:$0xff] }
0x1385   :  { %3163 = vmatpush.msra.mxu1 %v3135_v6  ;;  %v3304_v6 = vld [vmem:[%s7666_s12 + $0x40] sm:$0xff] }
0x1390   :  { %v2978_v23 = vpop.permute.xlu2 %2977 }
0x13a8   :  { %v2990_v25 = vpop.permute.xlu1 %2989 }
0x13b0   :  { %v2980_v26 = vpop.permute.xlu1 %2979 }
0x13c3   :  { %v2863_v7 = vpop.f32.mrf.mxu1 }
0x13c4   :  { %2965 = vrot.lane.b32.xlu0 %v2863_v7, %s7737_s2  ;;  %v3134_v7 = vld [vmem:[%s7664_s10 + $0x8] sm:$0xff] }
0x13c5   :  { %3164 = vmatpush.msra.mxu1 %v3134_v7  ;;  %v3303_v7 = vld [vmem:[%s7666_s12 + $0x38] sm:$0xff] }
0x13cb   :  { %v2866_v45 = vpop.f32.mrf.mxu1 }
0x13cc   :  { %2991 = vrot.lane.b32.xlu0 %v2956_v32, %s7745_s19  ;;  %2967 = vrot.lane.b32.xlu2 %v2866_v45, %s7737_s2  ;;  %v3133_v32 = vld [vmem:[%s7664_s10] sm:$0xff] }
0x13cd   :  { %3165 = vmatpush.msra.mxu1 %v3133_v32 }
0x13cf   :  { %v2818_v9 = vpop.f32.mrf.mxu0 }
0x13d1   :  { %v2959_v35 = vpop.f32.mrf.mxu2 }
0x13d3   :  { %v2869_v28 = vpop.f32.mrf.mxu1 }
0x13d4   :  { %2993 = vrot.lane.b32.xlu0 %v2959_v35, %s7745_s19  ;;  %2969 = vrot.lane.b32.xlu2 %v2869_v28, %s7737_s2 }
0x13d7   :  { %v2821_v38 = vpop.f32.mrf.mxu0 }
0x13df   :  { %v2824_v2 = vpop.f32.mrf.mxu0 }
0x13f6   :  { %v2982_v20 = vpop.permute.xlu1 %2981 }
0x1426   :  { %v2968_v34 = vpop.permute.xlu2 %2967 }
0x1427   :  { %v2999_v13 = vsel %vm230_vm12, %v2821_v38, %v2968_v34 }
0x1428   :  { %v3002_v16 = vsel %vm767_vm2, %v2999_v13, %v2980_v26 }
0x142e   :  { %v2970_v15 = vpop.permute.xlu2 %2969 }
0x142f   :  { %v3000_v36 = vsel %vm230_vm12, %v2824_v2, %v2970_v15 }
0x1430   :  { %v3003_v22 = vsel %vm767_vm2, %v3000_v36, %v2982_v20 }
0x1436   :  { %v2966_v31 = vpop.permute.xlu0 %2965 }
0x1437   :  { %v2998_v33 = vsel %vm230_vm12, %v2818_v9, %v2966_v31 }
0x1438   :  { %v3001_v29 = vsel %vm767_vm2, %v2998_v33, %v2978_v23 }
0x1439   :  { %v3004_v44 = vsel %vm771_vm3, %v3001_v29, %v2990_v25 }
0x143a   :  { %4750 = vmatmul.msk.f32.vlgmr.msrb.gmra.mxu0 %vm70_vm0, %v3004_v44 }
0x143e   :  { %v2992_v21 = vpop.permute.xlu0 %2991 }
0x143f   :  { %v3005_v50 = vsel %vm771_vm3, %v3002_v16, %v2992_v21  ;;  %v4979_v21 = vld [vmem:[%s7661_s8] ss:$0 sm:$0xff] }
0x1442   :  { %4751 = vmatmul.msk.f32.gmra.mxu0 %vm70_vm0, %v3005_v50  ;;  %v4980_v50 = vld [vmem:[%s7662_s9] ss:$0 sm:$0xff] }
0x1446   :  { %v2994_v58 = vpop.permute.xlu0 %2993 }
0x1447   :  { %v3006_v19 = vsel %vm771_vm3, %v3003_v22, %v2994_v58 }
0x144a   :  { %4752 = vmatmul.msk.f32.gmra.mxu0 %vm70_vm0, %v3006_v19 }
0x14b7   :  { %v3041_v53 = vpop.f32.mrf.mxu0 }
0x14b8   :  { %v3042_v59 = vadd.f32 %v4978_v51, %v3041_v53 }
0x14ba   :  { %v6935_v41 = vadd.f32 %v5297_v39, %v3042_v59 }
0x14bc   :  { %v3055_v8 = vsel %vm70_vm0, %v6935_v41, 0.0 }
0x14bd   :  { %3056 = vadd.xlane.f32.xlu2 %v3055_v8 }
0x14bf   :  { %v3044_v18 = vpop.f32.mrf.mxu0 }
0x14c0   :  { %v3045_v55 = vadd.f32 %v4978_v51, %v3044_v18 }
0x14c2   :  { %v6942_v10 = vadd.f32 %v5298_v63, %v3045_v55 }
0x14c4   :  { %v3058_v54 = vsel %vm70_vm0, %v6942_v10, 0.0 }
0x14c5   :  { %3059 = vadd.xlane.f32.xlu1 %v3058_v54 }
0x14c7   :  { %v3047_v4 = vpop.f32.mrf.mxu0 }
0x14c8   :  { %v3048_v27 = vadd.f32 %v4978_v51, %v3047_v4 }
0x14ca   :  { %v6949_v43 = vadd.f32 %v5299_v42, %v3048_v27 }
0x14cc   :  { %v3061_v47 = vsel %vm77_vm1, %v6949_v43, 0.0 }
0x14cd   :  { %3062 = vadd.xlane.f32.xlu0 %v3061_v47 }
0x1530   :  { %v3057_v48 = vpop.xlane.xlu2 %3056 }
0x1531   :  { %v3064_v24 = vmul.f32 %v3057_v48, %v5431_v12  ;;  %v3311_v48 = vld [vmem:[%s7666_s12 + $0x78] sm:$0xff] }
0x1532   :  { %3316 = vmatpush.msra.mxu3 %v3311_v48 }
0x1533   :  { %v3067_v5 = vsub.f32 %v6935_v41, %v3064_v24  ;;  %v4981_v24 = vld [vmem:[%s7663_s11] ss:$0 sm:$0xff] }
0x1535   :  { %v3070_v40 = vmul.f32 %v3067_v5, %v3067_v5 }
0x1537   :  { %v3073_v52 = vsel %vm70_vm0, %v3070_v40, 0.0  ;;  %v3309_v40 = vld [vmem:[%s7666_s12 + $0x68] sm:$0xff] }
0x1538   :  { %3074 = vadd.xlane.f32.xlu2 %v3073_v52  ;;  %v3060_v57 = vpop.xlane.xlu1 %3059 }
0x1539   :  { %v3065_v61 = vmul.f32 %v3060_v57, %v5431_v12 }
0x153b   :  { %v3068_v49 = vsub.f32 %v6942_v10, %v3065_v61  ;;  %v3308_v61 = vld [vmem:[%s7666_s12 + $0x60] sm:$0xff] }
0x153d   :  { %v3071_v62 = vmul.f32 %v3068_v49, %v3068_v49 }
0x153f   :  { %v3076_v1 = vsel %vm70_vm0, %v3071_v62, 0.0  ;;  %v3307_v62 = vld [vmem:[%s7666_s12 + $0x58] sm:$0xff] }
0x1540   :  { %v3063_v37 = vpop.xlane.xlu0 %3062  ;;  %3077 = vadd.xlane.f32.xlu1 %v3076_v1 }
0x1541   :  { %v3066_v56 = vmul.f32 %v3063_v37, %v5431_v12  ;;  %v3306_v37 = vld [vmem:[%s7666_s12 + $0x50] sm:$0xff] }
0x1543   :  { %v6961_v0 = vsub.f32 %v6949_v43, %v3066_v56 }
0x1545   :  { %v3072_v60 = vmul.f32 %v6961_v0, %v6961_v0 }
0x1547   :  { %v3079_v3 = vsel %vm77_vm1, %v3072_v60, 0.0 }
0x1548   :  { %3080 = vadd.xlane.f32.xlu2 %v3079_v3 }
0x15ab   :  { %v3075_v45 = vpop.xlane.xlu2 %3074 }
0x15ac   :  { %v3082_v35 = vmul.f32 %v3075_v45, %v5431_v12  ;;  %v3302_v45 = vld [vmem:[%s7666_s12 + $0x30] sm:$0xff] }
0x15ae   :  { %v3085_v28 = vadd.f32 1e-05, %v3082_v35 }
0x15b0   :  { %5198 = vrsqrt.f32 %v3085_v28  ;;  %vm3094_vm11 = vweird.f32 %v3085_v28 }
0x15b3   :  { %v3078_v30 = vpop.xlane.xlu1 %3077 }
0x15b4   :  { %v3083_v11 = vmul.f32 %v3078_v30, %v5431_v12 }
0x15b6   :  { %v5199_v17 = vpop.eup %5198  ;;  %v3086_v46 = vadd.f32 1e-05, %v3083_v11 }
0x15b7   :  { %v3089_v23 = vmul.f32 %v5199_v17, %v3085_v28  ;;  %vm3095_vm10 = vweird.f32 %v5199_v17  ;;  %v3301_v28 = vld [vmem:[%s7666_s12 + $0x28] sm:$0xff] }
0x15b8   :  { %5200 = vrsqrt.f32 %v3086_v46  ;;  %vm3096_vm4 = vmor %vm3094_vm11, %vm3095_vm10  ;;  %vm3104_vm6 = vweird.f32 %v3086_v46 }
0x15b9   :  { %v3090_v9 = vmul.f32 %v5199_v17, %v3089_v23  ;;  %v3300_v23 = vld [vmem:[%s7666_s12 + $0x20] sm:$0xff] }
0x15bb   :  { %v3091_v25 = vmul.f32 0.5, %v3090_v9  ;;  %v3081_v31 = vpop.xlane.xlu2 %3080 }
0x15bc   :  { %v3084_v33 = vmul.f32 %v3081_v31, %v5431_v12 }
0x15bd   :  { %v3092_v34 = vsub.f32 1.5, %v3091_v25 }
0x15be   :  { %v5201_v29 = vpop.eup %5200  ;;  %v3087_v44 = vadd.f32 1e-05, %v3084_v33  ;;  %v3299_v33 = vld [vmem:[%s7666_s12 + $0x18] sm:$0xff] }
0x15bf   :  { %v3093_v38 = vmul.f32 %v5199_v17, %v3092_v34  ;;  %v3099_v13 = vmul.f32 %v5201_v29, %v3086_v46  ;;  %vm3105_vm5 = vweird.f32 %v5201_v29 }
0x15c0   :  { %5202 = vrsqrt.f32 %v3087_v44  ;;  %vm3106_vm7 = vmor %vm3104_vm6, %vm3105_vm5  ;;  %vm3114_vm11 = vweird.f32 %v3087_v44 }
0x15c1   :  { %v3097_v26 = vsel %vm3096_vm4, %v5199_v17, %v3093_v38  ;;  %v3100_v16 = vmul.f32 %v5201_v29, %v3099_v13 }
0x15c2   :  { %v3118_v15 = vmul.f32 %v3097_v26, %v3067_v5  ;;  %v3310_v5 = vld [vmem:[%s7666_s12 + $0x70] sm:$0xff] }
0x15c3   :  { %v3101_v2 = vmul.f32 0.5, %v3100_v16  ;;  %3317 = vmatpush.msra.mxu3 %v3310_v5  ;;  %v3297_v16 = vld [vmem:[%s7666_s12 + $0x8] sm:$0xff] }
0x15c4   :  { %v3124_v36 = vmul.f32 %v4979_v21, %v3118_v15  ;;  %v3296_v15 = vld [vmem:[%s7666_s12] sm:$0xff] }
0x15c5   :  { %v3102_v58 = vsub.f32 1.5, %v3101_v2  ;;  %3318 = vmatpush.msra.mxu3 %v3309_v40 }
0x15c6   :  { %v5203_v20 = vpop.eup %5202  ;;  %v3130_v22 = vadd.f32 %v4980_v50, %v3124_v36 }
0x15c7   :  { %v3103_v19 = vmul.f32 %v5201_v29, %v3102_v58  ;;  %v3109_v51 = vmul.f32 %v5203_v20, %v3087_v44  ;;  %vm3115_vm10 = vweird.f32 %v5203_v20  ;;  %3319 = vmatpush.msra.mxu3 %v3308_v61 }
0x15c8   :  { %4753 = vmatmul.msk.f32.vlgmr.msra.gmra.mxu1 %vm70_vm0, %v3130_v22  ;;  %vm3116_vm4 = vmor %vm3114_vm11, %vm3115_vm10 }
0x15c9   :  { %v3107_v53 = vsel %vm3106_vm7, %v5201_v29, %v3103_v19  ;;  %v3110_v59 = vmul.f32 %v5203_v20, %v3109_v51  ;;  %3320 = vmatpush.msra.mxu3 %v3307_v62 }
0x15ca   :  { %v3119_v39 = vmul.f32 %v3107_v53, %v3068_v49 }
0x15cb   :  { %v3111_v8 = vmul.f32 0.5, %v3110_v59  ;;  %3321 = vmatpush.msra.mxu3 %v3306_v37 }
0x15cc   :  { %v3125_v18 = vmul.f32 %v4979_v21, %v3119_v39 }
0x15cd   :  { %v3112_v55 = vsub.f32 1.5, %v3111_v8 }
0x15ce   :  { %v3131_v63 = vadd.f32 %v4980_v50, %v3125_v18 }
0x15cf   :  { %v3113_v54 = vmul.f32 %v5203_v20, %v3112_v55 }
0x15d0   :  { %4754 = vmatmul.msk.f32.gmra.mxu1 %vm70_vm0, %v3131_v63 }
0x15d1   :  { %v3117_v4 = vsel %vm3116_vm4, %v5203_v20, %v3113_v54 }
0x15d2   :  { %v3120_v27 = vmul.f32 %v3117_v4, %v6961_v0  ;;  %v3305_v0 = vld [vmem:[%s7666_s12 + $0x48] sm:$0xff] }
0x15d3   :  { %3322 = vmatpush.msra.mxu3 %v3305_v0 }
0x15d4   :  { %v3126_v42 = vmul.f32 %v4979_v21, %v3120_v27  ;;  %v3298_v21 = vld [vmem:[%s7666_s12 + $0x10] sm:$0xff] }
0x15d5   :  { %3323 = vmatpush.msra.mxu3 %v3304_v6 }
0x15d6   :  { %v3132_v47 = vadd.f32 %v4980_v50, %v3126_v42 }
0x15d7   :  { %3324 = vmatpush.msra.mxu3 %v3303_v7 }
0x15d8   :  { %4755 = vmatmul.msk.f32.gmra.mxu1 %vm70_vm0, %v3132_v47 }
0x15d9   :  { %3325 = vmatpush.msra.mxu3 %v3302_v45 }
0x15db   :  { %3326 = vmatpush.msra.mxu3 %v3301_v28 }
0x15dd   :  { %3327 = vmatpush.msra.mxu3 %v3300_v23 }
0x15df   :  { %3328 = vmatpush.msra.mxu3 %v3299_v33 }
0x15e1   :  { %3329 = vmatpush.msra.mxu3 %v3298_v21 }
0x15e3   :  { %3330 = vmatpush.msra.mxu3 %v3297_v16 }
0x15e5   :  { %3331 = vmatpush.msra.mxu3 %v3296_v15 }
0x1645   :  { %v3167_v52 = vpop.f32.mrf.mxu1 }
0x1646   :  { %v7003_v57 = vadd.f32 %v4981_v24, %v3167_v52 }
0x1648   :  { %v7009_v49 = vmul.f32 0.70710677, %v7003_v57 }
0x164a   :  { %v3182_v1 = vand.u32 2147483647, %v7009_v49 }
0x164c   :  { %v3185_v56 = vmul.f32 0.3275911, %v3182_v1  ;;  %v3263_v19 = vsub.f32 0.0, %v3182_v1 }
0x164d   :  { %v3170_v60 = vpop.f32.mrf.mxu1 }
0x164e   :  { %v3188_v3 = vadd.f32 1.0, %v3185_v56  ;;  %v7021_v14 = vadd.f32 %v4981_v24, %v3170_v60  ;;  %v3266_v18 = vmul.f32 %v3263_v19, %v3182_v1 }
0x1650   :  { %5204 = vrcp.f32 %v3188_v3  ;;  %v7030_v32 = vmul.f32 0.70710677, %v7021_v14  ;;  %v3202_v29 = vand.u32 2147483648, %v3188_v3  ;;  %v3200_v13 = vand.u32 2147483647, %v3188_v3 }
0x1651   :  { %vm3196_vm5 = vweird.f32 %v3188_v3 }
0x1652   :  { %v7036_v35 = vand.u32 2147483647, %v7030_v32  ;;  %v3203_v2 = vor.u32 1.1754944e-38, %v3202_v29  ;;  %vm3201_vm10 = vcmp.eq.f32.partialorder %v3200_v13, 8.507059e+37 }
0x1654   :  { %v3186_v30 = vmul.f32 0.3275911, %v7036_v35  ;;  %v3264_v52 = vsub.f32 0.0, %v7036_v35 }
0x1655   :  { %v3173_v11 = vpop.f32.mrf.mxu1 }
0x1656   :  { %v5205_v17 = vpop.eup %5204  ;;  %v7042_v46 = vadd.f32 %v4981_v24, %v3173_v11  ;;  %v3189_v25 = vadd.f32 1.0, %v3186_v30  ;;  %v3269_v24 = vmul.f32 1.442695, %v3266_v18  ;;  %v3267_v7 = vmul.f32 %v3264_v52, %v7036_v35 }
0x1657   :  { %v3192_v9 = vmul.f32 %v5205_v17, %v3188_v3  ;;  %vm3197_vm7 = vweird.f32 %v5205_v17 }
0x1658   :  { %v7048_v31 = vmul.f32 0.70710677, %v7042_v46  ;;  %5206 = vrcp.f32 %v3189_v25  ;;  %vm3198_vm6 = vmor %vm3196_vm5, %vm3197_vm7  ;;  %v3217_v8 = vand.u32 2147483648, %v3189_v25  ;;  %v3215_v63 = vand.u32 2147483647, %v3189_v25 }
0x1659   :  { %v3193_v34 = vsub.f32 1.0, %v3192_v9  ;;  %vm3211_vm4 = vweird.f32 %v3189_v25 }
0x165a   :  { %v7054_v44 = vand.u32 2147483647, %v7048_v31  ;;  %v3218_v47 = vor.u32 1.1754944e-38, %v3217_v8  ;;  %vm3216_vm5 = vcmp.eq.f32.partialorder %v3215_v63, 8.507059e+37 }
0x165b   :  { %v3194_v38 = vmul.f32 %v5205_v17, %v3193_v34  ;;  %v3271_v34 = vmul.f32 1.442695, %v3267_v7 }
0x165c   :  { %v3187_v26 = vmul.f32 0.3275911, %v7054_v44  ;;  %v3265_v23 = vsub.f32 0.0, %v7054_v44 }
0x165d   :  { %v3195_v50 = vadd.f32 %v5205_v17, %v3194_v38 }
0x165e   :  { %v3190_v36 = vadd.f32 1.0, %v3187_v26  ;;  %v5207_v58 = vpop.eup %5206  ;;  %v3268_v35 = vmul.f32 %v3265_v23, %v7054_v44 }
0x165f   :  { %v3199_v20 = vsel %vm3198_vm6, %v5205_v17, %v3195_v50  ;;  %v3207_v51 = vmul.f32 %v5207_v58, %v3189_v25  ;;  %vm3212_vm11 = vweird.f32 %v5207_v58 }
0x1660   :  { %v3204_v22 = vsel %vm3201_vm10, %v3203_v2, %v3199_v20  ;;  %5208 = vrcp.f32 %v3190_v36  ;;  %vm3213_vm7 = vmor %vm3211_vm4, %vm3212_vm11  ;;  %v3232_v1 = vand.u32 2147483648, %v3190_v36  ;;  %v3230_v60 = vand.u32 2147483647, %v3190_v36 }
0x1661   :  { %v3236_v53 = vmul.f32 1.0614054, %v3204_v22  ;;  %v3208_v59 = vsub.f32 1.0, %v3207_v51  ;;  %5210 = vpow2.f32 %v3269_v24  ;;  %vm3226_vm10 = vweird.f32 %v3190_v36 }
0x1662   :  { %v3233_v28 = vor.u32 1.1754944e-38, %v3232_v1  ;;  %vm3231_vm4 = vcmp.eq.f32.partialorder %v3230_v60, 8.507059e+37  ;;  %5212 = vpow2.f32 %v3271_v34  ;;  %v3273_v20 = vmul.f32 1.442695, %v3268_v35  ;;  %v4761_v35 = vld [vmem:[%s7726_s30 + $0x38] sm:$0xff] }
0x1663   :  { %v3239_v39 = vadd.f32 -1.4531521, %v3236_v53  ;;  %v3209_v55 = vmul.f32 %v5207_v58, %v3208_v59  ;;  %v3176_v53 = vmul.f32 0.5, %v7003_v57  ;;  %3454 = vmatpush.msrb.mxu2 %v4761_v35 }
0x1664   :  { %5214 = vpow2.f32 %v3273_v20 }
0x1665   :  { %v3242_v54 = vmul.f32 %v3239_v39, %v3204_v22  ;;  %v3210_v27 = vadd.f32 %v5207_v58, %v3209_v55 }
0x1666   :  { %v5209_v4 = vpop.eup %5208 }
0x1667   :  { %v3245_v42 = vadd.f32 1.4214138, %v3242_v54  ;;  %v3222_v48 = vmul.f32 %v5209_v4, %v3190_v36  ;;  %v3214_v5 = vsel %vm3213_vm7, %v5207_v58, %v3210_v27  ;;  %vm3227_vm6 = vweird.f32 %v5209_v4  ;;  %v5211_v38 = vpop.eup %5210 }
0x1668   :  { %v3219_v62 = vsel %vm3216_vm5, %v3218_v47, %v3214_v5  ;;  %vm3228_vm11 = vmor %vm3226_vm10, %vm3227_vm6  ;;  %vm3281_vm7 = vcmp.lt.f32.partialorder %v7009_v49, 0.0  ;;  %v5213_v8 = vpop.eup %5212  ;;  %vm3282_vm5 = vcmp.lt.f32.partialorder %v7030_v32, 0.0  ;;  %vm3283_vm6 = vcmp.lt.f32.partialorder %v7048_v31, 0.0  ;;  %v4982_v32 = vld [vmem:[%s7665_s13] ss:$0 sm:$0xff] }
0x1669   :  { %v3248_v40 = vmul.f32 %v3245_v42, %v3204_v22  ;;  %v3223_v61 = vsub.f32 1.0, %v3222_v48  ;;  %v3237_v37 = vmul.f32 1.0614054, %v3219_v62  ;;  %v3177_v48 = vmul.f32 0.5, %v7021_v14 }
0x166a   :  { %v5215_v42 = vpop.eup %5214 }
0x166b   :  { %v3251_v56 = vadd.f32 -0.28449672, %v3248_v40  ;;  %v3224_v0 = vmul.f32 %v5209_v4, %v3223_v61  ;;  %v3240_v3 = vadd.f32 -1.4531521, %v3237_v37 }
0x166d   :  { %v3254_v6 = vmul.f32 %v3251_v56, %v3204_v22  ;;  %v3225_v45 = vadd.f32 %v5209_v4, %v3224_v0  ;;  %v3243_v30 = vmul.f32 %v3240_v3, %v3219_v62 }
0x166f   :  { %v3257_v11 = vadd.f32 0.2548296, %v3254_v6  ;;  %v3229_v17 = vsel %vm3228_vm11, %v5209_v4, %v3225_v45  ;;  %v3246_v9 = vadd.f32 1.4214138, %v3243_v30 }
0x1670   :  { %v3234_v25 = vsel %vm3231_vm4, %v3233_v28, %v3229_v17 }
0x1671   :  { %v3260_v33 = vmul.f32 %v3257_v11, %v3204_v22  ;;  %v3238_v29 = vmul.f32 1.0614054, %v3234_v25  ;;  %v3249_v13 = vmul.f32 %v3246_v9, %v3219_v62 }
0x1673   :  { %v3275_v21 = vmul.f32 %v5211_v38, %v3260_v33  ;;  %v3241_v26 = vadd.f32 -1.4531521, %v3238_v29  ;;  %v3252_v16 = vadd.f32 -0.28449672, %v3249_v13 }
0x1675   :  { %v3278_v50 = vsub.f32 1.0, %v3275_v21  ;;  %v3244_v15 = vmul.f32 %v3241_v26, %v3234_v25  ;;  %v3255_v2 = vmul.f32 %v3252_v16, %v3219_v62  ;;  %v4760_v16 = vld [vmem:[%s7726_s30 + $0x30] sm:$0xff] }
0x1676   :  { %3455 = vmatpush.msrb.mxu2 %v4760_v16 }
0x1677   :  { %v3284_v36 = vsub.f32 0.0, %v3278_v50  ;;  %v3247_v58 = vadd.f32 1.4214138, %v3244_v15  ;;  %v3258_v19 = vadd.f32 0.2548296, %v3255_v2  ;;  %v4758_v15 = vld [vmem:[%s7726_s30 + $0x20] sm:$0xff] }
0x1679   :  { %v3287_v22 = vsel %vm3281_vm7, %v3284_v36, %v3278_v50  ;;  %v3250_v51 = vmul.f32 %v3247_v58, %v3234_v25  ;;  %v3261_v39 = vmul.f32 %v3258_v19, %v3219_v62  ;;  %v3178_v62 = vmul.f32 0.5, %v7042_v46  ;;  %v4759_v50 = vld [vmem:[%s7726_s30 + $0x28] sm:$0xff] }
0x167a   :  { %v3290_v59 = vadd.f32 1.0, %v3287_v22  ;;  %3456 = vmatpush.msrb.mxu2 %v4759_v50 }
0x167b   :  { %v3253_v18 = vadd.f32 -0.28449672, %v3250_v51  ;;  %v3276_v55 = vmul.f32 %v5213_v8, %v3261_v39 }
0x167c   :  { %v3293_v44 = vmul.f32 %v3290_v59, %v3176_v53  ;;  %3457 = vmatpush.msrb.mxu2 %v4758_v15 }
0x167d   :  { %v3256_v63 = vmul.f32 %v3253_v18, %v3234_v25  ;;  %v3279_v54 = vsub.f32 1.0, %v3276_v55 }
0x167e   :  { %3332 = vmatmul.f32.vlgmr.msra.gmra.mxu3 %v3293_v44 }
0x167f   :  { %v3259_v4 = vadd.f32 0.2548296, %v3256_v63  ;;  %v3285_v27 = vsub.f32 0.0, %v3279_v54 }
0x1681   :  { %v3262_v49 = vmul.f32 %v3259_v4, %v3234_v25  ;;  %v3288_v47 = vsel %vm3282_vm5, %v3285_v27, %v3279_v54  ;;  %v4983_v4 = vld [vmem:[%s7727_s5 + $0x1] ss:$0 sm:$0xff] }
0x1682   :  { %v3291_v57 = vadd.f32 1.0, %v3288_v47 }
0x1683   :  { %v3277_v24 = vmul.f32 %v5215_v42, %v3262_v49  ;;  %v4956_v42 = vld [vmem:[%s7728_s0 + $0x1] ss:$0 sm:$0xff] }
0x1684   :  { %v3294_v5 = vmul.f32 %v3291_v57, %v3177_v48 }
0x1685   :  { %v3280_v40 = vsub.f32 1.0, %v3277_v24 }
0x1686   :  { %3335 = vmatmul.f32.gmra.mxu3 %v3294_v5 }
0x1687   :  { %v3286_v52 = vsub.f32 0.0, %v3280_v40 }
0x1689   :  { %v3289_v61 = vsel %vm3283_vm6, %v3286_v52, %v3280_v40 }
0x168a   :  { %v3292_v1 = vadd.f32 1.0, %v3289_v61 }
0x168c   :  { %v3295_v37 = vmul.f32 %v3292_v1, %v3178_v62 }
0x168e   :  { %3338 = vmatmul.f32.gmra.mxu3 %v3295_v37 }
0x1701   :  { %v3333_v56 = vpop.f32.mrf.mxu3 }
0x1702   :  { %v3334_v14 = vadd.f32 %v4982_v32, %v3333_v56 }
0x1704   :  { %v7080_v0 = vadd.f32 %v3334_v14, %v6935_v41 }
0x1706   :  { %v3347_v60 = vsel %vm70_vm0, %v7080_v0, 0.0 }
0x1707   :  { %3348 = vadd.xlane.f32.xlu0 %v3347_v60 }
0x1709   :  { %v3336_v31 = vpop.f32.mrf.mxu3 }
0x170a   :  { %v3337_v3 = vadd.f32 %v4982_v32, %v3336_v31 }
0x170c   :  { %v7085_v46 = vadd.f32 %v3337_v3, %v6942_v10 }
0x170e   :  { %v3350_v6 = vsel %vm70_vm0, %v7085_v46, 0.0 }
0x170f   :  { %3351 = vadd.xlane.f32.xlu1 %v3350_v6 }
0x1711   :  { %v3339_v7 = vpop.f32.mrf.mxu3 }
0x1712   :  { %v3340_v45 = vadd.f32 %v4982_v32, %v3339_v7 }
0x1714   :  { %v7090_v28 = vadd.f32 %v3340_v45, %v6949_v43 }
0x1716   :  { %v3353_v41 = vsel %vm77_vm1, %v7090_v28, 0.0 }
0x1717   :  { %3354 = vadd.xlane.f32.xlu2 %v3353_v41 }
0x177a   :  { %v3349_v30 = vpop.xlane.xlu0 %3348 }
0x177b   :  { %v3356_v11 = vmul.f32 %v3349_v30, %v5431_v12 }
0x177d   :  { %v3359_v17 = vsub.f32 %v7080_v0, %v3356_v11  ;;  %v4984_v11 = vld [vmem:[%s7729_s22 + $0x1] ss:$0 sm:$0xff] }
0x177f   :  { %v3362_v10 = vmul.f32 %v3359_v17, %v3359_v17 }
0x1781   :  { %v3365_v23 = vsel %vm70_vm0, %v3362_v10, 0.0 }
0x1782   :  { %3366 = vadd.xlane.f32.xlu0 %v3365_v23  ;;  %v3352_v9 = vpop.xlane.xlu1 %3351 }
0x1783   :  { %v3357_v25 = vmul.f32 %v3352_v9, %v5431_v12 }
0x1785   :  { %v3360_v33 = vsub.f32 %v7085_v46, %v3357_v25 }
0x1787   :  { %v3363_v43 = vmul.f32 %v3360_v33, %v3360_v33 }
0x1789   :  { %v3368_v34 = vsel %vm70_vm0, %v3363_v43, 0.0 }
0x178a   :  { %v3355_v29 = vpop.xlane.xlu2 %3354  ;;  %3369 = vadd.xlane.f32.xlu1 %v3368_v34 }
0x178b   :  { %v3358_v38 = vmul.f32 %v3355_v29, %v5431_v12 }
0x178d   :  { %v7102_v13 = vsub.f32 %v7090_v28, %v3358_v38 }
0x178f   :  { %v3364_v21 = vmul.f32 %v7102_v13, %v7102_v13 }
0x1791   :  { %v3371_v26 = vsel %vm77_vm1, %v3364_v21, 0.0 }
0x1792   :  { %3372 = vadd.xlane.f32.xlu2 %v3371_v26 }
0x17f5   :  { %v3367_v2 = vpop.xlane.xlu0 %3366 }
0x17f6   :  { %v3374_v36 = vmul.f32 %v3367_v2, %v5431_v12 }
0x17f8   :  { %v3377_v58 = vadd.f32 1e-05, %v3374_v36 }
0x17fa   :  { %5216 = vrsqrt.f32 %v3377_v58  ;;  %vm3386_vm11 = vweird.f32 %v3377_v58 }
0x17fd   :  { %v3370_v20 = vpop.xlane.xlu1 %3369 }
0x17fe   :  { %v3375_v19 = vmul.f32 %v3370_v20, %v5431_v12 }
0x1800   :  { %v5217_v22 = vpop.eup %5216  ;;  %v3378_v53 = vadd.f32 1e-05, %v3375_v19 }
0x1801   :  { %v3381_v51 = vmul.f32 %v5217_v22, %v3377_v58  ;;  %vm3387_vm10 = vweird.f32 %v5217_v22 }
0x1802   :  { %5218 = vrsqrt.f32 %v3378_v53  ;;  %vm3388_vm4 = vmor %vm3386_vm11, %vm3387_vm10  ;;  %vm3396_vm5 = vweird.f32 %v3378_v53 }
0x1803   :  { %v3382_v59 = vmul.f32 %v5217_v22, %v3381_v51 }
0x1805   :  { %v3383_v39 = vmul.f32 0.5, %v3382_v59  ;;  %v3373_v8 = vpop.xlane.xlu2 %3372 }
0x1806   :  { %v3376_v44 = vmul.f32 %v3373_v8, %v5431_v12 }
0x1807   :  { %v3384_v18 = vsub.f32 1.5, %v3383_v39 }
0x1808   :  { %v5219_v55 = vpop.eup %5218  ;;  %v3379_v54 = vadd.f32 1e-05, %v3376_v44 }
0x1809   :  { %v3385_v63 = vmul.f32 %v5217_v22, %v3384_v18  ;;  %v3391_v27 = vmul.f32 %v5219_v55, %v3378_v53  ;;  %vm3397_vm7 = vweird.f32 %v5219_v55 }
0x180a   :  { %5220 = vrsqrt.f32 %v3379_v54  ;;  %vm3398_vm6 = vmor %vm3396_vm5, %vm3397_vm7  ;;  %vm3406_vm11 = vweird.f32 %v3379_v54 }
0x180b   :  { %v3389_v49 = vsel %vm3388_vm4, %v5217_v22, %v3385_v63  ;;  %v3392_v48 = vmul.f32 %v5219_v55, %v3391_v27 }
0x180c   :  { %v3410_v47 = vmul.f32 %v3389_v49, %v3359_v17 }
0x180d   :  { %v3393_v24 = vmul.f32 0.5, %v3392_v48  ;;  %v4767_v48 = vld [vmem:[%s7740_s4 + $0x20] sm:$0xff] }
0x180e   :  { %v3416_v57 = vmul.f32 %v4983_v4, %v3410_v47 }
0x180f   :  { %v3394_v40 = vsub.f32 1.5, %v3393_v24 }
0x1810   :  { %v3422_v5 = vadd.f32 %v4956_v42, %v3416_v57  ;;  %v5221_v52 = vpop.eup %5220 }
0x1811   :  { %v3395_v61 = vmul.f32 %v5219_v55, %v3394_v40  ;;  %v3401_v62 = vmul.f32 %v5221_v52, %v3379_v54  ;;  %vm3407_vm10 = vweird.f32 %v5221_v52  ;;  %v4766_v54 = vld [vmem:[%s7740_s4 + $0x18] sm:$0xff] }
0x1812   :  { %4763 = vmatmul.msk.f32.vlgmr.msrb.gmra.mxu2 %vm70_vm0, %v3422_v5  ;;  %vm3408_vm4 = vmor %vm3406_vm11, %vm3407_vm10 }
0x1813   :  { %v3399_v1 = vsel %vm3398_vm6, %v5219_v55, %v3395_v61  ;;  %v3402_v37 = vmul.f32 %v5221_v52, %v3401_v62 }
0x1814   :  { %v3411_v32 = vmul.f32 %v3399_v1, %v3360_v33 }
0x1815   :  { %v3403_v56 = vmul.f32 0.5, %v3402_v37 }
0x1816   :  { %v3417_v14 = vmul.f32 %v4983_v4, %v3411_v32  ;;  %v4768_v32 = vld [vmem:[%s7740_s4 + $0x28] sm:$0xf]  ;;  %s7749_s4 = sld [smem:[#allocation10_spill]] }
0x1817   :  { %v3404_v60 = vsub.f32 1.5, %v3403_v56 }
0x1818   :  { %v3423_v31 = vadd.f32 %v4956_v42, %v3417_v14 }
0x1819   :  { %v3405_v3 = vmul.f32 %v5221_v52, %v3404_v60 }
0x181a   :  { %4764 = vmatmul.msk.f32.gmra.mxu2 %vm70_vm0, %v3423_v31 }
0x181b   :  { %v3409_v6 = vsel %vm3408_vm4, %v5221_v52, %v3405_v3 }
0x181c   :  { %v3412_v7 = vmul.f32 %v3409_v6, %v7102_v13 }
0x181e   :  { %v3418_v45 = vmul.f32 %v4983_v4, %v3412_v7 }
0x1820   :  { %v3424_v41 = vadd.f32 %v4956_v42, %v3418_v45 }
0x1822   :  { %4765 = vmatmul.msk.f32.gmra.mxu2 %vm70_vm0, %v3424_v41 }
0x1895   :  { %v3459_v30 = vpop.f32.mrf.mxu2 }
0x1896   :  { %v7147_v25 = vadd.f32 %v4984_v11, %v3459_v30 }
0x189d   :  { %v3462_v17 = vpop.f32.mrf.mxu2 }
0x189e   :  { %v7135_v10 = vadd.f32 %v4984_v11, %v3462_v17 }
0x18a0   :  { %3479 = vrot.lane.b32.xlu2 %v7135_v10, %s7731_s28 }
0x18a5   :  { %v3465_v23 = vpop.f32.mrf.mxu2 }
0x18a6   :  { %v7139_v9 = vadd.f32 %v4984_v11, %v3465_v23 }
0x18a8   :  { %3487 = vrot.lane.b32.xlu1 %v7139_v9, %s7733_s24  ;;  %3481 = vrot.lane.b32.xlu0 %v7139_v9, %s7731_s28 }
0x18a9   :  { %3475 = vrot.lane.b32.xlu2 %v7139_v9, %s7732_s1 }
0x18b0   :  { %3485 = vrot.lane.b32.xlu0 %v7135_v10, %s7733_s24  ;;  %3477 = vrot.lane.b32.xlu1 %v7147_v25, %s7731_s28 }
0x18b8   :  { %3483 = vrot.lane.b32.xlu0 %v7147_v25, %s7733_s24  ;;  %3473 = vrot.lane.b32.xlu1 %v7135_v10, %s7732_s1 }
0x18c0   :  { %3471 = vrot.lane.b32.xlu0 %v7147_v25, %s7732_s1 }
0x18fa   :  { %v3480_v33 = vpop.permute.xlu2 %3479 }
0x18fb   :  { %3582 = vrot.lane.b32.xlu0 %v3480_v33, %s7734_s25 }
0x1903   :  { %v7167_v13 = vpop.permute.xlu2 %3475 }
0x191a   :  { %v3488_v43 = vpop.permute.xlu1 %3487  ;;  %v3482_v34 = vpop.permute.xlu0 %3481 }
0x191b   :  { %3584 = vrot.lane.b32.xlu2 %v3482_v34, %s7734_s25  ;;  %3628 = vrot.lane.b32.xlu1 %v3488_v43, %s7734_s25 }
0x1922   :  { %v3486_v29 = vpop.permute.xlu0 %3485  ;;  %v7162_v38 = vpop.permute.xlu1 %3477 }
0x1923   :  { %3626 = vrot.lane.b32.xlu2 %v3486_v29, %s7734_s25  ;;  %3580 = vrot.lane.b32.xlu1 %v7162_v38, %s7734_s25  ;;  %v4934_v16 = vpack.i.bf16 %v3486_v29, %v3480_v33 }
0x192a   :  { %v7169_v21 = vpop.permute.xlu0 %3483  ;;  %v7171_v26 = vpop.permute.xlu1 %3473 }
0x192b   :  { %3540 = vrot.lane.b32.xlu2 %v7167_v13, %s7734_s25  ;;  %3624 = vrot.lane.b32.xlu0 %v7169_v21, %s7734_s25 }
0x192c   :  { %3538 = vrot.lane.b32.xlu1 %v7171_v26, %s7734_s25 }
0x1932   :  { %v7179_v35 = vpop.permute.xlu0 %3471 }
0x1933   :  { %3496 = vrot.lane.b32.xlu2 %v7139_v9, %s7734_s25  ;;  %3536 = vrot.lane.b32.xlu0 %v7179_v35, %s7734_s25 }
0x1934   :  { %3494 = vrot.lane.b32.xlu1 %v7135_v10, %s7734_s25 }
0x193b   :  { %3952 = vrot.lane.b32.xlu2 %v3488_v43, %s7735_s27  ;;  %3492 = vrot.lane.b32.xlu0 %v7147_v25, %s7734_s25 }
0x193c   :  { %4935 = vrot.lane.b32.xlu1 %v4934_v16, %s7735_s27 }
0x1943   :  { %3907 = vrot.lane.b32.xlu0 %v3482_v34, %s7735_s27 }
0x196d   :  { %v3583_v15 = vpop.permute.xlu0 %3582 }
0x1975   :  { %v3585_v50 = vpop.permute.xlu2 %3584 }
0x1976   :  { %4781 = vmatpush.xpose.msk.msra.mxu2 %vm230_vm12, %v3585_v50 }
0x197a   :  { %4782 = vmatpush.xpose.msk.msra.mxu2 %vm230_vm12, %v3583_v15 }
0x197d   :  { %v3627_v2 = vpop.permute.xlu2 %3626 }
0x1985   :  { %v3541_v36 = vpop.permute.xlu2 %3540 }
0x1986   :  { %4775 = vmatpush.xpose.msk.msrb.mxu1 %vm230_vm12, %v3541_v36 }
0x198d   :  { %v3497_v58 = vpop.permute.xlu2 %3496  ;;  %v3629_v20 = vpop.permute.xlu1 %3628 }
0x198e   :  { %4769 = vmatpush.xpose.msk.msra.mxu0 %vm230_vm12, %v3497_v58  ;;  %4787 = vmatpush.xpose.msk.msrb.mxu3 %vm230_vm12, %v3629_v20  ;;  %v4944_v58 = vpack.i.bf16 %v7179_v35, %v7171_v26  ;;  %v4939_v20 = vpack.i.bf16 %v7169_v21, %v7162_v38 }
0x1992   :  { %4788 = vmatpush.xpose.msk.msrb.mxu3 %vm230_vm12, %v3627_v2 }
0x1995   :  { %v3581_v19 = vpop.permute.xlu1 %3580  ;;  %v3953_v51 = vpop.permute.xlu2 %3952 }
0x1996   :  { %4783 = vmatpush.xpose.msk.msra.mxu2 %vm230_vm12, %v3581_v19 }
0x1999   :  { %4784 = vmatmul.msk.f32.vlgmr.msra.gmra.mxu2 %vm230_vm12, %v7162_v38 }
0x199d   :  { %v3625_v22 = vpop.permute.xlu0 %3624 }
0x199e   :  { %v3539_v53 = vpop.permute.xlu1 %3538  ;;  %4789 = vmatpush.xpose.msk.msrb.mxu3 %vm230_vm12, %v3625_v22 }
0x199f   :  { %4776 = vmatpush.xpose.msk.msrb.mxu1 %vm230_vm12, %v3539_v53 }
0x19a1   :  { %4785 = vmatmul.msk.f32.gmra.mxu2 %vm230_vm12, %v3480_v33  ;;  %4790 = vmatmul.msk.f32.vlgmr.msrb.gmra.mxu3 %vm230_vm12, %v7169_v21 }
0x19a2   :  { %4817 = vmatpush.msk.msra.mxu3 %vm564_vm13, %v3953_v51 }
0x19a5   :  { %v3537_v59 = vpop.permute.xlu0 %3536 }
0x19a6   :  { %v3495_v39 = vpop.permute.xlu1 %3494  ;;  %4777 = vmatpush.xpose.msk.msrb.mxu1 %vm230_vm12, %v3537_v59 }
0x19a7   :  { %4770 = vmatpush.xpose.msk.msra.mxu0 %vm230_vm12, %v3495_v39 }
0x19a9   :  { %4778 = vmatmul.msk.f32.vlgmr.msrb.gmra.mxu1 %vm230_vm12, %v7179_v35  ;;  %4786 = vmatmul.msk.f32.gmra.mxu2 %vm230_vm12, %v3482_v34 }
0x19aa   :  { %4791 = vmatmul.msk.f32.gmra.mxu3 %vm230_vm12, %v3486_v29 }
0x19ad   :  { %v3493_v8 = vpop.permute.xlu0 %3492 }
0x19ae   :  { %v4936_v18 = vpop.permute.xlu1 %4935  ;;  %4771 = vmatpush.xpose.msk.msra.mxu0 %vm230_vm12, %v3493_v8 }
0x19af   :  { %v4938_v44 = vunpack.i.h.bf16 %v4936_v18  ;;  %v4937_v63 = vunpack.i.l.bf16 %v4936_v18 }
0x19b1   :  { %3981 = vmatpush.msra.mxu3 %v4938_v44  ;;  %4772 = vmatmul.msk.f32.vlgmr.msra.gmra.mxu0 %vm230_vm12, %v7147_v25 }
0x19b2   :  { %4779 = vmatmul.msk.f32.gmra.mxu1 %vm230_vm12, %v7171_v26  ;;  %4792 = vmatmul.msk.f32.gmra.mxu3 %vm230_vm12, %v3488_v43 }
0x19b5   :  { %v3908_v55 = vpop.permute.xlu0 %3907 }
0x19b6   :  { %4813 = vmatpush.msk.msrb.mxu2 %vm564_vm13, %v3908_v55 }
0x19b8   :  { %3936 = vmatpush.msrb.mxu2 %v4937_v63 }
0x19b9   :  { %4773 = vmatmul.msk.f32.gmra.mxu0 %vm230_vm12, %v7135_v10 }
0x19ba   :  { %4780 = vmatmul.msk.f32.gmra.mxu1 %vm230_vm12, %v7167_v13 }
0x19c1   :  { %4774 = vmatmul.msk.f32.gmra.mxu0 %vm230_vm12, %v7139_v9 }
0x1a1c   :  { %v3615_v27 = vpop.f32.mrf.mxu2 }
0x1a1d   :  { %v3616_v47 = vadd.f32 %v4766_v54, %v3615_v27 }
0x1a1f   :  { %v3686_v61 = vsel %vm401_vm14, %v3616_v47, -inf }
0x1a24   :  { %v3659_v57 = vpop.f32.mrf.mxu3  ;;  %v3618_v40 = vpop.f32.mrf.mxu2 }
0x1a25   :  { %v3660_v62 = vadd.f32 %v4766_v54, %v3659_v57  ;;  %v3619_v1 = vadd.f32 %v4767_v48, %v3618_v40 }
0x1a26   :  { %v3571_v37 = vpop.f32.mrf.mxu1 }
0x1a27   :  { %v3695_v3 = vsel %vm401_vm14, %v3660_v62, -inf  ;;  %v3689_v6 = vsel %vm401_vm14, %v3619_v1, -inf  ;;  %v3572_v45 = vadd.f32 %v4766_v54, %v3571_v37 }
0x1a29   :  { %v3677_v17 = vsel %vm401_vm14, %v3572_v45, -inf }
0x1a2c   :  { %v3621_v7 = vpop.f32.mrf.mxu2 }
0x1a2d   :  { %v3662_v60 = vpop.f32.mrf.mxu3  ;;  %v3622_v30 = vadd.f32 %v4768_v32, %v3621_v7 }
0x1a2e   :  { %v3527_v4 = vpop.f32.mrf.mxu0  ;;  %v3663_v41 = vadd.f32 %v4767_v48, %v3662_v60 }
0x1a2f   :  { %v7229_v49 = vadd.f32 %v4766_v54, %v3527_v4  ;;  %v3574_v11 = vpop.f32.mrf.mxu1  ;;  %v3692_v43 = vsel %vm408_vm15, %v3622_v30, -inf }
0x1a30   :  { %v3698_v23 = vsel %vm401_vm14, %v3663_v41, -inf  ;;  %v3575_v34 = vadd.f32 %v4767_v48, %v3574_v11 }
0x1a31   :  { %v3668_v42 = vsel %vm401_vm14, %v7229_v49, -inf }
0x1a32   :  { %3669 = vmax.xlane.f32.xlu2 %v3668_v42  ;;  %v3680_v16 = vsel %vm401_vm14, %v3575_v34, -inf }
0x1a35   :  { %v3665_v33 = vpop.f32.mrf.mxu3 }
0x1a36   :  { %v3530_v24 = vpop.f32.mrf.mxu0  ;;  %v3666_v29 = vadd.f32 %v4768_v32, %v3665_v33 }
0x1a37   :  { %v7236_v5 = vadd.f32 %v4767_v48, %v3530_v24  ;;  %v3577_v15 = vpop.f32.mrf.mxu1 }
0x1a38   :  { %v3701_v50 = vsel %vm408_vm15, %v3666_v29, -inf  ;;  %v7255_v2 = vadd.f32 %v4768_v32, %v3577_v15 }
0x1a39   :  { %v3671_v52 = vsel %vm401_vm14, %v7236_v5, -inf }
0x1a3a   :  { %3672 = vmax.xlane.f32.xlu1 %v3671_v52  ;;  %3687 = vmax.xlane.f32.xlu2 %v3686_v61  ;;  %v3683_v36 = vsel %vm408_vm15, %v7255_v2, -inf }
0x1a3e   :  { %v3533_v56 = vpop.f32.mrf.mxu0 }
0x1a3f   :  { %v7244_v14 = vadd.f32 %v4768_v32, %v3533_v56 }
0x1a41   :  { %v3674_v31 = vsel %vm408_vm15, %v7244_v14, -inf }
0x1a42   :  { %3675 = vmax.xlane.f32.xlu0 %v3674_v31  ;;  %3696 = vmax.xlane.f32.xlu1 %v3695_v3 }
0x1a43   :  { %3690 = vmax.xlane.f32.xlu2 %v3689_v6 }
0x1a4a   :  { %3678 = vmax.xlane.f32.xlu0 %v3677_v17  ;;  %3699 = vmax.xlane.f32.xlu1 %v3698_v23 }
0x1a4b   :  { %3693 = vmax.xlane.f32.xlu2 %v3692_v43 }
0x1a52   :  { %3681 = vmax.xlane.f32.xlu0 %v3680_v16  ;;  %3702 = vmax.xlane.f32.xlu1 %v3701_v50 }
0x1a5a   :  { %3684 = vmax.xlane.f32.xlu0 %v3683_v36 }
0x1a63   :  { %3862 = vrot.lane.b32.xlu2 %v7167_v13, %s7735_s27 }
0x1a6b   :  { %4945 = vrot.lane.b32.xlu1 %v4944_v58, %s7735_s27 }
0x1a6e   :  { %4940 = vrot.lane.b32.xlu0 %v4939_v20, %s7735_s27 }
0x1aa5   :  { %v3670_v19 = vpop.xlane.xlu2 %3669 }
0x1aa6   :  { %v3704_v11 = vsub.f32 %v7229_v49, %v3670_v19 }
0x1aad   :  { %v3688_v22 = vpop.xlane.xlu2 %3687  ;;  %v3673_v51 = vpop.xlane.xlu1 %3672 }
0x1aae   :  { %v3710_v53 = vsub.f32 %v3616_v47, %v3688_v22  ;;  %v3705_v23 = vsub.f32 %v7236_v5, %v3673_v51 }
0x1ab0   :  { %v3728_v59 = vmul.f32 1.442695, %v3710_v53  ;;  %v3718_v49 = vmul.f32 1.442695, %v3705_v23 }
0x1ab2   :  { %5222 = vpow2.f32 %v3728_v59 }
0x1ab5   :  { %v7267_v39 = vpop.xlane.xlu0 %3675  ;;  %v3697_v8 = vpop.xlane.xlu1 %3696 }
0x1ab6   :  { %v3691_v13 = vpop.xlane.xlu2 %3690  ;;  %v3713_v18 = vsub.f32 %v3660_v62, %v3697_v8  ;;  %v3706_v15 = vsub.f32 %v7244_v14, %v7267_v39 }
0x1ab7   :  { %v3711_v35 = vsub.f32 %v3619_v1, %v3691_v13 }
0x1ab8   :  { %v7269_v44 = vpop.eup %5222  ;;  %v3734_v26 = vmul.f32 1.442695, %v3713_v18  ;;  %v3720_v58 = vmul.f32 1.442695, %v3706_v15 }
0x1ab9   :  { %v3758_v38 = vsel %vm401_vm14, %v7269_v44, 0.0  ;;  %v3730_v21 = vmul.f32 1.442695, %v3711_v35  ;;  %v4949_v35 = vpack.i.bf16 %v7147_v25, %v7135_v10 }
0x1aba   :  { %3759 = vadd.xlane.f32.xlu0 %v3758_v38  ;;  %5224 = vpow2.f32 %v3734_v26 }
0x1abb   :  { %5226 = vpow2.f32 %v3730_v21 }
0x1abd   :  { %v3679_v55 = vpop.xlane.xlu0 %3678  ;;  %v3700_v63 = vpop.xlane.xlu1 %3699 }
0x1abe   :  { %v3707_v54 = vsub.f32 %v3572_v45, %v3679_v55  ;;  %v3694_v4 = vpop.xlane.xlu2 %3693  ;;  %v3714_v42 = vsub.f32 %v3663_v41, %v3700_v63 }
0x1abf   :  { %v3712_v47 = vsub.f32 %v3622_v30, %v3694_v4 }
0x1ac0   :  { %v3722_v27 = vmul.f32 1.442695, %v3707_v54  ;;  %v7273_v48 = vpop.eup %5224  ;;  %v3736_v24 = vmul.f32 1.442695, %v3714_v42 }
0x1ac1   :  { %v3767_v57 = vsel %vm401_vm14, %v7273_v48, 0.0  ;;  %v3732_v40 = vmul.f32 1.442695, %v3712_v47  ;;  %v7277_v37 = vpop.eup %5226 }
0x1ac2   :  { %5228 = vpow2.f32 %v3722_v27  ;;  %3768 = vadd.xlane.f32.xlu2 %v3767_v57  ;;  %v3761_v3 = vsel %vm401_vm14, %v7277_v37, 0.0 }
0x1ac3   :  { %5230 = vpow2.f32 %v3736_v24 }
0x1ac4   :  { %5232 = vpow2.f32 %v3732_v40 }
0x1ac5   :  { %v3682_v52 = vpop.xlane.xlu0 %3681  ;;  %v3703_v61 = vpop.xlane.xlu1 %3702 }
0x1ac6   :  { %v3708_v62 = vsub.f32 %v3575_v34, %v3682_v52  ;;  %v3863_v1 = vpop.permute.xlu2 %3862  ;;  %v3715_v60 = vsub.f32 %v3666_v29, %v3703_v61  ;;  %v3716_v29 = vmul.f32 1.442695, %v3704_v11 }
0x1ac7   :  { %4809 = vmatpush.msk.msra.mxu1 %vm564_vm13, %v3863_v1 }
0x1ac8   :  { %v7280_v32 = vpop.eup %5228  ;;  %v3724_v56 = vmul.f32 1.442695, %v3708_v62  ;;  %v3738_v6 = vmul.f32 1.442695, %v3715_v60 }
0x1ac9   :  { %v3749_v31 = vsel %vm401_vm14, %v7280_v32, 0.0  ;;  %v7286_v45 = vpop.eup %5230 }
0x1aca   :  { %5234 = vpow2.f32 %v3724_v56  ;;  %3750 = vadd.xlane.f32.xlu1 %v3749_v31  ;;  %3762 = vadd.xlane.f32.xlu2 %v3761_v3  ;;  %v7289_v30 = vpop.eup %5232  ;;  %v3770_v34 = vsel %vm401_vm14, %v7286_v45, 0.0 }
0x1acb   :  { %5236 = vpow2.f32 %v3738_v6  ;;  %v3764_v16 = vsel %vm408_vm15, %v7289_v30, 0.0 }
0x1acd   :  { %v3685_v7 = vpop.xlane.xlu0 %3684 }
0x1ace   :  { %v3709_v41 = vsub.f32 %v7255_v2, %v3685_v7 }
0x1ad0   :  { %v7292_v17 = vpop.eup %5234  ;;  %v3726_v33 = vmul.f32 1.442695, %v3709_v41 }
0x1ad1   :  { %v3752_v43 = vsel %vm401_vm14, %v7292_v17, 0.0  ;;  %v7301_v50 = vpop.eup %5236 }
0x1ad2   :  { %5238 = vpow2.f32 %v3726_v33  ;;  %3753 = vadd.xlane.f32.xlu0 %v3752_v43  ;;  %3771 = vadd.xlane.f32.xlu1 %v3770_v34  ;;  %v3773_v36 = vsel %vm408_vm15, %v7301_v50, 0.0 }
0x1ad3   :  { %3765 = vadd.xlane.f32.xlu2 %v3764_v16  ;;  %5240 = vpow2.f32 %v3716_v29 }
0x1ad4   :  { %5242 = vpow2.f32 %v3718_v49 }
0x1ad5   :  { %5244 = vpow2.f32 %v3720_v58 }
0x1ad8   :  { %v7303_v5 = vpop.eup %5238 }
0x1ad9   :  { %v3755_v2 = vsel %vm408_vm15, %v7303_v5, 0.0  ;;  %v7311_v20 = vpop.eup %5240 }
0x1ada   :  { %3756 = vadd.xlane.f32.xlu0 %v3755_v2  ;;  %3774 = vadd.xlane.f32.xlu1 %v3773_v36  ;;  %v7313_v22 = vpop.eup %5242  ;;  %v3740_v14 = vsel %vm401_vm14, %v7311_v20, 0.0 }
0x1adb   :  { %v3743_v13 = vsel %vm401_vm14, %v7313_v22, 0.0  ;;  %v7319_v18 = vpop.eup %5244 }
0x1adc   :  { %v3746_v26 = vsel %vm408_vm15, %v7319_v18, 0.0 }
0x1add   :  { %v4946_v19 = vpop.permute.xlu1 %4945 }
0x1ade   :  { %v4947_v51 = vunpack.i.l.bf16 %v4946_v19  ;;  %v4948_v59 = vunpack.i.h.bf16 %v4946_v19 }
0x1ae0   :  { %v4941_v53 = vpop.permute.xlu0 %4940  ;;  %3891 = vmatpush.msra.mxu1 %v4947_v51  ;;  %v4823_v51 = vld [vmem:[%s7660_s6 + $0x30] sm:$0xff] }
0x1ae1   :  { %v4943_v39 = vunpack.i.h.bf16 %v4941_v53  ;;  %v4942_v8 = vunpack.i.l.bf16 %v4941_v53  ;;  %v4822_v53 = vld [vmem:[%s7660_s6 + $0x28] sm:$0xff] }
0x1ae2   :  { %3741 = vadd.xlane.f32.xlu0 %v3740_v14  ;;  %3744 = vadd.xlane.f32.xlu1 %v3743_v13  ;;  %v4821_v14 = vld [vmem:[%s7660_s6 + $0x20] sm:$0xff] }
0x1ae3   :  { %3892 = vmatpush.msra.mxu1 %v4948_v59  ;;  %3937 = vmatpush.msrb.mxu2 %v4942_v8 }
0x1ae4   :  { %3982 = vmatpush.msra.mxu3 %v4943_v39 }
0x1aea   :  { %3747 = vadd.xlane.f32.xlu1 %v3746_v26 }
0x1aeb   :  { %3817 = vrot.lane.b32.xlu2 %v7139_v9, %s7735_s27 }
0x1af6   :  { %4950 = vrot.lane.b32.xlu0 %v4949_v35, %s7735_s27 }
0x1b2d   :  { %v3760_v38 = vpop.xlane.xlu0 %3759 }
0x1b2e   :  { %5246 = vrcp.f32 %v3760_v38 }
0x1b34   :  { %v5247_v21 = vpop.eup %5246 }
0x1b35   :  { %v3794_v55 = vmul.f32 %v5247_v21, %v7269_v44  ;;  %v3769_v63 = vpop.xlane.xlu2 %3768 }
0x1b36   :  { %5248 = vrcp.f32 %v3769_v63 }
0x1b37   :  { %4799 = vst.msk [vmem:[%s7744_s3 + $0x150] sm:$0xff] %vm401_vm14, %v3794_v55  ;;  %4814 = vmatmul.msk.f32.vlgmr.msrb.gmra.mxu2 %vm401_vm14, %v3794_v55 }
0x1b3c   :  { %v5249_v54 = vpop.eup %5248 }
0x1b3d   :  { %v3751_v9 = vpop.xlane.xlu1 %3750  ;;  %v3797_v10 = vmul.f32 %v5249_v54, %v7273_v48  ;;  %v3763_v25 = vpop.xlane.xlu2 %3762 }
0x1b3e   :  { %5250 = vrcp.f32 %v3751_v9 }
0x1b3f   :  { %5252 = vrcp.f32 %v3763_v25  ;;  %4802 = vst.msk [vmem:[%s7744_s3 + $0x168] sm:$0xff] %vm401_vm14, %v3797_v10  ;;  %4818 = vmatmul.msk.f32.vlgmr.msra.gmra.mxu3 %vm401_vm14, %v3797_v10 }
0x1b44   :  { %v5251_v44 = vpop.eup %5250 }
0x1b45   :  { %v3791_v4 = vmul.f32 %v5251_v44, %v7280_v32  ;;  %v3754_v27 = vpop.xlane.xlu0 %3753  ;;  %v3772_v42 = vpop.xlane.xlu1 %3771 }
0x1b46   :  { %v5253_v47 = vpop.eup %5252  ;;  %5254 = vrcp.f32 %v3754_v27  ;;  %v3766_v48 = vpop.xlane.xlu2 %3765 }
0x1b47   :  { %4796 = vst.msk [vmem:[%s7744_s3 + $0x138] sm:$0xff] %vm401_vm14, %v3791_v4  ;;  %5256 = vrcp.f32 %v3772_v42  ;;  %4810 = vmatmul.msk.f32.vlgmr.msra.gmra.mxu1 %vm401_vm14, %v3791_v4  ;;  %v3795_v57 = vmul.f32 %v5253_v47, %v7277_v37 }
0x1b48   :  { %5258 = vrcp.f32 %v3766_v48 }
0x1b49   :  { %4800 = vst.msk [vmem:[%s7744_s3 + $0x158] sm:$0xff] %vm401_vm14, %v3795_v57  ;;  %4815 = vmatmul.msk.f32.gmra.mxu2 %vm401_vm14, %v3795_v57  ;;  %v4985_v57 = vld [vmem:[%s7659_s7 + $0x1] ss:$0 sm:$0xff] }
0x1b4c   :  { %v5255_v24 = vpop.eup %5254 }
0x1b4d   :  { %v5257_v40 = vpop.eup %5256  ;;  %v3757_v52 = vpop.xlane.xlu0 %3756  ;;  %v3792_v62 = vmul.f32 %v5255_v24, %v7292_v17 }
0x1b4e   :  { %v3775_v61 = vpop.xlane.xlu1 %3774  ;;  %v5259_v1 = vpop.eup %5258  ;;  %5260 = vrcp.f32 %v3757_v52  ;;  %v3798_v32 = vmul.f32 %v5257_v40, %v7286_v45 }
0x1b4f   :  { %v3818_v56 = vpop.permute.xlu2 %3817  ;;  %5262 = vrcp.f32 %v3775_v61  ;;  %4797 = vst.msk [vmem:[%s7744_s3 + $0x140] sm:$0xff] %vm401_vm14, %v3792_v62  ;;  %4811 = vmatmul.msk.f32.gmra.mxu1 %vm401_vm14, %v3792_v62  ;;  %v3796_v37 = vmul.f32 %v5259_v1, %v7289_v30 }
0x1b50   :  { %4805 = vmatpush.msk.msrb.mxu0 %vm564_vm13, %v3818_v56  ;;  %4803 = vst.msk [vmem:[%s7744_s3 + $0x170] sm:$0xff] %vm401_vm14, %v3798_v32  ;;  %4819 = vmatmul.msk.f32.gmra.mxu3 %vm401_vm14, %v3798_v32 }
0x1b51   :  { %4801 = vst.msk [vmem:[%s7744_s3 + $0x160] sm:$0xf] %vm408_vm15, %v3796_v37  ;;  %4816 = vmatmul.msk.f32.gmra.mxu2 %vm401_vm14, %v3796_v37 }
0x1b54   :  { %v5261_v60 = vpop.eup %5260 }
0x1b55   :  { %v5263_v31 = vpop.eup %5262  ;;  %v3742_v3 = vpop.xlane.xlu0 %3741  ;;  %v3793_v7 = vmul.f32 %v5261_v60, %v7303_v5 }
0x1b56   :  { %v3745_v6 = vpop.xlane.xlu1 %3744  ;;  %5264 = vrcp.f32 %v3742_v3  ;;  %v3799_v45 = vmul.f32 %v5263_v31, %v7301_v50 }
0x1b57   :  { %5266 = vrcp.f32 %v3745_v6  ;;  %4798 = vst.msk [vmem:[%s7744_s3 + $0x148] sm:$0xf] %vm408_vm15, %v3793_v7  ;;  %4812 = vmatmul.msk.f32.gmra.mxu1 %vm401_vm14, %v3793_v7 }
0x1b58   :  { %4804 = vst.msk [vmem:[%s7744_s3 + $0x178] sm:$0xf] %vm408_vm15, %v3799_v45  ;;  %4820 = vmatmul.msk.f32.gmra.mxu3 %vm401_vm14, %v3799_v45 }
0x1b5c   :  { %v5265_v41 = vpop.eup %5264 }
0x1b5d   :  { %v5267_v30 = vpop.eup %5266  ;;  %v3788_v11 = vmul.f32 %v5265_v41, %v7311_v20 }
0x1b5e   :  { %v3748_v17 = vpop.xlane.xlu1 %3747  ;;  %v3789_v23 = vmul.f32 %v5267_v30, %v7313_v22  ;;  %v4824_v22 = vld [vmem:[%s7660_s6 + $0x38] sm:$0xff] }
0x1b5f   :  { %5268 = vrcp.f32 %v3748_v17  ;;  %4793 = vst.msk [vmem:[%s7744_s3 + $0x120] sm:$0xff] %vm401_vm14, %v3788_v11 }
0x1b60   :  { %4794 = vst.msk [vmem:[%s7744_s3 + $0x128] sm:$0xff] %vm401_vm14, %v3789_v23 }
0x1b65   :  { %v5269_v33 = vpop.eup %5268 }
0x1b66   :  { %v3790_v43 = vmul.f32 %v5269_v33, %v7319_v18 }
0x1b68   :  { %4795 = vst.msk [vmem:[%s7744_s3 + $0x130] sm:$0xf] %vm408_vm15, %v3790_v43  ;;  %v4951_v34 = vpop.permute.xlu0 %4950 }
0x1b69   :  { %v4952_v29 = vunpack.i.l.bf16 %v4951_v34  ;;  %v4953_v16 = vunpack.i.h.bf16 %v4951_v34 }
0x1b6b   :  { %3846 = vmatpush.msrb.mxu0 %v4952_v29 }
0x1b6d   :  { %3847 = vmatpush.msrb.mxu0 %v4953_v16  ;;  %v4834_v16 = vld [vmem:[%s7664_s10 + $0x38] sm:$0xff] }
0x1b6e   :  { %4806 = vmatmul.msk.f32.vlgmr.msrb.gmra.mxu0 %vm401_vm14, %v3788_v11  ;;  %4193 = vmatpush.msrb.mxu1 %v4834_v16 }
0x1b6f   :  { %4067 = vmatpush.msra.mxu0 %v4824_v22 }
0x1b71   :  { %4068 = vmatpush.msra.mxu0 %v4823_v51 }
0x1b73   :  { %4069 = vmatpush.msra.mxu0 %v4822_v53 }
0x1b75   :  { %4070 = vmatpush.msra.mxu0 %v4821_v14 }
0x1b76   :  { %4807 = vmatmul.msk.f32.gmra.mxu0 %vm401_vm14, %v3789_v23 }
0x1b7e   :  { %4808 = vmatmul.msk.f32.gmra.mxu0 %vm401_vm14, %v3790_v43 }
0x1bba   :  { %v3939_v49 = vpop.f32.mrf.mxu2 }
0x1bc2   :  { %v3984_v50 = vpop.f32.mrf.mxu3 }
0x1bc3   :  { %4020 = vrot.lane.b32.xlu0 %v3984_v50, %s7745_s19  ;;  %v4832_v50 = vld [vmem:[%s7664_s10 + $0x28] sm:$0xff] }
0x1bc4   :  { %v3894_v5 = vpop.f32.mrf.mxu1 }
0x1bc5   :  { %3996 = vrot.lane.b32.xlu1 %v3894_v5, %s7737_s2  ;;  %v4831_v5 = vld [vmem:[%s7664_s10 + $0x20] sm:$0xff] }
0x1bcc   :  { %v3942_v15 = vpop.f32.mrf.mxu2  ;;  %v3897_v2 = vpop.f32.mrf.mxu1 }
0x1bcd   :  { %4010 = vrot.lane.b32.xlu0 %v3942_v15, %s7736_s23  ;;  %3998 = vrot.lane.b32.xlu2 %v3897_v2, %s7737_s2 }
0x1bd3   :  { %v3987_v36 = vpop.f32.mrf.mxu3 }
0x1bd4   :  { %v3900_v58 = vpop.f32.mrf.mxu1  ;;  %v3945_v19 = vpop.f32.mrf.mxu2 }
0x1bd5   :  { %4008 = vrot.lane.b32.xlu2 %v3939_v49, %s7736_s23  ;;  %4000 = vrot.lane.b32.xlu0 %v3900_v58, %s7737_s2  ;;  %v4833_v49 = vld [vmem:[%s7664_s10 + $0x30] sm:$0xff]  ;;  %s7748_s10 = sld [smem:[#allocation9_spill]] }
0x1bd6   :  { %4194 = vmatpush.msrb.mxu1 %v4833_v49  ;;  %v4847_v49 = vld [vmem:[%s7666_s12 + $0xc0] sm:$0xff] }
0x1bd8   :  { %4195 = vmatpush.msrb.mxu1 %v4832_v50  ;;  %v4846_v50 = vld [vmem:[%s7666_s12 + $0xb8] sm:$0xff] }
0x1bda   :  { %4196 = vmatpush.msrb.mxu1 %v4831_v5 }
0x1bdb   :  { %v3990_v20 = vpop.f32.mrf.mxu3 }
0x1bdc   :  { %4024 = vrot.lane.b32.xlu1 %v3990_v20, %s7745_s19 }
0x1bdd   :  { %4022 = vrot.lane.b32.xlu2 %v3987_v36, %s7745_s19 }
0x1be5   :  { %4012 = vrot.lane.b32.xlu2 %v3945_v19, %s7736_s23  ;;  %s7747_s23 = sld [smem:[#allocation11_spill]] }
0x1beb   :  { %v3849_v39 = vpop.f32.mrf.mxu0 }
0x1bf3   :  { %v3852_v21 = vpop.f32.mrf.mxu0 }
0x1bfb   :  { %v3855_v44 = vpop.f32.mrf.mxu0 }
0x1c27   :  { %v3999_v59 = vpop.permute.xlu2 %3998 }
0x1c28   :  { %v4030_v55 = vsel %vm230_vm12, %v3852_v21, %v3999_v59 }
0x1c2f   :  { %v4009_v8 = vpop.permute.xlu2 %4008 }
0x1c35   :  { %v4021_v13 = vpop.permute.xlu0 %4020 }
0x1c37   :  { %v3997_v18 = vpop.permute.xlu1 %3996  ;;  %v4023_v54 = vpop.permute.xlu2 %4022 }
0x1c38   :  { %v4029_v26 = vsel %vm230_vm12, %v3849_v39, %v3997_v18  ;;  %v4986_v18 = vld [vmem:[%s7661_s8 + $0x1] ss:$0 sm:$0xff] }
0x1c39   :  { %v4032_v35 = vsel %vm767_vm2, %v4029_v26, %v4009_v8 }
0x1c3a   :  { %v4035_v38 = vsel %vm771_vm3, %v4032_v35, %v4021_v13 }
0x1c3b   :  { %4826 = vmatmul.msk.f32.vlgmr.msra.gmra.mxu0 %vm70_vm0, %v4035_v38 }
0x1c3f   :  { %v4011_v63 = vpop.permute.xlu0 %4010  ;;  %v4013_v27 = vpop.permute.xlu2 %4012 }
0x1c40   :  { %v4033_v9 = vsel %vm767_vm2, %v4030_v55, %v4011_v63  ;;  %v4987_v55 = vld [vmem:[%s7662_s9 + $0x1] ss:$0 sm:$0xff] }
0x1c41   :  { %v4036_v10 = vsel %vm771_vm3, %v4033_v9, %v4023_v54 }
0x1c43   :  { %4827 = vmatmul.msk.f32.gmra.mxu0 %vm70_vm0, %v4036_v10 }
0x1c47   :  { %v4001_v25 = vpop.permute.xlu0 %4000 }
0x1c48   :  { %v4031_v4 = vsel %vm230_vm12, %v3855_v44, %v4001_v25 }
0x1c49   :  { %v4034_v47 = vsel %vm767_vm2, %v4031_v4, %v4013_v27 }
0x1c4e   :  { %v4025_v42 = vpop.permute.xlu1 %4024 }
0x1c4f   :  { %v4037_v48 = vsel %vm771_vm3, %v4034_v47, %v4025_v42 }
0x1c50   :  { %4828 = vmatmul.msk.f32.gmra.mxu0 %vm70_vm0, %v4037_v48 }
0x1cb8   :  { %v4072_v24 = vpop.f32.mrf.mxu0 }
0x1cb9   :  { %v4073_v40 = vadd.f32 %v4985_v57, %v4072_v24 }
0x1cbb   :  { %v7438_v52 = vadd.f32 %v4073_v40, %v7080_v0 }
0x1cbd   :  { %v4086_v61 = vsel %vm70_vm0, %v7438_v52, 0.0 }
0x1cbe   :  { %4087 = vadd.xlane.f32.xlu0 %v4086_v61 }
0x1cc0   :  { %v4075_v62 = vpop.f32.mrf.mxu0 }
0x1cc1   :  { %v4076_v1 = vadd.f32 %v4985_v57, %v4075_v62 }
0x1cc3   :  { %v7443_v32 = vadd.f32 %v4076_v1, %v7085_v46 }
0x1cc5   :  { %v4089_v56 = vsel %vm70_vm0, %v7443_v32, 0.0 }
0x1cc6   :  { %4090 = vadd.xlane.f32.xlu2 %v4089_v56 }
0x1ccd   :  { %v4078_v37 = vpop.f32.mrf.mxu0 }
0x1cce   :  { %v4079_v60 = vadd.f32 %v4985_v57, %v4078_v37 }
0x1cd0   :  { %v7448_v31 = vadd.f32 %v4079_v60, %v7090_v28 }
0x1cd2   :  { %v4092_v0 = vsel %vm77_vm1, %v7448_v31, 0.0 }
0x1cd3   :  { %4093 = vadd.xlane.f32.xlu1 %v4092_v0 }
0x1d31   :  { %v4088_v3 = vpop.xlane.xlu0 %4087 }
0x1d32   :  { %v4095_v6 = vmul.f32 %v4088_v3, %v5431_v12  ;;  %v4854_v3 = vld [vmem:[%s7666_s12 + $0xf8] sm:$0xff] }
0x1d33   :  { %4347 = vmatpush.msra.mxu2 %v4854_v3 }
0x1d34   :  { %v4098_v7 = vsub.f32 %v7438_v52, %v4095_v6  ;;  %v4988_v6 = vld [vmem:[%s7663_s11 + $0x1] ss:$0 sm:$0xff] }
0x1d36   :  { %v4101_v46 = vmul.f32 %v4098_v7, %v4098_v7 }
0x1d38   :  { %v4104_v45 = vsel %vm70_vm0, %v4101_v46, 0.0  ;;  %v4852_v46 = vld [vmem:[%s7666_s12 + $0xe8] sm:$0xff] }
0x1d39   :  { %4105 = vadd.xlane.f32.xlu0 %v4104_v45  ;;  %v4091_v41 = vpop.xlane.xlu2 %4090 }
0x1d3a   :  { %v4096_v30 = vmul.f32 %v4091_v41, %v5431_v12 }
0x1d3c   :  { %v4099_v11 = vsub.f32 %v7443_v32, %v4096_v30  ;;  %v4851_v30 = vld [vmem:[%s7666_s12 + $0xe0] sm:$0xff] }
0x1d3e   :  { %v4102_v28 = vmul.f32 %v4099_v11, %v4099_v11 }
0x1d40   :  { %v4107_v17 = vsel %vm70_vm0, %v4102_v28, 0.0  ;;  %v4850_v28 = vld [vmem:[%s7666_s12 + $0xd8] sm:$0xff] }
0x1d41   :  { %4108 = vadd.xlane.f32.xlu2 %v4107_v17 }
0x1d46   :  { %v4094_v23 = vpop.xlane.xlu1 %4093 }
0x1d47   :  { %v4097_v33 = vmul.f32 %v4094_v23, %v5431_v12  ;;  %v4849_v23 = vld [vmem:[%s7666_s12 + $0xd0] sm:$0xff] }
0x1d49   :  { %v7460_v43 = vsub.f32 %v7448_v31, %v4097_v33 }
0x1d4b   :  { %v4103_v34 = vmul.f32 %v7460_v43, %v7460_v43 }
0x1d4d   :  { %v4110_v29 = vsel %vm77_vm1, %v4103_v34, 0.0 }
0x1d4e   :  { %4111 = vadd.xlane.f32.xlu1 %v4110_v29 }
0x1dac   :  { %v4106_v15 = vpop.xlane.xlu0 %4105 }
0x1dad   :  { %v4113_v2 = vmul.f32 %v4106_v15, %v5431_v12  ;;  %v4845_v15 = vld [vmem:[%s7666_s12 + $0xb0] sm:$0xff] }
0x1daf   :  { %v4116_v36 = vadd.f32 1e-05, %v4113_v2 }
0x1db1   :  { %5270 = vrsqrt.f32 %v4116_v36  ;;  %vm4125_vm14 = vweird.f32 %v4116_v36 }
0x1db4   :  { %v4109_v58 = vpop.xlane.xlu2 %4108 }
0x1db5   :  { %v4114_v20 = vmul.f32 %v4109_v58, %v5431_v12 }
0x1db7   :  { %v5271_v19 = vpop.eup %5270  ;;  %v4117_v22 = vadd.f32 1e-05, %v4114_v20 }
0x1db8   :  { %v4120_v51 = vmul.f32 %v5271_v19, %v4116_v36  ;;  %vm4126_vm12 = vweird.f32 %v5271_v19  ;;  %v4844_v36 = vld [vmem:[%s7666_s12 + $0xa8] sm:$0xff] }
0x1db9   :  { %5272 = vrsqrt.f32 %v4117_v22  ;;  %vm4127_vm15 = vmor %vm4125_vm14, %vm4126_vm12  ;;  %vm4135_vm3 = vweird.f32 %v4117_v22 }
0x1dba   :  { %v4121_v53 = vmul.f32 %v5271_v19, %v4120_v51 }
0x1dbc   :  { %v4122_v14 = vmul.f32 0.5, %v4121_v53  ;;  %v4842_v53 = vld [vmem:[%s7666_s12 + $0x98] sm:$0xff] }
0x1dbe   :  { %v4123_v59 = vsub.f32 1.5, %v4122_v14 }
0x1dbf   :  { %v5273_v39 = vpop.eup %5272 }
0x1dc0   :  { %v4124_v8 = vmul.f32 %v5271_v19, %v4123_v59  ;;  %v4130_v13 = vmul.f32 %v5273_v39, %v4117_v22  ;;  %vm4136_vm2 = vweird.f32 %v5273_v39 }
0x1dc1   :  { %v4112_v26 = vpop.xlane.xlu1 %4111  ;;  %vm4137_vm7 = vmor %vm4135_vm3, %vm4136_vm2 }
0x1dc2   :  { %v4128_v35 = vsel %vm4127_vm15, %v5271_v19, %v4124_v8  ;;  %v4131_v38 = vmul.f32 %v5273_v39, %v4130_v13  ;;  %v4115_v21 = vmul.f32 %v4112_v26, %v5431_v12  ;;  %v4843_v19 = vld [vmem:[%s7666_s12 + $0xa0] sm:$0xff]  ;;  %v4841_v8 = vld [vmem:[%s7666_s12 + $0x90] sm:$0xff] }
0x1dc3   :  { %v4149_v63 = vmul.f32 %v4128_v35, %v4098_v7  ;;  %v4853_v7 = vld [vmem:[%s7666_s12 + $0xf0] sm:$0xff]  ;;  %v4840_v35 = vld [vmem:[%s7666_s12 + $0x88] sm:$0xff] }
0x1dc4   :  { %v4132_v9 = vmul.f32 0.5, %v4131_v38  ;;  %v4118_v54 = vadd.f32 1e-05, %v4115_v21  ;;  %4348 = vmatpush.msra.mxu2 %v4853_v7  ;;  %v4839_v38 = vld [vmem:[%s7666_s12 + $0x80] sm:$0xff] }
0x1dc5   :  { %v4155_v10 = vmul.f32 %v4986_v18, %v4149_v63 }
0x1dc6   :  { %v4133_v25 = vsub.f32 1.5, %v4132_v9  ;;  %5274 = vrsqrt.f32 %v4118_v54  ;;  %vm4145_vm6 = vweird.f32 %v4118_v54  ;;  %4349 = vmatpush.msra.mxu2 %v4852_v46 }
0x1dc7   :  { %v4161_v44 = vadd.f32 %v4987_v55, %v4155_v10 }
0x1dc8   :  { %v4134_v4 = vmul.f32 %v5273_v39, %v4133_v25  ;;  %4350 = vmatpush.msra.mxu2 %v4851_v30 }
0x1dc9   :  { %4836 = vmatmul.msk.f32.vlgmr.msrb.gmra.mxu1 %vm70_vm0, %v4161_v44 }
0x1dca   :  { %v4138_v27 = vsel %vm4137_vm7, %v5273_v39, %v4134_v4  ;;  %4351 = vmatpush.msra.mxu2 %v4850_v28 }
0x1dcb   :  { %v4150_v42 = vmul.f32 %v4138_v27, %v4099_v11 }
0x1dcc   :  { %v5275_v47 = vpop.eup %5274  ;;  %4352 = vmatpush.msra.mxu2 %v4849_v23 }
0x1dcd   :  { %v4140_v48 = vmul.f32 %v5275_v47, %v4118_v54  ;;  %v4156_v57 = vmul.f32 %v4986_v18, %v4150_v42  ;;  %vm4146_vm5 = vweird.f32 %v5275_v47 }
0x1dce   :  { %vm4147_vm10 = vmor %vm4145_vm6, %vm4146_vm5 }
0x1dcf   :  { %v4141_v24 = vmul.f32 %v5275_v47, %v4140_v48  ;;  %v4162_v40 = vadd.f32 %v4987_v55, %v4156_v57 }
0x1dd1   :  { %v4142_v61 = vmul.f32 0.5, %v4141_v24  ;;  %4837 = vmatmul.msk.f32.gmra.mxu1 %vm70_vm0, %v4162_v40 }
0x1dd3   :  { %v4143_v62 = vsub.f32 1.5, %v4142_v61 }
0x1dd5   :  { %v4144_v1 = vmul.f32 %v5275_v47, %v4143_v62 }
0x1dd7   :  { %v4148_v56 = vsel %vm4147_vm10, %v5275_v47, %v4144_v1 }
0x1dd8   :  { %v4151_v37 = vmul.f32 %v4148_v56, %v7460_v43  ;;  %v4848_v43 = vld [vmem:[%s7666_s12 + $0xc8] sm:$0xff] }
0x1dd9   :  { %4353 = vmatpush.msra.mxu2 %v4848_v43 }
0x1dda   :  { %v4157_v60 = vmul.f32 %v4986_v18, %v4151_v37 }
0x1ddb   :  { %4354 = vmatpush.msra.mxu2 %v4847_v49 }
0x1ddc   :  { %v4163_v0 = vadd.f32 %v4987_v55, %v4157_v60 }
0x1ddd   :  { %4355 = vmatpush.msra.mxu2 %v4846_v50 }
0x1dde   :  { %4838 = vmatmul.msk.f32.gmra.mxu1 %vm70_vm0, %v4163_v0 }
0x1ddf   :  { %4356 = vmatpush.msra.mxu2 %v4845_v15 }
0x1de1   :  { %4357 = vmatpush.msra.mxu2 %v4844_v36 }
0x1de3   :  { %4358 = vmatpush.msra.mxu2 %v4843_v19 }
0x1de5   :  { %4359 = vmatpush.msra.mxu2 %v4842_v53 }
0x1de7   :  { %4360 = vmatpush.msra.mxu2 %v4841_v8 }
0x1de9   :  { %4361 = vmatpush.msra.mxu2 %v4840_v35 }
0x1deb   :  { %4362 = vmatpush.msra.mxu2 %v4839_v38 }
0x1e46   :  { %v4198_v45 = vpop.f32.mrf.mxu1 }
0x1e47   :  { %v7502_v41 = vadd.f32 %v4988_v6, %v4198_v45 }
0x1e49   :  { %v7508_v11 = vmul.f32 0.70710677, %v7502_v41 }
0x1e4b   :  { %v4213_v17 = vand.u32 2147483647, %v7508_v11 }
0x1e4d   :  { %v4216_v33 = vmul.f32 0.3275911, %v4213_v17  ;;  %v4294_v44 = vsub.f32 0.0, %v4213_v17 }
0x1e4e   :  { %v4201_v34 = vpop.f32.mrf.mxu1 }
0x1e4f   :  { %v4219_v29 = vadd.f32 1.0, %v4216_v33  ;;  %v7520_v16 = vadd.f32 %v4988_v6, %v4201_v34  ;;  %v4297_v40 = vmul.f32 %v4294_v44, %v4213_v17  ;;  %v4207_v44 = vmul.f32 0.5, %v7502_v41 }
0x1e51   :  { %5276 = vrcp.f32 %v4219_v29  ;;  %v7529_v5 = vmul.f32 0.70710677, %v7520_v16  ;;  %v4233_v59 = vand.u32 2147483648, %v4219_v29  ;;  %v4231_v18 = vand.u32 2147483647, %v4219_v29 }
0x1e52   :  { %vm4227_vm4 = vweird.f32 %v4219_v29  ;;  %v4300_v0 = vmul.f32 1.442695, %v4297_v40  ;;  %v4208_v41 = vmul.f32 0.5, %v7520_v16  ;;  %v4989_v16 = vld [vmem:[%s7665_s13 + $0x1] ss:$0 sm:$0xff]  ;;  %s7751_s13 = sld [smem:[#allocation13_spill]] }
0x1e53   :  { %v7535_v2 = vand.u32 2147483647, %v7529_v5  ;;  %v4234_v63 = vor.u32 1.1754944e-38, %v4233_v59  ;;  %vm4232_vm14 = vcmp.eq.f32.partialorder %v4231_v18, 8.507059e+37 }
0x1e55   :  { %v4217_v58 = vmul.f32 0.3275911, %v7535_v2  ;;  %v4295_v7 = vsub.f32 0.0, %v7535_v2 }
0x1e57   :  { %v5277_v20 = vpop.eup %5276  ;;  %v4220_v51 = vadd.f32 1.0, %v4217_v58  ;;  %v4298_v43 = vmul.f32 %v4295_v7, %v7535_v2 }
0x1e58   :  { %v4223_v22 = vmul.f32 %v5277_v20, %v4219_v29  ;;  %vm4228_vm11 = vweird.f32 %v5277_v20 }
0x1e59   :  { %5278 = vrcp.f32 %v4220_v51  ;;  %vm4229_vm12 = vmor %vm4227_vm4, %vm4228_vm11  ;;  %v4248_v57 = vand.u32 2147483648, %v4220_v51  ;;  %v4246_v62 = vand.u32 2147483647, %v4220_v51  ;;  %vm4242_vm2 = vweird.f32 %v4220_v51 }
0x1e5a   :  { %v4224_v14 = vsub.f32 1.0, %v4223_v22  ;;  %v4302_v19 = vmul.f32 1.442695, %v4298_v43  ;;  %vm4312_vm4 = vcmp.lt.f32.partialorder %v7508_v11, 0.0 }
0x1e5b   :  { %v4204_v39 = vpop.f32.mrf.mxu1  ;;  %v4249_v60 = vor.u32 1.1754944e-38, %v4248_v57  ;;  %vm4247_vm7 = vcmp.eq.f32.partialorder %v4246_v62, 8.507059e+37 }
0x1e5c   :  { %v4225_v13 = vmul.f32 %v5277_v20, %v4224_v14  ;;  %v7550_v26 = vadd.f32 %v4988_v6, %v4204_v39 }
0x1e5e   :  { %v4226_v21 = vadd.f32 %v5277_v20, %v4225_v13  ;;  %v7559_v55 = vmul.f32 0.70710677, %v7550_v26 }
0x1e5f   :  { %v5279_v9 = vpop.eup %5278 }
0x1e60   :  { %v4230_v54 = vsel %vm4229_vm12, %v5277_v20, %v4226_v21  ;;  %v7562_v10 = vand.u32 2147483647, %v7559_v55  ;;  %v4238_v4 = vmul.f32 %v5279_v9, %v4220_v51  ;;  %vm4243_vm15 = vweird.f32 %v5279_v9 }
0x1e61   :  { %v4235_v25 = vsel %vm4232_vm14, %v4234_v63, %v4230_v54  ;;  %vm4244_vm3 = vmor %vm4242_vm2, %vm4243_vm15  ;;  %vm4313_vm12 = vcmp.lt.f32.partialorder %v7529_v5, 0.0  ;;  %vm4314_vm14 = vcmp.lt.f32.partialorder %v7559_v55, 0.0 }
0x1e62   :  { %v4267_v27 = vmul.f32 1.0614054, %v4235_v25  ;;  %v4218_v42 = vmul.f32 0.3275911, %v7562_v10  ;;  %v4239_v47 = vsub.f32 1.0, %v4238_v4  ;;  %v4296_v13 = vsub.f32 0.0, %v7562_v10 }
0x1e64   :  { %v4270_v48 = vadd.f32 -1.4531521, %v4267_v27  ;;  %v4221_v24 = vadd.f32 1.0, %v4218_v42  ;;  %v4240_v61 = vmul.f32 %v5279_v9, %v4239_v47 }
0x1e66   :  { %v4273_v1 = vmul.f32 %v4270_v48, %v4235_v25  ;;  %5280 = vrcp.f32 %v4221_v24  ;;  %v4241_v56 = vadd.f32 %v5279_v9, %v4240_v61  ;;  %v4263_v50 = vand.u32 2147483648, %v4221_v24 }
0x1e67   :  { %5282 = vpow2.f32 %v4300_v0  ;;  %v4261_v36 = vand.u32 2147483647, %v4221_v24  ;;  %vm4257_vm6 = vweird.f32 %v4221_v24 }
0x1e68   :  { %v4276_v37 = vadd.f32 1.4214138, %v4273_v1  ;;  %v4245_v3 = vsel %vm4244_vm3, %v5279_v9, %v4241_v56  ;;  %v4264_v59 = vor.u32 1.1754944e-38, %v4263_v50  ;;  %5284 = vpow2.f32 %v4302_v19 }
0x1e69   :  { %v4250_v46 = vsel %vm4247_vm7, %v4249_v60, %v4245_v3  ;;  %vm4262_vm11 = vcmp.eq.f32.partialorder %v4261_v36, 8.507059e+37 }
0x1e6a   :  { %v4279_v6 = vmul.f32 %v4276_v37, %v4235_v25  ;;  %v4268_v45 = vmul.f32 1.0614054, %v4250_v46 }
0x1e6c   :  { %v5281_v30 = vpop.eup %5280  ;;  %v4282_v28 = vadd.f32 -0.28449672, %v4279_v6  ;;  %v4271_v23 = vadd.f32 -1.4531521, %v4268_v45 }
0x1e6d   :  { %v4253_v17 = vmul.f32 %v5281_v30, %v4221_v24  ;;  %vm4258_vm5 = vweird.f32 %v5281_v30  ;;  %v5283_v22 = vpop.eup %5282 }
0x1e6e   :  { %v4285_v33 = vmul.f32 %v4282_v28, %v4235_v25  ;;  %v4274_v29 = vmul.f32 %v4271_v23, %v4250_v46  ;;  %vm4259_vm10 = vmor %vm4257_vm6, %vm4258_vm5  ;;  %v5285_v47 = vpop.eup %5284  ;;  %v4209_v28 = vmul.f32 0.5, %v7550_v26 }
0x1e6f   :  { %v4254_v34 = vsub.f32 1.0, %v4253_v17 }
0x1e70   :  { %v4288_v49 = vadd.f32 0.2548296, %v4285_v33  ;;  %v4277_v58 = vadd.f32 1.4214138, %v4274_v29 }
0x1e71   :  { %v4255_v15 = vmul.f32 %v5281_v30, %v4254_v34 }
0x1e72   :  { %v4291_v20 = vmul.f32 %v4288_v49, %v4235_v25  ;;  %v4280_v51 = vmul.f32 %v4277_v58, %v4250_v46  ;;  %v4299_v25 = vmul.f32 %v4296_v13, %v7562_v10 }
0x1e73   :  { %v4256_v53 = vadd.f32 %v5281_v30, %v4255_v15 }
0x1e74   :  { %v4306_v14 = vmul.f32 %v5283_v22, %v4291_v20  ;;  %v4283_v39 = vadd.f32 -0.28449672, %v4280_v51  ;;  %v4304_v40 = vmul.f32 1.442695, %v4299_v25 }
0x1e75   :  { %v4260_v8 = vsel %vm4259_vm10, %v5281_v30, %v4256_v53 }
0x1e76   :  { %v4309_v2 = vsub.f32 1.0, %v4306_v14  ;;  %v4265_v18 = vsel %vm4262_vm11, %v4264_v59, %v4260_v8  ;;  %v4286_v35 = vmul.f32 %v4283_v39, %v4250_v46  ;;  %5286 = vpow2.f32 %v4304_v40 }
0x1e77   :  { %v4269_v38 = vmul.f32 1.0614054, %v4265_v18 }
0x1e78   :  { %v4315_v21 = vsub.f32 0.0, %v4309_v2  ;;  %v4289_v63 = vadd.f32 0.2548296, %v4286_v35  ;;  %v4459_v35 = vld [vmem:[%s7746_s26 + $0x18] sm:$0xff] }
0x1e79   :  { %v4272_v9 = vadd.f32 -1.4531521, %v4269_v38  ;;  %4478 = vmatpush.msrb.mxu3 %v4459_v35  ;;  %v4458_v38 = vld [vmem:[%s7746_s26 + $0x10] sm:$0xff] }
0x1e7a   :  { %v4318_v54 = vsel %vm4312_vm4, %v4315_v21, %v4309_v2  ;;  %v4292_v27 = vmul.f32 %v4289_v63, %v4250_v46  ;;  %v4457_v21 = vld [vmem:[%s7746_s26 + $0x8] sm:$0xff]  ;;  %v4456_v63 = vld [vmem:[%s7746_s26] sm:$0xff] }
0x1e7b   :  { %v4321_v4 = vadd.f32 1.0, %v4318_v54  ;;  %v4275_v42 = vmul.f32 %v4272_v9, %v4265_v18  ;;  %4479 = vmatpush.msrb.mxu3 %v4458_v38 }
0x1e7c   :  { %v4307_v57 = vmul.f32 %v5285_v47, %v4292_v27  ;;  %v5287_v6 = vpop.eup %5286 }
0x1e7d   :  { %v4324_v48 = vmul.f32 %v4321_v4, %v4207_v44  ;;  %v4278_v24 = vadd.f32 1.4214138, %v4275_v42  ;;  %4480 = vmatpush.msrb.mxu3 %v4457_v21 }
0x1e7e   :  { %v4310_v61 = vsub.f32 1.0, %v4307_v57  ;;  %v4495_v57 = vld [vmem:[%s7747_s23 + $0x18] sm:$0xff] }
0x1e7f   :  { %4363 = vmatmul.f32.vlgmr.msra.gmra.mxu2 %v4324_v48  ;;  %v4281_v62 = vmul.f32 %v4278_v24, %v4265_v18  ;;  %4481 = vmatpush.msrb.mxu3 %v4456_v63  ;;  %v4494_v24 = vld [vmem:[%s7747_s23 + $0x10] sm:$0xff] }
0x1e80   :  { %v4316_v1 = vsub.f32 0.0, %v4310_v61  ;;  %4518 = vmatpush.msrb.mxu0 %v4495_v57 }
0x1e81   :  { %v4284_v11 = vadd.f32 -0.28449672, %v4281_v62 }
0x1e82   :  { %v4319_v56 = vsel %vm4313_vm12, %v4316_v1, %v4310_v61  ;;  %v4493_v61 = vld [vmem:[%s7747_s23 + $0x8] sm:$0xff]  ;;  %4519 = vmatpush.msrb.mxu0 %v4494_v24  ;;  %v4492_v1 = vld [vmem:[%s7747_s23] sm:$0xff] }
0x1e83   :  { %v4287_v10 = vmul.f32 %v4284_v11, %v4265_v18  ;;  %v4322_v37 = vadd.f32 1.0, %v4319_v56 }
0x1e84   :  { %4520 = vmatpush.msrb.mxu0 %v4493_v61 }
0x1e85   :  { %v4290_v60 = vadd.f32 0.2548296, %v4287_v10  ;;  %v4325_v0 = vmul.f32 %v4322_v37, %v4208_v41  ;;  %v4990_v10 = vld [vmem:[%s7748_s10] ss:$0 sm:$0xff] }
0x1e86   :  { %4521 = vmatpush.msrb.mxu0 %v4492_v1 }
0x1e87   :  { %v4293_v3 = vmul.f32 %v4290_v60, %v4265_v18  ;;  %4366 = vmatmul.f32.gmra.mxu2 %v4325_v0 }
0x1e89   :  { %v4308_v7 = vmul.f32 %v5287_v6, %v4293_v3  ;;  %v4976_v3 = vld [vmem:[%s7749_s4] ss:$0 sm:$0xff] }
0x1e8b   :  { %v4311_v46 = vsub.f32 1.0, %v4308_v7 }
0x1e8d   :  { %v4317_v45 = vsub.f32 0.0, %v4311_v46 }
0x1e8f   :  { %v4320_v30 = vsel %vm4314_vm14, %v4317_v45, %v4311_v46 }
0x1e90   :  { %v4323_v5 = vadd.f32 1.0, %v4320_v30 }
0x1e92   :  { %v4326_v17 = vmul.f32 %v4323_v5, %v4209_v28 }
0x1e94   :  { %4369 = vmatmul.f32.gmra.mxu2 %v4326_v17 }
0x1f02   :  { %v4364_v23 = vpop.f32.mrf.mxu2 }
0x1f03   :  { %v4365_v33 = vadd.f32 %v4989_v16, %v4364_v23 }
0x1f05   :  { %v4373_v43 = vadd.f32 %v4365_v33, %v7438_v52 }
0x1f07   :  { %v4378_v34 = vsel %vm70_vm0, %v4373_v43, 0.0 }
0x1f08   :  { %4379 = vadd.xlane.f32.xlu0 %v4378_v34 }
0x1f0a   :  { %v4367_v29 = vpop.f32.mrf.mxu2 }
0x1f0b   :  { %v4368_v49 = vadd.f32 %v4989_v16, %v4367_v29 }
0x1f0d   :  { %v4374_v55 = vadd.f32 %v4368_v49, %v7443_v32 }
0x1f0f   :  { %v4381_v26 = vsel %vm70_vm0, %v4374_v55, 0.0 }
0x1f10   :  { %4382 = vadd.xlane.f32.xlu2 %v4381_v26 }
0x1f17   :  { %v4370_v50 = vpop.f32.mrf.mxu2 }
0x1f18   :  { %v4371_v15 = vadd.f32 %v4989_v16, %v4370_v50 }
0x1f1a   :  { %v4375_v36 = vadd.f32 %v4371_v15, %v7448_v31 }
0x1f1c   :  { %v4384_v58 = vsel %vm77_vm1, %v4375_v36, 0.0 }
0x1f1d   :  { %4385 = vadd.xlane.f32.xlu1 %v4384_v58 }
0x1f7b   :  { %v4380_v20 = vpop.xlane.xlu0 %4379 }
0x1f7c   :  { %v4387_v52 = vmul.f32 %v4380_v20, %v5431_v12 }
0x1f7e   :  { %v4390_v19 = vsub.f32 %v4373_v43, %v4387_v52 }
0x1f80   :  { %v4393_v22 = vmul.f32 %v4390_v19, %v4390_v19 }
0x1f82   :  { %v4396_v51 = vsel %vm70_vm0, %v4393_v22, 0.0 }
0x1f83   :  { %4397 = vadd.xlane.f32.xlu0 %v4396_v51  ;;  %v4383_v53 = vpop.xlane.xlu2 %4382 }
0x1f84   :  { %v4388_v32 = vmul.f32 %v4383_v53, %v5431_v12  ;;  %v4991_v53 = vld [vmem:[%s7751_s13] ss:$0 sm:$0xff] }
0x1f86   :  { %v7587_v14 = vsub.f32 %v4374_v55, %v4388_v32 }
0x1f88   :  { %v4394_v59 = vmul.f32 %v7587_v14, %v7587_v14 }
0x1f8a   :  { %v4399_v31 = vsel %vm70_vm0, %v4394_v59, 0.0 }
0x1f8b   :  { %4400 = vadd.xlane.f32.xlu2 %v4399_v31 }
0x1f90   :  { %v4386_v39 = vpop.xlane.xlu1 %4385 }
0x1f91   :  { %v4389_v8 = vmul.f32 %v4386_v39, %v5431_v12 }
0x1f93   :  { %v7593_v2 = vsub.f32 %v4375_v36, %v4389_v8 }
0x1f95   :  { %v4395_v13 = vmul.f32 %v7593_v2, %v7593_v2 }
0x1f97   :  { %v4402_v18 = vsel %vm77_vm1, %v4395_v13, 0.0 }
0x1f98   :  { %4403 = vadd.xlane.f32.xlu1 %v4402_v18 }
0x1ff6   :  { %v4398_v9 = vpop.xlane.xlu0 %4397 }
0x1ff7   :  { %v4405_v54 = vmul.f32 %v4398_v9, %v5431_v12 }
0x1ff9   :  { %v4408_v25 = vadd.f32 1e-05, %v4405_v54 }
0x1ffb   :  { %5288 = vrsqrt.f32 %v4408_v25  ;;  %vm4417_vm15 = vweird.f32 %v4408_v25 }
0x1ffe   :  { %v4401_v44 = vpop.xlane.xlu2 %4400 }
0x1fff   :  { %v4406_v4 = vmul.f32 %v4401_v44, %v5431_v12 }
0x2001   :  { %v5289_v27 = vpop.eup %5288  ;;  %v4409_v47 = vadd.f32 1e-05, %v4406_v4 }
0x2002   :  { %v4412_v42 = vmul.f32 %v5289_v27, %v4408_v25  ;;  %vm4418_vm1 = vweird.f32 %v5289_v27 }
0x2003   :  { %5290 = vrsqrt.f32 %v4409_v47  ;;  %vm4419_vm2 = vmor %vm4417_vm15, %vm4418_vm1  ;;  %vm4427_vm7 = vweird.f32 %v4409_v47 }
0x2004   :  { %v4413_v48 = vmul.f32 %v5289_v27, %v4412_v42 }
0x2006   :  { %v4414_v40 = vmul.f32 0.5, %v4413_v48 }
0x2008   :  { %v4415_v62 = vsub.f32 1.5, %v4414_v40 }
0x2009   :  { %v5291_v11 = vpop.eup %5290 }
0x200a   :  { %v4416_v56 = vmul.f32 %v5289_v27, %v4415_v62  ;;  %v4422_v41 = vmul.f32 %v5291_v11, %v4409_v47  ;;  %vm4428_vm3 = vweird.f32 %v5291_v11 }
0x200b   :  { %v4404_v37 = vpop.xlane.xlu1 %4403  ;;  %vm4429_vm5 = vmor %vm4427_vm7, %vm4428_vm3 }
0x200c   :  { %v4420_v60 = vsel %vm4419_vm2, %v5289_v27, %v4416_v56  ;;  %v4407_v0 = vmul.f32 %v4404_v37, %v5431_v12  ;;  %v4423_v7 = vmul.f32 %v5291_v11, %v4422_v41 }
0x200d   :  { %v4441_v6 = vmul.f32 %v4420_v60, %v4390_v19 }
0x200e   :  { %v4410_v46 = vadd.f32 1e-05, %v4407_v0  ;;  %v4424_v30 = vmul.f32 0.5, %v4423_v7 }
0x200f   :  { %v4447_v45 = vmul.f32 %v4990_v10, %v4441_v6 }
0x2010   :  { %5292 = vrsqrt.f32 %v4410_v46  ;;  %v4425_v5 = vsub.f32 1.5, %v4424_v30  ;;  %vm4437_vm10 = vweird.f32 %v4410_v46 }
0x2011   :  { %v4453_v28 = vadd.f32 %v4976_v3, %v4447_v45 }
0x2012   :  { %v4426_v17 = vmul.f32 %v5291_v11, %v4425_v5 }
0x2013   :  { %4856 = vmatmul.msk.f32.vlgmr.msrb.gmra.mxu3 %vm70_vm0, %v4453_v28 }
0x2014   :  { %v4430_v16 = vsel %vm4429_vm5, %v5291_v11, %v4426_v17 }
0x2015   :  { %v4442_v23 = vmul.f32 %v4430_v16, %v7587_v14 }
0x2016   :  { %v5293_v12 = vpop.eup %5292 }
0x2017   :  { %v4432_v33 = vmul.f32 %v5293_v12, %v4410_v46  ;;  %v4448_v43 = vmul.f32 %v4990_v10, %v4442_v23  ;;  %vm4438_vm6 = vweird.f32 %v5293_v12 }
0x2018   :  { %vm4439_vm11 = vmor %vm4437_vm10, %vm4438_vm6 }
0x2019   :  { %v4433_v34 = vmul.f32 %v5293_v12, %v4432_v33  ;;  %v4454_v29 = vadd.f32 %v4976_v3, %v4448_v43 }
0x201b   :  { %v4434_v49 = vmul.f32 0.5, %v4433_v34  ;;  %4857 = vmatmul.msk.f32.gmra.mxu3 %vm70_vm0, %v4454_v29  ;;  %v4501_v20 = vrot.slane %v4454_v29, 4 }
0x201d   :  { %v4435_v55 = vsub.f32 1.5, %v4434_v49 }
0x201f   :  { %v4436_v26 = vmul.f32 %v5293_v12, %v4435_v55 }
0x2021   :  { %v4440_v50 = vsel %vm4439_vm11, %v5293_v12, %v4436_v26 }
0x2022   :  { %v4443_v15 = vmul.f32 %v4440_v50, %v7593_v2 }
0x2024   :  { %v4449_v36 = vmul.f32 %v4990_v10, %v4443_v15 }
0x2026   :  { %v4455_v58 = vadd.f32 %v4976_v3, %v4449_v36 }
0x2028   :  { %v4502_v52 = vrot.slane %v4455_v58, 4 }
0x202a   :  { %v4503_v19 = vsel %vm564_vm13, %v4501_v20, %v4502_v52  ;;  %vm7752_vm13 = vcmask 31744  }
0x202b   :  { %4860 = vmatmul.msk.f32.vlgmr.msrb.gmra.mxu0 %vm70_vm0, %v4503_v19 }
0x2096   :  { %v4483_v22 = vpop.f32.mrf.mxu3 }
0x2097   :  { %4858 = vst.msk [vmem:[%s7750_s18 + $0x10] sm:$0xff] %vm2270_vm8, %v4483_v22 }
0x209e   :  { %v4486_v51 = vpop.f32.mrf.mxu3 }
0x209f   :  { %4859 = vst.msk [vmem:[%s7750_s18 + $0x18] sm:$0xf] %vm2272_vm9, %v4486_v51 }
0x20a8   :  { %v4523_v32 = vpop.f32.mrf.mxu0 }
0x20a9   :  { %v4524_v14 = vadd.f32 %v4991_v53, %v4523_v32 }
0x20ab   :  { %4861 = vst.msk [vmem:[%s7753_s16 + $0x8] sm:$0xff] %vm7752_vm13, %v4524_v14 }

</bundles_post_ra>
